<compile_context>
chip_gen: v6e
topology: v6e:2x2x1
jax: 0.10.0
libtpu: 0.0.40
codegen_flags: <defaults>
</compile_context>

<pallas_src>
import math
from functools import partial

import jax
import jax.numpy as jnp
from jax.experimental import pallas as pl
from jax.experimental.pallas import tpu as pltpu

LANE = 128      # padded class width (one lane tile)
N_HEAD = 8


# ----------------------------------------------------------------------------
# Capability probe: can grid-invariant operands be single-buffered?
# (pl.Buffered(1) on the weight BlockSpecs; falls back to default buffering.)
# ----------------------------------------------------------------------------
def _probe_kernel(x_ref, o_ref):
    o_ref[...] = x_ref[...]


def _single_buffer_supported():
    try:
        f = pl.pallas_call(
            _probe_kernel,
            out_shape=jax.ShapeDtypeStruct((16, 128), jnp.float32),
            grid=(2,),
            in_specs=[pl.BlockSpec((8, 128), lambda i: (0, 0),
                                   pipeline_mode=pl.Buffered(1))],
            out_specs=pl.BlockSpec((8, 128), lambda i: (i, 0)),
        )
        jax.block_until_ready(f(jnp.zeros((8, 128), jnp.float32)))
        return True
    except Exception:
        return False


_SINGLE_BUFFER_WEIGHTS = _single_buffer_supported()


def _const_spec(shape):
    """BlockSpec for a grid-invariant (weight) operand: constant index_map means it
    is DMA'd once; single-buffer it when supported so it does not burn 2x VMEM."""
    index_map = lambda b: (0,) * len(shape)
    if _SINGLE_BUFFER_WEIGHTS:
        return pl.BlockSpec(shape, index_map, pipeline_mode=pl.Buffered(1))
    return pl.BlockSpec(shape, index_map)


# ----------------------------------------------------------------------------
# Fused per-batch kernel:
#   classifier1 + masked CE partials, 8-head cross-MHA, classifier0.
# TODO(synk): MultiHeadAttention is an external class in the original repo; it is
#             implemented here as standard Q/K/V/O-projected scaled-dot-product
#             attention (8 heads, d_model=768, head_dim=96), no residual/LayerNorm
#             and no image key-padding mask (same assumption as before).
# ----------------------------------------------------------------------------
def _gan_fused_kernel(xq_ref, xkv_ref, lab_ref,
                      w1_ref, b1_ref, wq_ref, bq_ref, wkv_ref, bkv_ref,
                      wo_ref, bo_ref, w0_ref, b0_ref,
                      logits1_ref, cross_ref, nll_ref, cnt_ref,
                      *, n_head, dh, num_classes):
    x_q = xq_ref[0]                                   # [S, D]  bf16 (text hidden)
    x_kv = xkv_ref[0]                                 # [L, D]  bf16 (image hidden)
    S, D = x_q.shape
    L = x_kv.shape[0]
    H = n_head

    # ---- classifier1 + masked cross-entropy partials (dropout == identity) ----
    logits1 = jnp.dot(x_q, w1_ref[...], preferred_element_type=jnp.float32) + b1_ref[...]
    logits1_ref[0] = logits1                          # lane-dense [S, CP] store

    lab = lab_ref[0]                                  # [S, 1] int32
    cls = jax.lax.broadcasted_iota(jnp.int32, logits1.shape, 1)
    lm = jnp.where(cls < num_classes, logits1, jnp.float32(-1e30))   # mask padded classes
    m = jnp.max(lm, axis=-1, keepdims=True)
    lse = m + jnp.log(jnp.sum(jnp.exp(lm - m), axis=-1, keepdims=True))
    picked = jnp.sum(jnp.where(cls == lab, logits1, 0.0), axis=-1, keepdims=True)
    valid = (lab != -100)
    nll = jnp.where(valid, lse - picked, 0.0)         # [S, 1]
    nll_ref[0] = jnp.sum(nll, axis=0, keepdims=True)                  # per-batch partial
    cnt_ref[0] = jnp.sum(valid.astype(jnp.float32), axis=0, keepdims=True)

    # ---- cross attention: wide unpadded projection matmuls (bf16 in, f32 acc) ----
    q = jnp.dot(x_q, wq_ref[...], preferred_element_type=jnp.float32) + bq_ref[...]      # [S, D]
    kv = jnp.dot(x_kv, wkv_ref[...], preferred_element_type=jnp.float32) + bkv_ref[...]  # [L, 2D]
    k = kv[:, :D]                                     # lane-aligned static slices
    v = kv[:, D:]

    # Per-head restriction via 96-lane head masks (heads occupy contiguous 96-lane
    # blocks of the 768-lane hidden axis).  This keeps the weights byte-minimal —
    # the kernel is weight-DMA bound — at the cost of a few extra MXU pushes on
    # these tiny score/ctx matmuls, and avoids any lane-unaligned reshape/slicing.
    lane = jax.lax.broadcasted_iota(jnp.int32, (H, 1, D), 2)
    head = jax.lax.broadcasted_iota(jnp.int32, (H, 1, D), 0)
    lo = head * dh
    hmask = (lane >= lo) & (lane < lo + dh)           # [H, 1, D]

    qh = jnp.where(hmask, q[None, :, :], 0.0).astype(jnp.bfloat16)          # [H, S, D]
    kb = jnp.broadcast_to(k.astype(jnp.bfloat16)[None, :, :], (H, L, D))
    vb = jnp.broadcast_to(v.astype(jnp.bfloat16)[None, :, :], (H, L, D))

    s = jnp.einsum('hsd,hld->hsl', qh, kb,
                   preferred_element_type=jnp.float32) * (1.0 / math.sqrt(dh))
    s = s - jnp.max(s, axis=-1, keepdims=True)
    p = jnp.exp(s)
    p = p * pl.reciprocal(jnp.sum(p, axis=-1, keepdims=True), approx=True)   # EUP slot
    pv = jnp.einsum('hsl,hld->hsd', p.astype(jnp.bfloat16), vb,
                    preferred_element_type=jnp.float32)                      # [H, S, D]
    ctx = jnp.sum(jnp.where(hmask, pv, 0.0), axis=0)                         # [S, D]

    attn = jnp.dot(ctx.astype(jnp.bfloat16), wo_ref[...],
                   preferred_element_type=jnp.float32) + bo_ref[...]         # [S, D]
    logits0 = jnp.dot(attn.astype(jnp.bfloat16), w0_ref[...],
                      preferred_element_type=jnp.float32) + b0_ref[...]      # [S, CP]
    cross_ref[0] = logits0


def pallas_gan_fused(text_bf16, image_bf16, labels, prep, *, n_head, num_classes):
    B, S, D = text_bf16.shape
    _, L, _ = image_bf16.shape
    dh = D // n_head
    CP = prep['w1'].shape[1]

    labels3d = labels.reshape(B, S, 1).astype(jnp.int32)
    act3 = lambda b: (b, 0, 0)

    return pl.pallas_call(
        partial(_gan_fused_kernel, n_head=n_head, dh=dh, num_classes=num_classes),
        out_shape=(
            jax.ShapeDtypeStruct((B, S, CP), jnp.float32),   # classifier1 logits (padded)
            jax.ShapeDtypeStruct((B, S, CP), jnp.float32),   # classifier0 logits (padded)
            jax.ShapeDtypeStruct((B, 1, 1), jnp.float32),    # CE: per-batch sum of nll
            jax.ShapeDtypeStruct((B, 1, 1), jnp.float32),    # CE: per-batch valid count
        ),
        grid=(B,),
        in_specs=[
            pl.BlockSpec((1, S, D), act3),     # text hidden
            pl.BlockSpec((1, L, D), act3),     # image hidden
            pl.BlockSpec((1, S, 1), act3),     # labels
            _const_spec((D, CP)),              # classifier1 W
            _const_spec((1, CP)),              # classifier1 b
            _const_spec((D, D)),               # Wq
            _const_spec((1, D)),               # bq
            _const_spec((D, 2 * D)),           # Wk|Wv fused
            _const_spec((1, 2 * D)),           # bk|bv fused
            _const_spec((D, D)),               # Wo
            _const_spec((1, D)),               # bo
            _const_spec((D, CP)),              # classifier0 W
            _const_spec((1, CP)),              # classifier0 b
        ],
        out_specs=[
            pl.BlockSpec((1, S, CP), act3),
            pl.BlockSpec((1, S, CP), act3),
            pl.BlockSpec((1, 1, 1), act3),
            pl.BlockSpec((1, 1, 1), act3),
        ],
        compiler_params=pltpu.CompilerParams(
            dimension_semantics=("parallel",),
            vmem_limit_bytes=32 * 1024 * 1024),
    )(text_bf16, image_bf16, labels3d,
      prep['w1'], prep['b1'], prep['wq'], prep['bq'], prep['wkv'], prep['bkv'],
      prep['wo'], prep['bo'], prep['w0'], prep['b0'])


# ----------------------------------------------------------------------------
# One-time parameter preparation (OUTSIDE the hot path): bf16 casts, Wk|Wv fuse,
# classifier lane-padding.  Removes the per-call weight repacking traffic.
# ----------------------------------------------------------------------------
def prepare_params(params, *, padded_classes=LANE):
    D, C = params['classifier1_w'].shape
    CP = padded_classes
    wq, wk, wv, wo, bq, bk, bv, bo = params['mha']

    def pad_cls_w(w):
        return jnp.zeros((D, CP), jnp.float32).at[:, :C].set(w).astype(jnp.bfloat16)

    def pad_cls_b(b):
        return jnp.zeros((1, CP), jnp.float32).at[0, :C].set(b)

    return {
        'w1': pad_cls_w(params['classifier1_w']), 'b1': pad_cls_b(params['classifier1_b']),
        'w0': pad_cls_w(params['classifier0_w']), 'b0': pad_cls_b(params['classifier0_b']),
        'wq': wq.astype(jnp.bfloat16),
        'bq': bq.reshape(1, D).astype(jnp.float32),
        'wkv': jnp.concatenate([wk, wv], axis=1).astype(jnp.bfloat16),
        'bkv': jnp.concatenate([bk, bv]).reshape(1, 2 * D).astype(jnp.float32),
        'wo': wo.astype(jnp.bfloat16),
        'bo': bo.reshape(1, D).astype(jnp.float32),
        'crf_start': params['crf_start'],
        'crf_end': params['crf_end'],
        'crf_trans': params['crf_trans'],
    }


# ----------------------------------------------------------------------------
# CRF negative log-likelihood (torchcrf semantics, batch_first=True, reduction='sum')
# TODO(synk): CRF is a sequential DP over a tiny tag set; kept in plain JAX (not a
#             Pallas hot path).
# ----------------------------------------------------------------------------
def crf_log_likelihood(emissions, tags, mask, start_t, end_t, trans):
    B, S, T = emissions.shape
    maskf = mask.astype(jnp.float32)

    first_tags = tags[:, 0]
    score = start_t[first_tags] + jnp.take_along_axis(
        emissions[:, 0], first_tags[:, None], axis=1)[:, 0]
    for i in range(1, S):
        emit_i = jnp.take_along_axis(emissions[:, i], tags[:, i][:, None], axis=1)[:, 0]
        step = trans[tags[:, i - 1], tags[:, i]] + emit_i
        score = score + step * maskf[:, i]
    seq_ends = jnp.sum(mask.astype(jnp.int32), axis=1) - 1
    last_tags = jnp.take_along_axis(tags, seq_ends[:, None], axis=1)[:, 0]
    numerator = score + end_t[last_tags]

    alpha = start_t[None, :] + emissions[:, 0]                 # [B, T]
    for i in range(1, S):
        nxt = jax.nn.logsumexp(
            alpha[:, :, None] + trans[None, :, :] + emissions[:, i][:, None, :], axis=1)
        alpha = jnp.where(mask[:, i][:, None], nxt, alpha)
    denominator = jax.nn.logsumexp(alpha + end_t[None, :], axis=1)

    return jnp.sum(numerator - denominator)                    # reduction='sum'


# ----------------------------------------------------------------------------
# Optimal transport (word-region alignment) distance.
# TODO(synk): optimal_transport_dist is an external UNITER-style helper; re-implemented
#             here as standard IPOT in plain JAX (pad conventions passed exactly as the
#             original forward does: text_pad = (attention_mask == 1), image_pad = zeros).
# ----------------------------------------------------------------------------
def optimal_transport_dist(txt_emb, img_emb, txt_pad, img_pad,
                           beta_ot=0.5, iteration=50, k=1):
    eps = 1e-12
    xn = txt_emb / jnp.maximum(jnp.linalg.norm(txt_emb, axis=-1, keepdims=True), eps)
    yn = img_emb / jnp.maximum(jnp.linalg.norm(img_emb, axis=-1, keepdims=True), eps)
    cost = 1.0 - jnp.einsum('bsd,bld->bsl', xn, yn)            # [B, M, N]

    joint_pad = txt_pad[:, :, None] | img_pad[:, None, :]
    cost = jnp.where(joint_pad, 0.0, cost)
    B, M, N = cost.shape
    txt_len = jnp.maximum((M - jnp.sum(txt_pad, axis=1)).astype(cost.dtype), 1.0)
    img_len = jnp.maximum((N - jnp.sum(img_pad, axis=1)).astype(cost.dtype), 1.0)

    valid_t = (~txt_pad).astype(cost.dtype)                    # [B, M]
    valid_i = (~img_pad).astype(cost.dtype)                    # [B, N]
    mu = valid_t / txt_len[:, None]
    nu = valid_i / img_len[:, None]

    A = jnp.exp(-cost / beta_ot) * (~joint_pad).astype(cost.dtype)
    T0 = valid_t[:, :, None] * valid_i[:, None, :]
    sigma0 = jnp.ones((B, N), cost.dtype) / N

    def body(_, carry):
        T, sigma = carry
        Q = A * T
        delta = sigma
        for _ in range(k):
            delta = mu / (jnp.einsum('bmn,bn->bm', Q, sigma) + 1e-9)
            sigma = nu / (jnp.einsum('bmn,bm->bn', Q, delta) + 1e-9)
        T = delta[:, :, None] * Q * sigma[:, None, :]
        return T, sigma

    T, _ = jax.lax.fori_loop(0, iteration, body, (T0, sigma0))
    return jnp.sum(cost * T, axis=(1, 2))                      # [B]


# ----------------------------------------------------------------------------
# GANModel forward (roberta/vit config; add_gan=False, only_text_loss=False,
# add_gan_loss=False; eval mode so dropout == identity).
# TODO(synk): RobertaModel / ViTModel / UnimoEncoder / CLIPVisionEmbeddings /
#             BertEmbeddings backbones are external pretrained transformers; their
#             last_hidden_state outputs are taken as inputs here.
# ----------------------------------------------------------------------------
def gan_model_forward(prep, text_hidden, image_hidden, attention_mask, labels,
                      cross_labels, *, alpha, beta, num_classes, n_head=N_HEAD):
    B, S, D = text_hidden.shape
    _, L, _ = image_hidden.shape
    C = num_classes

    text_bf16 = text_hidden.astype(jnp.bfloat16)
    image_bf16 = image_hidden.astype(jnp.bfloat16)

    # Fused kernel: classifier1 + CE partials, cross-MHA, classifier0.
    logits1_pad, cross_pad, nll, cnt = pallas_gan_fused(
        text_bf16, image_bf16, labels, prep, n_head=n_head, num_classes=C)

    # NOTE: count == 0 (all labels ignored) yields NaN, matching torch CrossEntropyLoss.
    text_loss = jnp.sum(nll) / jnp.sum(cnt)
    text_token_logits = logits1_pad[..., :C]
    cross_logits = cross_pad[..., :C]

    # CRF loss on cross_logits vs cross_labels
    mask = (labels != -100)
    mask = mask.at[:, 0].set(True)
    crf_ll = crf_log_likelihood(cross_logits, cross_labels, mask,
                                prep['crf_start'], prep['crf_end'], prep['crf_trans'])
    cross_crf_loss = -crf_ll / 10.0

    # optimal transport word-region alignment loss (f32 hidden states, as original)
    text_pad = (attention_mask == 1)                           # same quirk as original
    image_pad = jnp.zeros((B, L), dtype=bool)
    ot_dist = optimal_transport_dist(text_hidden, image_hidden, text_pad, image_pad)
    word_region_align_loss = jnp.mean(ot_dist)

    loss = alpha * text_loss + cross_crf_loss + beta * word_region_align_loss
    # TODO(synk): args.add_gan / args.add_gan_loss branches (UnimoEncoder, cal_loss)
    #             are external modules and disabled in this configuration.
    return {'loss': loss, 'logits': text_token_logits, 'cross_logits': None}


# ----------------------------------------------------------------------------
# Deterministic parameter initialization (raw f32 params, repacked once by
# prepare_params before entering the hot path).
# ----------------------------------------------------------------------------
def init_params(key, D, C):
    ks = jax.random.split(key, 16)
    std = 0.02
    params = {
        'classifier1_w': jax.random.normal(ks[0], (D, C), jnp.float32) * std,
        'classifier1_b': jnp.zeros((C,), jnp.float32),
        'classifier0_w': jax.random.normal(ks[1], (D, C), jnp.float32) * std,
        'classifier0_b': jnp.zeros((C,), jnp.float32),
        'mha': tuple(
            [jax.random.normal(ks[2 + i], (D, D), jnp.float32) * std for i in range(4)] +
            [jnp.zeros((D,), jnp.float32) for _ in range(4)]),
        'crf_start': jax.random.uniform(ks[6], (C,), jnp.float32, -0.1, 0.1),
        'crf_end': jax.random.uniform(ks[7], (C,), jnp.float32, -0.1, 0.1),
        'crf_trans': jax.random.uniform(ks[8], (C, C), jnp.float32, -0.1, 0.1),
    }
    return params


if __name__ == "__main__":
    key = jax.random.PRNGKey(0)
    B, S, L, D, C = 2, 8, 16, 768, 5        # batch, text seq, image patches, hidden, labels
    alpha, beta = 0.6, 0.01

    kp, kt, ki, kl, kc = jax.random.split(key, 5)
    params = init_params(kp, D, C)
    prep = prepare_params(params)            # one-time weight repacking (NOT in hot path)

    text_hidden = jax.random.normal(kt, (B, S, D), jnp.float32)    # RoBERTa last_hidden_state
    image_hidden = jax.random.normal(ki, (B, L, D), jnp.float32)   # ViT last_hidden_state

    # attention mask with some padding per row
    attention_mask = jnp.array([[1, 1, 1, 1, 1, 1, 0, 0],
                                [1, 1, 1, 1, 1, 0, 0, 0]], jnp.int32)
    labels_valid = jax.random.randint(kl, (B, S), 0, C, jnp.int32)
    labels = jnp.where(attention_mask == 1, labels_valid, -100)
    cross_labels = jax.random.randint(kc, (B, S), 0, C, jnp.int32)

    fwd = jax.jit(partial(gan_model_forward, alpha=alpha, beta=beta, num_classes=C))
    out = fwd(prep, text_hidden, image_hidden, attention_mask, labels, cross_labels)
    jax.block_until_ready(out['loss'])
    jax.block_until_ready(out['logits'])
    print("KERNEL_OK")
</pallas_src>

<mosaic_0001>
module attributes {stable_mosaic.version = 11 : i64} {
  func.func @_probe_kernel(%arg0: i32, %arg1: memref<8x128xf32, #tpu.memory_space<vmem>>, %arg2: memref<8x128xf32, #tpu.memory_space<vmem>>) attributes {dimension_semantics = [#tpu.dimension_semantics<arbitrary>], iteration_bounds = array<i64: 2>, scalar_prefetch = 0 : i64, scratch_operands = 0 : i64, tpu.core_type = #tpu.core_type<tc>, window_params = [{pipeline_mode = #tpu.pipeline_mode<synchronous>, transform_indices = @transform_0, window_bounds = array<i64: 8, 128>}, {transform_indices = @transform_1, window_bounds = array<i64: 8, 128>}]} {
    %c0 = arith.constant 0 : index
    %c0_0 = arith.constant 0 : index
    %0 = vector.load %arg1[%c0, %c0_0] : memref<8x128xf32, #tpu.memory_space<vmem>>, vector<8x128xf32>
    %c0_1 = arith.constant 0 : index
    %c0_2 = arith.constant 0 : index
    %1 = vector.load %arg2[%c0_1, %c0_2] : memref<8x128xf32, #tpu.memory_space<vmem>>, vector<8x128xf32>
    tpu.vector_store %arg2[%c0_1, %c0_2], %0 {strides = array<i32>} : memref<8x128xf32, #tpu.memory_space<vmem>>, vector<8x128xf32>,
    return
  }
  func.func @transform_0(%arg0: i32) -> (i32, i32) {
    %c0_i32 = arith.constant 0 : i32
    %c0_i32_0 = arith.constant 0 : i32
    %c0_i32_1 = arith.constant 0 : i32
    return %c0_i32, %c0_i32_0 : i32, i32
  }
  func.func @transform_1(%arg0: i32) -> (i32, i32) {
    %c0_i32 = arith.constant 0 : i32
    %c0_i32_0 = arith.constant 0 : i32
    return %arg0, %c0_i32 : i32, i32
  }
}

module attributes {stable_mosaic.version = 11 : i64} {
  func.func @_gan_fused_kernel(%arg0: i32, %arg1: memref<1x8x768xbf16, #tpu.memory_space<vmem>>, %arg2: memref<1x16x768xbf16, #tpu.memory_space<vmem>>, %arg3: memref<1x8x1xi32, #tpu.memory_space<vmem>>, %arg4: memref<768x128xbf16, #tpu.memory_space<vmem>>, %arg5: memref<1x128xf32, #tpu.memory_space<vmem>>, %arg6: memref<768x768xbf16, #tpu.memory_space<vmem>>, %arg7: memref<1x768xf32, #tpu.memory_space<vmem>>, %arg8: memref<768x1536xbf16, #tpu.memory_space<vmem>>, %arg9: memref<1x1536xf32, #tpu.memory_space<vmem>>, %arg10: memref<768x768xbf16, #tpu.memory_space<vmem>>, %arg11: memref<1x768xf32, #tpu.memory_space<vmem>>, %arg12: memref<768x128xbf16, #tpu.memory_space<vmem>>, %arg13: memref<1x128xf32, #tpu.memory_space<vmem>>, %arg14: memref<1x8x128xf32, #tpu.memory_space<vmem>>, %arg15: memref<1x8x128xf32, #tpu.memory_space<vmem>>, %arg16: memref<1x1x1xf32, #tpu.memory_space<vmem>>, %arg17: memref<1x1x1xf32, #tpu.memory_space<vmem>>) attributes {dimension_semantics = [#tpu.dimension_semantics<parallel>], iteration_bounds = array<i64: 2>, scalar_prefetch = 0 : i64, scratch_operands = 0 : i64, tpu.core_type = #tpu.core_type<tc>, window_params = [{transform_indices = @transform_0, window_bounds = array<i64: 1, 8, 768>}, {transform_indices = @transform_1, window_bounds = array<i64: 1, 16, 768>}, {transform_indices = @transform_2, window_bounds = array<i64: 1, 8, 1>}, {pipeline_mode = #tpu.pipeline_mode<synchronous>, transform_indices = @transform_3, window_bounds = array<i64: 768, 128>}, {pipeline_mode = #tpu.pipeline_mode<synchronous>, transform_indices = @transform_4, window_bounds = array<i64: 1, 128>}, {pipeline_mode = #tpu.pipeline_mode<synchronous>, transform_indices = @transform_5, window_bounds = array<i64: 768, 768>}, {pipeline_mode = #tpu.pipeline_mode<synchronous>, transform_indices = @transform_6, window_bounds = array<i64: 1, 768>}, {pipeline_mode = #tpu.pipeline_mode<synchronous>, transform_indices = @transform_7, window_bounds = array<i64: 768, 1536>}, {pipeline_mode = #tpu.pipeline_mode<synchronous>, transform_indices = @transform_8, window_bounds = array<i64: 1, 1536>}, {pipeline_mode = #tpu.pipeline_mode<synchronous>, transform_indices = @transform_9, window_bounds = array<i64: 768, 768>}, {pipeline_mode = #tpu.pipeline_mode<synchronous>, transform_indices = @transform_10, window_bounds = array<i64: 1, 768>}, {pipeline_mode = #tpu.pipeline_mode<synchronous>, transform_indices = @transform_11, window_bounds = array<i64: 768, 128>}, {pipeline_mode = #tpu.pipeline_mode<synchronous>, transform_indices = @transform_12, window_bounds = array<i64: 1, 128>}, {transform_indices = @transform_13, window_bounds = array<i64: 1, 8, 128>}, {transform_indices = @transform_14, window_bounds = array<i64: 1, 8, 128>}, {transform_indices = @transform_15, window_bounds = array<i64: 1, 1, 1>}, {transform_indices = @transform_16, window_bounds = array<i64: 1, 1, 1>}]} {
    %c0 = arith.constant 0 : index
    %c0_0 = arith.constant 0 : index
    %c0_1 = arith.constant 0 : index
    %0 = vector.load %arg1[%c0, %c0_0, %c0_1] : memref<1x8x768xbf16, #tpu.memory_space<vmem>>, vector<1x8x768xbf16>
    %1 = vector.shape_cast %0 : vector<1x8x768xbf16> to vector<8x768xbf16>
    %c0_2 = arith.constant 0 : index
    %c0_3 = arith.constant 0 : index
    %c0_4 = arith.constant 0 : index
    %2 = vector.load %arg2[%c0_2, %c0_3, %c0_4] : memref<1x16x768xbf16, #tpu.memory_space<vmem>>, vector<1x16x768xbf16>
    %3 = vector.shape_cast %2 : vector<1x16x768xbf16> to vector<16x768xbf16>
    %c0_5 = arith.constant 0 : index
    %c0_6 = arith.constant 0 : index
    %4 = vector.load %arg4[%c0_5, %c0_6] : memref<768x128xbf16, #tpu.memory_space<vmem>>, vector<768x128xbf16>
    %cst = arith.constant dense<0.000000e+00> : vector<8x128xf32>
    %5 = tpu.matmul %1, %4, %cst {dimension_numbers = #tpu.dot_dimension_numbers<[1], [0], [0], [1], [0, 0, 1, 1], [], []>} : vector<8x768xbf16>, vector<768x128xbf16>, vector<8x128xf32> -> vector<8x128xf32>
    %c0_7 = arith.constant 0 : index
    %c0_8 = arith.constant 0 : index
    %6 = vector.load %arg5[%c0_7, %c0_8] : memref<1x128xf32, #tpu.memory_space<vmem>>, vector<1x128xf32>
    %7 = vector.broadcast %6 : vector<1x128xf32> to vector<8x128xf32>
    %8 = arith.addf %5, %7 : vector<8x128xf32>
    %c0_9 = arith.constant 0 : index
    %c0_10 = arith.constant 0 : index
    %c0_11 = arith.constant 0 : index
    %9 = vector.load %arg14[%c0_9, %c0_10, %c0_11] : memref<1x8x128xf32, #tpu.memory_space<vmem>>, vector<1x8x128xf32>
    %10 = vector.shape_cast %9 : vector<1x8x128xf32> to vector<8x128xf32>
    %11 = vector.shape_cast %8 : vector<8x128xf32> to vector<1x8x128xf32>
    tpu.vector_store %arg14[%c0_9, %c0_10, %c0_11], %11 {strides = array<i32>} : memref<1x8x128xf32, #tpu.memory_space<vmem>>, vector<1x8x128xf32>,
    %c0_12 = arith.constant 0 : index
    %c0_13 = arith.constant 0 : index
    %c0_14 = arith.constant 0 : index
    %12 = vector.load %arg3[%c0_12, %c0_13, %c0_14] : memref<1x8x1xi32, #tpu.memory_space<vmem>>, vector<1x8x1xi32>
    %13 = vector.shape_cast %12 : vector<1x8x1xi32> to vector<8x1xi32>
    %14 = tpu.iota {dimensions = array<i32: 1>} : vector<8x128xi32>
    %c5_i32 = arith.constant 5 : i32
    %15 = vector.broadcast %c5_i32 : i32 to vector<8x128xi32>
    %16 = arith.cmpi slt, %14, %15 : vector<8x128xi32>
    %cst_15 = arith.constant -1.000000e+30 : f32
    %17 = vector.broadcast %cst_15 : f32 to vector<8x128xf32>
    %18 = arith.select %16, %8, %17 : vector<8x128xi1>, vector<8x128xf32>
    %cst_16 = arith.constant dense<0xFF800000> : vector<8xf32>
    %19 = vector.multi_reduction <maximumf>, %18, %cst_16 [1] : vector<8x128xf32> to vector<8xf32>
    %20 = vector.shape_cast %19 : vector<8xf32> to vector<8x1xf32>
    %21 = vector.broadcast %20 : vector<8x1xf32> to vector<8x128xf32>
    %22 = arith.subf %18, %21 : vector<8x128xf32>
    %23 = math.exp %22 : vector<8x128xf32>
    %cst_17 = arith.constant dense<0.000000e+00> : vector<8xf32>
    %24 = vector.multi_reduction <add>, %23, %cst_17 [1] : vector<8x128xf32> to vector<8xf32>
    %25 = vector.shape_cast %24 : vector<8xf32> to vector<8x1xf32>
    %26 = math.log %25 : vector<8x1xf32>
    %27 = arith.addf %20, %26 : vector<8x1xf32>
    %28 = vector.broadcast %13 : vector<8x1xi32> to vector<8x128xi32>
    %29 = arith.cmpi eq, %14, %28 : vector<8x128xi32>
    %cst_18 = arith.constant 0.000000e+00 : f32
    %30 = vector.broadcast %cst_18 : f32 to vector<8x128xf32>
    %31 = arith.select %29, %8, %30 : vector<8x128xi1>, vector<8x128xf32>
    %cst_19 = arith.constant dense<0.000000e+00> : vector<8xf32>
    %32 = vector.multi_reduction <add>, %31, %cst_19 [1] : vector<8x128xf32> to vector<8xf32>
    %33 = vector.shape_cast %32 : vector<8xf32> to vector<8x1xf32>
    %c-100_i32 = arith.constant -100 : i32
    %34 = vector.broadcast %c-100_i32 : i32 to vector<8x1xi32>
    %35 = arith.cmpi ne, %13, %34 : vector<8x1xi32>
    %36 = arith.subf %27, %33 : vector<8x1xf32>
    %cst_20 = arith.constant 0.000000e+00 : f32
    %37 = vector.broadcast %cst_20 : f32 to vector<8x1xf32>
    %38 = arith.select %35, %36, %37 : vector<8x1xi1>, vector<8x1xf32>
    %cst_21 = arith.constant dense<0.000000e+00> : vector<1xf32>
    %39 = vector.multi_reduction <add>, %38, %cst_21 [0] : vector<8x1xf32> to vector<1xf32>
    %40 = vector.shape_cast %39 : vector<1xf32> to vector<1x1xf32>
    %c0_22 = arith.constant 0 : index
    %c0_23 = arith.constant 0 : index
    %c0_24 = arith.constant 0 : index
    %41 = vector.load %arg16[%c0_22, %c0_23, %c0_24] : memref<1x1x1xf32, #tpu.memory_space<vmem>>, vector<1x1x1xf32>
    %42 = vector.shape_cast %41 : vector<1x1x1xf32> to vector<1x1xf32>
    %43 = vector.shape_cast %40 : vector<1x1xf32> to vector<1x1x1xf32>
    tpu.vector_store %arg16[%c0_22, %c0_23, %c0_24], %43 {strides = array<i32>} : memref<1x1x1xf32, #tpu.memory_space<vmem>>, vector<1x1x1xf32>,
    %44 = arith.extui %35 : vector<8x1xi1> to vector<8x1xi32>
    %45 = arith.sitofp %44 : vector<8x1xi32> to vector<8x1xf32>
    %cst_25 = arith.constant dense<0.000000e+00> : vector<1xf32>
    %46 = vector.multi_reduction <add>, %45, %cst_25 [0] : vector<8x1xf32> to vector<1xf32>
    %47 = vector.shape_cast %46 : vector<1xf32> to vector<1x1xf32>
    %c0_26 = arith.constant 0 : index
    %c0_27 = arith.constant 0 : index
    %c0_28 = arith.constant 0 : index
    %48 = vector.load %arg17[%c0_26, %c0_27, %c0_28] : memref<1x1x1xf32, #tpu.memory_space<vmem>>, vector<1x1x1xf32>
    %49 = vector.shape_cast %48 : vector<1x1x1xf32> to vector<1x1xf32>
    %50 = vector.shape_cast %47 : vector<1x1xf32> to vector<1x1x1xf32>
    tpu.vector_store %arg17[%c0_26, %c0_27, %c0_28], %50 {strides = array<i32>} : memref<1x1x1xf32, #tpu.memory_space<vmem>>, vector<1x1x1xf32>,
    %c0_29 = arith.constant 0 : index
    %c0_30 = arith.constant 0 : index
    %51 = vector.load %arg6[%c0_29, %c0_30] : memref<768x768xbf16, #tpu.memory_space<vmem>>, vector<768x768xbf16>
    %cst_31 = arith.constant dense<0.000000e+00> : vector<8x768xf32>
    %52 = tpu.matmul %1, %51, %cst_31 {dimension_numbers = #tpu.dot_dimension_numbers<[1], [0], [0], [1], [0, 0, 1, 1], [], []>} : vector<8x768xbf16>, vector<768x768xbf16>, vector<8x768xf32> -> vector<8x768xf32>
    %c0_32 = arith.constant 0 : index
    %c0_33 = arith.constant 0 : index
    %53 = vector.load %arg7[%c0_32, %c0_33] : memref<1x768xf32, #tpu.memory_space<vmem>>, vector<1x768xf32>
    %54 = vector.broadcast %53 : vector<1x768xf32> to vector<8x768xf32>
    %55 = arith.addf %52, %54 : vector<8x768xf32>
    %c0_34 = arith.constant 0 : index
    %c0_35 = arith.constant 0 : index
    %56 = vector.load %arg8[%c0_34, %c0_35] : memref<768x1536xbf16, #tpu.memory_space<vmem>>, vector<768x1536xbf16>
    %cst_36 = arith.constant dense<0.000000e+00> : vector<16x1536xf32>
    %57 = tpu.matmul %3, %56, %cst_36 {dimension_numbers = #tpu.dot_dimension_numbers<[1], [0], [0], [1], [0, 0, 1, 1], [], []>} : vector<16x768xbf16>, vector<768x1536xbf16>, vector<16x1536xf32> -> vector<16x1536xf32>
    %c0_37 = arith.constant 0 : index
    %c0_38 = arith.constant 0 : index
    %58 = vector.load %arg9[%c0_37, %c0_38] : memref<1x1536xf32, #tpu.memory_space<vmem>>, vector<1x1536xf32>
    %59 = vector.broadcast %58 : vector<1x1536xf32> to vector<16x1536xf32>
    %60 = arith.addf %57, %59 : vector<16x1536xf32>
    %61 = vector.extract_strided_slice %60 {offsets = [0, 0], sizes = [16, 768], strides = [1, 1]} : vector<16x1536xf32> to vector<16x768xf32>
    %62 = vector.extract_strided_slice %60 {offsets = [0, 768], sizes = [16, 768], strides = [1, 1]} : vector<16x1536xf32> to vector<16x768xf32>
    %63 = tpu.iota {dimensions = array<i32: 2>} : vector<8x1x768xi32>
    %64 = tpu.iota {dimensions = array<i32: 0>} : vector<8x1x768xi32>
    %c96_i32 = arith.constant 96 : i32
    %65 = vector.broadcast %c96_i32 : i32 to vector<8x1x768xi32>
    %66 = arith.muli %64, %65 : vector<8x1x768xi32>
    %67 = arith.cmpi sge, %63, %66 : vector<8x1x768xi32>
    %c96_i32_39 = arith.constant 96 : i32
    %68 = vector.broadcast %c96_i32_39 : i32 to vector<8x1x768xi32>
    %69 = arith.addi %66, %68 : vector<8x1x768xi32>
    %70 = arith.cmpi slt, %63, %69 : vector<8x1x768xi32>
    %71 = arith.andi %67, %70 : vector<8x1x768xi1>
    %72 = vector.shape_cast %55 : vector<8x768xf32> to vector<1x8x768xf32>
    %cst_40 = arith.constant 0.000000e+00 : f32
    %73 = vector.shape_cast %71 : vector<8x1x768xi1> to vector<8x1x768xi1>
    %74 = vector.broadcast %73 : vector<8x1x768xi1> to vector<8x8x768xi1>
    %75 = vector.shape_cast %72 : vector<1x8x768xf32> to vector<1x8x768xf32>
    %76 = vector.broadcast %75 : vector<1x8x768xf32> to vector<8x8x768xf32>
    %77 = vector.broadcast %cst_40 : f32 to vector<8x8x768xf32>
    %78 = arith.select %74, %76, %77 : vector<8x8x768xi1>, vector<8x8x768xf32>
    %79 = arith.truncf %78 : vector<8x8x768xf32> to vector<8x8x768xbf16>
    %80 = arith.truncf %61 : vector<16x768xf32> to vector<16x768xbf16>
    %81 = vector.shape_cast %80 : vector<16x768xbf16> to vector<1x16x768xbf16>
    %82 = vector.shape_cast %81 : vector<1x16x768xbf16> to vector<1x16x768xbf16>
    %83 = vector.broadcast %82 : vector<1x16x768xbf16> to vector<8x16x768xbf16>
    %84 = arith.truncf %62 : vector<16x768xf32> to vector<16x768xbf16>
    %85 = vector.shape_cast %84 : vector<16x768xbf16> to vector<1x16x768xbf16>
    %86 = vector.shape_cast %85 : vector<1x16x768xbf16> to vector<1x16x768xbf16>
    %87 = vector.broadcast %86 : vector<1x16x768xbf16> to vector<8x16x768xbf16>
    "tpu.trace_start"() <{level = 10 : i32, message = "hsd,hld->hsl"}> : () -> ()
    %cst_41 = arith.constant dense<0.000000e+00> : vector<8x8x16xf32>
    %88 = tpu.matmul %79, %83, %cst_41 {dimension_numbers = #tpu.dot_dimension_numbers<[2], [2], [1], [1], [0, 0, 0, 1, 1, 1], [0], [0]>} : vector<8x8x768xbf16>, vector<8x16x768xbf16>, vector<8x8x16xf32> -> vector<8x8x16xf32>
    "tpu.trace_stop"() : () -> ()
    %cst_42 = arith.constant 0.102062076 : f32
    %89 = vector.broadcast %cst_42 : f32 to vector<8x8x16xf32>
    %90 = arith.mulf %88, %89 : vector<8x8x16xf32>
    %cst_43 = arith.constant dense<0xFF800000> : vector<8x8xf32>
    %91 = vector.multi_reduction <maximumf>, %90, %cst_43 [2] : vector<8x8x16xf32> to vector<8x8xf32>
    %92 = vector.shape_cast %91 : vector<8x8xf32> to vector<8x8x1xf32>
    %93 = vector.broadcast %92 : vector<8x8x1xf32> to vector<8x8x16xf32>
    %94 = arith.subf %90, %93 : vector<8x8x16xf32>
    %95 = math.exp %94 : vector<8x8x16xf32>
    %cst_44 = arith.constant dense<0.000000e+00> : vector<8x8xf32>
    %96 = vector.multi_reduction <add>, %95, %cst_44 [2] : vector<8x8x16xf32> to vector<8x8xf32>
    %97 = vector.shape_cast %96 : vector<8x8xf32> to vector<8x8x1xf32>
    %98 = tpu.reciprocal %97 {approx = true} : vector<8x8x1xf32> -> vector<8x8x1xf32>
    %99 = vector.broadcast %98 : vector<8x8x1xf32> to vector<8x8x16xf32>
    %100 = arith.mulf %95, %99 : vector<8x8x16xf32>
    %101 = arith.truncf %100 : vector<8x8x16xf32> to vector<8x8x16xbf16>
    "tpu.trace_start"() <{level = 10 : i32, message = "hsl,hld->hsd"}> : () -> ()
    %cst_45 = arith.constant dense<0.000000e+00> : vector<8x8x768xf32>
    %102 = tpu.matmul %101, %87, %cst_45 {dimension_numbers = #tpu.dot_dimension_numbers<[2], [1], [1], [2], [0, 0, 0, 1, 1, 2], [0], [0]>} : vector<8x8x16xbf16>, vector<8x16x768xbf16>, vector<8x8x768xf32> -> vector<8x8x768xf32>
    %cst_46 = arith.constant 0.000000e+00 : f32
    "tpu.trace_stop"() : () -> ()
    %103 = vector.shape_cast %71 : vector<8x1x768xi1> to vector<8x1x768xi1>
    %104 = vector.broadcast %103 : vector<8x1x768xi1> to vector<8x8x768xi1>
    %105 = vector.broadcast %cst_46 : f32 to vector<8x8x768xf32>
    %106 = arith.select %104, %102, %105 : vector<8x8x768xi1>, vector<8x8x768xf32>
    %cst_47 = arith.constant dense<0.000000e+00> : vector<8x768xf32>
    %107 = vector.multi_reduction <add>, %106, %cst_47 [0] : vector<8x8x768xf32> to vector<8x768xf32>
    %108 = arith.truncf %107 : vector<8x768xf32> to vector<8x768xbf16>
    %c0_48 = arith.constant 0 : index
    %c0_49 = arith.constant 0 : index
    %109 = vector.load %arg10[%c0_48, %c0_49] : memref<768x768xbf16, #tpu.memory_space<vmem>>, vector<768x768xbf16>
    %cst_50 = arith.constant dense<0.000000e+00> : vector<8x768xf32>
    %110 = tpu.matmul %108, %109, %cst_50 {dimension_numbers = #tpu.dot_dimension_numbers<[1], [0], [0], [1], [0, 0, 1, 1], [], []>} : vector<8x768xbf16>, vector<768x768xbf16>, vector<8x768xf32> -> vector<8x768xf32>
    %c0_51 = arith.constant 0 : index
    %c0_52 = arith.constant 0 : index
    %111 = vector.load %arg11[%c0_51, %c0_52] : memref<1x768xf32, #tpu.memory_space<vmem>>, vector<1x768xf32>
    %112 = vector.broadcast %111 : vector<1x768xf32> to vector<8x768xf32>
    %113 = arith.addf %110, %112 : vector<8x768xf32>
    %114 = arith.truncf %113 : vector<8x768xf32> to vector<8x768xbf16>
    %c0_53 = arith.constant 0 : index
    %c0_54 = arith.constant 0 : index
    %115 = vector.load %arg12[%c0_53, %c0_54] : memref<768x128xbf16, #tpu.memory_space<vmem>>, vector<768x128xbf16>
    %cst_55 = arith.constant dense<0.000000e+00> : vector<8x128xf32>
    %116 = tpu.matmul %114, %115, %cst_55 {dimension_numbers = #tpu.dot_dimension_numbers<[1], [0], [0], [1], [0, 0, 1, 1], [], []>} : vector<8x768xbf16>, vector<768x128xbf16>, vector<8x128xf32> -> vector<8x128xf32>
    %c0_56 = arith.constant 0 : index
    %c0_57 = arith.constant 0 : index
    %117 = vector.load %arg13[%c0_56, %c0_57] : memref<1x128xf32, #tpu.memory_space<vmem>>, vector<1x128xf32>
    %118 = vector.broadcast %117 : vector<1x128xf32> to vector<8x128xf32>
    %119 = arith.addf %116, %118 : vector<8x128xf32>
    %c0_58 = arith.constant 0 : index
    %c0_59 = arith.constant 0 : index
    %c0_60 = arith.constant 0 : index
    %120 = vector.load %arg15[%c0_58, %c0_59, %c0_60] : memref<1x8x128xf32, #tpu.memory_space<vmem>>, vector<1x8x128xf32>
    %121 = vector.shape_cast %120 : vector<1x8x128xf32> to vector<8x128xf32>
    %122 = vector.shape_cast %119 : vector<8x128xf32> to vector<1x8x128xf32>
    tpu.vector_store %arg15[%c0_58, %c0_59, %c0_60], %122 {strides = array<i32>} : memref<1x8x128xf32, #tpu.memory_space<vmem>>, vector<1x8x128xf32>,
    return
  }
  func.func @transform_0(%arg0: i32) -> (i32, i32, i32) {
    %c0_i32 = arith.constant 0 : i32
    %c0_i32_0 = arith.constant 0 : i32
    %c0_i32_1 = arith.constant 0 : i32
    return %arg0, %c0_i32, %c0_i32_0 : i32, i32, i32
  }
  func.func @transform_1(%arg0: i32) -> (i32, i32, i32) {
    %c0_i32 = arith.constant 0 : i32
    %c0_i32_0 = arith.constant 0 : i32
    %c0_i32_1 = arith.constant 0 : i32
    return %arg0, %c0_i32, %c0_i32_0 : i32, i32, i32
  }
  func.func @transform_2(%arg0: i32) -> (i32, i32, i32) {
    %c0_i32 = arith.constant 0 : i32
    %c0_i32_0 = arith.constant 0 : i32
    %c0_i32_1 = arith.constant 0 : i32
    return %arg0, %c0_i32, %c0_i32_0 : i32, i32, i32
  }
  func.func @transform_3(%arg0: i32) -> (i32, i32) {
    %c0_i32 = arith.constant 0 : i32
    %c0_i32_0 = arith.constant 0 : i32
    %c0_i32_1 = arith.constant 0 : i32
    return %c0_i32, %c0_i32_0 : i32, i32
  }
  func.func @transform_4(%arg0: i32) -> (i32, i32) {
    %c0_i32 = arith.constant 0 : i32
    %c0_i32_0 = arith.constant 0 : i32
    %c0_i32_1 = arith.constant 0 : i32
    return %c0_i32, %c0_i32_0 : i32, i32
  }
  func.func @transform_5(%arg0: i32) -> (i32, i32) {
    %c0_i32 = arith.constant 0 : i32
    %c0_i32_0 = arith.constant 0 : i32
    %c0_i32_1 = arith.constant 0 : i32
    return %c0_i32, %c0_i32_0 : i32, i32
  }
  func.func @transform_6(%arg0: i32) -> (i32, i32) {
    %c0_i32 = arith.constant 0 : i32
    %c0_i32_0 = arith.constant 0 : i32
    %c0_i32_1 = arith.constant 0 : i32
    return %c0_i32, %c0_i32_0 : i32, i32
  }
  func.func @transform_7(%arg0: i32) -> (i32, i32) {
    %c0_i32 = arith.constant 0 : i32
    %c0_i32_0 = arith.constant 0 : i32
    %c0_i32_1 = arith.constant 0 : i32
    return %c0_i32, %c0_i32_0 : i32, i32
  }
  func.func @transform_8(%arg0: i32) -> (i32, i32) {
    %c0_i32 = arith.constant 0 : i32
    %c0_i32_0 = arith.constant 0 : i32
    %c0_i32_1 = arith.constant 0 : i32
    return %c0_i32, %c0_i32_0 : i32, i32
  }
  func.func @transform_9(%arg0: i32) -> (i32, i32) {
    %c0_i32 = arith.constant 0 : i32
    %c0_i32_0 = arith.constant 0 : i32
    %c0_i32_1 = arith.constant 0 : i32
    return %c0_i32, %c0_i32_0 : i32, i32
  }
  func.func @transform_10(%arg0: i32) -> (i32, i32) {
    %c0_i32 = arith.constant 0 : i32
    %c0_i32_0 = arith.constant 0 : i32
    %c0_i32_1 = arith.constant 0 : i32
    return %c0_i32, %c0_i32_0 : i32, i32
  }
  func.func @transform_11(%arg0: i32) -> (i32, i32) {
    %c0_i32 = arith.constant 0 : i32
    %c0_i32_0 = arith.constant 0 : i32
    %c0_i32_1 = arith.constant 0 : i32
    return %c0_i32, %c0_i32_0 : i32, i32
  }
  func.func @transform_12(%arg0: i32) -> (i32, i32) {
    %c0_i32 = arith.constant 0 : i32
    %c0_i32_0 = arith.constant 0 : i32
    %c0_i32_1 = arith.constant 0 : i32
    return %c0_i32, %c0_i32_0 : i32, i32
  }
  func.func @transform_13(%arg0: i32) -> (i32, i32, i32) {
    %c0_i32 = arith.constant 0 : i32
    %c0_i32_0 = arith.constant 0 : i32
    %c0_i32_1 = arith.constant 0 : i32
    return %arg0, %c0_i32, %c0_i32_0 : i32, i32, i32
  }
  func.func @transform_14(%arg0: i32) -> (i32, i32, i32) {
    %c0_i32 = arith.constant 0 : i32
    %c0_i32_0 = arith.constant 0 : i32
    %c0_i32_1 = arith.constant 0 : i32
    return %arg0, %c0_i32, %c0_i32_0 : i32, i32, i32
  }
  func.func @transform_15(%arg0: i32) -> (i32, i32, i32) {
    %c0_i32 = arith.constant 0 : i32
    %c0_i32_0 = arith.constant 0 : i32
    %c0_i32_1 = arith.constant 0 : i32
    return %arg0, %c0_i32, %c0_i32_0 : i32, i32, i32
  }
  func.func @transform_16(%arg0: i32) -> (i32, i32, i32) {
    %c0_i32 = arith.constant 0 : i32
    %c0_i32_0 = arith.constant 0 : i32
    %c0_i32_1 = arith.constant 0 : i32
    return %arg0, %c0_i32, %c0_i32_0 : i32, i32, i32
  }
}

</mosaic_0001>

<bundles_post_ra>
// kernel: tpu_custom_call.1
= control target key start
LH: loop header
LB: loop body
LE: loop exit
PB: predicated region body
PF: predicated region fallthrough
CT: control target
= control target key end

     0   :  { %6 = vsyncpa [#allocation3], 0  ;;  %s453_s0 = inlined_call_operand.hbm [shape: f32[8,128], index: 0, kind: input, shape index: {}]   ;;  %s454_s1 = inlined_call_operand.hbm [shape: f32[16,128], index: 1, kind: output, shape index: {}]  }
   0x1   :  { %7 = vsyncpa [#allocation4], 0 }
   0x2   :  { %9 = vsyncpa [#allocation4 + $0x1], 0  ;;  %s347_s6 = smov 0   ;;  %s349_s7 = smov 0  }
   0x3   :  { %s351_s8 = smov 0   ;;  %s353_s9 = smov 0  }
   0x4 LB: > { %s368_s10 = sadd.s32 4294967295, %s333_s9   ;;  %s183_s11 = sadd.s32 4294967294, %s333_s9   ;;  %s333_s9 = sphi %s353_s9, %s462_s9   ;;  %s329_s8 = sphi %s351_s8, %s461_s8   ;;  %s325_s7 = sphi %s349_s7, %s460_s7   ;;  %s321_s6 = sphi %s347_s6, %s459_s6  }
   0x5   : > { %s372_s12 = sadd.s32 1, %s333_s9   ;;  %s43_s13 = sadd.s32 1, %s329_s8 }
   0x6   : > { %s40_s14 = ssub.s32 %s333_s9, %s372_s12  ;;  %p53_p0 = scmp.ne.s32.totalorder %s329_s8, %s325_s7 }
   0x7   : > { %p41_p1 = scmp.eq.s32.totalorder %s40_s14, 0  ;;  %p54_p2 = scmp.eq.s32.totalorder %s368_s10, 1 }
   0x8   : > { %p59_p3 = scmp.ne.s32.totalorder %s325_s7, %s321_s6  ;;  %p60_p4 = scmp.eq.s32.totalorder %s183_s11, 1 }
   0x9   : > { %s383_s15 = scalar_select %p41_p1, %s329_s8, %s43_s13  }
   0xa   : > { %p385_p5 = por %p54_p2, %p53_p0  ;;  %p389_p6 = por %p60_p4, %p59_p3 }
   0xb   : > { %p184_p7 = scmp.ge.s32.totalorder %s333_s9, 1  ;;  %p67_p8 = scmp.lt.s32.totalorder %s333_s9, 3 }
   0xc   : > { %s456_s17 = scalar_select %p389_p6, 1, 0 }
   0xd   : > { %p207_p9 = scmp.eq.s32.totalorder %s368_s10, 0  ;;  %p396_p10 = pnand %p184_p7, %p67_p8 }
   0xe   : > { %s335_s19 = smov [#allocation2]  }
   0xf   : > { %s80_s20 = sshll.u32 %s335_s19, 4  ;;  %p199_p11 = pneg %p396_p10  ;;  %s81_s20 = int_to_ptr.vmem [resolvable:$true] %s80_s20 }
  0x10   : > { %s254_s21 = scalar_lea.vmem %s81_s20, 128  ;;  %p262_p3 = scmp.lt.s32.totalorder %s81_s20, %s81_s20 }
  0x11   : > { %p200_p12 = pnand %p207_p9, %p199_p11  ;;  %p255_p0 = scmp.ne.s32.totalorder %s81_s20, %s254_s21 }
  0x12   : > { %p263_p4 = scmp.lt.s32.totalorder %s254_s21, %s254_s21 }
  0x13   : > { %p245_p13 = pneg %p200_p12 }
  0x14   : > { %p264_p6 = por %p263_p4, %p262_p3 }
  0x15   : > { %p257_p1 = pnand %p255_p0, %p245_p13 }
  0x17   : > { %p258_p2 = pneg %p257_p1 }
  0x19   : > { %p265_p7 = pnand %p264_p6, %p258_p2 }
  0x1b   : > { %268 = shalt.err (!%p265_p7)
}
  0x1c   : > { %202 = dma.hbm_to_vmem [thread:$0]  (!%p200_p12), %s453_s0, 128, %s81_s20, [#allocation3]  }
  0x1d   : > { %93 = sbr.rel (%p396_p10) target bundleno = 60 (0x3c), region = 24 }
  0x22   : > { %312 = dma.done.wait (%p207_p9), [#allocation3], 128  }
  0x23   : > { %314 = vsyncadd (%p207_p9), [#allocation3], 4294967168  ;;  %s105_s24 = sand.u32 1, %s325_s7   ;;  %s190_s28 = sshll.u32 %s368_s10, 7  ;;  %v108_v0 = vld [vmem:[#allocation2] sm:$0xff] }
  0x24   : > { %s188_s25 = sshll.u32 %s105_s24, 3  ;;  %s122_s2 = scalar_lea.hbm %s454_s1, %s190_s28 }
  0x25   : > { %s107_s26 = scalar_lea.vmem [#allocation5], %s188_s25  ;;  %s111_s3 = scalar_lea.sflag [#allocation4], %s105_s24 }
  0x26   : > { %s124_s27 = sshll.u32 %s107_s26, 4  ;;  %109 = vst [vmem:[%s107_s26] sm:$0xff] %v108_v0  ;;  %s336_s5 = smov [#allocation5]   ;;  %s415_s27 = int_to_ptr.vmem [resolvable:$true] %s124_s27 }
  0x27   : > { %s269_s4 = scalar_lea.vmem %s415_s27, 128  ;;  %s273_s11 = sshll.u32 %s336_s5, 4  ;;  %s274_s11 = int_to_ptr.vmem [resolvable:$false] %s273_s11 }
  0x28   : > { %p270_p6 = scmp.ne.s32.totalorder %s415_s27, %s269_s4  ;;  %s275_s10 = scalar_lea.vmem %s274_s11, 256 }
  0x29   : > { %p276_p10 = scmp.lt.s32.totalorder %s415_s27, %s274_s11  ;;  %p277_p11 = scmp.lt.s32.totalorder %s275_s10, %s269_s4 }
  0x2a   : > { %p271_p8 = pnand %p270_p6, %p385_p5 }
  0x2b   : > { %p278_p12 = por %p277_p11, %p276_p10 }
  0x2c   : > { %p272_p9 = pneg %p271_p8 }
  0x2e   : > { %p279_p13 = pnand %p278_p12, %p272_p9 }
  0x30   : > { %282 = shalt.err (!%p279_p13)
}
  0x31   : > { %s283_s13 = scalar_lea.hbm %s122_s2, 128  ;;  %s287_s19 = scalar_lea.hbm %s454_s1, 256 }
  0x32   : > { %p284_p0 = scmp.ne.s32.totalorder %s122_s2, %s283_s13  ;;  %p288_p3 = scmp.lt.s32.totalorder %s122_s2, %s454_s1 }
  0x33   : > { %p289_p4 = scmp.lt.s32.totalorder %s287_s19, %s283_s13 }
  0x34   : > { %p285_p1 = pnand %p284_p0, %p385_p5 }
  0x35   : > { %p290_p7 = por %p289_p4, %p288_p3 }
  0x36   : > { %p286_p2 = pneg %p285_p1 }
  0x38   : > { %p291_p6 = pnand %p290_p7, %p286_p2 }
  0x3a   : > { %294 = shalt.err (!%p291_p6)
}
  0x3b   : > { %197 = dma.vmem_to_hbm [thread:$0]  (%p385_p5), %s415_s27, 128, %s122_s2, %s111_s3  }
  0x3c PF: > { %p209_p8 = scmp.ge.s32.totalorder %s333_s9, 2  ;;  %s136_s22 = sand.u32 1, %s321_s6  }
  0x3d   : > { %p458_p9 = scmp.ne.s32.totalorder %s456_s17, 0  ;;  %s137_s23 = scalar_lea.sflag [#allocation4], %s136_s22 }
  0x3f   : > { %p204_p10 = pnand %p209_p8, %p458_p9 }
  0x41   : > { %p205_p11 = pneg %p204_p10 }
  0x43   : > { %316 = dma.done.wait (%p205_p11), %s137_s23, 128  }
  0x44   : > { %318 = vsyncadd (%p205_p11), %s137_s23, 4294967168  ;;  %p12_p12 = scmp.ge.s32.totalorder %s372_s12, 4   ;;  %s459_s6 = smov %s325_s7 }
  0x45   : > { %s460_s7 = smov %s329_s8  ;;  %s461_s8 = smov %s383_s15 }
  0x46   : > { %s462_s9 = smov %s372_s12  ;;  %14 = sbr.rel (!%p12_p12) target bundleno = 4 (0x4), region = 61 }
  0x4b   :  { %142 = vsyncpa [#allocation3], 1 }
  0x4c   :  { %144 = vsyncpa [#allocation3 + $0x1], 1 }
  0x4d   :  { %145 = vsyncpa [#allocation4], 1 }
  0x4e   :  { %147 = vsyncpa [#allocation4 + $0x1], 1 }

// kernel: mul.46
= control target key start
LH: loop header
LB: loop body
LE: loop exit
PB: predicated region body
PF: predicated region fallthrough
CT: control target
= control target key end

     0   :  { %s40_s0 = inlined_call_operand.vmem [shape: f32[2,8], index: 0, kind: input, shape index: {}]   ;;  %s41_s1 = inlined_call_operand.vmem [shape: f32[2,8,16], index: 1, kind: output, shape index: {}]  }
   0x1   :  { %v4_v0 = vld [vmem:[%s40_s0] ss:$0 sm:$0xff]  ;;  %v16_v1 = vld [vmem:[%s40_s0 + $0x1] ss:$0 sm:$0xff] }
   0x2   :  { %6 = vbcast.lane.b32.xlu0 %v4_v0, 256 }
   0x6   :  { %12 = vbcast.lane.b32.xlu0 %v16_v1, 256 }
  0x74   :  { %v7_v2 = vpop.permute.xlu0 %6 }
  0x75   :  { %8 = vst [vmem:[%s41_s1] sm:$0xff] %v7_v2 }
  0x78   :  { %v13_v3 = vpop.permute.xlu0 %12 }
  0x79   :  { %17 = vst [vmem:[%s41_s1 + $0x8] sm:$0xff] %v13_v3 }

// kernel: custom-call.32
= control target key start
LH: loop header
LB: loop body
LE: loop exit
PB: predicated region body
PF: predicated region fallthrough
CT: control target
= control target key end

     0   :  { %s6_s0 = inlined_call_operand.vmem [shape: f32[2,16], index: 0, kind: output, shape index: {}]  }

// kernel: gan_model_forward.1
= control target key start
LH: loop header
LB: loop body
LE: loop exit
PB: predicated region body
PF: predicated region fallthrough
CT: control target
= control target key end

     0   :  { %s18067_s0 = inlined_call_operand.vmem [shape: bf16[2,8,768], index: 0, kind: input, shape index: {}]   ;;  %s18068_s1 = inlined_call_operand.vmem [shape: bf16[2,16,768], index: 1, kind: input, shape index: {}]   ;;  %s18069_s2 = inlined_call_operand.vmem [shape: s32[2,8,1], index: 2, kind: input, shape index: {}]   ;;  %s18070_s3 = inlined_call_operand.hbm [shape: bf16[768,128], index: 3, kind: input, shape index: {}]   ;;  %s18071_s4 = inlined_call_operand.hbm [shape: f32[1,128], index: 4, kind: input, shape index: {}]   ;;  %s18072_s5 = inlined_call_operand.hbm [shape: bf16[768,768], index: 5, kind: input, shape index: {}]   ;;  %s18073_s6 = inlined_call_operand.hbm [shape: f32[1,768], index: 6, kind: input, shape index: {}]   ;;  %s18074_s7 = inlined_call_operand.hbm [shape: bf16[768,1536], index: 7, kind: input, shape index: {}]   ;;  %s18075_s8 = inlined_call_operand.hbm [shape: f32[1,1536], index: 8, kind: input, shape index: {}]   ;;  %s18076_s9 = inlined_call_operand.hbm [shape: bf16[768,768], index: 9, kind: input, shape index: {}]   ;;  %s18077_s10 = inlined_call_operand.hbm [shape: f32[1,768], index: 10, kind: input, shape index: {}]   ;;  %s18078_s11 = inlined_call_operand.hbm [shape: bf16[768,128], index: 11, kind: input, shape index: {}]   ;;  %s18079_s12 = inlined_call_operand.hbm [shape: f32[1,128], index: 12, kind: input, shape index: {}]   ;;  %s18080_s13 = inlined_call_operand.vmem [shape: f32[2,8,128], index: 13, kind: output, shape index: {0}]   ;;  %s18081_s14 = inlined_call_operand.vmem [shape: f32[2,8,128], index: 14, kind: output, shape index: {1}]   ;;  %s18082_s15 = inlined_call_operand.vmem [shape: f32[2,1,1], index: 15, kind: output, shape index: {2}]   ;;  %s18083_s16 = inlined_call_operand.vmem [shape: f32[2,1,1], index: 16, kind: output, shape index: {3}]  }
   0x1   :  { %18095 = sst [smem:[#allocation31_spill]] %s18067_s0 }
   0x2   :  { %18096 = sst [smem:[#allocation32_spill]] %s18070_s3 }
   0x3   :  { %22 = vsyncpa [#allocation3], 0 }
   0x4   :  { %23 = vsyncpa [#allocation5], 0 }
   0x5   :  { %24 = vsyncpa [#allocation8], 0 }
   0x6   :  { %25 = vsyncpa [#allocation11], 0 }
   0x7   :  { %26 = vsyncpa [#allocation14], 0 }
   0x8   :  { %27 = vsyncpa [#allocation17], 0  ;;  %s17080_s21 = smov 0  }
   0x9 LB: > { %s16976_s22 = smov [#allocation4]   ;;  %s17086_s24 = sadd.s32 4294967295, %s16974_s21   ;;  %s16974_s21 = sphi %s17080_s21, %s33_s21  }
   0xa   : > { %s456_s23 = sshll.u32 %s16976_s22, 4  ;;  %p13188_p0 = scmp.ge.s32.totalorder %s16974_s21, 1  ;;  %s457_s23 = int_to_ptr.vmem [resolvable:$true] %s456_s23 }
   0xb   : > { %p430_p1 = scmp.lt.s32.totalorder %s16974_s21, 3  ;;  %p14746_p2 = scmp.eq.s32.totalorder %s17086_s24, 0 }
   0xc   : > { %s16977_s26 = smov [#allocation7]   ;;  %s16978_s28 = smov [#allocation10]  }
   0xd   : > { %p17091_p3 = pnand %p13188_p0, %p430_p1  ;;  %s480_s27 = sshll.u32 %s16977_s26, 4  ;;  %s17097_s27 = int_to_ptr.vmem [resolvable:$true] %s480_s27 }
   0xe   : > { %s504_s29 = sshll.u32 %s16978_s28, 4  ;;  %s16979_s0 = smov [#allocation13]   ;;  %s17105_s29 = int_to_ptr.vmem [resolvable:$true] %s504_s29 }
   0xf   : > { %p14715_p4 = pneg %p17091_p3  ;;  %s528_s17 = sshll.u32 %s16979_s0, 4  ;;  %s17107_s17 = int_to_ptr.vmem [resolvable:$true] %s528_s17 }
  0x10   : > { %s16695_s19 = scalar_lea.vmem %s457_s23, 16  ;;  %s16702_s20 = scalar_lea.vmem %s457_s23, 32 }
  0x11   : > { %p17101_p5 = pnand %p14746_p2, %p14715_p4  ;;  %p16696_p7 = scmp.ne.s32.totalorder %s457_s23, %s16695_s19 }
  0x12   : > { %p16703_p10 = scmp.lt.s32.totalorder %s457_s23, %s457_s23  ;;  %p16704_p11 = scmp.lt.s32.totalorder %s16702_s20, %s16695_s19 }
  0x13   : > { %p17111_p6 = pneg %p17101_p5 }
  0x14   : > { %p16705_p12 = por %p16704_p11, %p16703_p10 }
  0x15   : > { %p16698_p8 = pnand %p16696_p7, %p17111_p6 }
  0x17   : > { %p16699_p9 = pneg %p16698_p8 }
  0x19   : > { %p16706_p13 = pnand %p16705_p12, %p16699_p9 }
  0x1b   : > { %16709 = shalt.err (!%p16706_p13)
}
  0x1c   : > { %14721 = dma.hbm_to_vmem [thread:$0]  (!%p17101_p5), %s18071_s4, 16, %s457_s23, [#allocation5]  }
  0x1d   : > { %s16721_s28 = scalar_lea.vmem %s17097_s27, 96  ;;  %p16729_p7 = scmp.lt.s32.totalorder %s17097_s27, %s17097_s27 }
  0x1e   : > { %p16722_p0 = scmp.ne.s32.totalorder %s17097_s27, %s16721_s28  ;;  %p16730_p8 = scmp.lt.s32.totalorder %s16721_s28, %s16721_s28 }
  0x20   : > { %p16724_p1 = pnand %p16722_p0, %p17111_p6  ;;  %p16731_p9 = por %p16730_p8, %p16729_p7 }
  0x22   : > { %p16725_p4 = pneg %p16724_p1 }
  0x24   : > { %p16732_p10 = pnand %p16731_p9, %p16725_p4 }
  0x26   : > { %16735 = shalt.err (!%p16732_p10)
}
  0x27   : > { %14727 = dma.hbm_to_vmem [thread:$0]  (!%p17101_p5), %s18073_s6, 96, %s17097_s27, [#allocation8]  }
  0x28   : > { %s16747_s23 = scalar_lea.vmem %s17105_s29, 192  ;;  %p16755_p0 = scmp.lt.s32.totalorder %s17105_s29, %s17105_s29 }
  0x29   : > { %p16748_p11 = scmp.ne.s32.totalorder %s17105_s29, %s16747_s23  ;;  %p16756_p1 = scmp.lt.s32.totalorder %s16747_s23, %s16747_s23 }
  0x2b   : > { %p16750_p12 = pnand %p16748_p11, %p17111_p6  ;;  %p16757_p4 = por %p16756_p1, %p16755_p0 }
  0x2d   : > { %p16751_p13 = pneg %p16750_p12 }
  0x2f   : > { %p16758_p7 = pnand %p16757_p4, %p16751_p13 }
  0x31   : > { %16761 = shalt.err (!%p16758_p7)
}
  0x32   : > { %14733 = dma.hbm_to_vmem [thread:$0]  (!%p17101_p5), %s18075_s8, 192, %s17105_s29, [#allocation11]  }
  0x33   : > { %s16773_s27 = scalar_lea.vmem %s17107_s17, 96  ;;  %p16781_p11 = scmp.lt.s32.totalorder %s17107_s17, %s17107_s17 }
  0x34   : > { %p16774_p8 = scmp.ne.s32.totalorder %s17107_s17, %s16773_s27  ;;  %p16782_p12 = scmp.lt.s32.totalorder %s16773_s27, %s16773_s27 }
  0x36   : > { %p16776_p9 = pnand %p16774_p8, %p17111_p6  ;;  %p16783_p13 = por %p16782_p12, %p16781_p11 }
  0x38   : > { %p16777_p10 = pneg %p16776_p9 }
  0x3a   : > { %p16784_p0 = pnand %p16783_p13, %p16777_p10 }
  0x3c   : > { %16787 = shalt.err (!%p16784_p0)
}
  0x3d   : > { %14739 = dma.hbm_to_vmem [thread:$0]  (!%p17101_p5), %s18077_s10, 96, %s17107_s17, [#allocation14]  }
  0x3e   : > { %s16980_s29 = smov [#allocation2]  }
  0x3f   : > { %s442_s0 = sshll.u32 %s16980_s29, 4  ;;  %s443_s0 = int_to_ptr.vmem [resolvable:$true] %s442_s0 }
  0x40   : > { %s16799_s19 = scalar_lea.vmem %s443_s0, 6144  ;;  %p16807_p8 = scmp.lt.s32.totalorder %s443_s0, %s443_s0 }
  0x41   : > { %p16800_p1 = scmp.ne.s32.totalorder %s443_s0, %s16799_s19  ;;  %p16808_p9 = scmp.lt.s32.totalorder %s16799_s19, %s16799_s19 }
  0x43   : > { %p16802_p4 = pnand %p16800_p1, %p17111_p6  ;;  %p16809_p10 = por %p16808_p9, %p16807_p8 }
  0x45   : > { %p16803_p7 = pneg %p16802_p4 }
  0x47   : > { %p16810_p11 = pnand %p16809_p10, %p16803_p7 }
  0x49   : > { %16813 = shalt.err (!%p16810_p11)
}
  0x4a   : > { %s18084_s23 = smov 64   ;;  %s18085_s20 = smov 4  }
  0x4b   : > { %s18100_s3 = sld [smem:[#allocation32_spill]]  ;;  %s16983_s27 = smov [#allocation6]  }
  0x4c   : > { %s466_s26 = sshll.u32 %s16983_s27, 4  ;;  %s467_s26 = int_to_ptr.vmem [resolvable:$true] %s466_s26 }
  0x4d   : > { %s16825_s28 = scalar_lea.vmem %s467_s26, 36864  ;;  %p16833_p1 = scmp.lt.s32.totalorder %s467_s26, %s467_s26 }
  0x4e   : > { %p16826_p12 = scmp.ne.s32.totalorder %s467_s26, %s16825_s28  ;;  %p16834_p4 = scmp.lt.s32.totalorder %s16825_s28, %s16825_s28 }
  0x50   : > { %p16828_p13 = pnand %p16826_p12, %p17111_p6  ;;  %p16835_p7 = por %p16834_p4, %p16833_p1 }
  0x51   : > { %14718 = dma.hbm_to_vmem [thread:$0]  (!%p17101_p5), %s18100_s3, 6144, %s443_s0, [#allocation3], %s18084_s23, %s18084_s23, %s18085_s20  }
  0x52   : > { %p16829_p0 = pneg %p16828_p13 }
  0x54   : > { %p16836_p8 = pnand %p16835_p7, %p16829_p0 }
  0x56   : > { %16839 = shalt.err (!%p16836_p8)
}
  0x57   : > { %s18086_s29 = smov 384   ;;  %s18087_s19 = smov 24  }
  0x58   : > { %14724 = dma.hbm_to_vmem [thread:$0]  (!%p17101_p5), %s18072_s5, 36864, %s467_s26, [#allocation5], %s18086_s29, %s18086_s29, %s18087_s19  }
  0x59   : > { %s16986_s22 = smov [#allocation9]  }
  0x5a   : > { %s490_s27 = sshll.u32 %s16986_s22, 4  ;;  %s491_s27 = int_to_ptr.vmem [resolvable:$true] %s490_s27 }
  0x5b   : > { %s16851_s23 = scalar_lea.vmem %s491_s27, 73728  ;;  %p16859_p12 = scmp.lt.s32.totalorder %s491_s27, %s491_s27 }
  0x5c   : > { %p16852_p9 = scmp.ne.s32.totalorder %s491_s27, %s16851_s23  ;;  %p16860_p13 = scmp.lt.s32.totalorder %s16851_s23, %s16851_s23 }
  0x5e   : > { %p16854_p10 = pnand %p16852_p9, %p17111_p6  ;;  %p16861_p0 = por %p16860_p13, %p16859_p12 }
  0x60   : > { %p16855_p11 = pneg %p16854_p10 }
  0x62   : > { %p16862_p1 = pnand %p16861_p0, %p16855_p11 }
  0x64   : > { %16865 = shalt.err (!%p16862_p1)
}
  0x65   : > { %s16987_s28 = smov 768   ;;  %s16988_s20 = smov 48  }
  0x66   : > { %14730 = dma.hbm_to_vmem [thread:$0]  (!%p17101_p5), %s18074_s7, 73728, %s491_s27, [#allocation8], %s16987_s28, %s16987_s28, %s16988_s20  }
  0x67   : > { %s16989_s17 = smov [#allocation12]   ;;  %s16990_s29 = smov [#allocation15]  }
  0x68   : > { %s514_s22 = sshll.u32 %s16989_s17, 4  ;;  %s538_s19 = sshll.u32 %s16990_s29, 4  ;;  %s515_s22 = int_to_ptr.vmem [resolvable:$true] %s514_s22  ;;  %s539_s19 = int_to_ptr.vmem [resolvable:$true] %s538_s19 }
  0x69   : > { %s16877_s3 = scalar_lea.vmem %s515_s22, 36864  ;;  %p16885_p9 = scmp.lt.s32.totalorder %s515_s22, %s515_s22 }
  0x6a   : > { %p16878_p4 = scmp.ne.s32.totalorder %s515_s22, %s16877_s3  ;;  %p16886_p10 = scmp.lt.s32.totalorder %s16877_s3, %s16877_s3 }
  0x6c   : > { %p16880_p7 = pnand %p16878_p4, %p17111_p6  ;;  %p16887_p11 = por %p16886_p10, %p16885_p9 }
  0x6e   : > { %p16881_p8 = pneg %p16880_p7 }
  0x70   : > { %p16888_p12 = pnand %p16887_p11, %p16881_p8 }
  0x72   : > { %16891 = shalt.err (!%p16888_p12)
}
  0x73   : > { %s18101_s23 = smov 24   ;;  %s18102_s20 = smov 384  }
  0x74   : > { %14736 = dma.hbm_to_vmem [thread:$0]  (!%p17101_p5), %s18076_s9, 36864, %s515_s22, [#allocation11], %s18102_s20, %s18102_s20, %s18101_s23  }
  0x75   : > { %s16903_s29 = scalar_lea.vmem %s539_s19, 6144  ;;  %p16911_p4 = scmp.lt.s32.totalorder %s539_s19, %s539_s19 }
  0x76   : > { %p16904_p13 = scmp.ne.s32.totalorder %s539_s19, %s16903_s29  ;;  %p16912_p7 = scmp.lt.s32.totalorder %s16903_s29, %s16903_s29 }
  0x78   : > { %p16906_p0 = pnand %p16904_p13, %p17111_p6  ;;  %p16913_p9 = por %p16912_p7, %p16911_p4 }
  0x7a   : > { %p16907_p1 = pneg %p16906_p0 }
  0x7c   : > { %p16914_p8 = pnand %p16913_p9, %p16907_p1 }
  0x7e   : > { %16917 = shalt.err (!%p16914_p8)
}
  0x7f   : > { %s18103_s3 = smov 4   ;;  %s18104_s0 = smov 64  }
  0x80   : > { %14742 = dma.hbm_to_vmem [thread:$0]  (!%p17101_p5), %s18078_s11, 6144, %s539_s19, [#allocation14], %s18104_s0, %s18104_s0, %s18103_s3  }
  0x81   : > { %s16991_s22 = smov [#allocation16]  }
  0x82   : > { %s552_s23 = sshll.u32 %s16991_s22, 4  ;;  %s553_s23 = int_to_ptr.vmem [resolvable:$true] %s552_s23 }
  0x83   : > { %s16929_s20 = scalar_lea.vmem %s553_s23, 16  ;;  %s16936_s27 = scalar_lea.vmem %s553_s23, 32 }
  0x84   : > { %p16930_p10 = scmp.ne.s32.totalorder %s553_s23, %s16929_s20  ;;  %p16937_p13 = scmp.lt.s32.totalorder %s553_s23, %s553_s23 }
  0x85   : > { %p16938_p0 = scmp.lt.s32.totalorder %s16936_s27, %s16929_s20 }
  0x86   : > { %p16932_p11 = pnand %p16930_p10, %p17111_p6 }
  0x87   : > { %p16939_p1 = por %p16938_p0, %p16937_p13 }
  0x88   : > { %p16933_p12 = pneg %p16932_p11 }
  0x8a   : > { %p16940_p4 = pnand %p16939_p1, %p16933_p12 }
  0x8c   : > { %16943 = shalt.err (!%p16940_p4)
}
  0x8d   : > { %14745 = dma.hbm_to_vmem [thread:$0]  (!%p17101_p5), %s18079_s12, 16, %s553_s23, [#allocation17]  }
  0x8e   : > { %588 = sbr.rel (%p17091_p3) target bundleno = 2499 (0x9c3), region = 72 }
  0x93   : > { %16949 = dma.done.wait (%p14746_p2), [#allocation3], 6144  }
  0x94   : > { %16951 = vsyncadd (%p14746_p2), [#allocation3], 4294961152 }
  0x95   : > { %16953 = dma.done.wait (%p14746_p2), [#allocation5], 36880  }
  0x96   : > { %16955 = vsyncadd (%p14746_p2), [#allocation5], 4294930416 }
  0x97   : > { %16957 = dma.done.wait (%p14746_p2), [#allocation8], 73824  }
  0x98   : > { %16959 = vsyncadd (%p14746_p2), [#allocation8], 4294893472 }
  0x99   : > { %16961 = dma.done.wait (%p14746_p2), [#allocation11], 37056  }
  0x9a   : > { %16963 = vsyncadd (%p14746_p2), [#allocation11], 4294930240 }
  0x9b   : > { %16965 = dma.done.wait (%p14746_p2), [#allocation14], 6240  }
  0x9c   : > { %16967 = vsyncadd (%p14746_p2), [#allocation14], 4294961056 }
  0x9d   : > { %16969 = dma.done.wait (%p14746_p2), [#allocation17], 16  }
  0x9e   : > { %16971 = vsyncadd (%p14746_p2), [#allocation17], 4294967280  ;;  %v14795_v0 = vld [vmem:[#allocation2 + $0x78] sm:$0xff]   ;;  %v14799_v4 = vld [vmem:[#allocation2 + $0x70] sm:$0xff]   ;;  %p692_p2 = scmp.lt.s32.totalorder %s17086_s24, 1  ;;  %s18105_s19 = sld [smem:[#allocation31_spill]] }
  0x9f   : > { %v14796_v1 = vld [vmem:[#allocation2 + $0xf8] sm:$0xff]   ;;  %14541 = vmatprep.subr.bf16.mxu0 %v14795_v0  ;;  %v14800_v5 = vld [vmem:[#allocation2 + $0xf0] sm:$0xff]   ;;  %v14803_v8 = vld [vmem:[#allocation2 + $0x68] sm:$0xff]  }
  0xa0   : > { %v14797_v2 = vld [vmem:[#allocation2 + $0x38] sm:$0xff]   ;;  %14563 = vmatprep.subr.bf16.mxu1 %v14796_v1  ;;  %v14801_v6 = vld [vmem:[#allocation2 + $0x30] sm:$0xff]   ;;  %v14804_v9 = vld [vmem:[#allocation2 + $0xe8] sm:$0xff]   ;;  %s18122_s24 = smov (!%p692_p2, %s17086_s24), 1 }
  0xa1   : > { %v14798_v3 = vld [vmem:[#allocation2 + $0xb8] sm:$0xff]   ;;  %14542 = vmatpush3.bf16.msra.mxu0 %v14797_v2  ;;  %v14802_v7 = vld [vmem:[#allocation2 + $0xb0] sm:$0xff]   ;;  %v14805_v10 = vld [vmem:[#allocation2 + $0x28] sm:$0xff]   ;;  %s14673_s25 = smul.u32 24, %s18122_s24  ;;  %s17292_s0 = sshll.u32 %s18122_s24, 3 }
  0xa2   : > { %14564 = vmatpush3.bf16.msra.mxu1 %v14798_v3  ;;  %14543 = vmatprep.subr.bf16.mxu0 %v14799_v4  ;;  %v14806_v11 = vld [vmem:[#allocation2 + $0xa8] sm:$0xff]   ;;  %v14807_v12 = vld [vmem:[#allocation2 + $0x60] sm:$0xff]   ;;  %v14811_v16 = vld [vmem:[#allocation2 + $0x58] sm:$0xff]   ;;  %s17299_s22 = scalar_lea.vmem %s18080_s13, %s17292_s0  ;;  %s14674_s23 = smul.u32 48, %s18122_s24 }
  0xa3   : > { %14565 = vmatprep.subr.bf16.mxu1 %v14800_v5  ;;  %v14808_v13 = vld [vmem:[#allocation2 + $0xe0] sm:$0xff]   ;;  %v14812_v17 = vld [vmem:[#allocation2 + $0xd8] sm:$0xff]   ;;  %v14815_v20 = vld [vmem:[#allocation2 + $0x50] sm:$0xff]   ;;  %s705_s30 = scalar_lea.vmem %s18069_s2, %s17292_s0  ;;  %s713_s20 = scalar_lea.vmem %s18081_s14, %s17292_s0 }
  0xa4   : > { %v14809_v14 = vld [vmem:[#allocation2 + $0x20] sm:$0xff]   ;;  %v14813_v18 = vld [vmem:[#allocation2 + $0x18] sm:$0xff]   ;;  %v14816_v21 = vld [vmem:[#allocation2 + $0xd0] sm:$0xff]   ;;  %s17246_s3 = scalar_lea.vmem %s18105_s19, %s14673_s25  ;;  %s17306_s28 = scalar_lea.vmem %s18068_s1, %s14674_s23 }
  0xa5   : > { %14544 = vmatpush3.bf16.msra.mxu0 %v14801_v6  ;;  %v14810_v15 = vld [vmem:[#allocation2 + $0xa0] sm:$0xff]   ;;  %v14814_v19 = vld [vmem:[#allocation2 + $0x98] sm:$0xff]   ;;  %v14817_v22 = vld [vmem:[#allocation2 + $0x10] sm:$0xff]  }
  0xa6   : > { %14566 = vmatpush3.bf16.msra.mxu1 %v14802_v7  ;;  %14545 = vmatprep.subr.bf16.mxu0 %v14803_v8  ;;  %v14818_v23 = vld [vmem:[#allocation2 + $0x90] sm:$0xff]   ;;  %v14819_v24 = vld [vmem:[#allocation2 + $0x48] sm:$0xff]   ;;  %v14823_v28 = vld [vmem:[#allocation2 + $0x40] sm:$0xff]  }
  0xa7   : > { %14567 = vmatprep.subr.bf16.mxu1 %v14804_v9  ;;  %v14820_v25 = vld [vmem:[#allocation2 + $0xc8] sm:$0xff]   ;;  %v14824_v29 = vld [vmem:[#allocation2 + $0xc0] sm:$0xff]   ;;  %v14831_v38 = vld [vmem:[#allocation2 + $0x178] sm:$0xff]  }
  0xa8   : > { %v14821_v26 = vld [vmem:[#allocation2 + $0x8] sm:$0xff]   ;;  %v14825_v30 = vld [vmem:[#allocation2] sm:$0xff]   ;;  %v14835_v41 = vld [vmem:[#allocation2 + $0x138] sm:$0xff]  }
  0xa9   : > { %14546 = vmatpush3.bf16.msra.mxu0 %v14805_v10  ;;  %v14822_v27 = vld [vmem:[#allocation2 + $0x88] sm:$0xff]   ;;  %v14826_v31 = vld [vmem:[#allocation2 + $0x80] sm:$0xff]   ;;  %v14836_v42 = vld [vmem:[#allocation2 + $0x170] sm:$0xff]  }
  0xaa   : > { %14568 = vmatpush3.bf16.msra.mxu1 %v14806_v11  ;;  %14547 = vmatprep.subr.bf16.mxu0 %v14807_v12  ;;  %v721_v32 = vld [vmem:[%s17246_s3] sm:$0xff]  ;;  %v722_v33 = vld [vmem:[%s17246_s3 + $0x8] sm:$0xff]  ;;  %v14840_v45 = vld [vmem:[#allocation2 + $0x130] sm:$0xff]  }
  0xab   : > { %14569 = vmatprep.subr.bf16.mxu1 %v14808_v13  ;;  %v17250_v34 = vcombine.high %v721_v32, %v721_v32  ;;  %v17252_v35 = vcombine.high %v722_v33, %v722_v33  ;;  %v17254_v36 = vcombine.low %v721_v32, %v721_v32  ;;  %v17256_v37 = vcombine.low %v722_v33, %v722_v33  ;;  %v14832_v39 = vld [vmem:[#allocation6 + $0x150] ss:$24 sps:$4 sm:$0xff]   ;;  %v14834_v40 = vld [vmem:[#allocation6 + $0x154] ss:$24 sps:$4 sm:$0xff]   ;;  %v14837_v43 = vld [vmem:[#allocation6 + $0x120] ss:$24 sps:$4 sm:$0xff]  }
  0xac   : > { %v14839_v44 = vld [vmem:[#allocation6 + $0x124] ss:$24 sps:$4 sm:$0xff]   ;;  %v14842_v47 = vld [vmem:[#allocation6 + $0xf0] ss:$24 sps:$4 sm:$0xff]   ;;  %v14844_v48 = vld [vmem:[#allocation6 + $0xf4] ss:$24 sps:$4 sm:$0xff]  }
  0xad   : > { %14548 = vmatpush3.bf16.msra.mxu0 %v14809_v14  ;;  %1174 = vmatprep.mubr.bf16.mxu0 %v17250_v34  ;;  %v14841_v46 = vld [vmem:[#allocation2 + $0x168] sm:$0xff]   ;;  %v14846_v50 = vld [vmem:[#allocation2 + $0x160] sm:$0xff]   ;;  %v14851_v54 = vld [vmem:[#allocation2 + $0x158] sm:$0xff]  }
  0xae   : > { %14570 = vmatpush3.bf16.msra.mxu1 %v14810_v15  ;;  %14549 = vmatprep.subr.bf16.mxu0 %v14811_v16  ;;  %v14845_v49 = vld [vmem:[#allocation2 + $0x128] sm:$0xff]   ;;  %v14847_v52 = vld [vmem:[#allocation6 + $0xc0] ss:$24 sps:$4 sm:$0xff]   ;;  %v14856_v58 = vld [vmem:[#allocation2 + $0x150] sm:$0xff]  }
  0xaf   : > { %14571 = vmatprep.subr.bf16.mxu1 %v14812_v17  ;;  %1214 = vmatprep.mubr.bf16.mxu1 %v17252_v35  ;;  %v14849_v51 = vld [vmem:[#allocation6 + $0xc4] ss:$24 sps:$4 sm:$0xff]   ;;  %v14854_v55 = vld [vmem:[#allocation6 + $0x94] ss:$24 sps:$4 sm:$0xff]   ;;  %v14852_v56 = vld [vmem:[#allocation6 + $0x90] ss:$24 sps:$4 sm:$0xff]  }
  0xb0   : > { %v14850_v53 = vld [vmem:[#allocation2 + $0x120] sm:$0xff]   ;;  %v14855_v57 = vld [vmem:[#allocation2 + $0x118] sm:$0xff]   ;;  %v14860_v61 = vld [vmem:[#allocation2 + $0x110] sm:$0xff]  }
  0xb1   : > { %14550 = vmatpush3.bf16.msra.mxu0 %v14813_v18  ;;  %v14859_v59 = vld [vmem:[#allocation6 + $0x64] ss:$24 sps:$4 sm:$0xff]   ;;  %v14857_v60 = vld [vmem:[#allocation6 + $0x60] ss:$24 sps:$4 sm:$0xff]   ;;  %v14864_v63 = vld [vmem:[#allocation6 + $0x34] ss:$24 sps:$4 sm:$0xff]  }
  0xb2   : > { %14572 = vmatpush3.bf16.msra.mxu1 %v14814_v19  ;;  %14551 = vmatprep.subr.bf16.mxu0 %v14815_v20  ;;  %v14861_v62 = vld [vmem:[#allocation2 + $0x148] sm:$0xff]   ;;  %v14866_v2 = vld [vmem:[#allocation2 + $0x140] sm:$0xff]   ;;  %v723_v4 = vld [vmem:[%s17246_s3 + $0x10] sm:$0xff]  ;;  %s719_s3 = scalar_lea.vmem %s18083_s16, %s18122_s24 }
  0xb3   : > { %14573 = vmatprep.subr.bf16.mxu1 %v14816_v21  ;;  %v14862_v0 = vld [vmem:[#allocation6 + $0x30] ss:$24 sps:$4 sm:$0xff]   ;;  %v14869_v3 = vld [vmem:[#allocation6 + $0x4] ss:$24 sps:$4 sm:$0xff]   ;;  %v17264_v5 = vcombine.high %v723_v4, %v723_v4  ;;  %v14867_v6 = vld [vmem:[#allocation6] ss:$24 sps:$4 sm:$0xff]   ;;  %v17267_v10 = vcombine.low %v723_v4, %v723_v4 }
  0xb4   : > { %v14865_v1 = vld [vmem:[#allocation2 + $0x108] sm:$0xff]   ;;  %v14870_v7 = vld [vmem:[#allocation2 + $0x100] sm:$0xff]  }
  0xb5   : > { %14552 = vmatpush3.bf16.msra.mxu0 %v14817_v22  ;;  %v14875_v8 = vld [vmem:[#allocation6 + $0x2d4] ss:$24 sps:$4 sm:$0xff]   ;;  %v14873_v11 = vld [vmem:[#allocation6 + $0x2d0] ss:$24 sps:$4 sm:$0xff]   ;;  %v14881_v13 = vld [vmem:[#allocation6 + $0x2a4] ss:$24 sps:$4 sm:$0xff]  }
  0xb6   : > { %14574 = vmatpush3.bf16.msra.mxu1 %v14818_v23  ;;  %14553 = vmatprep.subr.bf16.mxu0 %v14819_v24  ;;  %v14878_v9 = vld [vmem:[#allocation6 + $0x454] ss:$24 sps:$4 sm:$0xff]   ;;  %v14876_v12 = vld [vmem:[#allocation6 + $0x450] ss:$24 sps:$4 sm:$0xff]   ;;  %v14884_v14 = vld [vmem:[#allocation6 + $0x424] ss:$24 sps:$4 sm:$0xff]  }
  0xb7   : > { %14575 = vmatprep.subr.bf16.mxu1 %v14820_v25  ;;  %v14879_v15 = vld [vmem:[#allocation6 + $0x2a0] ss:$24 sps:$4 sm:$0xff]   ;;  %v14887_v17 = vld [vmem:[#allocation6 + $0x274] ss:$24 sps:$4 sm:$0xff]   ;;  %v14885_v19 = vld [vmem:[#allocation6 + $0x270] ss:$24 sps:$4 sm:$0xff]  }
  0xb8   : > { %v14882_v16 = vld [vmem:[#allocation6 + $0x420] ss:$24 sps:$4 sm:$0xff]   ;;  %v14890_v18 = vld [vmem:[#allocation6 + $0x3f4] ss:$24 sps:$4 sm:$0xff]   ;;  %v14888_v20 = vld [vmem:[#allocation6 + $0x3f0] ss:$24 sps:$4 sm:$0xff]  }
  0xb9   : > { %14554 = vmatpush3.bf16.msra.mxu0 %v14821_v26  ;;  %v14893_v21 = vld [vmem:[#allocation6 + $0x244] ss:$24 sps:$4 sm:$0xff]   ;;  %v14891_v23 = vld [vmem:[#allocation6 + $0x240] ss:$24 sps:$4 sm:$0xff]   ;;  %v14899_v25 = vld [vmem:[#allocation6 + $0x214] ss:$24 sps:$4 sm:$0xff]  }
  0xba   : > { %14576 = vmatpush3.bf16.msra.mxu1 %v14822_v27  ;;  %14555 = vmatprep.subr.bf16.mxu0 %v14823_v28  ;;  %v14896_v22 = vld [vmem:[#allocation6 + $0x3c4] ss:$24 sps:$4 sm:$0xff]   ;;  %v14894_v24 = vld [vmem:[#allocation6 + $0x3c0] ss:$24 sps:$4 sm:$0xff]   ;;  %v14902_v26 = vld [vmem:[#allocation6 + $0x394] ss:$24 sps:$4 sm:$0xff]  }
  0xbb   : > { %14577 = vmatprep.subr.bf16.mxu1 %v14824_v29  ;;  %v14897_v27 = vld [vmem:[#allocation6 + $0x210] ss:$24 sps:$4 sm:$0xff]   ;;  %v14905_v29 = vld [vmem:[#allocation6 + $0x1e4] ss:$24 sps:$4 sm:$0xff]   ;;  %v14906_v32 = vld [vmem:[#allocation6 + $0x360] ss:$24 sps:$4 sm:$0xff]  }
  0xbc   : > { %v14900_v28 = vld [vmem:[#allocation6 + $0x390] ss:$24 sps:$4 sm:$0xff]   ;;  %v14911_v33 = vld [vmem:[#allocation6 + $0x1b4] ss:$24 sps:$4 sm:$0xff]   ;;  %v14954_v4 = vld [vmem:[#allocation6 + $0x660] ss:$24 sps:$4 sm:$0xff]  }
  0xbd   : > { %14556 = vmatpush3.bf16.msra.mxu0 %v14825_v30  ;;  %v14908_v30 = vld [vmem:[#allocation6 + $0x364] ss:$24 sps:$4 sm:$0xff]  }
  0xbe   : > { %14578 = vmatpush3.bf16.msra.mxu1 %v14826_v31  ;;  %14585 = vmatprep.subr.bf16.mxu0 %v14831_v38  ;;  %v14903_v31 = vld [vmem:[#allocation6 + $0x1e0] ss:$24 sps:$4 sm:$0xff]   ;;  %v14914_v38 = vld [vmem:[#allocation6 + $0x334] ss:$24 sps:$4 sm:$0xff]  }
  0xbf   : > { %3068 = vmatprep.subr.bf16.mxu1 %v14834_v40  ;;  %v14912_v40 = vld [vmem:[#allocation6 + $0x330] ss:$24 sps:$4 sm:$0xff]  }
  0xc0   : > { %1175 = vmatmul.mubr.bf16.vlgmr.msra.gmra.mxu0 %v17254_v36 }
  0xc1   : > { %1215 = vmatmul.mubr.bf16.vlgmr.msra.gmra.mxu1 %v17256_v37  ;;  %14586 = vmatpush3.bf16.msra.mxu0 %v14835_v41  ;;  %v14917_v41 = vld [vmem:[#allocation6 + $0x184] ss:$24 sps:$4 sm:$0xff]  }
  0xc2   : > { %3069 = vmatpush1.bf16.msra.mxu1 %v14832_v39  ;;  %14587 = vmatprep.subr.bf16.mxu0 %v14836_v42  ;;  %v14909_v39 = vld [vmem:[#allocation6 + $0x1b0] ss:$24 sps:$4 sm:$0xff]   ;;  %v14920_v42 = vld [vmem:[#allocation6 + $0x304] ss:$24 sps:$4 sm:$0xff]  }
  0xc3   : > { %3100 = vmatprep.mubr.bf16.mxu1 %v17250_v34  ;;  %3070 = vmatprep.subr.bf16.mxu1 %v14839_v44  ;;  %v14918_v44 = vld [vmem:[#allocation6 + $0x300] ss:$24 sps:$4 sm:$0xff]  }
  0xc4   : > { %1254 = vmatprep.mubr.bf16.mxu0 %v17264_v5 }
  0xc5   : > { %14588 = vmatpush3.bf16.msra.mxu0 %v14840_v45  ;;  %v14923_v45 = vld [vmem:[#allocation6 + $0x5d4] ss:$24 sps:$4 sm:$0xff]  }
  0xc6   : > { %3071 = vmatpush1.bf16.msra.mxu1 %v14837_v43  ;;  %14589 = vmatprep.subr.bf16.mxu0 %v14841_v46  ;;  %v14915_v43 = vld [vmem:[#allocation6 + $0x180] ss:$24 sps:$4 sm:$0xff]   ;;  %v14926_v46 = vld [vmem:[#allocation6 + $0x754] ss:$24 sps:$4 sm:$0xff]  }
  0xc7   : > { %3072 = vmatprep.subr.bf16.mxu1 %v14844_v48  ;;  %v14924_v48 = vld [vmem:[#allocation6 + $0x750] ss:$24 sps:$4 sm:$0xff]  }
  0xc9   : > { %14590 = vmatpush3.bf16.msra.mxu0 %v14845_v49  ;;  %v14929_v49 = vld [vmem:[#allocation6 + $0x5a4] ss:$24 sps:$4 sm:$0xff]  }
  0xca   : > { %3073 = vmatpush1.bf16.msra.mxu1 %v14842_v47  ;;  %14591 = vmatprep.subr.bf16.mxu0 %v14846_v50  ;;  %v14921_v47 = vld [vmem:[#allocation6 + $0x5d0] ss:$24 sps:$4 sm:$0xff]   ;;  %v14932_v50 = vld [vmem:[#allocation6 + $0x724] ss:$24 sps:$4 sm:$0xff]  }
  0xcb   : > { %3074 = vmatprep.subr.bf16.mxu1 %v14849_v51  ;;  %v14927_v51 = vld [vmem:[#allocation6 + $0x5a0] ss:$24 sps:$4 sm:$0xff]  }
  0xcd   : > { %14592 = vmatpush3.bf16.msra.mxu0 %v14850_v53  ;;  %v14935_v53 = vld [vmem:[#allocation6 + $0x574] ss:$24 sps:$4 sm:$0xff]  }
  0xce   : > { %3075 = vmatpush1.bf16.msra.mxu1 %v14847_v52  ;;  %14593 = vmatprep.subr.bf16.mxu0 %v14851_v54  ;;  %v14930_v52 = vld [vmem:[#allocation6 + $0x720] ss:$24 sps:$4 sm:$0xff]   ;;  %v14938_v54 = vld [vmem:[#allocation6 + $0x6f4] ss:$24 sps:$4 sm:$0xff]  }
  0xcf   : > { %3076 = vmatprep.subr.bf16.mxu1 %v14854_v55  ;;  %v14933_v55 = vld [vmem:[#allocation6 + $0x570] ss:$24 sps:$4 sm:$0xff]  }
  0xd1   : > { %14594 = vmatpush3.bf16.msra.mxu0 %v14855_v57  ;;  %v14941_v57 = vld [vmem:[#allocation6 + $0x544] ss:$24 sps:$4 sm:$0xff]  }
  0xd2   : > { %3077 = vmatpush1.bf16.msra.mxu1 %v14852_v56  ;;  %14595 = vmatprep.subr.bf16.mxu0 %v14856_v58  ;;  %v14936_v56 = vld [vmem:[#allocation6 + $0x6f0] ss:$24 sps:$4 sm:$0xff]   ;;  %v14944_v58 = vld [vmem:[#allocation6 + $0x6c4] ss:$24 sps:$4 sm:$0xff]  }
  0xd3   : > { %3078 = vmatprep.subr.bf16.mxu1 %v14859_v59  ;;  %v14939_v59 = vld [vmem:[#allocation6 + $0x540] ss:$24 sps:$4 sm:$0xff]  }
  0xd5   : > { %14596 = vmatpush3.bf16.msra.mxu0 %v14860_v61  ;;  %v14947_v61 = vld [vmem:[#allocation6 + $0x514] ss:$24 sps:$4 sm:$0xff]  }
  0xd6   : > { %3079 = vmatpush1.bf16.msra.mxu1 %v14857_v60  ;;  %14597 = vmatprep.subr.bf16.mxu0 %v14861_v62  ;;  %v14942_v60 = vld [vmem:[#allocation6 + $0x6c0] ss:$24 sps:$4 sm:$0xff]   ;;  %v14950_v62 = vld [vmem:[#allocation6 + $0x694] ss:$24 sps:$4 sm:$0xff]  }
  0xd7   : > { %3080 = vmatprep.subr.bf16.mxu1 %v14864_v63  ;;  %v14945_v63 = vld [vmem:[#allocation6 + $0x510] ss:$24 sps:$4 sm:$0xff]  }
  0xd9   : > { %14598 = vmatpush3.bf16.msra.mxu0 %v14865_v1  ;;  %v14953_v1 = vld [vmem:[#allocation6 + $0x4e4] ss:$24 sps:$4 sm:$0xff]  }
  0xda   : > { %3081 = vmatpush1.bf16.msra.mxu1 %v14862_v0  ;;  %14599 = vmatprep.subr.bf16.mxu0 %v14866_v2  ;;  %v14948_v0 = vld [vmem:[#allocation6 + $0x690] ss:$24 sps:$4 sm:$0xff]   ;;  %v14956_v2 = vld [vmem:[#allocation6 + $0x664] ss:$24 sps:$4 sm:$0xff]  }
  0xdb   : > { %3082 = vmatprep.subr.bf16.mxu1 %v14869_v3  ;;  %v14951_v3 = vld [vmem:[#allocation6 + $0x4e0] ss:$24 sps:$4 sm:$0xff]  }
  0xdd   : > { %14600 = vmatpush3.bf16.msra.mxu0 %v14870_v7  ;;  %v14962_v7 = vld [vmem:[#allocation6 + $0x634] ss:$24 sps:$4 sm:$0xff]  }
  0xde   : > { %3083 = vmatpush1.bf16.msra.mxu1 %v14867_v6  ;;  %3109 = vmatprep.subr.bf16.mxu0 %v14878_v9  ;;  %v14959_v6 = vld [vmem:[#allocation6 + $0x4b4] ss:$24 sps:$4 sm:$0xff]   ;;  %v14960_v9 = vld [vmem:[#allocation6 + $0x630] ss:$24 sps:$4 sm:$0xff]  }
  0xdf   : > { %3084 = vmatprep.subr.bf16.mxu1 %v14875_v8  ;;  %v14957_v8 = vld [vmem:[#allocation6 + $0x4b0] ss:$24 sps:$4 sm:$0xff]  }
  0xe0   : > { %1255 = vmatmul.mubr.bf16.vlgmr.msra.gmra.mxu0 %v17267_v10 }
  0xe1   : > { %3110 = vmatpush1.bf16.msra.mxu0 %v14876_v12  ;;  %3141 = vmatprep.mubr.bf16.mxu0 %v17252_v35  ;;  %v14968_v12 = vld [vmem:[#allocation6 + $0x604] ss:$24 sps:$4 sm:$0xff]  }
  0xe2   : > { %3085 = vmatpush2.bf16.msra.mxu1 %v14873_v11  ;;  %3111 = vmatprep.subr.bf16.mxu0 %v14884_v14  ;;  %v14965_v11 = vld [vmem:[#allocation6 + $0x484] ss:$24 sps:$4 sm:$0xff]   ;;  %v14966_v14 = vld [vmem:[#allocation6 + $0x600] ss:$24 sps:$4 sm:$0xff]  }
  0xe3   : > { %3086 = vmatprep.subr.bf16.mxu1 %v14881_v13  ;;  %v14963_v13 = vld [vmem:[#allocation6 + $0x480] ss:$24 sps:$4 sm:$0xff]  }
  0xe5   : > { %3112 = vmatpush1.bf16.msra.mxu0 %v14882_v16  ;;  %v14974_v16 = vld [vmem:[#allocation6 + $0x15c] ss:$24 sps:$4 sm:$0xff]  }
  0xe6   : > { %3087 = vmatpush2.bf16.msra.mxu1 %v14879_v15  ;;  %3113 = vmatprep.subr.bf16.mxu0 %v14890_v18  ;;  %v14971_v15 = vld [vmem:[#allocation6 + $0x8d4] ss:$24 sps:$4 sm:$0xff]   ;;  %v14972_v18 = vld [vmem:[#allocation6 + $0x158] ss:$24 sps:$4 sm:$0xff]  }
  0xe7   : > { %3088 = vmatprep.subr.bf16.mxu1 %v14887_v17  ;;  %v14969_v17 = vld [vmem:[#allocation6 + $0x8d0] ss:$24 sps:$4 sm:$0xff]  }
  0xe9   : > { %3114 = vmatpush1.bf16.msra.mxu0 %v14888_v20  ;;  %v14980_v20 = vld [vmem:[#allocation6 + $0x12c] ss:$24 sps:$4 sm:$0xff]  }
  0xea   : > { %3089 = vmatpush2.bf16.msra.mxu1 %v14885_v19  ;;  %3115 = vmatprep.subr.bf16.mxu0 %v14896_v22  ;;  %v14977_v19 = vld [vmem:[#allocation6 + $0x8a4] ss:$24 sps:$4 sm:$0xff]   ;;  %v14978_v22 = vld [vmem:[#allocation6 + $0x128] ss:$24 sps:$4 sm:$0xff]  }
  0xeb   : > { %3090 = vmatprep.subr.bf16.mxu1 %v14893_v21  ;;  %v14975_v21 = vld [vmem:[#allocation6 + $0x8a0] ss:$24 sps:$4 sm:$0xff]  }
  0xed   : > { %3116 = vmatpush1.bf16.msra.mxu0 %v14894_v24  ;;  %v14986_v24 = vld [vmem:[#allocation6 + $0xfc] ss:$24 sps:$4 sm:$0xff]  }
  0xee   : > { %3091 = vmatpush2.bf16.msra.mxu1 %v14891_v23  ;;  %3117 = vmatprep.subr.bf16.mxu0 %v14902_v26  ;;  %v14983_v23 = vld [vmem:[#allocation6 + $0x874] ss:$24 sps:$4 sm:$0xff]   ;;  %v14984_v26 = vld [vmem:[#allocation6 + $0xf8] ss:$24 sps:$4 sm:$0xff]  }
  0xef   : > { %3092 = vmatprep.subr.bf16.mxu1 %v14899_v25  ;;  %v14981_v25 = vld [vmem:[#allocation6 + $0x870] ss:$24 sps:$4 sm:$0xff]  }
  0xf1   : > { %3118 = vmatpush1.bf16.msra.mxu0 %v14900_v28  ;;  %v14992_v28 = vld [vmem:[#allocation6 + $0xcc] ss:$24 sps:$4 sm:$0xff]  }
  0xf2   : > { %3093 = vmatpush2.bf16.msra.mxu1 %v14897_v27  ;;  %3119 = vmatprep.subr.bf16.mxu0 %v14908_v30  ;;  %v14989_v27 = vld [vmem:[#allocation6 + $0x844] ss:$24 sps:$4 sm:$0xff]   ;;  %v14990_v30 = vld [vmem:[#allocation6 + $0xc8] ss:$24 sps:$4 sm:$0xff]  }
  0xf3   : > { %3094 = vmatprep.subr.bf16.mxu1 %v14905_v29  ;;  %v14987_v29 = vld [vmem:[#allocation6 + $0x840] ss:$24 sps:$4 sm:$0xff]  }
  0xf5   : > { %3120 = vmatpush1.bf16.msra.mxu0 %v14906_v32  ;;  %v14998_v32 = vld [vmem:[#allocation6 + $0x9c] ss:$24 sps:$4 sm:$0xff]  }
  0xf6   : > { %3095 = vmatpush2.bf16.msra.mxu1 %v14903_v31  ;;  %3121 = vmatprep.subr.bf16.mxu0 %v14914_v38  ;;  %v14995_v31 = vld [vmem:[#allocation6 + $0x814] ss:$24 sps:$4 sm:$0xff]   ;;  %v14996_v38 = vld [vmem:[#allocation6 + $0x98] ss:$24 sps:$4 sm:$0xff]  }
  0xf7   : > { %3096 = vmatprep.subr.bf16.mxu1 %v14911_v33  ;;  %v14993_v33 = vld [vmem:[#allocation6 + $0x810] ss:$24 sps:$4 sm:$0xff]  }
  0xf9   : > { %3122 = vmatpush1.bf16.msra.mxu0 %v14912_v40  ;;  %v15004_v40 = vld [vmem:[#allocation6 + $0x6c] ss:$24 sps:$4 sm:$0xff]  }
  0xfa   : > { %3097 = vmatpush2.bf16.msra.mxu1 %v14909_v39  ;;  %3123 = vmatprep.subr.bf16.mxu0 %v14920_v42  ;;  %v15001_v39 = vld [vmem:[#allocation6 + $0x7e4] ss:$24 sps:$4 sm:$0xff]   ;;  %v15002_v42 = vld [vmem:[#allocation6 + $0x68] ss:$24 sps:$4 sm:$0xff]  }
  0xfb   : > { %3098 = vmatprep.subr.bf16.mxu1 %v14917_v41  ;;  %v14999_v41 = vld [vmem:[#allocation6 + $0x7e0] ss:$24 sps:$4 sm:$0xff]  }
  0xfd   : > { %3124 = vmatpush1.bf16.msra.mxu0 %v14918_v44  ;;  %v15010_v44 = vld [vmem:[#allocation6 + $0x3c] ss:$24 sps:$4 sm:$0xff]  }
  0xfe   : > { %3099 = vmatpush2.bf16.msra.mxu1 %v14915_v43  ;;  %3125 = vmatprep.subr.bf16.mxu0 %v14923_v45  ;;  %v15007_v43 = vld [vmem:[#allocation6 + $0x7b4] ss:$24 sps:$4 sm:$0xff]   ;;  %v15005_v45 = vld [vmem:[#allocation6 + $0x7b0] ss:$24 sps:$4 sm:$0xff]  }
  0xff   : > { %3150 = vmatprep.subr.bf16.mxu1 %v14926_v46  ;;  %v15008_v46 = vld [vmem:[#allocation6 + $0x38] ss:$24 sps:$4 sm:$0xff]  }
 0x101   : > { %3101 = vmatmul.mubr.bf16.vlgmr.msra.gmra.mxu1 %v17254_v36  ;;  %3126 = vmatpush2.bf16.msra.mxu0 %v14921_v47  ;;  %v15013_v47 = vld [vmem:[#allocation6 + $0x784] ss:$24 sps:$4 sm:$0xff]  }
 0x102   : > { %3151 = vmatpush1.bf16.msra.mxu1 %v14924_v48  ;;  %3127 = vmatprep.subr.bf16.mxu0 %v14929_v49  ;;  %v15016_v48 = vld [vmem:[#allocation6 + $0xc] ss:$24 sps:$4 sm:$0xff]   ;;  %v15011_v49 = vld [vmem:[#allocation6 + $0x780] ss:$24 sps:$4 sm:$0xff]  }
 0x103   : > { %3152 = vmatprep.subr.bf16.mxu1 %v14932_v50  ;;  %3182 = vmatprep.mubr.bf16.mxu1 %v17264_v5  ;;  %v15014_v50 = vld [vmem:[#allocation6 + $0x8] ss:$24 sps:$4 sm:$0xff]  }
 0x105   : > { %3128 = vmatpush2.bf16.msra.mxu0 %v14927_v51  ;;  %v15019_v51 = vld [vmem:[#allocation6 + $0x2dc] ss:$24 sps:$4 sm:$0xff]  }
 0x106   : > { %3153 = vmatpush1.bf16.msra.mxu1 %v14930_v52  ;;  %3129 = vmatprep.subr.bf16.mxu0 %v14935_v53  ;;  %v15022_v52 = vld [vmem:[#allocation6 + $0x45c] ss:$24 sps:$4 sm:$0xff]   ;;  %v15017_v53 = vld [vmem:[#allocation6 + $0x2d8] ss:$24 sps:$4 sm:$0xff]  }
 0x107   : > { %3154 = vmatprep.subr.bf16.mxu1 %v14938_v54  ;;  %v15020_v54 = vld [vmem:[#allocation6 + $0x458] ss:$24 sps:$4 sm:$0xff]  }
 0x109   : > { %3130 = vmatpush2.bf16.msra.mxu0 %v14933_v55  ;;  %v15025_v55 = vld [vmem:[#allocation6 + $0x2ac] ss:$24 sps:$4 sm:$0xff]  }
 0x10a   : > { %3155 = vmatpush1.bf16.msra.mxu1 %v14936_v56  ;;  %3131 = vmatprep.subr.bf16.mxu0 %v14941_v57  ;;  %v15028_v56 = vld [vmem:[#allocation6 + $0x42c] ss:$24 sps:$4 sm:$0xff]   ;;  %v15023_v57 = vld [vmem:[#allocation6 + $0x2a8] ss:$24 sps:$4 sm:$0xff]  }
 0x10b   : > { %3156 = vmatprep.subr.bf16.mxu1 %v14944_v58  ;;  %v15026_v58 = vld [vmem:[#allocation6 + $0x428] ss:$24 sps:$4 sm:$0xff]  }
 0x10d   : > { %3132 = vmatpush2.bf16.msra.mxu0 %v14939_v59  ;;  %v15031_v59 = vld [vmem:[#allocation6 + $0x27c] ss:$24 sps:$4 sm:$0xff]  }
 0x10e   : > { %3157 = vmatpush1.bf16.msra.mxu1 %v14942_v60  ;;  %3133 = vmatprep.subr.bf16.mxu0 %v14947_v61  ;;  %v15034_v60 = vld [vmem:[#allocation6 + $0x3fc] ss:$24 sps:$4 sm:$0xff]   ;;  %v15029_v61 = vld [vmem:[#allocation6 + $0x278] ss:$24 sps:$4 sm:$0xff]  }
 0x10f   : > { %3158 = vmatprep.subr.bf16.mxu1 %v14950_v62  ;;  %v15032_v62 = vld [vmem:[#allocation6 + $0x3f8] ss:$24 sps:$4 sm:$0xff]  }
 0x111   : > { %3134 = vmatpush2.bf16.msra.mxu0 %v14945_v63  ;;  %v15037_v63 = vld [vmem:[#allocation6 + $0x24c] ss:$24 sps:$4 sm:$0xff]  }
 0x112   : > { %3159 = vmatpush1.bf16.msra.mxu1 %v14948_v0  ;;  %3135 = vmatprep.subr.bf16.mxu0 %v14953_v1  ;;  %v15040_v0 = vld [vmem:[#allocation6 + $0x3cc] ss:$24 sps:$4 sm:$0xff]   ;;  %v15035_v1 = vld [vmem:[#allocation6 + $0x248] ss:$24 sps:$4 sm:$0xff]  }
 0x113   : > { %3160 = vmatprep.subr.bf16.mxu1 %v14956_v2  ;;  %v15038_v2 = vld [vmem:[#allocation6 + $0x3c8] ss:$24 sps:$4 sm:$0xff]  }
 0x115   : > { %3136 = vmatpush2.bf16.msra.mxu0 %v14951_v3  ;;  %v15043_v3 = vld [vmem:[#allocation6 + $0x21c] ss:$24 sps:$4 sm:$0xff]  }
 0x116   : > { %3161 = vmatpush1.bf16.msra.mxu1 %v14954_v4  ;;  %3137 = vmatprep.subr.bf16.mxu0 %v14959_v6  ;;  %v15046_v4 = vld [vmem:[#allocation6 + $0x39c] ss:$24 sps:$4 sm:$0xff]   ;;  %v15041_v6 = vld [vmem:[#allocation6 + $0x218] ss:$24 sps:$4 sm:$0xff]  }
 0x117   : > { %3162 = vmatprep.subr.bf16.mxu1 %v14962_v7  ;;  %v15044_v7 = vld [vmem:[#allocation6 + $0x398] ss:$24 sps:$4 sm:$0xff]  }
 0x119   : > { %3138 = vmatpush2.bf16.msra.mxu0 %v14957_v8  ;;  %v15049_v8 = vld [vmem:[#allocation6 + $0x1ec] ss:$24 sps:$4 sm:$0xff]  }
 0x11a   : > { %3163 = vmatpush1.bf16.msra.mxu1 %v14960_v9  ;;  %3139 = vmatprep.subr.bf16.mxu0 %v14965_v11  ;;  %v15052_v9 = vld [vmem:[#allocation6 + $0x36c] ss:$24 sps:$4 sm:$0xff]   ;;  %v15047_v11 = vld [vmem:[#allocation6 + $0x1e8] ss:$24 sps:$4 sm:$0xff]  }
 0x11b   : > { %3164 = vmatprep.subr.bf16.mxu1 %v14968_v12  ;;  %v15050_v12 = vld [vmem:[#allocation6 + $0x368] ss:$24 sps:$4 sm:$0xff]  }
 0x11d   : > { %3140 = vmatpush2.bf16.msra.mxu0 %v14963_v13  ;;  %v15055_v13 = vld [vmem:[#allocation6 + $0x1bc] ss:$24 sps:$4 sm:$0xff]  }
 0x11e   : > { %3165 = vmatpush1.bf16.msra.mxu1 %v14966_v14  ;;  %3191 = vmatprep.subr.bf16.mxu0 %v14974_v16  ;;  %v15058_v14 = vld [vmem:[#allocation6 + $0x33c] ss:$24 sps:$4 sm:$0xff]   ;;  %v15056_v16 = vld [vmem:[#allocation6 + $0x338] ss:$24 sps:$4 sm:$0xff]  }
 0x11f   : > { %3166 = vmatprep.subr.bf16.mxu1 %v14971_v15  ;;  %v15053_v15 = vld [vmem:[#allocation6 + $0x1b8] ss:$24 sps:$4 sm:$0xff]  }
 0x120   : > { %3142 = vmatmul.mubr.bf16.vlgmr.msra.gmra.mxu0 %v17256_v37 }
 0x121   : > { %3192 = vmatpush1.bf16.msra.mxu0 %v14972_v18  ;;  %3223 = vmatprep.mubr.bf16.mxu0 %v17250_v34  ;;  %v15064_v18 = vld [vmem:[#allocation6 + $0x30c] ss:$24 sps:$4 sm:$0xff]  }
 0x122   : > { %3167 = vmatpush2.bf16.msra.mxu1 %v14969_v17  ;;  %3193 = vmatprep.subr.bf16.mxu0 %v14980_v20  ;;  %v15061_v17 = vld [vmem:[#allocation6 + $0x18c] ss:$24 sps:$4 sm:$0xff]   ;;  %v15062_v20 = vld [vmem:[#allocation6 + $0x308] ss:$24 sps:$4 sm:$0xff]  }
 0x123   : > { %3168 = vmatprep.subr.bf16.mxu1 %v14977_v19  ;;  %v15059_v19 = vld [vmem:[#allocation6 + $0x188] ss:$24 sps:$4 sm:$0xff]  }
 0x125   : > { %3194 = vmatpush1.bf16.msra.mxu0 %v14978_v22  ;;  %v15070_v22 = vld [vmem:[#allocation6 + $0x75c] ss:$24 sps:$4 sm:$0xff]  }
 0x126   : > { %3169 = vmatpush2.bf16.msra.mxu1 %v14975_v21  ;;  %3195 = vmatprep.subr.bf16.mxu0 %v14986_v24  ;;  %v15067_v21 = vld [vmem:[#allocation6 + $0x5dc] ss:$24 sps:$4 sm:$0xff]   ;;  %v15068_v24 = vld [vmem:[#allocation6 + $0x758] ss:$24 sps:$4 sm:$0xff]  }
 0x127   : > { %3170 = vmatprep.subr.bf16.mxu1 %v14983_v23  ;;  %v15065_v23 = vld [vmem:[#allocation6 + $0x5d8] ss:$24 sps:$4 sm:$0xff]  }
 0x129   : > { %3196 = vmatpush1.bf16.msra.mxu0 %v14984_v26  ;;  %v15076_v26 = vld [vmem:[#allocation6 + $0x72c] ss:$24 sps:$4 sm:$0xff]  }
 0x12a   : > { %3171 = vmatpush2.bf16.msra.mxu1 %v14981_v25  ;;  %3197 = vmatprep.subr.bf16.mxu0 %v14992_v28  ;;  %v15073_v25 = vld [vmem:[#allocation6 + $0x5ac] ss:$24 sps:$4 sm:$0xff]   ;;  %v15074_v28 = vld [vmem:[#allocation6 + $0x728] ss:$24 sps:$4 sm:$0xff]  }
 0x12b   : > { %3172 = vmatprep.subr.bf16.mxu1 %v14989_v27  ;;  %v15071_v27 = vld [vmem:[#allocation6 + $0x5a8] ss:$24 sps:$4 sm:$0xff]  }
 0x12d   : > { %3198 = vmatpush1.bf16.msra.mxu0 %v14990_v30  ;;  %v15082_v30 = vld [vmem:[#allocation6 + $0x6fc] ss:$24 sps:$4 sm:$0xff]  }
 0x12e   : > { %3173 = vmatpush2.bf16.msra.mxu1 %v14987_v29  ;;  %3199 = vmatprep.subr.bf16.mxu0 %v14998_v32  ;;  %v15079_v29 = vld [vmem:[#allocation6 + $0x57c] ss:$24 sps:$4 sm:$0xff]   ;;  %v15080_v32 = vld [vmem:[#allocation6 + $0x6f8] ss:$24 sps:$4 sm:$0xff]  }
 0x12f   : > { %3174 = vmatprep.subr.bf16.mxu1 %v14995_v31  ;;  %v15077_v31 = vld [vmem:[#allocation6 + $0x578] ss:$24 sps:$4 sm:$0xff]  }
 0x131   : > { %3200 = vmatpush1.bf16.msra.mxu0 %v14996_v38  ;;  %v15088_v38 = vld [vmem:[#allocation6 + $0x6cc] ss:$24 sps:$4 sm:$0xff]  }
 0x132   : > { %3175 = vmatpush2.bf16.msra.mxu1 %v14993_v33  ;;  %3201 = vmatprep.subr.bf16.mxu0 %v15004_v40  ;;  %v15085_v33 = vld [vmem:[#allocation6 + $0x54c] ss:$24 sps:$4 sm:$0xff]   ;;  %v15086_v40 = vld [vmem:[#allocation6 + $0x6c8] ss:$24 sps:$4 sm:$0xff]  }
 0x133   : > { %3176 = vmatprep.subr.bf16.mxu1 %v15001_v39  ;;  %v15083_v39 = vld [vmem:[#allocation6 + $0x548] ss:$24 sps:$4 sm:$0xff]  }
 0x135   : > { %3202 = vmatpush1.bf16.msra.mxu0 %v15002_v42  ;;  %v15094_v42 = vld [vmem:[#allocation6 + $0x69c] ss:$24 sps:$4 sm:$0xff]  }
 0x136   : > { %3177 = vmatpush2.bf16.msra.mxu1 %v14999_v41  ;;  %3203 = vmatprep.subr.bf16.mxu0 %v15010_v44  ;;  %v15091_v41 = vld [vmem:[#allocation6 + $0x51c] ss:$24 sps:$4 sm:$0xff]   ;;  %v15092_v44 = vld [vmem:[#allocation6 + $0x698] ss:$24 sps:$4 sm:$0xff]  }
 0x137   : > { %3178 = vmatprep.subr.bf16.mxu1 %v15007_v43  ;;  %v15089_v43 = vld [vmem:[#allocation6 + $0x518] ss:$24 sps:$4 sm:$0xff]  }
 0x139   : > { %3204 = vmatpush1.bf16.msra.mxu0 %v15008_v46  ;;  %v15100_v46 = vld [vmem:[#allocation6 + $0x66c] ss:$24 sps:$4 sm:$0xff]  }
 0x13a   : > { %3179 = vmatpush2.bf16.msra.mxu1 %v15005_v45  ;;  %3205 = vmatprep.subr.bf16.mxu0 %v15016_v48  ;;  %v15097_v45 = vld [vmem:[#allocation6 + $0x4ec] ss:$24 sps:$4 sm:$0xff]   ;;  %v15098_v48 = vld [vmem:[#allocation6 + $0x668] ss:$24 sps:$4 sm:$0xff]  }
 0x13b   : > { %3180 = vmatprep.subr.bf16.mxu1 %v15013_v47  ;;  %v15095_v47 = vld [vmem:[#allocation6 + $0x4e8] ss:$24 sps:$4 sm:$0xff]  }
 0x13d   : > { %3206 = vmatpush1.bf16.msra.mxu0 %v15014_v50  ;;  %v15106_v50 = vld [vmem:[#allocation6 + $0x63c] ss:$24 sps:$4 sm:$0xff]  }
 0x13e   : > { %3181 = vmatpush2.bf16.msra.mxu1 %v15011_v49  ;;  %3207 = vmatprep.subr.bf16.mxu0 %v15019_v51  ;;  %v15103_v49 = vld [vmem:[#allocation6 + $0x4bc] ss:$24 sps:$4 sm:$0xff]   ;;  %v15101_v51 = vld [vmem:[#allocation6 + $0x4b8] ss:$24 sps:$4 sm:$0xff]  }
 0x13f   : > { %3232 = vmatprep.subr.bf16.mxu1 %v15022_v52  ;;  %v15104_v52 = vld [vmem:[#allocation6 + $0x638] ss:$24 sps:$4 sm:$0xff]  }
 0x141   : > { %3183 = vmatmul.mubr.bf16.vlgmr.msra.gmra.mxu1 %v17267_v10  ;;  %3208 = vmatpush2.bf16.msra.mxu0 %v15017_v53  ;;  %v15109_v53 = vld [vmem:[#allocation6 + $0x48c] ss:$24 sps:$4 sm:$0xff]  }
 0x142   : > { %3233 = vmatpush1.bf16.msra.mxu1 %v15020_v54  ;;  %3209 = vmatprep.subr.bf16.mxu0 %v15025_v55  ;;  %v15112_v54 = vld [vmem:[#allocation6 + $0x60c] ss:$24 sps:$4 sm:$0xff]   ;;  %v15107_v55 = vld [vmem:[#allocation6 + $0x488] ss:$24 sps:$4 sm:$0xff]  }
 0x143   : > { %3234 = vmatprep.subr.bf16.mxu1 %v15028_v56  ;;  %3264 = vmatprep.mubr.bf16.mxu1 %v17252_v35  ;;  %v15110_v56 = vld [vmem:[#allocation6 + $0x608] ss:$24 sps:$4 sm:$0xff]  }
 0x145   : > { %3210 = vmatpush2.bf16.msra.mxu0 %v15023_v57  ;;  %v15115_v57 = vld [vmem:[#allocation6 + $0x8dc] ss:$24 sps:$4 sm:$0xff]  }
 0x146   : > { %3235 = vmatpush1.bf16.msra.mxu1 %v15026_v58  ;;  %3211 = vmatprep.subr.bf16.mxu0 %v15031_v59  ;;  %v15118_v58 = vld [vmem:[#allocation6 + $0x164] ss:$24 sps:$4 sm:$0xff]   ;;  %v15113_v59 = vld [vmem:[#allocation6 + $0x8d8] ss:$24 sps:$4 sm:$0xff]  }
 0x147   : > { %3236 = vmatprep.subr.bf16.mxu1 %v15034_v60  ;;  %v15116_v60 = vld [vmem:[#allocation6 + $0x160] ss:$24 sps:$4 sm:$0xff]  }
 0x149   : > { %3212 = vmatpush2.bf16.msra.mxu0 %v15029_v61  ;;  %v15121_v61 = vld [vmem:[#allocation6 + $0x8ac] ss:$24 sps:$4 sm:$0xff]  }
 0x14a   : > { %3237 = vmatpush1.bf16.msra.mxu1 %v15032_v62  ;;  %3213 = vmatprep.subr.bf16.mxu0 %v15037_v63  ;;  %v15124_v62 = vld [vmem:[#allocation6 + $0x134] ss:$24 sps:$4 sm:$0xff]  }
 0x14b   : > { %3238 = vmatprep.subr.bf16.mxu1 %v15040_v0 }
 0x14d   : > { %3214 = vmatpush2.bf16.msra.mxu0 %v15035_v1  ;;  %v15119_v1 = vld [vmem:[#allocation6 + $0x8a8] ss:$24 sps:$4 sm:$0xff]  }
 0x14e   : > { %3239 = vmatpush1.bf16.msra.mxu1 %v15038_v2  ;;  %3215 = vmatprep.subr.bf16.mxu0 %v15043_v3 }
 0x14f   : > { %3240 = vmatprep.subr.bf16.mxu1 %v15046_v4  ;;  %v15122_v4 = vld [vmem:[#allocation6 + $0x130] ss:$24 sps:$4 sm:$0xff]  }
 0x151   : > { %3216 = vmatpush2.bf16.msra.mxu0 %v15041_v6  ;;  %v15127_v6 = vld [vmem:[#allocation6 + $0x87c] ss:$24 sps:$4 sm:$0xff]  }
 0x152   : > { %3241 = vmatpush1.bf16.msra.mxu1 %v15044_v7  ;;  %3217 = vmatprep.subr.bf16.mxu0 %v15049_v8  ;;  %v15130_v7 = vld [vmem:[#allocation6 + $0x104] ss:$24 sps:$4 sm:$0xff]  }
 0x153   : > { %3242 = vmatprep.subr.bf16.mxu1 %v15052_v9 }
 0x155   : > { %3218 = vmatpush2.bf16.msra.mxu0 %v15047_v11  ;;  %v15125_v11 = vld [vmem:[#allocation6 + $0x878] ss:$24 sps:$4 sm:$0xff]  }
 0x156   : > { %3243 = vmatpush1.bf16.msra.mxu1 %v15050_v12  ;;  %3219 = vmatprep.subr.bf16.mxu0 %v15055_v13  ;;  %v15128_v13 = vld [vmem:[#allocation6 + $0x100] ss:$24 sps:$4 sm:$0xff]  }
 0x157   : > { %3244 = vmatprep.subr.bf16.mxu1 %v15058_v14  ;;  %v15133_v14 = vld [vmem:[#allocation6 + $0x84c] ss:$24 sps:$4 sm:$0xff]  }
 0x159   : > { %3220 = vmatpush2.bf16.msra.mxu0 %v15053_v15 }
 0x15a   : > { %3245 = vmatpush1.bf16.msra.mxu1 %v15056_v16  ;;  %3221 = vmatprep.subr.bf16.mxu0 %v15061_v17  ;;  %v15136_v16 = vld [vmem:[#allocation6 + $0xd4] ss:$24 sps:$4 sm:$0xff]   ;;  %v15131_v17 = vld [vmem:[#allocation6 + $0x848] ss:$24 sps:$4 sm:$0xff]  }
 0x15b   : > { %3246 = vmatprep.subr.bf16.mxu1 %v15064_v18  ;;  %v15134_v18 = vld [vmem:[#allocation6 + $0xd0] ss:$24 sps:$4 sm:$0xff]  }
 0x15d   : > { %3222 = vmatpush2.bf16.msra.mxu0 %v15059_v19  ;;  %v15139_v19 = vld [vmem:[#allocation6 + $0x81c] ss:$24 sps:$4 sm:$0xff]  }
 0x15e   : > { %3247 = vmatpush1.bf16.msra.mxu1 %v15062_v20  ;;  %3273 = vmatprep.subr.bf16.mxu0 %v15070_v22  ;;  %v15142_v20 = vld [vmem:[#allocation6 + $0xa4] ss:$24 sps:$4 sm:$0xff]  }
 0x15f   : > { %3248 = vmatprep.subr.bf16.mxu1 %v15067_v21  ;;  %v15137_v21 = vld [vmem:[#allocation6 + $0x818] ss:$24 sps:$4 sm:$0xff]   ;;  %v15145_v22 = vld [vmem:[#allocation6 + $0x7ec] ss:$24 sps:$4 sm:$0xff]  }
 0x160   : > { %3224 = vmatmul.mubr.bf16.vlgmr.msra.gmra.mxu0 %v17254_v36 }
 0x161   : > { %3274 = vmatpush1.bf16.msra.mxu0 %v15068_v24  ;;  %3305 = vmatprep.mubr.bf16.mxu0 %v17264_v5  ;;  %v15143_v24 = vld [vmem:[#allocation6 + $0x7e8] ss:$24 sps:$4 sm:$0xff]  }
 0x162   : > { %3249 = vmatpush2.bf16.msra.mxu1 %v15065_v23  ;;  %3275 = vmatprep.subr.bf16.mxu0 %v15076_v26  ;;  %v15148_v23 = vld [vmem:[#allocation6 + $0x74] ss:$24 sps:$4 sm:$0xff]  }
 0x163   : > { %3250 = vmatprep.subr.bf16.mxu1 %v15073_v25  ;;  %v15146_v25 = vld [vmem:[#allocation6 + $0x70] ss:$24 sps:$4 sm:$0xff]   ;;  %v15151_v26 = vld [vmem:[#allocation6 + $0x7bc] ss:$24 sps:$4 sm:$0xff]  }
 0x165   : > { %3276 = vmatpush1.bf16.msra.mxu0 %v15074_v28  ;;  %v15149_v28 = vld [vmem:[#allocation6 + $0x7b8] ss:$24 sps:$4 sm:$0xff]  }
 0x166   : > { %3251 = vmatpush2.bf16.msra.mxu1 %v15071_v27  ;;  %3277 = vmatprep.subr.bf16.mxu0 %v15082_v30  ;;  %v15154_v27 = vld [vmem:[#allocation6 + $0x44] ss:$24 sps:$4 sm:$0xff]  }
 0x167   : > { %3252 = vmatprep.subr.bf16.mxu1 %v15079_v29  ;;  %v15152_v29 = vld [vmem:[#allocation6 + $0x40] ss:$24 sps:$4 sm:$0xff]   ;;  %v15157_v30 = vld [vmem:[#allocation6 + $0x78c] ss:$24 sps:$4 sm:$0xff]  }
 0x169   : > { %3278 = vmatpush1.bf16.msra.mxu0 %v15080_v32  ;;  %v15155_v32 = vld [vmem:[#allocation6 + $0x788] ss:$24 sps:$4 sm:$0xff]  }
 0x16a   : > { %3253 = vmatpush2.bf16.msra.mxu1 %v15077_v31  ;;  %3279 = vmatprep.subr.bf16.mxu0 %v15088_v38  ;;  %v15160_v31 = vld [vmem:[#allocation6 + $0x14] ss:$24 sps:$4 sm:$0xff]   ;;  %v15163_v38 = vld [vmem:[#allocation6 + $0x2e4] ss:$24 sps:$4 sm:$0xff]  }
 0x16b   : > { %3254 = vmatprep.subr.bf16.mxu1 %v15085_v33  ;;  %v15158_v33 = vld [vmem:[#allocation6 + $0x10] ss:$24 sps:$4 sm:$0xff]  }
 0x16d   : > { %3280 = vmatpush1.bf16.msra.mxu0 %v15086_v40 }
 0x16e   : > { %3255 = vmatpush2.bf16.msra.mxu1 %v15083_v39  ;;  %3281 = vmatprep.subr.bf16.mxu0 %v15094_v42  ;;  %v15166_v39 = vld [vmem:[#allocation6 + $0x464] ss:$24 sps:$4 sm:$0xff]   ;;  %v15161_v42 = vld [vmem:[#allocation6 + $0x2e0] ss:$24 sps:$4 sm:$0xff]  }
 0x16f   : > { %3256 = vmatprep.subr.bf16.mxu1 %v15091_v41  ;;  %v13216_v41 = vld [vmem:[#allocation4] ss:$0 sm:$0xff] }
 0x171   : > { %3282 = vmatpush1.bf16.msra.mxu0 %v15092_v44  ;;  %v15169_v44 = vld [vmem:[#allocation6 + $0x2b4] ss:$24 sps:$4 sm:$0xff]  }
 0x172   : > { %3257 = vmatpush2.bf16.msra.mxu1 %v15089_v43  ;;  %3283 = vmatprep.subr.bf16.mxu0 %v15100_v46  ;;  %v15164_v43 = vld [vmem:[#allocation6 + $0x460] ss:$24 sps:$4 sm:$0xff]  }
 0x173   : > { %3258 = vmatprep.subr.bf16.mxu1 %v15097_v45  ;;  %v15172_v45 = vld [vmem:[#allocation6 + $0x434] ss:$24 sps:$4 sm:$0xff]  }
 0x175   : > { %3284 = vmatpush1.bf16.msra.mxu0 %v15098_v48  ;;  %v15167_v48 = vld [vmem:[#allocation6 + $0x2b0] ss:$24 sps:$4 sm:$0xff]  }
 0x176   : > { %3259 = vmatpush2.bf16.msra.mxu1 %v15095_v47  ;;  %3285 = vmatprep.subr.bf16.mxu0 %v15106_v50  ;;  %v15170_v50 = vld [vmem:[#allocation6 + $0x430] ss:$24 sps:$4 sm:$0xff]  }
 0x177   : > { %3260 = vmatprep.subr.bf16.mxu1 %v15103_v49 }
 0x179   : > { %3286 = vmatpush1.bf16.msra.mxu0 %v15104_v52 }
 0x17a   : > { %3261 = vmatpush2.bf16.msra.mxu1 %v15101_v51  ;;  %3287 = vmatprep.subr.bf16.mxu0 %v15112_v54  ;;  %v15175_v51 = vld [vmem:[#allocation6 + $0x284] ss:$24 sps:$4 sm:$0xff]  }
 0x17b   : > { %3262 = vmatprep.subr.bf16.mxu1 %v15109_v53  ;;  %v15178_v53 = vld [vmem:[#allocation6 + $0x404] ss:$24 sps:$4 sm:$0xff]  }
 0x17d   : > { %3288 = vmatpush1.bf16.msra.mxu0 %v15110_v56  ;;  %v15173_v56 = vld [vmem:[#allocation6 + $0x280] ss:$24 sps:$4 sm:$0xff]  }
 0x17e   : > { %3263 = vmatpush2.bf16.msra.mxu1 %v15107_v55  ;;  %3289 = vmatprep.subr.bf16.mxu0 %v15115_v57 }
 0x17f   : > { %3314 = vmatprep.subr.bf16.mxu1 %v15118_v58 }
 0x180   : > { %v17279_v63 = vpop.f32.mrf.mxu0 }
 0x181   : > { %v17281_v0 = vpop.f32.mrf.mxu1  ;;  %3265 = vmatmul.mubr.bf16.vlgmr.msra.gmra.mxu1 %v17256_v37  ;;  %3290 = vmatpush2.bf16.msra.mxu0 %v15113_v59  ;;  %v15176_v59 = vld [vmem:[#allocation6 + $0x400] ss:$24 sps:$4 sm:$0xff]  }
 0x182   : > { %3315 = vmatpush1.bf16.msra.mxu1 %v15116_v60  ;;  %v14558_v2 = vpop.f32.mrf.mxu0  ;;  %3291 = vmatprep.subr.bf16.mxu0 %v15121_v61  ;;  %v15181_v60 = vld [vmem:[#allocation6 + $0x254] ss:$24 sps:$4 sm:$0xff]  }
 0x183   : > { %v17284_v3 = vpop.f32.mrf.mxu1  ;;  %3316 = vmatprep.subr.bf16.mxu1 %v15124_v62  ;;  %3346 = vmatprep.mubr.bf16.mxu1 %v17250_v34  ;;  %v15140_v34 = vld [vmem:[#allocation6 + $0xa0] ss:$24 sps:$4 sm:$0xff]   ;;  %v14559_v40 = vadd.f32 %v14558_v2, %v17279_v63  ;;  %v15184_v61 = vld [vmem:[#allocation6 + $0x3d4] ss:$24 sps:$4 sm:$0xff]   ;;  %v15182_v63 = vld [vmem:[#allocation6 + $0x3d0] ss:$24 sps:$4 sm:$0xff]  }
 0x184   : > { %v14560_v9 = vpop.f32.mrf.mxu0  ;;  %v14581_v49 = vadd.f32 %v17284_v3, %v17281_v0  ;;  %v15187_v0 = vld [vmem:[#allocation6 + $0x224] ss:$24 sps:$4 sm:$0xff]   ;;  %v15185_v2 = vld [vmem:[#allocation6 + $0x220] ss:$24 sps:$4 sm:$0xff]  }
 0x185   : > { %v14582_v8 = vpop.f32.mrf.mxu1  ;;  %3292 = vmatpush2.bf16.msra.mxu0 %v15119_v1  ;;  %v1177_v46 = vadd.f32 %v14559_v40, %v13216_v41  ;;  %v15190_v1 = vld [vmem:[#allocation6 + $0x3a4] ss:$24 sps:$4 sm:$0xff]   ;;  %v15188_v3 = vld [vmem:[#allocation6 + $0x3a0] ss:$24 sps:$4 sm:$0xff]  }
 0x186   : > { %3317 = vmatpush1.bf16.msra.mxu1 %v15122_v4  ;;  %v14561_v15 = vpop.f32.mrf.mxu0  ;;  %3293 = vmatprep.subr.bf16.mxu0 %v15127_v6  ;;  %v15193_v4 = vld [vmem:[#allocation6 + $0x1f4] ss:$24 sps:$4 sm:$0xff]   ;;  %v15194_v8 = vld [vmem:[#allocation6 + $0x370] ss:$24 sps:$4 sm:$0xff]   ;;  %v15199_v9 = vld [vmem:[#allocation6 + $0x1c4] ss:$24 sps:$4 sm:$0xff]  }
 0x187   : > { %v14583_v12 = vpop.f32.mrf.mxu1  ;;  %3318 = vmatprep.subr.bf16.mxu1 %v15130_v7  ;;  %v1217_v54 = vadd.f32 %v14581_v49, %v1177_v46  ;;  %v15196_v6 = vld [vmem:[#allocation6 + $0x374] ss:$24 sps:$4 sm:$0xff]   ;;  %v15191_v7 = vld [vmem:[#allocation6 + $0x1f0] ss:$24 sps:$4 sm:$0xff]   ;;  %v15235_v40 = vld [vmem:[#allocation6 + $0x524] ss:$24 sps:$4 sm:$0xff]   ;;  %v18088_v46 = vlaneseq }
 0x188   : > { %v15197_v12 = vld [vmem:[#allocation6 + $0x1c0] ss:$24 sps:$4 sm:$0xff]   ;;  %v15208_v15 = vld [vmem:[#allocation6 + $0x314] ss:$24 sps:$4 sm:$0xff]   ;;  %v15238_v41 = vld [vmem:[#allocation6 + $0x6a4] ss:$24 sps:$4 sm:$0xff]  }
 0x189   : > { %3294 = vmatpush2.bf16.msra.mxu0 %v15125_v11  ;;  %v15202_v11 = vld [vmem:[#allocation6 + $0x344] ss:$24 sps:$4 sm:$0xff]  }
 0x18a   : > { %3319 = vmatpush1.bf16.msra.mxu1 %v15128_v13  ;;  %3295 = vmatprep.subr.bf16.mxu0 %v15133_v14  ;;  %v15200_v13 = vld [vmem:[#allocation6 + $0x340] ss:$24 sps:$4 sm:$0xff]   ;;  %v15205_v14 = vld [vmem:[#allocation6 + $0x194] ss:$24 sps:$4 sm:$0xff]   ;;  %v15250_v49 = vld [vmem:[#allocation6 + $0x644] ss:$24 sps:$4 sm:$0xff]  }
 0x18b   : > { %3320 = vmatprep.subr.bf16.mxu1 %v15136_v16  ;;  %v15203_v16 = vld [vmem:[#allocation6 + $0x190] ss:$24 sps:$4 sm:$0xff]  }
 0x18d   : > { %3296 = vmatpush2.bf16.msra.mxu0 %v15131_v17  ;;  %v15206_v17 = vld [vmem:[#allocation6 + $0x310] ss:$24 sps:$4 sm:$0xff]  }
 0x18e   : > { %3321 = vmatpush1.bf16.msra.mxu1 %v15134_v18  ;;  %3297 = vmatprep.subr.bf16.mxu0 %v15139_v19  ;;  %v15211_v18 = vld [vmem:[#allocation6 + $0x5e4] ss:$24 sps:$4 sm:$0xff]  }
 0x18f   : > { %3322 = vmatprep.subr.bf16.mxu1 %v15142_v20  ;;  %v15214_v19 = vld [vmem:[#allocation6 + $0x764] ss:$24 sps:$4 sm:$0xff]   ;;  %v15209_v20 = vld [vmem:[#allocation6 + $0x5e0] ss:$24 sps:$4 sm:$0xff]  }
 0x191   : > { %3298 = vmatpush2.bf16.msra.mxu0 %v15137_v21  ;;  %v15212_v21 = vld [vmem:[#allocation6 + $0x760] ss:$24 sps:$4 sm:$0xff]  }
 0x192   : > { %3323 = vmatpush1.bf16.msra.mxu1 %v15140_v34  ;;  %3299 = vmatprep.subr.bf16.mxu0 %v15145_v22  ;;  %v15217_v34 = vld [vmem:[#allocation6 + $0x5b4] ss:$24 sps:$4 sm:$0xff]  }
 0x193   : > { %3324 = vmatprep.subr.bf16.mxu1 %v15148_v23  ;;  %v15220_v22 = vld [vmem:[#allocation6 + $0x734] ss:$24 sps:$4 sm:$0xff]  }
 0x195   : > { %3300 = vmatpush2.bf16.msra.mxu0 %v15143_v24  ;;  %v15215_v24 = vld [vmem:[#allocation6 + $0x5b0] ss:$24 sps:$4 sm:$0xff]  }
 0x196   : > { %3325 = vmatpush1.bf16.msra.mxu1 %v15146_v25  ;;  %3301 = vmatprep.subr.bf16.mxu0 %v15151_v26  ;;  %v15218_v25 = vld [vmem:[#allocation6 + $0x730] ss:$24 sps:$4 sm:$0xff]   ;;  %v15223_v26 = vld [vmem:[#allocation6 + $0x584] ss:$24 sps:$4 sm:$0xff]  }
 0x197   : > { %3326 = vmatprep.subr.bf16.mxu1 %v15154_v27 }
 0x199   : > { %3302 = vmatpush2.bf16.msra.mxu0 %v15149_v28  ;;  %v15226_v28 = vld [vmem:[#allocation6 + $0x704] ss:$24 sps:$4 sm:$0xff]  }
 0x19a   : > { %3327 = vmatpush1.bf16.msra.mxu1 %v15152_v29  ;;  %3303 = vmatprep.subr.bf16.mxu0 %v15157_v30  ;;  %v15221_v30 = vld [vmem:[#allocation6 + $0x580] ss:$24 sps:$4 sm:$0xff]  }
 0x19b   : > { %3328 = vmatprep.subr.bf16.mxu1 %v15160_v31  ;;  %v15224_v31 = vld [vmem:[#allocation6 + $0x700] ss:$24 sps:$4 sm:$0xff]  }
 0x19d   : > { %3304 = vmatpush2.bf16.msra.mxu0 %v15155_v32  ;;  %v15229_v32 = vld [vmem:[#allocation6 + $0x554] ss:$24 sps:$4 sm:$0xff]  }
 0x19e   : > { %3329 = vmatpush1.bf16.msra.mxu1 %v15158_v33  ;;  %3355 = vmatprep.subr.bf16.mxu0 %v15166_v39  ;;  %v15230_v39 = vld [vmem:[#allocation6 + $0x6d0] ss:$24 sps:$4 sm:$0xff]  }
 0x19f   : > { %3330 = vmatprep.subr.bf16.mxu1 %v15163_v38  ;;  %v15227_v38 = vld [vmem:[#allocation6 + $0x550] ss:$24 sps:$4 sm:$0xff]  }
 0x1a0   : > { %v14601_v47 = vpop.f32.mrf.mxu0  ;;  %3306 = vmatmul.mubr.bf16.vlgmr.msra.gmra.mxu0 %v17267_v10 }
 0x1a1   : > { %3356 = vmatpush1.bf16.msra.mxu0 %v15164_v43  ;;  %3387 = vmatprep.mubr.bf16.mxu0 %v17252_v35  ;;  %v15179_v35 = vld [vmem:[#allocation6 + $0x250] ss:$24 sps:$4 sm:$0xff]   ;;  %v15241_v43 = vld [vmem:[#allocation6 + $0x4f4] ss:$24 sps:$4 sm:$0xff]  }
 0x1a2   : > { %3331 = vmatpush2.bf16.msra.mxu1 %v15161_v42  ;;  %v14602_v52 = vpop.f32.mrf.mxu0  ;;  %3357 = vmatprep.subr.bf16.mxu0 %v15172_v45  ;;  %v15233_v42 = vld [vmem:[#allocation6 + $0x520] ss:$24 sps:$4 sm:$0xff]   ;;  %v15239_v45 = vld [vmem:[#allocation6 + $0x4f0] ss:$24 sps:$4 sm:$0xff]  }
 0x1a3   : > { %3332 = vmatprep.subr.bf16.mxu1 %v15169_v44  ;;  %v14603_v55 = vadd.f32 %v14602_v52, %v14601_v47  ;;  %v15244_v44 = vld [vmem:[#allocation6 + $0x674] ss:$24 sps:$4 sm:$0xff]   ;;  %v15242_v47 = vld [vmem:[#allocation6 + $0x670] ss:$24 sps:$4 sm:$0xff]   ;;  %v15248_v52 = vld [vmem:[#allocation6 + $0x640] ss:$24 sps:$4 sm:$0xff]  }
 0x1a4   : > { %v14604_v57 = vpop.f32.mrf.mxu0 }
 0x1a5   : > { %v1257_v58 = vadd.f32 %v14603_v55, %v1217_v54  ;;  %3358 = vmatpush1.bf16.msra.mxu0 %v15170_v50  ;;  %v17315_v50 = vshrl.u32 %v18088_v46, 7  ;;  %v15256_v54 = vld [vmem:[#allocation6 + $0x614] ss:$24 sps:$4 sm:$0xff]   ;;  %v17317_v55 = vld [vmem:[#allocation7] sm:$0x3f] }
 0x1a6   : > { %3333 = vmatpush2.bf16.msra.mxu1 %v15167_v48  ;;  %3359 = vmatprep.subr.bf16.mxu0 %v15178_v53  ;;  %v14605_v62 = vpop.f32.mrf.mxu0  ;;  %v15247_v48 = vld [vmem:[#allocation6 + $0x4c4] ss:$24 sps:$4 sm:$0xff]   ;;  %v15253_v53 = vld [vmem:[#allocation6 + $0x494] ss:$24 sps:$4 sm:$0xff]  }
 0x1a7   : > { %3334 = vmatprep.subr.bf16.mxu1 %v15175_v51  ;;  %1262 = vst [vmem:[%s17299_s22] sm:$0xff] %v1257_v58  ;;  %18106 = vst [vmem:[#allocation24_spill] sm:$0xff] %v17315_v50  ;;  %v15245_v51 = vld [vmem:[#allocation6 + $0x4c0] ss:$24 sps:$4 sm:$0xff]   ;;  %v17323_v57 = vsub.s32 1, %v17315_v50  ;;  %v15251_v58 = vld [vmem:[#allocation6 + $0x490] ss:$24 sps:$4 sm:$0xff]  }
 0x1a9   : > { %3360 = vmatpush1.bf16.msra.mxu0 %v15176_v59  ;;  %18107 = vst [vmem:[#allocation25_spill] sm:$0xff] %v17323_v57  ;;  %v15254_v59 = vld [vmem:[#allocation6 + $0x610] ss:$24 sps:$4 sm:$0xff]  }
 0x1aa   : > { %3335 = vmatpush2.bf16.msra.mxu1 %v15173_v56  ;;  %3361 = vmatprep.subr.bf16.mxu0 %v15184_v61  ;;  %v17320_v56 = vsub.s32 0, %v17315_v50  ;;  %v15262_v61 = vld [vmem:[#allocation9 + $0x2a4] ss:$48 sps:$4 sm:$0xff]  }
 0x1ab   : > { %3336 = vmatprep.subr.bf16.mxu1 %v15181_v60  ;;  %v15259_v60 = vld [vmem:[#allocation6 + $0x8e4] ss:$24 sps:$4 sm:$0xff]  }
 0x1ac   : > { %v1601_v62 = vrot.slane %v17317_v55, %v17320_v56 }
 0x1ad   : > { %3362 = vmatpush1.bf16.msra.mxu0 %v15182_v63  ;;  %v1605_v63 = vrot.slane %v17317_v55, %v17323_v57 }
 0x1ae   : > { %3337 = vmatpush2.bf16.msra.mxu1 %v15179_v35  ;;  %3363 = vmatprep.subr.bf16.mxu0 %v15190_v1  ;;  %v15257_v35 = vld [vmem:[#allocation6 + $0x8e0] ss:$24 sps:$4 sm:$0xff]   ;;  %v15265_v1 = vld [vmem:[#allocation6 + $0x8b4] ss:$24 sps:$4 sm:$0xff]  }
 0x1af   : > { %3338 = vmatprep.subr.bf16.mxu1 %v15187_v0  ;;  %v15260_v0 = vld [vmem:[#allocation9 + $0x2a0] ss:$48 sps:$4 sm:$0xff]  }
 0x1b1   : > { %3364 = vmatpush1.bf16.msra.mxu0 %v15188_v3 }
 0x1b2   : > { %3339 = vmatpush2.bf16.msra.mxu1 %v15185_v2  ;;  %3365 = vmatprep.subr.bf16.mxu0 %v15196_v6  ;;  %v15268_v2 = vld [vmem:[#allocation9 + $0x244] ss:$48 sps:$4 sm:$0xff]   ;;  %v15266_v6 = vld [vmem:[#allocation9 + $0x240] ss:$48 sps:$4 sm:$0xff]  }
 0x1b3   : > { %3340 = vmatprep.subr.bf16.mxu1 %v15193_v4  ;;  %v15263_v4 = vld [vmem:[#allocation6 + $0x8b0] ss:$24 sps:$4 sm:$0xff]  }
 0x1b5   : > { %3366 = vmatpush1.bf16.msra.mxu0 %v15194_v8 }
 0x1b6   : > { %3341 = vmatpush2.bf16.msra.mxu1 %v15191_v7  ;;  %3367 = vmatprep.subr.bf16.mxu0 %v15202_v11  ;;  %v17331_v7 = vld [vmem:[%s17306_s28 + $0x4] ss:$24 sps:$4 sm:$0xff]  }
 0x1b7   : > { %3342 = vmatprep.subr.bf16.mxu1 %v15199_v9 }
 0x1b9   : > { %3368 = vmatpush1.bf16.msra.mxu0 %v15200_v13  ;;  %v15271_v13 = vld [vmem:[#allocation6 + $0x884] ss:$24 sps:$4 sm:$0xff]  }
 0x1ba   : > { %3343 = vmatpush2.bf16.msra.mxu1 %v15197_v12  ;;  %3369 = vmatprep.subr.bf16.mxu0 %v15208_v15 }
 0x1bb   : > { %3344 = vmatprep.subr.bf16.mxu1 %v15205_v14  ;;  %v15274_v14 = vld [vmem:[#allocation9 + $0x1e4] ss:$48 sps:$4 sm:$0xff]  }
 0x1bd   : > { %3370 = vmatpush1.bf16.msra.mxu0 %v15206_v17  ;;  %v15269_v17 = vld [vmem:[#allocation6 + $0x880] ss:$24 sps:$4 sm:$0xff]  }
 0x1be   : > { %3345 = vmatpush2.bf16.msra.mxu1 %v15203_v16  ;;  %3371 = vmatprep.subr.bf16.mxu0 %v15211_v18  ;;  %v15277_v18 = vld [vmem:[#allocation6 + $0x854] ss:$24 sps:$4 sm:$0xff]  }
 0x1bf   : > { %3396 = vmatprep.subr.bf16.mxu1 %v15214_v19  ;;  %v15280_v19 = vld [vmem:[#allocation9 + $0x184] ss:$48 sps:$4 sm:$0xff]  }
 0x1c1   : > { %v17308_v23 = vpop.f32.mrf.mxu1  ;;  %3347 = vmatmul.mubr.bf16.vlgmr.msra.gmra.mxu1 %v17254_v36  ;;  %3372 = vmatpush2.bf16.msra.mxu0 %v15209_v20  ;;  %v15232_v36 = vld [vmem:[#allocation6 + $0x6d4] ss:$24 sps:$4 sm:$0xff]  }
 0x1c2   : > { %3397 = vmatpush1.bf16.msra.mxu1 %v15212_v21  ;;  %3373 = vmatprep.subr.bf16.mxu0 %v15217_v34  ;;  %v3103_v3 = vadd.f32 %v17308_v23, %v1601_v62  ;;  %v15275_v21 = vld [vmem:[#allocation6 + $0x850] ss:$24 sps:$4 sm:$0xff]  }
 0x1c3   : > { %v17311_v27 = vpop.f32.mrf.mxu1  ;;  %3398 = vmatprep.subr.bf16.mxu1 %v15220_v22  ;;  %3428 = vmatprep.mubr.bf16.mxu1 %v17264_v5  ;;  %v15236_v5 = vld [vmem:[#allocation6 + $0x6a0] ss:$24 sps:$4 sm:$0xff]   ;;  %v15283_v22 = vld [vmem:[#allocation6 + $0x824] ss:$24 sps:$4 sm:$0xff]  }
 0x1c4   : > { %v3105_v9 = vadd.f32 %v17311_v27, %v1605_v63  ;;  %v15278_v34 = vld [vmem:[#allocation9 + $0x180] ss:$48 sps:$4 sm:$0xff]   ;;  %v15286_v23 = vld [vmem:[#allocation9 + $0x124] ss:$48 sps:$4 sm:$0xff]  }
 0x1c5   : > { %v3106_v29 = vpop.f32.mrf.mxu1  ;;  %3374 = vmatpush2.bf16.msra.mxu0 %v15215_v24  ;;  %v15281_v24 = vld [vmem:[#allocation6 + $0x820] ss:$24 sps:$4 sm:$0xff]  }
 0x1c6   : > { %3399 = vmatpush1.bf16.msra.mxu1 %v15218_v25  ;;  %3375 = vmatprep.subr.bf16.mxu0 %v15223_v26  ;;  %v15284_v25 = vld [vmem:[#allocation9 + $0x120] ss:$48 sps:$4 sm:$0xff]   ;;  %v15292_v27 = vld [vmem:[#allocation9 + $0xc4] ss:$48 sps:$4 sm:$0xff]  }
 0x1c7   : > { %v3107_v33 = vpop.f32.mrf.mxu1  ;;  %3400 = vmatprep.subr.bf16.mxu1 %v15226_v28  ;;  %v15289_v26 = vld [vmem:[#allocation6 + $0x7f4] ss:$24 sps:$4 sm:$0xff]   ;;  %v15287_v28 = vld [vmem:[#allocation6 + $0x7f0] ss:$24 sps:$4 sm:$0xff]  }
 0x1c8   : > { %v15290_v29 = vld [vmem:[#allocation9 + $0xc0] ss:$48 sps:$4 sm:$0xff]   ;;  %v15328_v63 = vld [vmem:[#allocation9 + $0x784] ss:$48 sps:$4 sm:$0xff]  }
 0x1c9   : > { %3376 = vmatpush2.bf16.msra.mxu0 %v15221_v30  ;;  %v15295_v30 = vld [vmem:[#allocation6 + $0x7c4] ss:$24 sps:$4 sm:$0xff]  }
 0x1ca   : > { %3401 = vmatpush1.bf16.msra.mxu1 %v15224_v31  ;;  %3377 = vmatprep.subr.bf16.mxu0 %v15229_v32  ;;  %v15298_v31 = vld [vmem:[#allocation9 + $0x64] ss:$48 sps:$4 sm:$0xff]   ;;  %v15296_v33 = vld [vmem:[#allocation9 + $0x60] ss:$48 sps:$4 sm:$0xff]  }
 0x1cb   : > { %3402 = vmatprep.subr.bf16.mxu1 %v15232_v36  ;;  %v15293_v32 = vld [vmem:[#allocation6 + $0x7c0] ss:$24 sps:$4 sm:$0xff]   ;;  %v15301_v36 = vld [vmem:[#allocation6 + $0x794] ss:$24 sps:$4 sm:$0xff]  }
 0x1cd   : > { %3378 = vmatpush2.bf16.msra.mxu0 %v15227_v38  ;;  %v15304_v38 = vld [vmem:[#allocation9 + $0x4] ss:$48 sps:$4 sm:$0xff]  }
 0x1ce   : > { %3403 = vmatpush1.bf16.msra.mxu1 %v15230_v39  ;;  %3379 = vmatprep.subr.bf16.mxu0 %v15235_v40  ;;  %v15299_v39 = vld [vmem:[#allocation6 + $0x790] ss:$24 sps:$4 sm:$0xff]  }
 0x1cf   : > { %3404 = vmatprep.subr.bf16.mxu1 %v15238_v41  ;;  %v15302_v40 = vld [vmem:[#allocation9] ss:$48 sps:$4 sm:$0xff]   ;;  %v15307_v41 = vld [vmem:[#allocation9 + $0x5a4] ss:$48 sps:$4 sm:$0xff]  }
 0x1d1   : > { %3380 = vmatpush2.bf16.msra.mxu0 %v15233_v42  ;;  %v15310_v42 = vld [vmem:[#allocation9 + $0x8a4] ss:$48 sps:$4 sm:$0xff]  }
 0x1d2   : > { %3405 = vmatpush1.bf16.msra.mxu1 %v15236_v5  ;;  %3381 = vmatprep.subr.bf16.mxu0 %v15241_v43  ;;  %v15305_v5 = vld [vmem:[#allocation9 + $0x5a0] ss:$48 sps:$4 sm:$0xff]  }
 0x1d3   : > { %3406 = vmatprep.subr.bf16.mxu1 %v15244_v44  ;;  %v15308_v43 = vld [vmem:[#allocation9 + $0x8a0] ss:$48 sps:$4 sm:$0xff]   ;;  %v15313_v44 = vld [vmem:[#allocation9 + $0x544] ss:$48 sps:$4 sm:$0xff]  }
 0x1d5   : > { %3382 = vmatpush2.bf16.msra.mxu0 %v15239_v45  ;;  %v15316_v45 = vld [vmem:[#allocation9 + $0x844] ss:$48 sps:$4 sm:$0xff]  }
 0x1d6   : > { %3407 = vmatpush1.bf16.msra.mxu1 %v15242_v47  ;;  %3383 = vmatprep.subr.bf16.mxu0 %v15247_v48  ;;  %v15311_v47 = vld [vmem:[#allocation9 + $0x540] ss:$48 sps:$4 sm:$0xff]  }
 0x1d7   : > { %3408 = vmatprep.subr.bf16.mxu1 %v15250_v49  ;;  %v15314_v48 = vld [vmem:[#allocation9 + $0x840] ss:$48 sps:$4 sm:$0xff]   ;;  %v17341_v49 = vld [vmem:[%s17306_s28 + $0xc] ss:$24 sps:$4 sm:$0xff]  }
 0x1d9   : > { %3384 = vmatpush2.bf16.msra.mxu0 %v15245_v51 }
 0x1da   : > { %3409 = vmatpush1.bf16.msra.mxu1 %v15248_v52  ;;  %3385 = vmatprep.subr.bf16.mxu0 %v15253_v53 }
 0x1db   : > { %3410 = vmatprep.subr.bf16.mxu1 %v15256_v54  ;;  %v15319_v54 = vld [vmem:[#allocation9 + $0x4e4] ss:$48 sps:$4 sm:$0xff]  }
 0x1dd   : > { %3386 = vmatpush2.bf16.msra.mxu0 %v15251_v58  ;;  %v15322_v58 = vld [vmem:[#allocation9 + $0x7e4] ss:$48 sps:$4 sm:$0xff]  }
 0x1de   : > { %3411 = vmatpush1.bf16.msra.mxu1 %v15254_v59  ;;  %6987 = vmatprep.subr.bf16.mxu0 %v15262_v61  ;;  %v15320_v61 = vld [vmem:[#allocation9 + $0x7e0] ss:$48 sps:$4 sm:$0xff]  }
 0x1df   : > { %3412 = vmatprep.subr.bf16.mxu1 %v15259_v60  ;;  %v15317_v60 = vld [vmem:[#allocation9 + $0x4e0] ss:$48 sps:$4 sm:$0xff]  }
 0x1e0   : > { %v3143_v8 = vpop.f32.mrf.mxu0  ;;  %3388 = vmatmul.mubr.bf16.vlgmr.msra.gmra.mxu0 %v17256_v37  ;;  %v15272_v37 = vld [vmem:[#allocation9 + $0x1e0] ss:$48 sps:$4 sm:$0xff]  }
 0x1e1   : > { %v17335_v11 = vadd.f32 %v3143_v8, %v3103_v3  ;;  %6988 = vmatpush1.bf16.msra.mxu0 %v15260_v0  ;;  %7019 = vmatprep.mubr.bf16.mxu0 %v17331_v7  ;;  %v15323_v0 = vld [vmem:[#allocation9 + $0x480] ss:$48 sps:$4 sm:$0xff]   ;;  %v15334_v3 = vld [vmem:[#allocation9 + $0x724] ss:$48 sps:$4 sm:$0xff]  }
 0x1e2   : > { %3413 = vmatpush2.bf16.msra.mxu1 %v15257_v35  ;;  %v3145_v12 = vpop.f32.mrf.mxu0  ;;  %6989 = vmatprep.subr.bf16.mxu0 %v15268_v2  ;;  %v15325_v35 = vld [vmem:[#allocation9 + $0x484] ss:$48 sps:$4 sm:$0xff]  }
 0x1e3   : > { %3414 = vmatprep.subr.bf16.mxu1 %v15265_v1  ;;  %v17337_v15 = vadd.f32 %v3145_v12, %v3105_v9  ;;  %v15326_v1 = vld [vmem:[#allocation9 + $0x780] ss:$48 sps:$4 sm:$0xff]   ;;  %v15331_v2 = vld [vmem:[#allocation9 + $0x424] ss:$48 sps:$4 sm:$0xff]  }
 0x1e4   : > { %v3147_v16 = vpop.f32.mrf.mxu0  ;;  %v15337_v8 = vld [vmem:[#allocation9 + $0x3c4] ss:$48 sps:$4 sm:$0xff]   ;;  %v15338_v12 = vld [vmem:[#allocation9 + $0x6c0] ss:$48 sps:$4 sm:$0xff]  }
 0x1e5   : > { %6990 = vmatpush1.bf16.msra.mxu0 %v15266_v6  ;;  %v15332_v6 = vld [vmem:[#allocation9 + $0x720] ss:$48 sps:$4 sm:$0xff]   ;;  %v15340_v9 = vld [vmem:[#allocation9 + $0x6c4] ss:$48 sps:$4 sm:$0xff]  }
 0x1e6   : > { %3415 = vmatpush2.bf16.msra.mxu1 %v15263_v4  ;;  %6991 = vmatprep.subr.bf16.mxu0 %v15274_v14  ;;  %v3148_v20 = vpop.f32.mrf.mxu0  ;;  %v15329_v4 = vld [vmem:[#allocation9 + $0x420] ss:$48 sps:$4 sm:$0xff]   ;;  %v15346_v14 = vld [vmem:[#allocation9 + $0x664] ss:$48 sps:$4 sm:$0xff]  }
 0x1e7   : > { %3416 = vmatprep.subr.bf16.mxu1 %v15271_v13  ;;  %v15343_v13 = vld [vmem:[#allocation9 + $0x364] ss:$48 sps:$4 sm:$0xff]   ;;  %v15344_v16 = vld [vmem:[#allocation9 + $0x660] ss:$48 sps:$4 sm:$0xff]  }
 0x1e8   : > { %v15357_v20 = vld [vmem:[#allocation9 + $0xba4] ss:$48 sps:$4 sm:$0xff]  }
 0x1e9   : > { %6992 = vmatpush1.bf16.msra.mxu0 %v15272_v37  ;;  %v15352_v37 = vld [vmem:[#allocation9 + $0x604] ss:$48 sps:$4 sm:$0xff]  }
 0x1ea   : > { %3417 = vmatpush2.bf16.msra.mxu1 %v15269_v17  ;;  %6993 = vmatprep.subr.bf16.mxu0 %v15280_v19  ;;  %v15349_v17 = vld [vmem:[#allocation9 + $0x304] ss:$48 sps:$4 sm:$0xff]   ;;  %v15350_v19 = vld [vmem:[#allocation9 + $0x600] ss:$48 sps:$4 sm:$0xff]  }
 0x1eb   : > { %3418 = vmatprep.subr.bf16.mxu1 %v15277_v18  ;;  %v15347_v18 = vld [vmem:[#allocation9 + $0x300] ss:$48 sps:$4 sm:$0xff]  }
 0x1ed   : > { %6994 = vmatpush1.bf16.msra.mxu0 %v15278_v34  ;;  %v17352_v34 = vld [vmem:[%s17306_s28] ss:$24 sps:$4 sm:$0xff]  }
 0x1ee   : > { %3419 = vmatpush2.bf16.msra.mxu1 %v15275_v21  ;;  %6995 = vmatprep.subr.bf16.mxu0 %v15286_v23  ;;  %v15360_v21 = vld [vmem:[#allocation9 + $0xea4] ss:$48 sps:$4 sm:$0xff]   ;;  %v15358_v23 = vld [vmem:[#allocation9 + $0xea0] ss:$48 sps:$4 sm:$0xff]  }
 0x1ef   : > { %3420 = vmatprep.subr.bf16.mxu1 %v15283_v22  ;;  %v15355_v22 = vld [vmem:[#allocation9 + $0xba0] ss:$48 sps:$4 sm:$0xff]  }
 0x1f1   : > { %6996 = vmatpush1.bf16.msra.mxu0 %v15284_v25  ;;  %v15367_v25 = vld [vmem:[#allocation9 + $0xe44] ss:$48 sps:$4 sm:$0xff]  }
 0x1f2   : > { %3421 = vmatpush2.bf16.msra.mxu1 %v15281_v24  ;;  %6997 = vmatprep.subr.bf16.mxu0 %v15292_v27  ;;  %v15364_v24 = vld [vmem:[#allocation9 + $0xb44] ss:$48 sps:$4 sm:$0xff]   ;;  %v15365_v27 = vld [vmem:[#allocation9 + $0xe40] ss:$48 sps:$4 sm:$0xff]  }
 0x1f3   : > { %3422 = vmatprep.subr.bf16.mxu1 %v15289_v26  ;;  %v15362_v26 = vld [vmem:[#allocation9 + $0xb40] ss:$48 sps:$4 sm:$0xff]  }
 0x1f5   : > { %6998 = vmatpush1.bf16.msra.mxu0 %v15290_v29 }
 0x1f6   : > { %3423 = vmatpush2.bf16.msra.mxu1 %v15287_v28  ;;  %6999 = vmatprep.subr.bf16.mxu0 %v15298_v31  ;;  %v17355_v28 = vld [vmem:[%s17306_s28 + $0x14] ss:$24 sps:$4 sm:$0xff]  }
 0x1f7   : > { %3424 = vmatprep.subr.bf16.mxu1 %v15295_v30  ;;  %v15370_v30 = vld [vmem:[#allocation9 + $0xae4] ss:$48 sps:$4 sm:$0xff]  }
 0x1f8   : > { %v15373_v31 = vld [vmem:[#allocation9 + $0xde4] ss:$48 sps:$4 sm:$0xff]  }
 0x1f9   : > { %7000 = vmatpush1.bf16.msra.mxu0 %v15296_v33 }
 0x1fa   : > { %3425 = vmatpush2.bf16.msra.mxu1 %v15293_v32  ;;  %7001 = vmatprep.subr.bf16.mxu0 %v15304_v38  ;;  %v15371_v38 = vld [vmem:[#allocation9 + $0xde0] ss:$48 sps:$4 sm:$0xff]  }
 0x1fb   : > { %3426 = vmatprep.subr.bf16.mxu1 %v15301_v36  ;;  %v15368_v36 = vld [vmem:[#allocation9 + $0xae0] ss:$48 sps:$4 sm:$0xff]  }
 0x1fd   : > { %7002 = vmatpush1.bf16.msra.mxu0 %v15302_v40  ;;  %v15379_v40 = vld [vmem:[#allocation9 + $0xd84] ss:$48 sps:$4 sm:$0xff]  }
 0x1fe   : > { %3427 = vmatpush2.bf16.msra.mxu1 %v15299_v39  ;;  %7003 = vmatprep.subr.bf16.mxu0 %v15307_v41  ;;  %v15376_v39 = vld [vmem:[#allocation9 + $0xa84] ss:$48 sps:$4 sm:$0xff]  }
 0x1ff   : > { %7030 = vmatprep.subr.bf16.mxu1 %v15310_v42  ;;  %v15374_v42 = vld [vmem:[#allocation9 + $0xa80] ss:$48 sps:$4 sm:$0xff]  }
 0x201   : > { %v3184_v51 = vpop.f32.mrf.mxu1  ;;  %3429 = vmatmul.mubr.bf16.vlgmr.msra.gmra.mxu1 %v17267_v10  ;;  %7004 = vmatpush2.bf16.msra.mxu0 %v15305_v5  ;;  %v15377_v5 = vld [vmem:[#allocation9 + $0xd80] ss:$48 sps:$4 sm:$0xff]  }
 0x202   : > { %v17345_v52 = vadd.f32 %v3184_v51, %v17335_v11  ;;  %7031 = vmatpush1.bf16.msra.mxu1 %v15308_v43  ;;  %7005 = vmatprep.subr.bf16.mxu0 %v15313_v44  ;;  %v15335_v11 = vld [vmem:[#allocation9 + $0x3c0] ss:$48 sps:$4 sm:$0xff]   ;;  %v15382_v43 = vld [vmem:[#allocation9 + $0xa24] ss:$48 sps:$4 sm:$0xff]  }
 0x203   : > { %v3186_v53 = vpop.f32.mrf.mxu1  ;;  %7032 = vmatprep.subr.bf16.mxu1 %v15316_v45  ;;  %7062 = vmatprep.mubr.bf16.mxu1 %v17341_v49  ;;  %v15385_v44 = vld [vmem:[#allocation9 + $0xd24] ss:$48 sps:$4 sm:$0xff]   ;;  %v15380_v45 = vld [vmem:[#allocation9 + $0xa20] ss:$48 sps:$4 sm:$0xff]  }
 0x204   : > { %v17348_v59 = vadd.f32 %v3186_v53, %v17337_v15  ;;  %v15341_v15 = vld [vmem:[#allocation9 + $0x360] ss:$48 sps:$4 sm:$0xff]   ;;  %v15391_v51 = vld [vmem:[#allocation9 + $0xcc4] ss:$48 sps:$4 sm:$0xff]  }
 0x205   : > { %v3188_v62 = vpop.f32.mrf.mxu1  ;;  %7006 = vmatpush2.bf16.msra.mxu0 %v15311_v47  ;;  %v15383_v47 = vld [vmem:[#allocation9 + $0xd20] ss:$48 sps:$4 sm:$0xff]  }
 0x206   : > { %7033 = vmatpush1.bf16.msra.mxu1 %v15314_v48  ;;  %7007 = vmatprep.subr.bf16.mxu0 %v15319_v54  ;;  %v15388_v48 = vld [vmem:[#allocation9 + $0x9c4] ss:$48 sps:$4 sm:$0xff]   ;;  %v15386_v53 = vld [vmem:[#allocation9 + $0x9c0] ss:$48 sps:$4 sm:$0xff]  }
 0x207   : > { %v3189_v10 = vpop.f32.mrf.mxu1  ;;  %7034 = vmatprep.subr.bf16.mxu1 %v15322_v58  ;;  %v15389_v54 = vld [vmem:[#allocation9 + $0xcc0] ss:$48 sps:$4 sm:$0xff]   ;;  %v15394_v58 = vld [vmem:[#allocation9 + $0x964] ss:$48 sps:$4 sm:$0xff]  }
 0x208   : > { %v15395_v62 = vld [vmem:[#allocation9 + $0xc60] ss:$48 sps:$4 sm:$0xff]   ;;  %v17364_v10 = vsub.s32 2, %v17315_v50 }
 0x209   : > { %7008 = vmatpush2.bf16.msra.mxu0 %v15317_v60  ;;  %v15397_v60 = vld [vmem:[#allocation9 + $0xc64] ss:$48 sps:$4 sm:$0xff]  }
 0x20a   : > { %7035 = vmatpush1.bf16.msra.mxu1 %v15320_v61  ;;  %7009 = vmatprep.subr.bf16.mxu0 %v15325_v35  ;;  %v15392_v61 = vld [vmem:[#allocation9 + $0x960] ss:$48 sps:$4 sm:$0xff]   ;;  %v15400_v35 = vld [vmem:[#allocation9 + $0x904] ss:$48 sps:$4 sm:$0xff]  }
 0x20b   : > { %7036 = vmatprep.subr.bf16.mxu1 %v15328_v63  ;;  %v15403_v63 = vld [vmem:[#allocation9 + $0xc04] ss:$48 sps:$4 sm:$0xff]  }
 0x20d   : > { %7010 = vmatpush2.bf16.msra.mxu0 %v15323_v0  ;;  %v17367_v0 = vsub.s32 3, %v17315_v50 }
 0x20e   : > { %7037 = vmatpush1.bf16.msra.mxu1 %v15326_v1  ;;  %7011 = vmatprep.subr.bf16.mxu0 %v15331_v2  ;;  %v1609_v1 = vrot.slane %v17317_v55, %v17364_v10  ;;  %v15398_v2 = vld [vmem:[#allocation9 + $0x900] ss:$48 sps:$4 sm:$0xff]  }
 0x20f   : > { %7038 = vmatprep.subr.bf16.mxu1 %v15334_v3  ;;  %v15401_v3 = vld [vmem:[#allocation9 + $0xc00] ss:$48 sps:$4 sm:$0xff]  }
 0x211   : > { %7012 = vmatpush2.bf16.msra.mxu0 %v15329_v4  ;;  %v17372_v4 = vld [vmem:[%s17306_s28 + $0x8] ss:$24 sps:$4 sm:$0xff]  }
 0x212   : > { %7039 = vmatpush1.bf16.msra.mxu1 %v15332_v6  ;;  %7013 = vmatprep.subr.bf16.mxu0 %v15337_v8  ;;  %v15409_v6 = vld [vmem:[#allocation9 + $0x11a4] ss:$48 sps:$4 sm:$0xff]   ;;  %v15412_v8 = vld [vmem:[#allocation9 + $0x2ac] ss:$48 sps:$4 sm:$0xff]  }
 0x213   : > { %7040 = vmatprep.subr.bf16.mxu1 %v15340_v9  ;;  %v1613_v9 = vrot.slane %v17317_v55, %v17367_v0 }
 0x215   : > { %7014 = vmatpush2.bf16.msra.mxu0 %v15335_v11  ;;  %v15407_v11 = vld [vmem:[#allocation9 + $0x11a0] ss:$48 sps:$4 sm:$0xff]  }
 0x216   : > { %7041 = vmatpush1.bf16.msra.mxu1 %v15338_v12  ;;  %7015 = vmatprep.subr.bf16.mxu0 %v15343_v13  ;;  %v15410_v12 = vld [vmem:[#allocation9 + $0x2a8] ss:$48 sps:$4 sm:$0xff]  }
 0x217   : > { %7042 = vmatprep.subr.bf16.mxu1 %v15346_v14  ;;  %v15415_v14 = vld [vmem:[#allocation9 + $0x1144] ss:$48 sps:$4 sm:$0xff]  }
 0x219   : > { %7016 = vmatpush2.bf16.msra.mxu0 %v15341_v15  ;;  %v15418_v15 = vld [vmem:[#allocation9 + $0x24c] ss:$48 sps:$4 sm:$0xff]  }
 0x21a   : > { %7043 = vmatpush1.bf16.msra.mxu1 %v15344_v16  ;;  %7017 = vmatprep.subr.bf16.mxu0 %v15349_v17  ;;  %v15413_v17 = vld [vmem:[#allocation9 + $0x1140] ss:$48 sps:$4 sm:$0xff]  }
 0x21b   : > { %7044 = vmatprep.subr.bf16.mxu1 %v15352_v37  ;;  %v15416_v37 = vld [vmem:[#allocation9 + $0x248] ss:$48 sps:$4 sm:$0xff]  }
 0x21d   : > { %7018 = vmatpush2.bf16.msra.mxu0 %v15347_v18 }
 0x21e   : > { %7045 = vmatpush1.bf16.msra.mxu1 %v15350_v19  ;;  %7073 = vmatprep.subr.bf16.mxu0 %v15360_v21  ;;  %v15424_v21 = vld [vmem:[#allocation9 + $0x1ec] ss:$48 sps:$4 sm:$0xff]  }
 0x21f   : > { %7046 = vmatprep.subr.bf16.mxu1 %v15357_v20  ;;  %v15421_v20 = vld [vmem:[#allocation9 + $0x10e4] ss:$48 sps:$4 sm:$0xff]  }
 0x220   : > { %7020 = vmatmul.mubr.bf16.vlgmr.msra.gmra.mxu0 %v17352_v34  ;;  %v17358_v29 = vpop.f32.mrf.mxu0 }
 0x221   : > { %7074 = vmatpush1.bf16.msra.mxu0 %v15358_v23  ;;  %7105 = vmatprep.mubr.bf16.mxu0 %v17355_v28  ;;  %v3226_v13 = vadd.f32 %v17358_v29, %v1609_v1  ;;  %v15419_v23 = vld [vmem:[#allocation9 + $0x10e0] ss:$48 sps:$4 sm:$0xff]   ;;  %v15430_v29 = vld [vmem:[#allocation9 + $0x18c] ss:$48 sps:$4 sm:$0xff]  }
 0x222   : > { %7047 = vmatpush2.bf16.msra.mxu1 %v15355_v22  ;;  %7075 = vmatprep.subr.bf16.mxu0 %v15367_v25  ;;  %v17360_v32 = vpop.f32.mrf.mxu0 }
 0x223   : > { %7048 = vmatprep.subr.bf16.mxu1 %v15364_v24  ;;  %v3228_v16 = vadd.f32 %v17360_v32, %v1613_v9  ;;  %v15422_v24 = vld [vmem:[#allocation9 + $0x1e8] ss:$48 sps:$4 sm:$0xff]   ;;  %v15433_v32 = vld [vmem:[#allocation9 + $0x1024] ss:$48 sps:$4 sm:$0xff]   ;;  %v15475_v9 = vld [vmem:[#allocation9 + $0x7ec] ss:$48 sps:$4 sm:$0xff]  }
 0x224   : > { %v3229_v33 = vpop.f32.mrf.mxu0 }
 0x225   : > { %7076 = vmatpush1.bf16.msra.mxu0 %v15365_v27  ;;  %v15427_v27 = vld [vmem:[#allocation9 + $0x1084] ss:$48 sps:$4 sm:$0xff]   ;;  %v15436_v33 = vld [vmem:[#allocation9 + $0x12c] ss:$48 sps:$4 sm:$0xff]  }
 0x226   : > { %7049 = vmatpush2.bf16.msra.mxu1 %v15362_v26  ;;  %7077 = vmatprep.subr.bf16.mxu0 %v15373_v31  ;;  %v3230_v41 = vpop.f32.mrf.mxu0  ;;  %v15428_v31 = vld [vmem:[#allocation9 + $0x188] ss:$48 sps:$4 sm:$0xff]  }
 0x227   : > { %7050 = vmatprep.subr.bf16.mxu1 %v15370_v30  ;;  %v15425_v30 = vld [vmem:[#allocation9 + $0x1080] ss:$48 sps:$4 sm:$0xff]   ;;  %v15440_v41 = vld [vmem:[#allocation9 + $0xc8] ss:$48 sps:$4 sm:$0xff]  }
 0x229   : > { %7078 = vmatpush1.bf16.msra.mxu0 %v15371_v38  ;;  %v15439_v38 = vld [vmem:[#allocation9 + $0xfc4] ss:$48 sps:$4 sm:$0xff]  }
 0x22a   : > { %7051 = vmatpush2.bf16.msra.mxu1 %v15368_v36  ;;  %7079 = vmatprep.subr.bf16.mxu0 %v15379_v40  ;;  %v15431_v36 = vld [vmem:[#allocation9 + $0x1020] ss:$48 sps:$4 sm:$0xff]  }
 0x22b   : > { %7052 = vmatprep.subr.bf16.mxu1 %v15376_v39  ;;  %v15442_v39 = vld [vmem:[#allocation9 + $0xcc] ss:$48 sps:$4 sm:$0xff]   ;;  %v15437_v40 = vld [vmem:[#allocation9 + $0xfc0] ss:$48 sps:$4 sm:$0xff]  }
 0x22d   : > { %7080 = vmatpush1.bf16.msra.mxu0 %v15377_v5  ;;  %v15448_v5 = vld [vmem:[#allocation9 + $0x6c] ss:$48 sps:$4 sm:$0xff]  }
 0x22e   : > { %7053 = vmatpush2.bf16.msra.mxu1 %v15374_v42  ;;  %7081 = vmatprep.subr.bf16.mxu0 %v15385_v44  ;;  %v15445_v42 = vld [vmem:[#allocation9 + $0xf64] ss:$48 sps:$4 sm:$0xff]   ;;  %v15446_v44 = vld [vmem:[#allocation9 + $0x68] ss:$48 sps:$4 sm:$0xff]  }
 0x22f   : > { %7054 = vmatprep.subr.bf16.mxu1 %v15382_v43  ;;  %v15443_v43 = vld [vmem:[#allocation9 + $0xf60] ss:$48 sps:$4 sm:$0xff]  }
 0x231   : > { %7082 = vmatpush1.bf16.msra.mxu0 %v15383_v47  ;;  %v15454_v47 = vld [vmem:[#allocation9 + $0xc] ss:$48 sps:$4 sm:$0xff]  }
 0x232   : > { %7055 = vmatpush2.bf16.msra.mxu1 %v15380_v45  ;;  %7083 = vmatprep.subr.bf16.mxu0 %v15391_v51  ;;  %v15451_v45 = vld [vmem:[#allocation9 + $0xf04] ss:$48 sps:$4 sm:$0xff]   ;;  %v15452_v51 = vld [vmem:[#allocation9 + $0x8] ss:$48 sps:$4 sm:$0xff]  }
 0x233   : > { %7056 = vmatprep.subr.bf16.mxu1 %v15388_v48  ;;  %v15449_v48 = vld [vmem:[#allocation9 + $0xf00] ss:$48 sps:$4 sm:$0xff]  }
 0x235   : > { %7084 = vmatpush1.bf16.msra.mxu0 %v15389_v54  ;;  %v15460_v54 = vld [vmem:[#allocation9 + $0x5ac] ss:$48 sps:$4 sm:$0xff]  }
 0x236   : > { %7057 = vmatpush2.bf16.msra.mxu1 %v15386_v53  ;;  %7085 = vmatprep.subr.bf16.mxu0 %v15397_v60  ;;  %v17385_v53 = vld [vmem:[%s17306_s28 + $0x10] ss:$24 sps:$4 sm:$0xff]  }
 0x237   : > { %7058 = vmatprep.subr.bf16.mxu1 %v15394_v58  ;;  %v15463_v58 = vld [vmem:[#allocation9 + $0x8ac] ss:$48 sps:$4 sm:$0xff]   ;;  %v15458_v60 = vld [vmem:[#allocation9 + $0x5a8] ss:$48 sps:$4 sm:$0xff]  }
 0x239   : > { %7086 = vmatpush1.bf16.msra.mxu0 %v15395_v62  ;;  %v15466_v62 = vld [vmem:[#allocation9 + $0x54c] ss:$48 sps:$4 sm:$0xff]  }
 0x23a   : > { %7059 = vmatpush2.bf16.msra.mxu1 %v15392_v61  ;;  %7087 = vmatprep.subr.bf16.mxu0 %v15403_v63  ;;  %v15461_v61 = vld [vmem:[#allocation9 + $0x8a8] ss:$48 sps:$4 sm:$0xff]  }
 0x23b   : > { %7060 = vmatprep.subr.bf16.mxu1 %v15400_v35  ;;  %v15469_v35 = vld [vmem:[#allocation9 + $0x84c] ss:$48 sps:$4 sm:$0xff]  }
 0x23d   : > { %7088 = vmatpush1.bf16.msra.mxu0 %v15401_v3  ;;  %v15467_v3 = vld [vmem:[#allocation9 + $0x848] ss:$48 sps:$4 sm:$0xff]  }
 0x23e   : > { %7061 = vmatpush2.bf16.msra.mxu1 %v15398_v2  ;;  %7089 = vmatprep.subr.bf16.mxu0 %v15409_v6  ;;  %v15464_v2 = vld [vmem:[#allocation9 + $0x548] ss:$48 sps:$4 sm:$0xff]  }
 0x23f   : > { %7116 = vmatprep.subr.bf16.mxu1 %v15412_v8  ;;  %v15472_v8 = vld [vmem:[#allocation9 + $0x4ec] ss:$48 sps:$4 sm:$0xff]  }
 0x241   : > { %v3266_v18 = vpop.f32.mrf.mxu1  ;;  %7063 = vmatmul.mubr.bf16.vlgmr.msra.gmra.mxu1 %v17372_v4  ;;  %7090 = vmatpush2.bf16.msra.mxu0 %v15407_v11 }
 0x242   : > { %v17379_v19 = vadd.f32 %v3266_v18, %v3226_v13  ;;  %7117 = vmatpush1.bf16.msra.mxu1 %v15410_v12  ;;  %7091 = vmatprep.subr.bf16.mxu0 %v15415_v14  ;;  %v15470_v13 = vld [vmem:[#allocation9 + $0x4e8] ss:$48 sps:$4 sm:$0xff]  }
 0x243   : > { %v3268_v55 = vpop.f32.mrf.mxu1  ;;  %7118 = vmatprep.subr.bf16.mxu1 %v15418_v15  ;;  %7148 = vmatprep.mubr.bf16.mxu1 %v17331_v7  ;;  %v15434_v7 = vld [vmem:[#allocation9 + $0x128] ss:$48 sps:$4 sm:$0xff]   ;;  %v15478_v15 = vld [vmem:[#allocation9 + $0x48c] ss:$48 sps:$4 sm:$0xff]  }
 0x244   : > { %v17381_v22 = vadd.f32 %v3268_v55, %v3228_v16  ;;  %v15473_v14 = vld [vmem:[#allocation9 + $0x7e8] ss:$48 sps:$4 sm:$0xff]   ;;  %v15481_v16 = vld [vmem:[#allocation9 + $0x78c] ss:$48 sps:$4 sm:$0xff]  }
 0x245   : > { %v3270_v25 = vpop.f32.mrf.mxu1  ;;  %7092 = vmatpush2.bf16.msra.mxu0 %v15413_v17  ;;  %v15479_v18 = vld [vmem:[#allocation9 + $0x788] ss:$48 sps:$4 sm:$0xff]   ;;  %v15487_v55 = vld [vmem:[#allocation9 + $0x72c] ss:$48 sps:$4 sm:$0xff]  }
 0x246   : > { %7119 = vmatpush1.bf16.msra.mxu1 %v15416_v37  ;;  %7093 = vmatprep.subr.bf16.mxu0 %v15421_v20  ;;  %v15476_v37 = vld [vmem:[#allocation9 + $0x488] ss:$48 sps:$4 sm:$0xff]   ;;  %v15496_v25 = vld [vmem:[#allocation9 + $0x36c] ss:$48 sps:$4 sm:$0xff]  }
 0x247   : > { %v3271_v26 = vpop.f32.mrf.mxu1  ;;  %7120 = vmatprep.subr.bf16.mxu1 %v15424_v21  ;;  %v15485_v20 = vld [vmem:[#allocation9 + $0x728] ss:$48 sps:$4 sm:$0xff]   ;;  %v15490_v21 = vld [vmem:[#allocation9 + $0x3cc] ss:$48 sps:$4 sm:$0xff]  }
 0x248   : > { %v15499_v26 = vld [vmem:[#allocation9 + $0x66c] ss:$48 sps:$4 sm:$0xff]  }
 0x249   : > { %7094 = vmatpush2.bf16.msra.mxu0 %v15419_v23  ;;  %v15488_v23 = vld [vmem:[#allocation9 + $0x3c8] ss:$48 sps:$4 sm:$0xff]  }
 0x24a   : > { %7121 = vmatpush1.bf16.msra.mxu1 %v15422_v24  ;;  %7095 = vmatprep.subr.bf16.mxu0 %v15427_v27  ;;  %v15491_v24 = vld [vmem:[#allocation9 + $0x6c8] ss:$48 sps:$4 sm:$0xff]  }
 0x24b   : > { %7122 = vmatprep.subr.bf16.mxu1 %v15430_v29  ;;  %v15494_v27 = vld [vmem:[#allocation9 + $0x368] ss:$48 sps:$4 sm:$0xff]  }
 0x24c   : > { %v15497_v29 = vld [vmem:[#allocation9 + $0x668] ss:$48 sps:$4 sm:$0xff]  }
 0x24d   : > { %7096 = vmatpush2.bf16.msra.mxu0 %v15425_v30  ;;  %v15502_v30 = vld [vmem:[#allocation9 + $0x30c] ss:$48 sps:$4 sm:$0xff]  }
 0x24e   : > { %7123 = vmatpush1.bf16.msra.mxu1 %v15428_v31  ;;  %7097 = vmatprep.subr.bf16.mxu0 %v15433_v32  ;;  %v15505_v31 = vld [vmem:[#allocation9 + $0x60c] ss:$48 sps:$4 sm:$0xff]   ;;  %v15500_v32 = vld [vmem:[#allocation9 + $0x308] ss:$48 sps:$4 sm:$0xff]  }
 0x24f   : > { %7124 = vmatprep.subr.bf16.mxu1 %v15436_v33  ;;  %v15503_v33 = vld [vmem:[#allocation9 + $0x608] ss:$48 sps:$4 sm:$0xff]  }
 0x251   : > { %7098 = vmatpush2.bf16.msra.mxu0 %v15431_v36  ;;  %v15508_v36 = vld [vmem:[#allocation9 + $0xbac] ss:$48 sps:$4 sm:$0xff]  }
 0x252   : > { %7125 = vmatpush1.bf16.msra.mxu1 %v15434_v7  ;;  %7099 = vmatprep.subr.bf16.mxu0 %v15439_v38  ;;  %v15511_v7 = vld [vmem:[#allocation9 + $0xeac] ss:$48 sps:$4 sm:$0xff]   ;;  %v15506_v38 = vld [vmem:[#allocation9 + $0xba8] ss:$48 sps:$4 sm:$0xff]  }
 0x253   : > { %7126 = vmatprep.subr.bf16.mxu1 %v15442_v39  ;;  %v15509_v39 = vld [vmem:[#allocation9 + $0xea8] ss:$48 sps:$4 sm:$0xff]  }
 0x255   : > { %7100 = vmatpush2.bf16.msra.mxu0 %v15437_v40  ;;  %v15514_v40 = vld [vmem:[#allocation9 + $0xb4c] ss:$48 sps:$4 sm:$0xff]  }
 0x256   : > { %7127 = vmatpush1.bf16.msra.mxu1 %v15440_v41  ;;  %7101 = vmatprep.subr.bf16.mxu0 %v15445_v42  ;;  %v15517_v41 = vld [vmem:[#allocation9 + $0xe4c] ss:$48 sps:$4 sm:$0xff]   ;;  %v15512_v42 = vld [vmem:[#allocation9 + $0xb48] ss:$48 sps:$4 sm:$0xff]  }
 0x257   : > { %7128 = vmatprep.subr.bf16.mxu1 %v15448_v5  ;;  %v15515_v5 = vld [vmem:[#allocation9 + $0xe48] ss:$48 sps:$4 sm:$0xff]  }
 0x259   : > { %7102 = vmatpush2.bf16.msra.mxu0 %v15443_v43 }
 0x25a   : > { %7129 = vmatpush1.bf16.msra.mxu1 %v15446_v44  ;;  %7103 = vmatprep.subr.bf16.mxu0 %v15451_v45  ;;  %v15520_v45 = vld [vmem:[#allocation9 + $0xaec] ss:$48 sps:$4 sm:$0xff]  }
 0x25b   : > { %7130 = vmatprep.subr.bf16.mxu1 %v15454_v47  ;;  %v15523_v47 = vld [vmem:[#allocation9 + $0xdec] ss:$48 sps:$4 sm:$0xff]  }
 0x25d   : > { %7104 = vmatpush2.bf16.msra.mxu0 %v15449_v48  ;;  %v15518_v48 = vld [vmem:[#allocation9 + $0xae8] ss:$48 sps:$4 sm:$0xff]  }
 0x25e   : > { %7131 = vmatpush1.bf16.msra.mxu1 %v15452_v51  ;;  %7159 = vmatprep.subr.bf16.mxu0 %v15463_v58  ;;  %v15521_v51 = vld [vmem:[#allocation9 + $0xde8] ss:$48 sps:$4 sm:$0xff]  }
 0x25f   : > { %7132 = vmatprep.subr.bf16.mxu1 %v15460_v54 }
 0x260   : > { %v3307_v63 = vpop.f32.mrf.mxu0  ;;  %7106 = vmatmul.mubr.bf16.vlgmr.msra.gmra.mxu0 %v17385_v53 }
 0x261   : > { %v17389_v1 = vadd.f32 %v3307_v63, %v17379_v19  ;;  %7160 = vmatpush1.bf16.msra.mxu0 %v15461_v61  ;;  %7191 = vmatprep.mubr.bf16.mxu0 %v17341_v49  ;;  %v15484_v19 = vld [vmem:[#allocation9 + $0x42c] ss:$48 sps:$4 sm:$0xff]   ;;  %v15482_v49 = vld [vmem:[#allocation9 + $0x428] ss:$48 sps:$4 sm:$0xff]  }
 0x262   : > { %7133 = vmatpush2.bf16.msra.mxu1 %v15458_v60  ;;  %v3309_v6 = vpop.f32.mrf.mxu0  ;;  %7161 = vmatprep.subr.bf16.mxu0 %v15469_v35  ;;  %v15526_v60 = vld [vmem:[#allocation9 + $0xa8c] ss:$48 sps:$4 sm:$0xff]   ;;  %v15524_v61 = vld [vmem:[#allocation9 + $0xa88] ss:$48 sps:$4 sm:$0xff]  }
 0x263   : > { %7134 = vmatprep.subr.bf16.mxu1 %v15466_v62  ;;  %v17392_v11 = vadd.f32 %v3309_v6, %v17381_v22  ;;  %v15493_v22 = vld [vmem:[#allocation9 + $0x6cc] ss:$48 sps:$4 sm:$0xff]   ;;  %v15527_v62 = vld [vmem:[#allocation9 + $0xd88] ss:$48 sps:$4 sm:$0xff]  }
 0x264   : > { %v3311_v12 = vpop.f32.mrf.mxu0  ;;  %v15532_v35 = vld [vmem:[#allocation9 + $0xa2c] ss:$48 sps:$4 sm:$0xff]  }
 0x265   : > { %18108 = vst [vmem:[#allocation26_spill] sm:$0xff] %v17392_v11  ;;  %7162 = vmatpush1.bf16.msra.mxu0 %v15467_v3  ;;  %v15535_v63 = vld [vmem:[#allocation9 + $0xd2c] ss:$48 sps:$4 sm:$0xff]  }
 0x266   : > { %7135 = vmatpush2.bf16.msra.mxu1 %v15464_v2  ;;  %7163 = vmatprep.subr.bf16.mxu0 %v15475_v9  ;;  %v3312_v17 = vpop.f32.mrf.mxu0  ;;  %v15530_v2 = vld [vmem:[#allocation9 + $0xa28] ss:$48 sps:$4 sm:$0xff]   ;;  %v15538_v3 = vld [vmem:[#allocation9 + $0x9cc] ss:$48 sps:$4 sm:$0xff]  }
 0x267   : > { %7136 = vmatprep.subr.bf16.mxu1 %v15472_v8  ;;  %v15541_v6 = vld [vmem:[#allocation9 + $0xccc] ss:$48 sps:$4 sm:$0xff]   ;;  %v15536_v8 = vld [vmem:[#allocation9 + $0x9c8] ss:$48 sps:$4 sm:$0xff]  }
 0x268   : > { %v15539_v9 = vld [vmem:[#allocation9 + $0xcc8] ss:$48 sps:$4 sm:$0xff]   ;;  %v15544_v12 = vld [vmem:[#allocation9 + $0x96c] ss:$48 sps:$4 sm:$0xff]  }
 0x269   : > { %7164 = vmatpush1.bf16.msra.mxu0 %v15473_v14  ;;  %v15542_v14 = vld [vmem:[#allocation9 + $0x968] ss:$48 sps:$4 sm:$0xff]   ;;  %v15553_v17 = vld [vmem:[#allocation9 + $0xc0c] ss:$48 sps:$4 sm:$0xff]  }
 0x26a   : > { %7137 = vmatpush2.bf16.msra.mxu1 %v15470_v13  ;;  %7165 = vmatprep.subr.bf16.mxu0 %v15481_v16  ;;  %v15547_v13 = vld [vmem:[#allocation9 + $0xc6c] ss:$48 sps:$4 sm:$0xff]  }
 0x26b   : > { %7138 = vmatprep.subr.bf16.mxu1 %v15478_v15  ;;  %v15545_v15 = vld [vmem:[#allocation9 + $0xc68] ss:$48 sps:$4 sm:$0xff]   ;;  %v15550_v16 = vld [vmem:[#allocation9 + $0x90c] ss:$48 sps:$4 sm:$0xff]  }
 0x26d   : > { %7166 = vmatpush1.bf16.msra.mxu0 %v15479_v18  ;;  %v17405_v18 = vsub.s32 5, %v17315_v50 }
 0x26e   : > { %7139 = vmatpush2.bf16.msra.mxu1 %v15476_v37  ;;  %7167 = vmatprep.subr.bf16.mxu0 %v15487_v55  ;;  %v17402_v37 = vsub.s32 4, %v17315_v50  ;;  %v15551_v55 = vld [vmem:[#allocation9 + $0xc08] ss:$48 sps:$4 sm:$0xff]  }
 0x26f   : > { %7140 = vmatprep.subr.bf16.mxu1 %v15484_v19  ;;  %18110 = vst [vmem:[#allocation28_spill] sm:$0xff] %v17405_v18  ;;  %v15548_v19 = vld [vmem:[#allocation9 + $0x908] ss:$48 sps:$4 sm:$0xff]  }
 0x270   : > { %18109 = vst [vmem:[#allocation27_spill] sm:$0xff] %v17402_v37 }
 0x271   : > { %7168 = vmatpush1.bf16.msra.mxu0 %v15485_v20  ;;  %v15559_v20 = vld [vmem:[#allocation9 + $0x2b4] ss:$48 sps:$4 sm:$0xff]  }
 0x272   : > { %7141 = vmatpush2.bf16.msra.mxu1 %v15482_v49  ;;  %7169 = vmatprep.subr.bf16.mxu0 %v15493_v22  ;;  %v15556_v49 = vld [vmem:[#allocation9 + $0x11ac] ss:$48 sps:$4 sm:$0xff]  }
 0x273   : > { %7142 = vmatprep.subr.bf16.mxu1 %v15490_v21  ;;  %v16670_v21 = vld [vmem:[#allocation7] sm:$0x3f] }
 0x274   : > { %v1617_v22 = vrot.slane %v16670_v21, %v17402_v37 }
 0x275   : > { %7170 = vmatpush1.bf16.msra.mxu0 %v15491_v24  ;;  %v15557_v24 = vld [vmem:[#allocation9 + $0x2b0] ss:$48 sps:$4 sm:$0xff]  }
 0x276   : > { %7143 = vmatpush2.bf16.msra.mxu1 %v15488_v23  ;;  %7171 = vmatprep.subr.bf16.mxu0 %v15499_v26  ;;  %v15554_v23 = vld [vmem:[#allocation9 + $0x11a8] ss:$48 sps:$4 sm:$0xff]   ;;  %v15562_v26 = vld [vmem:[#allocation9 + $0x114c] ss:$48 sps:$4 sm:$0xff]  }
 0x277   : > { %7144 = vmatprep.subr.bf16.mxu1 %v15496_v25  ;;  %v1621_v25 = vrot.slane %v16670_v21, %v17405_v18 }
 0x279   : > { %7172 = vmatpush1.bf16.msra.mxu0 %v15497_v29 }
 0x27a   : > { %7145 = vmatpush2.bf16.msra.mxu1 %v15494_v27  ;;  %7173 = vmatprep.subr.bf16.mxu0 %v15505_v31  ;;  %v15565_v27 = vld [vmem:[#allocation9 + $0x254] ss:$48 sps:$4 sm:$0xff]   ;;  %v15563_v31 = vld [vmem:[#allocation9 + $0x250] ss:$48 sps:$4 sm:$0xff]  }
 0x27b   : > { %7146 = vmatprep.subr.bf16.mxu1 %v15502_v30  ;;  %v15560_v30 = vld [vmem:[#allocation9 + $0x1148] ss:$48 sps:$4 sm:$0xff]  }
 0x27d   : > { %7174 = vmatpush1.bf16.msra.mxu0 %v15503_v33 }
 0x27e   : > { %7147 = vmatpush2.bf16.msra.mxu1 %v15500_v32  ;;  %7175 = vmatprep.subr.bf16.mxu0 %v15508_v36 }
 0x27f   : > { %7202 = vmatprep.subr.bf16.mxu1 %v15511_v7 }
 0x281   : > { %v17395_v43 = vpop.f32.mrf.mxu1  ;;  %7149 = vmatmul.mubr.bf16.vlgmr.msra.gmra.mxu1 %v17352_v34  ;;  %7176 = vmatpush2.bf16.msra.mxu0 %v15506_v38  ;;  %v15529_v34 = vld [vmem:[#allocation9 + $0xd8c] ss:$48 sps:$4 sm:$0xff]  }
 0x282   : > { %7203 = vmatpush1.bf16.msra.mxu1 %v15509_v39  ;;  %7177 = vmatprep.subr.bf16.mxu0 %v15514_v40  ;;  %v3349_v29 = vadd.f32 %v17395_v43, %v1617_v22  ;;  %v15568_v38 = vld [vmem:[#allocation9 + $0x10ec] ss:$48 sps:$4 sm:$0xff]   ;;  %v15571_v39 = vld [vmem:[#allocation9 + $0x1f4] ss:$48 sps:$4 sm:$0xff]  }
 0x283   : > { %v17398_v44 = vpop.f32.mrf.mxu1  ;;  %7204 = vmatprep.subr.bf16.mxu1 %v15517_v41  ;;  %7234 = vmatprep.mubr.bf16.mxu1 %v17355_v28  ;;  %v15533_v28 = vld [vmem:[#allocation9 + $0xd28] ss:$48 sps:$4 sm:$0xff]   ;;  %v15574_v43 = vld [vmem:[#allocation9 + $0x108c] ss:$48 sps:$4 sm:$0xff]  }
 0x284   : > { %v3351_v33 = vadd.f32 %v17398_v44, %v1621_v25  ;;  %v15566_v41 = vld [vmem:[#allocation9 + $0x10e8] ss:$48 sps:$4 sm:$0xff]   ;;  %v15577_v44 = vld [vmem:[#allocation9 + $0x194] ss:$48 sps:$4 sm:$0xff]  }
 0x285   : > { %v3352_v54 = vpop.f32.mrf.mxu1  ;;  %7178 = vmatpush2.bf16.msra.mxu0 %v15512_v42  ;;  %v15569_v42 = vld [vmem:[#allocation9 + $0x1f0] ss:$48 sps:$4 sm:$0xff]  }
 0x286   : > { %7205 = vmatpush1.bf16.msra.mxu1 %v15515_v5  ;;  %7179 = vmatprep.subr.bf16.mxu0 %v15520_v45  ;;  %v17417_v5 = vld [vmem:[%s17306_s28 + $0x4] ss:$24 sps:$4 sm:$0xff]  }
 0x287   : > { %v3353_v58 = vpop.f32.mrf.mxu1  ;;  %7206 = vmatprep.subr.bf16.mxu1 %v15523_v47  ;;  %v15572_v47 = vld [vmem:[#allocation9 + $0x1088] ss:$48 sps:$4 sm:$0xff]   ;;  %v15583_v54 = vld [vmem:[#allocation9 + $0x134] ss:$48 sps:$4 sm:$0xff]  }
 0x288   : > { %v15578_v58 = vld [vmem:[#allocation9 + $0x1028] ss:$48 sps:$4 sm:$0xff]  }
 0x289   : > { %7180 = vmatpush2.bf16.msra.mxu0 %v15518_v48  ;;  %v15575_v48 = vld [vmem:[#allocation9 + $0x190] ss:$48 sps:$4 sm:$0xff]  }
 0x28a   : > { %7207 = vmatpush1.bf16.msra.mxu1 %v15521_v51  ;;  %7181 = vmatprep.subr.bf16.mxu0 %v15526_v60  ;;  %v15580_v51 = vld [vmem:[#allocation9 + $0x102c] ss:$48 sps:$4 sm:$0xff]   ;;  %v15581_v60 = vld [vmem:[#allocation9 + $0x130] ss:$48 sps:$4 sm:$0xff]  }
 0x28b   : > { %7208 = vmatprep.subr.bf16.mxu1 %v15529_v34  ;;  %v15586_v34 = vld [vmem:[#allocation9 + $0xfcc] ss:$48 sps:$4 sm:$0xff]  }
 0x28d   : > { %7182 = vmatpush2.bf16.msra.mxu0 %v15524_v61  ;;  %v15589_v61 = vld [vmem:[#allocation9 + $0xd4] ss:$48 sps:$4 sm:$0xff]  }
 0x28e   : > { %7209 = vmatpush1.bf16.msra.mxu1 %v15527_v62  ;;  %7183 = vmatprep.subr.bf16.mxu0 %v15532_v35  ;;  %v15584_v62 = vld [vmem:[#allocation9 + $0xfc8] ss:$48 sps:$4 sm:$0xff]   ;;  %v15587_v35 = vld [vmem:[#allocation9 + $0xd0] ss:$48 sps:$4 sm:$0xff]  }
 0x28f   : > { %7210 = vmatprep.subr.bf16.mxu1 %v15535_v63  ;;  %v15592_v63 = vld [vmem:[#allocation9 + $0xf6c] ss:$48 sps:$4 sm:$0xff]  }
 0x291   : > { %7184 = vmatpush2.bf16.msra.mxu0 %v15530_v2  ;;  %v15595_v2 = vld [vmem:[#allocation9 + $0x74] ss:$48 sps:$4 sm:$0xff]  }
 0x292   : > { %7211 = vmatpush1.bf16.msra.mxu1 %v15533_v28  ;;  %7185 = vmatprep.subr.bf16.mxu0 %v15538_v3  ;;  %v15590_v28 = vld [vmem:[#allocation9 + $0xf68] ss:$48 sps:$4 sm:$0xff]   ;;  %v15593_v3 = vld [vmem:[#allocation9 + $0x70] ss:$48 sps:$4 sm:$0xff]  }
 0x293   : > { %7212 = vmatprep.subr.bf16.mxu1 %v15541_v6  ;;  %v15598_v6 = vld [vmem:[#allocation9 + $0xf0c] ss:$48 sps:$4 sm:$0xff]  }
 0x295   : > { %7186 = vmatpush2.bf16.msra.mxu0 %v15536_v8  ;;  %v15601_v8 = vld [vmem:[#allocation9 + $0x14] ss:$48 sps:$4 sm:$0xff]  }
 0x296   : > { %7213 = vmatpush1.bf16.msra.mxu1 %v15539_v9  ;;  %7187 = vmatprep.subr.bf16.mxu0 %v15544_v12  ;;  %v15596_v9 = vld [vmem:[#allocation9 + $0xf08] ss:$48 sps:$4 sm:$0xff]   ;;  %v15599_v12 = vld [vmem:[#allocation9 + $0x10] ss:$48 sps:$4 sm:$0xff]  }
 0x297   : > { %7214 = vmatprep.subr.bf16.mxu1 %v15547_v13  ;;  %v15604_v13 = vld [vmem:[#allocation9 + $0x5b4] ss:$48 sps:$4 sm:$0xff]  }
 0x299   : > { %7188 = vmatpush2.bf16.msra.mxu0 %v15542_v14  ;;  %v15607_v14 = vld [vmem:[#allocation9 + $0x8b4] ss:$48 sps:$4 sm:$0xff]  }
 0x29a   : > { %7215 = vmatpush1.bf16.msra.mxu1 %v15545_v15  ;;  %7189 = vmatprep.subr.bf16.mxu0 %v15550_v16  ;;  %v15602_v15 = vld [vmem:[#allocation9 + $0x5b0] ss:$48 sps:$4 sm:$0xff]  }
 0x29b   : > { %7216 = vmatprep.subr.bf16.mxu1 %v15553_v17  ;;  %v15605_v16 = vld [vmem:[#allocation9 + $0x8b0] ss:$48 sps:$4 sm:$0xff]   ;;  %v15610_v17 = vld [vmem:[#allocation9 + $0x554] ss:$48 sps:$4 sm:$0xff]  }
 0x29d   : > { %7190 = vmatpush2.bf16.msra.mxu0 %v15548_v19  ;;  %v15613_v19 = vld [vmem:[#allocation9 + $0x854] ss:$48 sps:$4 sm:$0xff]  }
 0x29e   : > { %7217 = vmatpush1.bf16.msra.mxu1 %v15551_v55  ;;  %7245 = vmatprep.subr.bf16.mxu0 %v15559_v20  ;;  %v15608_v55 = vld [vmem:[#allocation9 + $0x550] ss:$48 sps:$4 sm:$0xff]  }
 0x29f   : > { %7218 = vmatprep.subr.bf16.mxu1 %v15556_v49  ;;  %v15611_v49 = vld [vmem:[#allocation9 + $0x850] ss:$48 sps:$4 sm:$0xff]  }
 0x2a0   : > { %v3389_v32 = vpop.f32.mrf.mxu0  ;;  %7192 = vmatmul.mubr.bf16.vlgmr.msra.gmra.mxu0 %v17372_v4 }
 0x2a1   : > { %v17412_v36 = vadd.f32 %v3389_v32, %v3349_v29  ;;  %7246 = vmatpush1.bf16.msra.mxu0 %v15557_v24  ;;  %7277 = vmatprep.mubr.bf16.mxu0 %v17417_v5  ;;  %v15619_v24 = vld [vmem:[#allocation9 + $0x7f4] ss:$48 sps:$4 sm:$0xff]  }
 0x2a2   : > { %7219 = vmatpush2.bf16.msra.mxu1 %v15554_v23  ;;  %v3391_v7 = vpop.f32.mrf.mxu0  ;;  %7247 = vmatprep.subr.bf16.mxu0 %v15565_v27  ;;  %v15616_v23 = vld [vmem:[#allocation9 + $0x4f4] ss:$48 sps:$4 sm:$0xff]   ;;  %v15617_v27 = vld [vmem:[#allocation9 + $0x7f0] ss:$48 sps:$4 sm:$0xff]  }
 0x2a3   : > { %7220 = vmatprep.subr.bf16.mxu1 %v15562_v26  ;;  %v17414_v40 = vadd.f32 %v3391_v7, %v3351_v33  ;;  %v15614_v26 = vld [vmem:[#allocation9 + $0x4f0] ss:$48 sps:$4 sm:$0xff]   ;;  %v17428_v29 = vld [vmem:[%s17306_s28 + $0xc] ss:$24 sps:$4 sm:$0xff]  }
 0x2a4   : > { %v3393_v4 = vpop.f32.mrf.mxu0  ;;  %v15625_v32 = vld [vmem:[#allocation9 + $0x794] ss:$48 sps:$4 sm:$0xff]   ;;  %v15620_v33 = vld [vmem:[#allocation9 + $0x490] ss:$48 sps:$4 sm:$0xff]  }
 0x2a5   : > { %7248 = vmatpush1.bf16.msra.mxu0 %v15563_v31  ;;  %v15622_v31 = vld [vmem:[#allocation9 + $0x494] ss:$48 sps:$4 sm:$0xff]   ;;  %v15632_v4 = vld [vmem:[#allocation9 + $0x3d0] ss:$48 sps:$4 sm:$0xff]  }
 0x2a6   : > { %7221 = vmatpush2.bf16.msra.mxu1 %v15560_v30  ;;  %7249 = vmatprep.subr.bf16.mxu0 %v15571_v39  ;;  %v3394_v45 = vpop.f32.mrf.mxu0  ;;  %v15628_v7 = vld [vmem:[#allocation9 + $0x434] ss:$48 sps:$4 sm:$0xff]   ;;  %v15626_v39 = vld [vmem:[#allocation9 + $0x430] ss:$48 sps:$4 sm:$0xff]  }
 0x2a7   : > { %7222 = vmatprep.subr.bf16.mxu1 %v15568_v38  ;;  %v15631_v38 = vld [vmem:[#allocation9 + $0x734] ss:$48 sps:$4 sm:$0xff]  }
 0x2a8   : > { %v15643_v45 = vld [vmem:[#allocation9 + $0x674] ss:$48 sps:$4 sm:$0xff]  }
 0x2a9   : > { %7250 = vmatpush1.bf16.msra.mxu0 %v15569_v42  ;;  %v15637_v42 = vld [vmem:[#allocation9 + $0x6d4] ss:$48 sps:$4 sm:$0xff]  }
 0x2aa   : > { %7223 = vmatpush2.bf16.msra.mxu1 %v15566_v41  ;;  %7251 = vmatprep.subr.bf16.mxu0 %v15577_v44  ;;  %v15634_v41 = vld [vmem:[#allocation9 + $0x3d4] ss:$48 sps:$4 sm:$0xff]  }
 0x2ab   : > { %7224 = vmatprep.subr.bf16.mxu1 %v15574_v43  ;;  %v15635_v43 = vld [vmem:[#allocation9 + $0x6d0] ss:$48 sps:$4 sm:$0xff]   ;;  %v15640_v44 = vld [vmem:[#allocation9 + $0x374] ss:$48 sps:$4 sm:$0xff]  }
 0x2ad   : > { %7252 = vmatpush1.bf16.msra.mxu0 %v15575_v48  ;;  %v15641_v48 = vld [vmem:[#allocation9 + $0x670] ss:$48 sps:$4 sm:$0xff]  }
 0x2ae   : > { %7225 = vmatpush2.bf16.msra.mxu1 %v15572_v47  ;;  %7253 = vmatprep.subr.bf16.mxu0 %v15583_v54  ;;  %v15638_v47 = vld [vmem:[#allocation9 + $0x370] ss:$48 sps:$4 sm:$0xff]   ;;  %v15649_v54 = vld [vmem:[#allocation9 + $0x614] ss:$48 sps:$4 sm:$0xff]  }
 0x2af   : > { %7226 = vmatprep.subr.bf16.mxu1 %v15580_v51  ;;  %v15646_v51 = vld [vmem:[#allocation9 + $0x314] ss:$48 sps:$4 sm:$0xff]  }
 0x2b1   : > { %7254 = vmatpush1.bf16.msra.mxu0 %v15581_v60  ;;  %v15647_v60 = vld [vmem:[#allocation9 + $0x610] ss:$48 sps:$4 sm:$0xff]  }
 0x2b2   : > { %7227 = vmatpush2.bf16.msra.mxu1 %v15578_v58  ;;  %7255 = vmatprep.subr.bf16.mxu0 %v15589_v61  ;;  %v15644_v58 = vld [vmem:[#allocation9 + $0x310] ss:$48 sps:$4 sm:$0xff]   ;;  %v15655_v61 = vld [vmem:[#allocation9 + $0xeb4] ss:$48 sps:$4 sm:$0xff]  }
 0x2b3   : > { %7228 = vmatprep.subr.bf16.mxu1 %v15586_v34  ;;  %v15652_v34 = vld [vmem:[#allocation9 + $0xbb4] ss:$48 sps:$4 sm:$0xff]  }
 0x2b5   : > { %7256 = vmatpush1.bf16.msra.mxu0 %v15587_v35  ;;  %v15653_v35 = vld [vmem:[#allocation9 + $0xeb0] ss:$48 sps:$4 sm:$0xff]  }
 0x2b6   : > { %7229 = vmatpush2.bf16.msra.mxu1 %v15584_v62  ;;  %7257 = vmatprep.subr.bf16.mxu0 %v15595_v2  ;;  %v15650_v62 = vld [vmem:[#allocation9 + $0xbb0] ss:$48 sps:$4 sm:$0xff]   ;;  %v15661_v2 = vld [vmem:[#allocation9 + $0xe54] ss:$48 sps:$4 sm:$0xff]  }
 0x2b7   : > { %7230 = vmatprep.subr.bf16.mxu1 %v15592_v63  ;;  %v15658_v63 = vld [vmem:[#allocation9 + $0xb54] ss:$48 sps:$4 sm:$0xff]  }
 0x2b9   : > { %7258 = vmatpush1.bf16.msra.mxu0 %v15593_v3  ;;  %v15659_v3 = vld [vmem:[#allocation9 + $0xe50] ss:$48 sps:$4 sm:$0xff]  }
 0x2ba   : > { %7231 = vmatpush2.bf16.msra.mxu1 %v15590_v28  ;;  %7259 = vmatprep.subr.bf16.mxu0 %v15601_v8  ;;  %v15656_v28 = vld [vmem:[#allocation9 + $0xb50] ss:$48 sps:$4 sm:$0xff]   ;;  %v15664_v8 = vld [vmem:[#allocation9 + $0xaf4] ss:$48 sps:$4 sm:$0xff]  }
 0x2bb   : > { %7232 = vmatprep.subr.bf16.mxu1 %v15598_v6  ;;  %v17432_v6 = vld [vmem:[%s17306_s28] ss:$24 sps:$4 sm:$0xff]  }
 0x2bd   : > { %7260 = vmatpush1.bf16.msra.mxu0 %v15599_v12  ;;  %v15662_v12 = vld [vmem:[#allocation9 + $0xaf0] ss:$48 sps:$4 sm:$0xff]  }
 0x2be   : > { %7233 = vmatpush2.bf16.msra.mxu1 %v15596_v9  ;;  %7261 = vmatprep.subr.bf16.mxu0 %v15604_v13  ;;  %v15667_v9 = vld [vmem:[#allocation9 + $0xdf4] ss:$48 sps:$4 sm:$0xff]   ;;  %v15665_v13 = vld [vmem:[#allocation9 + $0xdf0] ss:$48 sps:$4 sm:$0xff]  }
 0x2bf   : > { %7288 = vmatprep.subr.bf16.mxu1 %v15607_v14  ;;  %v17436_v14 = vld [vmem:[%s17306_s28 + $0x14] ss:$24 sps:$4 sm:$0xff]  }
 0x2c1   : > { %v3430_v20 = vpop.f32.mrf.mxu1  ;;  %7235 = vmatmul.mubr.bf16.vlgmr.msra.gmra.mxu1 %v17385_v53  ;;  %7262 = vmatpush2.bf16.msra.mxu0 %v15602_v15  ;;  %v15670_v15 = vld [vmem:[#allocation9 + $0xa94] ss:$48 sps:$4 sm:$0xff]  }
 0x2c2   : > { %v17422_v21 = vadd.f32 %v3430_v20, %v17412_v36  ;;  %7289 = vmatpush1.bf16.msra.mxu1 %v15605_v16  ;;  %7263 = vmatprep.subr.bf16.mxu0 %v15610_v17  ;;  %v15623_v36 = vld [vmem:[#allocation9 + $0x790] ss:$48 sps:$4 sm:$0xff]   ;;  %v15673_v16 = vld [vmem:[#allocation9 + $0xd94] ss:$48 sps:$4 sm:$0xff]  }
 0x2c3   : > { %v3432_v22 = vpop.f32.mrf.mxu1  ;;  %7290 = vmatprep.subr.bf16.mxu1 %v15613_v19  ;;  %7320 = vmatprep.mubr.bf16.mxu1 %v17428_v29  ;;  %v15668_v17 = vld [vmem:[#allocation9 + $0xa90] ss:$48 sps:$4 sm:$0xff]  }
 0x2c4   : > { %18111 = vst [vmem:[#allocation29_spill] sm:$0xff] %v17422_v21  ;;  %v17425_v25 = vadd.f32 %v3432_v22, %v17414_v40  ;;  %v15629_v40 = vld [vmem:[#allocation9 + $0x730] ss:$48 sps:$4 sm:$0xff]  }
 0x2c5   : > { %v3434_v53 = vpop.f32.mrf.mxu1  ;;  %7264 = vmatpush2.bf16.msra.mxu0 %v15608_v55  ;;  %v15671_v19 = vld [vmem:[#allocation9 + $0xd90] ss:$48 sps:$4 sm:$0xff]   ;;  %v15676_v55 = vld [vmem:[#allocation9 + $0xa34] ss:$48 sps:$4 sm:$0xff]  }
 0x2c6   : > { %18112 = vst [vmem:[#allocation30_spill] sm:$0xff] %v17425_v25  ;;  %7291 = vmatpush1.bf16.msra.mxu1 %v15611_v49  ;;  %7265 = vmatprep.subr.bf16.mxu0 %v15616_v23  ;;  %v15679_v49 = vld [vmem:[#allocation9 + $0xd34] ss:$48 sps:$4 sm:$0xff]   ;;  %v15674_v20 = vld [vmem:[#allocation9 + $0xa30] ss:$48 sps:$4 sm:$0xff]  }
 0x2c7   : > { %v3435_v30 = vpop.f32.mrf.mxu1  ;;  %7292 = vmatprep.subr.bf16.mxu1 %v15619_v24  ;;  %v15677_v22 = vld [vmem:[#allocation9 + $0xd30] ss:$48 sps:$4 sm:$0xff]   ;;  %v15682_v23 = vld [vmem:[#allocation9 + $0x9d4] ss:$48 sps:$4 sm:$0xff]  }
 0x2c8   : > { %v15685_v24 = vld [vmem:[#allocation9 + $0xcd4] ss:$48 sps:$4 sm:$0xff]  }
 0x2c9   : > { %7266 = vmatpush2.bf16.msra.mxu0 %v15614_v26  ;;  %v15680_v26 = vld [vmem:[#allocation9 + $0x9d0] ss:$48 sps:$4 sm:$0xff]   ;;  %v15688_v53 = vld [vmem:[#allocation9 + $0x974] ss:$48 sps:$4 sm:$0xff]  }
 0x2ca   : > { %7293 = vmatpush1.bf16.msra.mxu1 %v15617_v27  ;;  %7267 = vmatprep.subr.bf16.mxu0 %v15622_v31  ;;  %v15683_v27 = vld [vmem:[#allocation9 + $0xcd0] ss:$48 sps:$4 sm:$0xff]   ;;  %v15691_v30 = vld [vmem:[#allocation9 + $0xc74] ss:$48 sps:$4 sm:$0xff]  }
 0x2cb   : > { %7294 = vmatprep.subr.bf16.mxu1 %v15625_v32  ;;  %v15686_v31 = vld [vmem:[#allocation9 + $0x970] ss:$48 sps:$4 sm:$0xff]  }
 0x2cc   : > { %v15689_v32 = vld [vmem:[#allocation9 + $0xc70] ss:$48 sps:$4 sm:$0xff]  }
 0x2cd   : > { %7268 = vmatpush2.bf16.msra.mxu0 %v15620_v33  ;;  %v15694_v33 = vld [vmem:[#allocation9 + $0x914] ss:$48 sps:$4 sm:$0xff]  }
 0x2ce   : > { %7295 = vmatpush1.bf16.msra.mxu1 %v15623_v36  ;;  %7269 = vmatprep.subr.bf16.mxu0 %v15628_v7  ;;  %v15697_v36 = vld [vmem:[#allocation9 + $0xc14] ss:$48 sps:$4 sm:$0xff]   ;;  %v15692_v7 = vld [vmem:[#allocation9 + $0x910] ss:$48 sps:$4 sm:$0xff]  }
 0x2cf   : > { %7296 = vmatprep.subr.bf16.mxu1 %v15631_v38  ;;  %v15695_v38 = vld [vmem:[#allocation9 + $0xc10] ss:$48 sps:$4 sm:$0xff]  }
 0x2d1   : > { %7270 = vmatpush2.bf16.msra.mxu0 %v15626_v39  ;;  %v15700_v39 = vld [vmem:[#allocation9 + $0x11b4] ss:$48 sps:$4 sm:$0xff]  }
 0x2d2   : > { %7297 = vmatpush1.bf16.msra.mxu1 %v15629_v40  ;;  %7271 = vmatprep.subr.bf16.mxu0 %v15634_v41  ;;  %v15703_v40 = vld [vmem:[#allocation9 + $0x2bc] ss:$48 sps:$4 sm:$0xff]   ;;  %v15698_v41 = vld [vmem:[#allocation9 + $0x11b0] ss:$48 sps:$4 sm:$0xff]  }
 0x2d3   : > { %7298 = vmatprep.subr.bf16.mxu1 %v15637_v42  ;;  %v15701_v42 = vld [vmem:[#allocation9 + $0x2b8] ss:$48 sps:$4 sm:$0xff]  }
 0x2d5   : > { %7272 = vmatpush2.bf16.msra.mxu0 %v15632_v4  ;;  %v15706_v4 = vld [vmem:[#allocation9 + $0x1154] ss:$48 sps:$4 sm:$0xff]  }
 0x2d6   : > { %7299 = vmatpush1.bf16.msra.mxu1 %v15635_v43  ;;  %7273 = vmatprep.subr.bf16.mxu0 %v15640_v44  ;;  %v15709_v43 = vld [vmem:[#allocation9 + $0x25c] ss:$48 sps:$4 sm:$0xff]   ;;  %v15704_v44 = vld [vmem:[#allocation9 + $0x1150] ss:$48 sps:$4 sm:$0xff]  }
 0x2d7   : > { %7300 = vmatprep.subr.bf16.mxu1 %v15643_v45  ;;  %v15707_v45 = vld [vmem:[#allocation9 + $0x258] ss:$48 sps:$4 sm:$0xff]  }
 0x2d9   : > { %7274 = vmatpush2.bf16.msra.mxu0 %v15638_v47  ;;  %v17440_v47 = vld [vmem:[%s17306_s28 + $0x8] ss:$24 sps:$4 sm:$0xff]  }
 0x2da   : > { %7301 = vmatpush1.bf16.msra.mxu1 %v15641_v48  ;;  %7275 = vmatprep.subr.bf16.mxu0 %v15646_v51  ;;  %v15712_v48 = vld [vmem:[#allocation9 + $0x10f4] ss:$48 sps:$4 sm:$0xff]   ;;  %v15715_v51 = vld [vmem:[#allocation9 + $0x1fc] ss:$48 sps:$4 sm:$0xff]  }
 0x2db   : > { %7302 = vmatprep.subr.bf16.mxu1 %v15649_v54  ;;  %v15710_v54 = vld [vmem:[#allocation9 + $0x10f0] ss:$48 sps:$4 sm:$0xff]  }
 0x2dd   : > { %7276 = vmatpush2.bf16.msra.mxu0 %v15644_v58  ;;  %v15713_v58 = vld [vmem:[#allocation9 + $0x1f8] ss:$48 sps:$4 sm:$0xff]  }
 0x2de   : > { %7303 = vmatpush1.bf16.msra.mxu1 %v15647_v60  ;;  %7331 = vmatprep.subr.bf16.mxu0 %v15655_v61  ;;  %v15718_v60 = vld [vmem:[#allocation9 + $0x1094] ss:$48 sps:$4 sm:$0xff]   ;;  %v15716_v61 = vld [vmem:[#allocation9 + $0x1090] ss:$48 sps:$4 sm:$0xff]  }
 0x2df   : > { %7304 = vmatprep.subr.bf16.mxu1 %v15652_v34  ;;  %v15721_v34 = vld [vmem:[#allocation9 + $0x19c] ss:$48 sps:$4 sm:$0xff]  }
 0x2e0   : > { %7278 = vmatmul.mubr.bf16.vlgmr.msra.gmra.mxu0 %v17432_v6 }
 0x2e1   : > { %7332 = vmatpush1.bf16.msra.mxu0 %v15653_v35  ;;  %7363 = vmatprep.mubr.bf16.mxu0 %v17436_v14  ;;  %v15724_v35 = vld [vmem:[#allocation9 + $0x1034] ss:$48 sps:$4 sm:$0xff]  }
 0x2e2   : > { %7305 = vmatpush2.bf16.msra.mxu1 %v15650_v62  ;;  %7333 = vmatprep.subr.bf16.mxu0 %v15661_v2  ;;  %v15719_v62 = vld [vmem:[#allocation9 + $0x198] ss:$48 sps:$4 sm:$0xff]   ;;  %v15722_v2 = vld [vmem:[#allocation9 + $0x1030] ss:$48 sps:$4 sm:$0xff]  }
 0x2e3   : > { %7306 = vmatprep.subr.bf16.mxu1 %v15658_v63  ;;  %v15727_v63 = vld [vmem:[#allocation9 + $0x13c] ss:$48 sps:$4 sm:$0xff]  }
 0x2e5   : > { %7334 = vmatpush1.bf16.msra.mxu0 %v15659_v3  ;;  %v15733_v3 = vld [vmem:[#allocation9 + $0xdc] ss:$48 sps:$4 sm:$0xff]  }
 0x2e6   : > { %7307 = vmatpush2.bf16.msra.mxu1 %v15656_v28  ;;  %7335 = vmatprep.subr.bf16.mxu0 %v15667_v9  ;;  %v15725_v28 = vld [vmem:[#allocation9 + $0x138] ss:$48 sps:$4 sm:$0xff]  }
 0x2e7   : > { %7308 = vmatprep.subr.bf16.mxu1 %v15664_v8  ;;  %v15728_v8 = vld [vmem:[#allocation9 + $0xfd0] ss:$48 sps:$4 sm:$0xff]   ;;  %v15731_v9 = vld [vmem:[#allocation9 + $0xd8] ss:$48 sps:$4 sm:$0xff]  }
 0x2e9   : > { %7336 = vmatpush1.bf16.msra.mxu0 %v15665_v13  ;;  %v15739_v13 = vld [vmem:[#allocation9 + $0x7c] ss:$48 sps:$4 sm:$0xff]  }
 0x2ea   : > { %7309 = vmatpush2.bf16.msra.mxu1 %v15662_v12  ;;  %7337 = vmatprep.subr.bf16.mxu0 %v15673_v16  ;;  %v15736_v12 = vld [vmem:[#allocation9 + $0xf74] ss:$48 sps:$4 sm:$0xff]   ;;  %v15737_v16 = vld [vmem:[#allocation9 + $0x78] ss:$48 sps:$4 sm:$0xff]  }
 0x2eb   : > { %7310 = vmatprep.subr.bf16.mxu1 %v15670_v15  ;;  %v15734_v15 = vld [vmem:[#allocation9 + $0xf70] ss:$48 sps:$4 sm:$0xff]  }
 0x2ed   : > { %7338 = vmatpush1.bf16.msra.mxu0 %v15671_v19  ;;  %v15745_v19 = vld [vmem:[#allocation9 + $0x1c] ss:$48 sps:$4 sm:$0xff]  }
 0x2ee   : > { %7311 = vmatpush2.bf16.msra.mxu1 %v15668_v17  ;;  %7339 = vmatprep.subr.bf16.mxu0 %v15679_v49  ;;  %v15742_v17 = vld [vmem:[#allocation9 + $0xf14] ss:$48 sps:$4 sm:$0xff]   ;;  %v15743_v49 = vld [vmem:[#allocation9 + $0x18] ss:$48 sps:$4 sm:$0xff]  }
 0x2ef   : > { %7312 = vmatprep.subr.bf16.mxu1 %v15676_v55  ;;  %v15740_v55 = vld [vmem:[#allocation9 + $0xf10] ss:$48 sps:$4 sm:$0xff]  }
 0x2f1   : > { %7340 = vmatpush1.bf16.msra.mxu0 %v15677_v22  ;;  %v15751_v22 = vld [vmem:[#allocation9 + $0x8bc] ss:$48 sps:$4 sm:$0xff]  }
 0x2f2   : > { %7313 = vmatpush2.bf16.msra.mxu1 %v15674_v20  ;;  %7341 = vmatprep.subr.bf16.mxu0 %v15685_v24  ;;  %v15748_v20 = vld [vmem:[#allocation9 + $0x5bc] ss:$48 sps:$4 sm:$0xff]   ;;  %v15749_v24 = vld [vmem:[#allocation9 + $0x8b8] ss:$48 sps:$4 sm:$0xff]  }
 0x2f3   : > { %7314 = vmatprep.subr.bf16.mxu1 %v15682_v23  ;;  %v15746_v23 = vld [vmem:[#allocation9 + $0x5b8] ss:$48 sps:$4 sm:$0xff]  }
 0x2f5   : > { %7342 = vmatpush1.bf16.msra.mxu0 %v15683_v27  ;;  %v15757_v27 = vld [vmem:[#allocation9 + $0x85c] ss:$48 sps:$4 sm:$0xff]  }
 0x2f6   : > { %7315 = vmatpush2.bf16.msra.mxu1 %v15680_v26  ;;  %7343 = vmatprep.subr.bf16.mxu0 %v15691_v30  ;;  %v15754_v26 = vld [vmem:[#allocation9 + $0x55c] ss:$48 sps:$4 sm:$0xff]   ;;  %v15752_v30 = vld [vmem:[#allocation9 + $0x558] ss:$48 sps:$4 sm:$0xff]  }
 0x2f7   : > { %7316 = vmatprep.subr.bf16.mxu1 %v15688_v53  ;;  %v17445_v53 = vld [vmem:[%s17306_s28 + $0x10] ss:$24 sps:$4 sm:$0xff]  }
 0x2f9   : > { %7344 = vmatpush1.bf16.msra.mxu0 %v15689_v32  ;;  %v15760_v32 = vld [vmem:[#allocation9 + $0x4fc] ss:$48 sps:$4 sm:$0xff]  }
 0x2fa   : > { %7317 = vmatpush2.bf16.msra.mxu1 %v15686_v31  ;;  %7345 = vmatprep.subr.bf16.mxu0 %v15697_v36  ;;  %v15755_v31 = vld [vmem:[#allocation9 + $0x858] ss:$48 sps:$4 sm:$0xff]  }
 0x2fb   : > { %7318 = vmatprep.subr.bf16.mxu1 %v15694_v33  ;;  %v15763_v33 = vld [vmem:[#allocation9 + $0x7fc] ss:$48 sps:$4 sm:$0xff]   ;;  %v15758_v36 = vld [vmem:[#allocation9 + $0x4f8] ss:$48 sps:$4 sm:$0xff]  }
 0x2fd   : > { %7346 = vmatpush1.bf16.msra.mxu0 %v15695_v38  ;;  %v15766_v38 = vld [vmem:[#allocation9 + $0x49c] ss:$48 sps:$4 sm:$0xff]  }
 0x2fe   : > { %7319 = vmatpush2.bf16.msra.mxu1 %v15692_v7  ;;  %7347 = vmatprep.subr.bf16.mxu0 %v15700_v39  ;;  %v15761_v7 = vld [vmem:[#allocation9 + $0x7f8] ss:$48 sps:$4 sm:$0xff]   ;;  %v15769_v39 = vld [vmem:[#allocation9 + $0x79c] ss:$48 sps:$4 sm:$0xff]  }
 0x2ff   : > { %7374 = vmatprep.subr.bf16.mxu1 %v15703_v40  ;;  %v15764_v40 = vld [vmem:[#allocation9 + $0x498] ss:$48 sps:$4 sm:$0xff]  }
 0x301   : > { %7321 = vmatmul.mubr.bf16.vlgmr.msra.gmra.mxu1 %v17440_v47  ;;  %7348 = vmatpush2.bf16.msra.mxu0 %v15698_v41  ;;  %v15767_v41 = vld [vmem:[#allocation9 + $0x798] ss:$48 sps:$4 sm:$0xff]  }
 0x302   : > { %7375 = vmatpush1.bf16.msra.mxu1 %v15701_v42  ;;  %7349 = vmatprep.subr.bf16.mxu0 %v15706_v4  ;;  %v15772_v42 = vld [vmem:[#allocation9 + $0x43c] ss:$48 sps:$4 sm:$0xff]  }
 0x303   : > { %7376 = vmatprep.subr.bf16.mxu1 %v15709_v43  ;;  %7406 = vmatprep.mubr.bf16.mxu1 %v17417_v5  ;;  %v15730_v5 = vld [vmem:[#allocation9 + $0xfd4] ss:$48 sps:$4 sm:$0xff]   ;;  %v15775_v4 = vld [vmem:[#allocation9 + $0x73c] ss:$48 sps:$4 sm:$0xff]   ;;  %v15770_v43 = vld [vmem:[#allocation9 + $0x438] ss:$48 sps:$4 sm:$0xff]  }
 0x305   : > { %7350 = vmatpush2.bf16.msra.mxu0 %v15704_v44  ;;  %v15778_v44 = vld [vmem:[#allocation9 + $0x3dc] ss:$48 sps:$4 sm:$0xff]  }
 0x306   : > { %7377 = vmatpush1.bf16.msra.mxu1 %v15707_v45  ;;  %7351 = vmatprep.subr.bf16.mxu0 %v15712_v48  ;;  %v15781_v45 = vld [vmem:[#allocation9 + $0x6dc] ss:$48 sps:$4 sm:$0xff]   ;;  %v15776_v48 = vld [vmem:[#allocation9 + $0x3d8] ss:$48 sps:$4 sm:$0xff]  }
 0x307   : > { %7378 = vmatprep.subr.bf16.mxu1 %v15715_v51  ;;  %v15779_v51 = vld [vmem:[#allocation9 + $0x6d8] ss:$48 sps:$4 sm:$0xff]  }
 0x309   : > { %7352 = vmatpush2.bf16.msra.mxu0 %v15710_v54  ;;  %v15784_v54 = vld [vmem:[#allocation9 + $0x37c] ss:$48 sps:$4 sm:$0xff]  }
 0x30a   : > { %7379 = vmatpush1.bf16.msra.mxu1 %v15713_v58  ;;  %7353 = vmatprep.subr.bf16.mxu0 %v15718_v60  ;;  %v15787_v58 = vld [vmem:[#allocation9 + $0x67c] ss:$48 sps:$4 sm:$0xff]   ;;  %v15782_v60 = vld [vmem:[#allocation9 + $0x378] ss:$48 sps:$4 sm:$0xff]  }
 0x30b   : > { %7380 = vmatprep.subr.bf16.mxu1 %v15721_v34  ;;  %v15785_v34 = vld [vmem:[#allocation9 + $0x678] ss:$48 sps:$4 sm:$0xff]  }
 0x30d   : > { %7354 = vmatpush2.bf16.msra.mxu0 %v15716_v61  ;;  %v15790_v61 = vld [vmem:[#allocation9 + $0x31c] ss:$48 sps:$4 sm:$0xff]  }
 0x30e   : > { %7381 = vmatpush1.bf16.msra.mxu1 %v15719_v62  ;;  %7355 = vmatprep.subr.bf16.mxu0 %v15724_v35  ;;  %v15793_v62 = vld [vmem:[#allocation9 + $0x61c] ss:$48 sps:$4 sm:$0xff]   ;;  %v15788_v35 = vld [vmem:[#allocation9 + $0x318] ss:$48 sps:$4 sm:$0xff]  }
 0x30f   : > { %7382 = vmatprep.subr.bf16.mxu1 %v15727_v63  ;;  %v15791_v63 = vld [vmem:[#allocation9 + $0x618] ss:$48 sps:$4 sm:$0xff]  }
 0x311   : > { %7356 = vmatpush2.bf16.msra.mxu0 %v15722_v2  ;;  %v15796_v2 = vld [vmem:[#allocation9 + $0xbbc] ss:$48 sps:$4 sm:$0xff]  }
 0x312   : > { %7383 = vmatpush1.bf16.msra.mxu1 %v15725_v28  ;;  %7357 = vmatprep.subr.bf16.mxu0 %v15730_v5  ;;  %v15799_v28 = vld [vmem:[#allocation9 + $0xebc] ss:$48 sps:$4 sm:$0xff]   ;;  %v15794_v5 = vld [vmem:[#allocation9 + $0xbb8] ss:$48 sps:$4 sm:$0xff]  }
 0x313   : > { %7384 = vmatprep.subr.bf16.mxu1 %v15733_v3  ;;  %v15797_v3 = vld [vmem:[#allocation9 + $0xeb8] ss:$48 sps:$4 sm:$0xff]  }
 0x315   : > { %7358 = vmatpush2.bf16.msra.mxu0 %v15728_v8  ;;  %v15802_v8 = vld [vmem:[#allocation9 + $0xb5c] ss:$48 sps:$4 sm:$0xff]  }
 0x316   : > { %7385 = vmatpush1.bf16.msra.mxu1 %v15731_v9  ;;  %7359 = vmatprep.subr.bf16.mxu0 %v15736_v12  ;;  %v15805_v9 = vld [vmem:[#allocation9 + $0xe5c] ss:$48 sps:$4 sm:$0xff]   ;;  %v15800_v12 = vld [vmem:[#allocation9 + $0xb58] ss:$48 sps:$4 sm:$0xff]  }
 0x317   : > { %7386 = vmatprep.subr.bf16.mxu1 %v15739_v13  ;;  %v15803_v13 = vld [vmem:[#allocation9 + $0xe58] ss:$48 sps:$4 sm:$0xff]  }
 0x319   : > { %7360 = vmatpush2.bf16.msra.mxu0 %v15734_v15  ;;  %v15808_v15 = vld [vmem:[#allocation9 + $0xafc] ss:$48 sps:$4 sm:$0xff]  }
 0x31a   : > { %7387 = vmatpush1.bf16.msra.mxu1 %v15737_v16  ;;  %7361 = vmatprep.subr.bf16.mxu0 %v15742_v17  ;;  %v15811_v16 = vld [vmem:[#allocation9 + $0xdfc] ss:$48 sps:$4 sm:$0xff]   ;;  %v15806_v17 = vld [vmem:[#allocation9 + $0xaf8] ss:$48 sps:$4 sm:$0xff]  }
 0x31b   : > { %7388 = vmatprep.subr.bf16.mxu1 %v15745_v19  ;;  %v15809_v19 = vld [vmem:[#allocation9 + $0xdf8] ss:$48 sps:$4 sm:$0xff]  }
 0x31d   : > { %7362 = vmatpush2.bf16.msra.mxu0 %v15740_v55  ;;  %v15814_v55 = vld [vmem:[#allocation9 + $0xa9c] ss:$48 sps:$4 sm:$0xff]  }
 0x31e   : > { %7389 = vmatpush1.bf16.msra.mxu1 %v15743_v49  ;;  %7417 = vmatprep.subr.bf16.mxu0 %v15751_v22  ;;  %v15817_v49 = vld [vmem:[#allocation9 + $0xd9c] ss:$48 sps:$4 sm:$0xff]  }
 0x31f   : > { %7390 = vmatprep.subr.bf16.mxu1 %v15748_v20  ;;  %v15812_v20 = vld [vmem:[#allocation9 + $0xa98] ss:$48 sps:$4 sm:$0xff]   ;;  %v15820_v22 = vld [vmem:[#allocation9 + $0xa3c] ss:$48 sps:$4 sm:$0xff]  }
 0x320   : > { %7364 = vmatmul.mubr.bf16.vlgmr.msra.gmra.mxu0 %v17445_v53 }
 0x321   : > { %7418 = vmatpush1.bf16.msra.mxu0 %v15749_v24  ;;  %7449 = vmatprep.mubr.bf16.mxu0 %v17428_v29  ;;  %v15773_v29 = vld [vmem:[#allocation9 + $0x738] ss:$48 sps:$4 sm:$0xff]  }
 0x322   : > { %7391 = vmatpush2.bf16.msra.mxu1 %v15746_v23  ;;  %7419 = vmatprep.subr.bf16.mxu0 %v15757_v27  ;;  %v15823_v23 = vld [vmem:[#allocation9 + $0xd3c] ss:$48 sps:$4 sm:$0xff]   ;;  %v15818_v24 = vld [vmem:[#allocation9 + $0xa38] ss:$48 sps:$4 sm:$0xff]  }
 0x323   : > { %7392 = vmatprep.subr.bf16.mxu1 %v15754_v26  ;;  %v15821_v26 = vld [vmem:[#allocation9 + $0xd38] ss:$48 sps:$4 sm:$0xff]   ;;  %v15829_v27 = vld [vmem:[#allocation9 + $0xcdc] ss:$48 sps:$4 sm:$0xff]  }
 0x325   : > { %7420 = vmatpush1.bf16.msra.mxu0 %v15755_v31  ;;  %v15827_v31 = vld [vmem:[#allocation9 + $0xcd8] ss:$48 sps:$4 sm:$0xff]  }
 0x326   : > { %7393 = vmatpush2.bf16.msra.mxu1 %v15752_v30  ;;  %7421 = vmatprep.subr.bf16.mxu0 %v15763_v33  ;;  %v15824_v30 = vld [vmem:[#allocation9 + $0x9d8] ss:$48 sps:$4 sm:$0xff]   ;;  %v15835_v33 = vld [vmem:[#allocation9 + $0xc7c] ss:$48 sps:$4 sm:$0xff]  }
 0x327   : > { %7394 = vmatprep.subr.bf16.mxu1 %v15760_v32  ;;  %v15832_v32 = vld [vmem:[#allocation9 + $0x97c] ss:$48 sps:$4 sm:$0xff]  }
 0x329   : > { %7422 = vmatpush1.bf16.msra.mxu0 %v15761_v7  ;;  %v15833_v7 = vld [vmem:[#allocation9 + $0xc78] ss:$48 sps:$4 sm:$0xff]  }
 0x32a   : > { %7395 = vmatpush2.bf16.msra.mxu1 %v15758_v36  ;;  %7423 = vmatprep.subr.bf16.mxu0 %v15769_v39  ;;  %v15830_v36 = vld [vmem:[#allocation9 + $0x978] ss:$48 sps:$4 sm:$0xff]   ;;  %v15841_v39 = vld [vmem:[#allocation9 + $0xc1c] ss:$48 sps:$4 sm:$0xff]  }
 0x32b   : > { %7396 = vmatprep.subr.bf16.mxu1 %v15766_v38  ;;  %v15838_v38 = vld [vmem:[#allocation9 + $0x91c] ss:$48 sps:$4 sm:$0xff]  }
 0x32d   : > { %7424 = vmatpush1.bf16.msra.mxu0 %v15767_v41  ;;  %v15839_v41 = vld [vmem:[#allocation9 + $0xc18] ss:$48 sps:$4 sm:$0xff]  }
 0x32e   : > { %7397 = vmatpush2.bf16.msra.mxu1 %v15764_v40  ;;  %7425 = vmatprep.subr.bf16.mxu0 %v15775_v4  ;;  %v15836_v40 = vld [vmem:[#allocation9 + $0x918] ss:$48 sps:$4 sm:$0xff]   ;;  %v15847_v4 = vld [vmem:[#allocation9 + $0x2c4] ss:$48 sps:$4 sm:$0xff]  }
 0x32f   : > { %7398 = vmatprep.subr.bf16.mxu1 %v15772_v42  ;;  %v15844_v42 = vld [vmem:[#allocation9 + $0x11bc] ss:$48 sps:$4 sm:$0xff]  }
 0x331   : > { %7426 = vmatpush1.bf16.msra.mxu0 %v15773_v29  ;;  %v15845_v29 = vld [vmem:[#allocation9 + $0x2c0] ss:$48 sps:$4 sm:$0xff]  }
 0x332   : > { %7399 = vmatpush2.bf16.msra.mxu1 %v15770_v43  ;;  %7427 = vmatprep.subr.bf16.mxu0 %v15781_v45  ;;  %v15842_v43 = vld [vmem:[#allocation9 + $0x11b8] ss:$48 sps:$4 sm:$0xff]   ;;  %v15853_v45 = vld [vmem:[#allocation9 + $0x264] ss:$48 sps:$4 sm:$0xff]  }
 0x333   : > { %7400 = vmatprep.subr.bf16.mxu1 %v15778_v44  ;;  %v15850_v44 = vld [vmem:[#allocation9 + $0x115c] ss:$48 sps:$4 sm:$0xff]  }
 0x335   : > { %7428 = vmatpush1.bf16.msra.mxu0 %v15779_v51  ;;  %v15851_v51 = vld [vmem:[#allocation9 + $0x260] ss:$48 sps:$4 sm:$0xff]  }
 0x336   : > { %7401 = vmatpush2.bf16.msra.mxu1 %v15776_v48  ;;  %7429 = vmatprep.subr.bf16.mxu0 %v15787_v58  ;;  %v15848_v48 = vld [vmem:[#allocation9 + $0x1158] ss:$48 sps:$4 sm:$0xff]   ;;  %v15859_v58 = vld [vmem:[#allocation9 + $0x204] ss:$48 sps:$4 sm:$0xff]  }
 0x337   : > { %7402 = vmatprep.subr.bf16.mxu1 %v15784_v54  ;;  %v15856_v54 = vld [vmem:[#allocation9 + $0x10fc] ss:$48 sps:$4 sm:$0xff]  }
 0x339   : > { %7430 = vmatpush1.bf16.msra.mxu0 %v15785_v34  ;;  %v15857_v34 = vld [vmem:[#allocation9 + $0x200] ss:$48 sps:$4 sm:$0xff]  }
 0x33a   : > { %7403 = vmatpush2.bf16.msra.mxu1 %v15782_v60  ;;  %7431 = vmatprep.subr.bf16.mxu0 %v15793_v62  ;;  %v15854_v60 = vld [vmem:[#allocation9 + $0x10f8] ss:$48 sps:$4 sm:$0xff]   ;;  %v15862_v62 = vld [vmem:[#allocation9 + $0x109c] ss:$48 sps:$4 sm:$0xff]  }
 0x33b   : > { %7404 = vmatprep.subr.bf16.mxu1 %v15790_v61  ;;  %v17453_v61 = vld [vmem:[%s17306_s28 + $0x4] ss:$24 sps:$4 sm:$0xff]  }
 0x33d   : > { %7432 = vmatpush1.bf16.msra.mxu0 %v15791_v63  ;;  %v15863_v63 = vld [vmem:[#allocation9 + $0x1a0] ss:$48 sps:$4 sm:$0xff]  }
 0x33e   : > { %7405 = vmatpush2.bf16.msra.mxu1 %v15788_v35  ;;  %7433 = vmatprep.subr.bf16.mxu0 %v15796_v2  ;;  %v15865_v35 = vld [vmem:[#allocation9 + $0x1a4] ss:$48 sps:$4 sm:$0xff]   ;;  %v15868_v2 = vld [vmem:[#allocation9 + $0x103c] ss:$48 sps:$4 sm:$0xff]  }
 0x33f   : > { %7460 = vmatprep.subr.bf16.mxu1 %v15799_v28  ;;  %v15871_v28 = vld [vmem:[#allocation9 + $0x144] ss:$48 sps:$4 sm:$0xff]  }
 0x341   : > { %7407 = vmatmul.mubr.bf16.vlgmr.msra.gmra.mxu1 %v17432_v6  ;;  %7434 = vmatpush2.bf16.msra.mxu0 %v15794_v5  ;;  %v15815_v6 = vld [vmem:[#allocation9 + $0xd98] ss:$48 sps:$4 sm:$0xff]  }
 0x342   : > { %7461 = vmatpush1.bf16.msra.mxu1 %v15797_v3  ;;  %7435 = vmatprep.subr.bf16.mxu0 %v15802_v8  ;;  %v15866_v5 = vld [vmem:[#allocation9 + $0x1038] ss:$48 sps:$4 sm:$0xff]   ;;  %v15869_v3 = vld [vmem:[#allocation9 + $0x140] ss:$48 sps:$4 sm:$0xff]   ;;  %v15874_v8 = vld [vmem:[#allocation9 + $0xfdc] ss:$48 sps:$4 sm:$0xff]  }
 0x343   : > { %7462 = vmatprep.subr.bf16.mxu1 %v15805_v9  ;;  %7492 = vmatprep.mubr.bf16.mxu1 %v17436_v14  ;;  %v15826_v14 = vld [vmem:[#allocation9 + $0x9dc] ss:$48 sps:$4 sm:$0xff]   ;;  %v15877_v9 = vld [vmem:[#allocation9 + $0xe4] ss:$48 sps:$4 sm:$0xff]  }
 0x345   : > { %7436 = vmatpush2.bf16.msra.mxu0 %v15800_v12  ;;  %v15872_v12 = vld [vmem:[#allocation9 + $0xfd8] ss:$48 sps:$4 sm:$0xff]  }
 0x346   : > { %7463 = vmatpush1.bf16.msra.mxu1 %v15803_v13  ;;  %7437 = vmatprep.subr.bf16.mxu0 %v15808_v15  ;;  %v15875_v13 = vld [vmem:[#allocation9 + $0xe0] ss:$48 sps:$4 sm:$0xff]   ;;  %v15880_v15 = vld [vmem:[#allocation9 + $0xf7c] ss:$48 sps:$4 sm:$0xff]  }
 0x347   : > { %7464 = vmatprep.subr.bf16.mxu1 %v15811_v16  ;;  %v15883_v16 = vld [vmem:[#allocation9 + $0x84] ss:$48 sps:$4 sm:$0xff]  }
 0x349   : > { %7438 = vmatpush2.bf16.msra.mxu0 %v15806_v17  ;;  %v15878_v17 = vld [vmem:[#allocation9 + $0xf78] ss:$48 sps:$4 sm:$0xff]  }
 0x34a   : > { %7465 = vmatpush1.bf16.msra.mxu1 %v15809_v19  ;;  %7439 = vmatprep.subr.bf16.mxu0 %v15814_v55  ;;  %v15881_v19 = vld [vmem:[#allocation9 + $0x80] ss:$48 sps:$4 sm:$0xff]   ;;  %v15886_v55 = vld [vmem:[#allocation9 + $0xf1c] ss:$48 sps:$4 sm:$0xff]  }
 0x34b   : > { %7466 = vmatprep.subr.bf16.mxu1 %v15817_v49  ;;  %v15889_v49 = vld [vmem:[#allocation9 + $0x24] ss:$48 sps:$4 sm:$0xff]  }
 0x34d   : > { %7440 = vmatpush2.bf16.msra.mxu0 %v15812_v20  ;;  %v15884_v20 = vld [vmem:[#allocation9 + $0xf18] ss:$48 sps:$4 sm:$0xff]  }
 0x34e   : > { %7467 = vmatpush1.bf16.msra.mxu1 %v15815_v6  ;;  %7441 = vmatprep.subr.bf16.mxu0 %v15820_v22  ;;  %v15887_v6 = vld [vmem:[#allocation9 + $0x20] ss:$48 sps:$4 sm:$0xff]   ;;  %v15892_v22 = vld [vmem:[#allocation9 + $0x5c4] ss:$48 sps:$4 sm:$0xff]  }
 0x34f   : > { %7468 = vmatprep.subr.bf16.mxu1 %v15823_v23  ;;  %v15895_v23 = vld [vmem:[#allocation9 + $0x8c4] ss:$48 sps:$4 sm:$0xff]  }
 0x351   : > { %7442 = vmatpush2.bf16.msra.mxu0 %v15818_v24  ;;  %v15890_v24 = vld [vmem:[#allocation9 + $0x5c0] ss:$48 sps:$4 sm:$0xff]  }
 0x352   : > { %7469 = vmatpush1.bf16.msra.mxu1 %v15821_v26  ;;  %7443 = vmatprep.subr.bf16.mxu0 %v15826_v14  ;;  %v15893_v26 = vld [vmem:[#allocation9 + $0x8c0] ss:$48 sps:$4 sm:$0xff]   ;;  %v15898_v14 = vld [vmem:[#allocation9 + $0x564] ss:$48 sps:$4 sm:$0xff]  }
 0x353   : > { %7470 = vmatprep.subr.bf16.mxu1 %v15829_v27  ;;  %v15901_v27 = vld [vmem:[#allocation9 + $0x864] ss:$48 sps:$4 sm:$0xff]  }
 0x355   : > { %7444 = vmatpush2.bf16.msra.mxu0 %v15824_v30  ;;  %v15896_v30 = vld [vmem:[#allocation9 + $0x560] ss:$48 sps:$4 sm:$0xff]  }
 0x356   : > { %7471 = vmatpush1.bf16.msra.mxu1 %v15827_v31  ;;  %7445 = vmatprep.subr.bf16.mxu0 %v15832_v32  ;;  %v15899_v31 = vld [vmem:[#allocation9 + $0x860] ss:$48 sps:$4 sm:$0xff]   ;;  %v15904_v32 = vld [vmem:[#allocation9 + $0x504] ss:$48 sps:$4 sm:$0xff]  }
 0x357   : > { %7472 = vmatprep.subr.bf16.mxu1 %v15835_v33  ;;  %v15907_v33 = vld [vmem:[#allocation9 + $0x804] ss:$48 sps:$4 sm:$0xff]  }
 0x359   : > { %7446 = vmatpush2.bf16.msra.mxu0 %v15830_v36  ;;  %v17458_v36 = vld [vmem:[%s17306_s28 + $0xc] ss:$24 sps:$4 sm:$0xff]  }
 0x35a   : > { %7473 = vmatpush1.bf16.msra.mxu1 %v15833_v7  ;;  %7447 = vmatprep.subr.bf16.mxu0 %v15838_v38  ;;  %v15902_v7 = vld [vmem:[#allocation9 + $0x500] ss:$48 sps:$4 sm:$0xff]  }
 0x35b   : > { %7474 = vmatprep.subr.bf16.mxu1 %v15841_v39  ;;  %v15905_v38 = vld [vmem:[#allocation9 + $0x800] ss:$48 sps:$4 sm:$0xff]   ;;  %v15910_v39 = vld [vmem:[#allocation9 + $0x4a4] ss:$48 sps:$4 sm:$0xff]  }
 0x35d   : > { %7448 = vmatpush2.bf16.msra.mxu0 %v15836_v40  ;;  %v15913_v40 = vld [vmem:[#allocation9 + $0x7a4] ss:$48 sps:$4 sm:$0xff]  }
 0x35e   : > { %7475 = vmatpush1.bf16.msra.mxu1 %v15839_v41  ;;  %7503 = vmatprep.subr.bf16.mxu0 %v15847_v4  ;;  %v15911_v41 = vld [vmem:[#allocation9 + $0x7a0] ss:$48 sps:$4 sm:$0xff]   ;;  %v15919_v4 = vld [vmem:[#allocation9 + $0x744] ss:$48 sps:$4 sm:$0xff]  }
 0x35f   : > { %7476 = vmatprep.subr.bf16.mxu1 %v15844_v42  ;;  %v15916_v42 = vld [vmem:[#allocation9 + $0x444] ss:$48 sps:$4 sm:$0xff]  }
 0x360   : > { %7450 = vmatmul.mubr.bf16.vlgmr.msra.gmra.mxu0 %v17440_v47  ;;  %v15860_v47 = vld [vmem:[#allocation9 + $0x1098] ss:$48 sps:$4 sm:$0xff]  }
 0x361   : > { %7504 = vmatpush1.bf16.msra.mxu0 %v15845_v29  ;;  %7535 = vmatprep.mubr.bf16.mxu0 %v17453_v61  ;;  %v15917_v29 = vld [vmem:[#allocation9 + $0x740] ss:$48 sps:$4 sm:$0xff]  }
 0x362   : > { %7477 = vmatpush2.bf16.msra.mxu1 %v15842_v43  ;;  %7505 = vmatprep.subr.bf16.mxu0 %v15853_v45  ;;  %v15914_v43 = vld [vmem:[#allocation9 + $0x440] ss:$48 sps:$4 sm:$0xff]   ;;  %v15925_v45 = vld [vmem:[#allocation9 + $0x6e4] ss:$48 sps:$4 sm:$0xff]  }
 0x363   : > { %7478 = vmatprep.subr.bf16.mxu1 %v15850_v44  ;;  %v15922_v44 = vld [vmem:[#allocation9 + $0x3e4] ss:$48 sps:$4 sm:$0xff]  }
 0x365   : > { %7506 = vmatpush1.bf16.msra.mxu0 %v15851_v51  ;;  %v15923_v51 = vld [vmem:[#allocation9 + $0x6e0] ss:$48 sps:$4 sm:$0xff]  }
 0x366   : > { %7479 = vmatpush2.bf16.msra.mxu1 %v15848_v48  ;;  %7507 = vmatprep.subr.bf16.mxu0 %v15859_v58  ;;  %v15920_v48 = vld [vmem:[#allocation9 + $0x3e0] ss:$48 sps:$4 sm:$0xff]   ;;  %v15931_v58 = vld [vmem:[#allocation9 + $0x684] ss:$48 sps:$4 sm:$0xff]  }
 0x367   : > { %7480 = vmatprep.subr.bf16.mxu1 %v15856_v54  ;;  %v15928_v54 = vld [vmem:[#allocation9 + $0x384] ss:$48 sps:$4 sm:$0xff]  }
 0x369   : > { %7508 = vmatpush1.bf16.msra.mxu0 %v15857_v34  ;;  %v15929_v34 = vld [vmem:[#allocation9 + $0x680] ss:$48 sps:$4 sm:$0xff]  }
 0x36a   : > { %7481 = vmatpush2.bf16.msra.mxu1 %v15854_v60  ;;  %7509 = vmatprep.subr.bf16.mxu0 %v15865_v35  ;;  %v15926_v60 = vld [vmem:[#allocation9 + $0x380] ss:$48 sps:$4 sm:$0xff]   ;;  %v15937_v35 = vld [vmem:[#allocation9 + $0x624] ss:$48 sps:$4 sm:$0xff]  }
 0x36b   : > { %7482 = vmatprep.subr.bf16.mxu1 %v15862_v62  ;;  %v15934_v62 = vld [vmem:[#allocation9 + $0x324] ss:$48 sps:$4 sm:$0xff]  }
 0x36d   : > { %7510 = vmatpush1.bf16.msra.mxu0 %v15863_v63  ;;  %v15935_v63 = vld [vmem:[#allocation9 + $0x620] ss:$48 sps:$4 sm:$0xff]  }
 0x36e   : > { %7483 = vmatpush2.bf16.msra.mxu1 %v15860_v47  ;;  %7511 = vmatprep.subr.bf16.mxu0 %v15871_v28  ;;  %v15932_v47 = vld [vmem:[#allocation9 + $0x320] ss:$48 sps:$4 sm:$0xff]   ;;  %v15943_v28 = vld [vmem:[#allocation9 + $0xec4] ss:$48 sps:$4 sm:$0xff]  }
 0x36f   : > { %7484 = vmatprep.subr.bf16.mxu1 %v15868_v2  ;;  %v15940_v2 = vld [vmem:[#allocation9 + $0xbc4] ss:$48 sps:$4 sm:$0xff]  }
 0x371   : > { %7512 = vmatpush1.bf16.msra.mxu0 %v15869_v3  ;;  %v15941_v3 = vld [vmem:[#allocation9 + $0xec0] ss:$48 sps:$4 sm:$0xff]  }
 0x372   : > { %7485 = vmatpush2.bf16.msra.mxu1 %v15866_v5  ;;  %7513 = vmatprep.subr.bf16.mxu0 %v15877_v9  ;;  %v15938_v5 = vld [vmem:[#allocation9 + $0xbc0] ss:$48 sps:$4 sm:$0xff]   ;;  %v15949_v9 = vld [vmem:[#allocation9 + $0xe64] ss:$48 sps:$4 sm:$0xff]  }
 0x373   : > { %7486 = vmatprep.subr.bf16.mxu1 %v15874_v8  ;;  %v15946_v8 = vld [vmem:[#allocation9 + $0xb64] ss:$48 sps:$4 sm:$0xff]  }
 0x375   : > { %7514 = vmatpush1.bf16.msra.mxu0 %v15875_v13  ;;  %v15944_v13 = vld [vmem:[#allocation9 + $0xb60] ss:$48 sps:$4 sm:$0xff]  }
 0x376   : > { %7487 = vmatpush2.bf16.msra.mxu1 %v15872_v12  ;;  %7515 = vmatprep.subr.bf16.mxu0 %v15883_v16  ;;  %v17462_v12 = vld [vmem:[%s17306_s28] ss:$24 sps:$4 sm:$0xff]   ;;  %v15952_v16 = vld [vmem:[#allocation9 + $0xb04] ss:$48 sps:$4 sm:$0xff]  }
 0x377   : > { %7488 = vmatprep.subr.bf16.mxu1 %v15880_v15  ;;  %v15947_v15 = vld [vmem:[#allocation9 + $0xe60] ss:$48 sps:$4 sm:$0xff]  }
 0x379   : > { %7516 = vmatpush1.bf16.msra.mxu0 %v15881_v19  ;;  %v17466_v19 = vld [vmem:[%s17306_s28 + $0x14] ss:$24 sps:$4 sm:$0xff]  }
 0x37a   : > { %7489 = vmatpush2.bf16.msra.mxu1 %v15878_v17  ;;  %7517 = vmatprep.subr.bf16.mxu0 %v15889_v49  ;;  %v15955_v17 = vld [vmem:[#allocation9 + $0xe04] ss:$48 sps:$4 sm:$0xff]   ;;  %v15953_v49 = vld [vmem:[#allocation9 + $0xe00] ss:$48 sps:$4 sm:$0xff]  }
 0x37b   : > { %7490 = vmatprep.subr.bf16.mxu1 %v15886_v55  ;;  %v15950_v55 = vld [vmem:[#allocation9 + $0xb00] ss:$48 sps:$4 sm:$0xff]  }
 0x37d   : > { %7518 = vmatpush1.bf16.msra.mxu0 %v15887_v6  ;;  %v15961_v6 = vld [vmem:[#allocation9 + $0xda4] ss:$48 sps:$4 sm:$0xff]  }
 0x37e   : > { %7491 = vmatpush2.bf16.msra.mxu1 %v15884_v20  ;;  %7519 = vmatprep.subr.bf16.mxu0 %v15892_v22  ;;  %v15958_v20 = vld [vmem:[#allocation9 + $0xaa4] ss:$48 sps:$4 sm:$0xff]   ;;  %v15956_v22 = vld [vmem:[#allocation9 + $0xaa0] ss:$48 sps:$4 sm:$0xff]  }
 0x37f   : > { %7546 = vmatprep.subr.bf16.mxu1 %v15895_v23  ;;  %v15959_v23 = vld [vmem:[#allocation9 + $0xda0] ss:$48 sps:$4 sm:$0xff]  }
 0x381   : > { %7493 = vmatmul.mubr.bf16.vlgmr.msra.gmra.mxu1 %v17445_v53  ;;  %7520 = vmatpush2.bf16.msra.mxu0 %v15890_v24  ;;  %v15908_v53 = vld [vmem:[#allocation9 + $0x4a0] ss:$48 sps:$4 sm:$0xff]   ;;  %v15964_v24 = vld [vmem:[#allocation9 + $0xa44] ss:$48 sps:$4 sm:$0xff]  }
 0x382   : > { %7547 = vmatpush1.bf16.msra.mxu1 %v15893_v26  ;;  %7521 = vmatprep.subr.bf16.mxu0 %v15898_v14  ;;  %v15967_v26 = vld [vmem:[#allocation9 + $0xd44] ss:$48 sps:$4 sm:$0xff]   ;;  %v15962_v14 = vld [vmem:[#allocation9 + $0xa40] ss:$48 sps:$4 sm:$0xff]  }
 0x383   : > { %7548 = vmatprep.subr.bf16.mxu1 %v15901_v27  ;;  %7578 = vmatprep.mubr.bf16.mxu1 %v17458_v36  ;;  %v15965_v27 = vld [vmem:[#allocation9 + $0xd40] ss:$48 sps:$4 sm:$0xff]  }
 0x385   : > { %7522 = vmatpush2.bf16.msra.mxu0 %v15896_v30  ;;  %v15970_v30 = vld [vmem:[#allocation9 + $0x9e4] ss:$48 sps:$4 sm:$0xff]  }
 0x386   : > { %7549 = vmatpush1.bf16.msra.mxu1 %v15899_v31  ;;  %7523 = vmatprep.subr.bf16.mxu0 %v15904_v32  ;;  %v15973_v31 = vld [vmem:[#allocation9 + $0xce4] ss:$48 sps:$4 sm:$0xff]   ;;  %v15968_v32 = vld [vmem:[#allocation9 + $0x9e0] ss:$48 sps:$4 sm:$0xff]  }
 0x387   : > { %7550 = vmatprep.subr.bf16.mxu1 %v15907_v33  ;;  %v15971_v33 = vld [vmem:[#allocation9 + $0xce0] ss:$48 sps:$4 sm:$0xff]  }
 0x389   : > { %7524 = vmatpush2.bf16.msra.mxu0 %v15902_v7  ;;  %v15976_v7 = vld [vmem:[#allocation9 + $0x984] ss:$48 sps:$4 sm:$0xff]  }
 0x38a   : > { %7551 = vmatpush1.bf16.msra.mxu1 %v15905_v38  ;;  %7525 = vmatprep.subr.bf16.mxu0 %v15910_v39  ;;  %v15979_v38 = vld [vmem:[#allocation9 + $0xc84] ss:$48 sps:$4 sm:$0xff]   ;;  %v15974_v39 = vld [vmem:[#allocation9 + $0x980] ss:$48 sps:$4 sm:$0xff]  }
 0x38b   : > { %7552 = vmatprep.subr.bf16.mxu1 %v15913_v40  ;;  %v15977_v40 = vld [vmem:[#allocation9 + $0xc80] ss:$48 sps:$4 sm:$0xff]  }
 0x38d   : > { %7526 = vmatpush2.bf16.msra.mxu0 %v15908_v53  ;;  %v15982_v53 = vld [vmem:[#allocation9 + $0x924] ss:$48 sps:$4 sm:$0xff]  }
 0x38e   : > { %7553 = vmatpush1.bf16.msra.mxu1 %v15911_v41  ;;  %7527 = vmatprep.subr.bf16.mxu0 %v15916_v42  ;;  %v15985_v41 = vld [vmem:[#allocation9 + $0xc24] ss:$48 sps:$4 sm:$0xff]   ;;  %v15980_v42 = vld [vmem:[#allocation9 + $0x920] ss:$48 sps:$4 sm:$0xff]  }
 0x38f   : > { %7554 = vmatprep.subr.bf16.mxu1 %v15919_v4  ;;  %v15983_v4 = vld [vmem:[#allocation9 + $0xc20] ss:$48 sps:$4 sm:$0xff]  }
 0x391   : > { %7528 = vmatpush2.bf16.msra.mxu0 %v15914_v43  ;;  %v15988_v43 = vld [vmem:[#allocation9 + $0x11c4] ss:$48 sps:$4 sm:$0xff]  }
 0x392   : > { %7555 = vmatpush1.bf16.msra.mxu1 %v15917_v29  ;;  %7529 = vmatprep.subr.bf16.mxu0 %v15922_v44  ;;  %v15991_v29 = vld [vmem:[#allocation9 + $0x2cc] ss:$48 sps:$4 sm:$0xff]   ;;  %v15986_v44 = vld [vmem:[#allocation9 + $0x11c0] ss:$48 sps:$4 sm:$0xff]  }
 0x393   : > { %7556 = vmatprep.subr.bf16.mxu1 %v15925_v45  ;;  %v15989_v45 = vld [vmem:[#allocation9 + $0x2c8] ss:$48 sps:$4 sm:$0xff]  }
 0x395   : > { %7530 = vmatpush2.bf16.msra.mxu0 %v15920_v48  ;;  %v15994_v48 = vld [vmem:[#allocation9 + $0x1164] ss:$48 sps:$4 sm:$0xff]  }
 0x396   : > { %7557 = vmatpush1.bf16.msra.mxu1 %v15923_v51  ;;  %7531 = vmatprep.subr.bf16.mxu0 %v15928_v54  ;;  %v15997_v51 = vld [vmem:[#allocation9 + $0x26c] ss:$48 sps:$4 sm:$0xff]   ;;  %v17470_v54 = vld [vmem:[%s17306_s28 + $0x8] ss:$24 sps:$4 sm:$0xff]  }
 0x397   : > { %7558 = vmatprep.subr.bf16.mxu1 %v15931_v58  ;;  %v15992_v58 = vld [vmem:[#allocation9 + $0x1160] ss:$48 sps:$4 sm:$0xff]  }
 0x399   : > { %7532 = vmatpush2.bf16.msra.mxu0 %v15926_v60  ;;  %v15995_v60 = vld [vmem:[#allocation9 + $0x268] ss:$48 sps:$4 sm:$0xff]  }
 0x39a   : > { %7559 = vmatpush1.bf16.msra.mxu1 %v15929_v34  ;;  %7533 = vmatprep.subr.bf16.mxu0 %v15934_v62  ;;  %v16000_v34 = vld [vmem:[#allocation9 + $0x1104] ss:$48 sps:$4 sm:$0xff]   ;;  %v16003_v62 = vld [vmem:[#allocation9 + $0x20c] ss:$48 sps:$4 sm:$0xff]  }
 0x39b   : > { %7560 = vmatprep.subr.bf16.mxu1 %v15937_v35  ;;  %v15998_v35 = vld [vmem:[#allocation9 + $0x1100] ss:$48 sps:$4 sm:$0xff]  }
 0x39d   : > { %7534 = vmatpush2.bf16.msra.mxu0 %v15932_v47  ;;  %v16001_v47 = vld [vmem:[#allocation9 + $0x208] ss:$48 sps:$4 sm:$0xff]  }
 0x39e   : > { %7561 = vmatpush1.bf16.msra.mxu1 %v15935_v63  ;;  %7589 = vmatprep.subr.bf16.mxu0 %v15943_v28  ;;  %v16006_v63 = vld [vmem:[#allocation9 + $0x10a4] ss:$48 sps:$4 sm:$0xff]   ;;  %v16004_v28 = vld [vmem:[#allocation9 + $0x10a0] ss:$48 sps:$4 sm:$0xff]  }
 0x39f   : > { %7562 = vmatprep.subr.bf16.mxu1 %v15940_v2  ;;  %v16009_v2 = vld [vmem:[#allocation9 + $0x1ac] ss:$48 sps:$4 sm:$0xff]  }
 0x3a0   : > { %7536 = vmatmul.mubr.bf16.vlgmr.msra.gmra.mxu0 %v17462_v12 }
 0x3a1   : > { %7590 = vmatpush1.bf16.msra.mxu0 %v15941_v3  ;;  %7621 = vmatprep.mubr.bf16.mxu0 %v17466_v19  ;;  %v16012_v3 = vld [vmem:[#allocation9 + $0x1044] ss:$48 sps:$4 sm:$0xff]  }
 0x3a2   : > { %7563 = vmatpush2.bf16.msra.mxu1 %v15938_v5  ;;  %7591 = vmatprep.subr.bf16.mxu0 %v15949_v9  ;;  %v16007_v5 = vld [vmem:[#allocation9 + $0x1a8] ss:$48 sps:$4 sm:$0xff]   ;;  %v16010_v9 = vld [vmem:[#allocation9 + $0x1040] ss:$48 sps:$4 sm:$0xff]  }
 0x3a3   : > { %7564 = vmatprep.subr.bf16.mxu1 %v15946_v8  ;;  %v16015_v8 = vld [vmem:[#allocation9 + $0x14c] ss:$48 sps:$4 sm:$0xff]  }
 0x3a5   : > { %7592 = vmatpush1.bf16.msra.mxu0 %v15947_v15  ;;  %v16021_v15 = vld [vmem:[#allocation9 + $0xec] ss:$48 sps:$4 sm:$0xff]  }
 0x3a6   : > { %7565 = vmatpush2.bf16.msra.mxu1 %v15944_v13  ;;  %7593 = vmatprep.subr.bf16.mxu0 %v15955_v17  ;;  %v16018_v13 = vld [vmem:[#allocation9 + $0xfe4] ss:$48 sps:$4 sm:$0xff]   ;;  %v16016_v17 = vld [vmem:[#allocation9 + $0xfe0] ss:$48 sps:$4 sm:$0xff]  }
 0x3a7   : > { %7566 = vmatprep.subr.bf16.mxu1 %v15952_v16  ;;  %v17474_v16 = vpop.f32.mrf.mxu0 }
 0x3a9   : > { %7594 = vmatpush1.bf16.msra.mxu0 %v15953_v49  ;;  %v16024_v49 = vld [vmem:[#allocation9 + $0xf84] ss:$48 sps:$4 sm:$0xff]  }
 0x3aa   : > { %7567 = vmatpush2.bf16.msra.mxu1 %v15950_v55  ;;  %7595 = vmatprep.subr.bf16.mxu0 %v15961_v6  ;;  %v16019_v55 = vld [vmem:[#allocation9 + $0xe8] ss:$48 sps:$4 sm:$0xff]   ;;  %v17476_v6 = vpop.f32.mrf.mxu0 }
 0x3ab   : > { %7568 = vmatprep.subr.bf16.mxu1 %v15958_v20  ;;  %v16027_v20 = vld [vmem:[#allocation9 + $0x8c] ss:$48 sps:$4 sm:$0xff]  }
 0x3ad   : > { %7596 = vmatpush1.bf16.msra.mxu0 %v15959_v23  ;;  %v16025_v23 = vld [vmem:[#allocation9 + $0x88] ss:$48 sps:$4 sm:$0xff]  }
 0x3ae   : > { %7569 = vmatpush2.bf16.msra.mxu1 %v15956_v22  ;;  %7597 = vmatprep.subr.bf16.mxu0 %v15967_v26  ;;  %v16022_v22 = vld [vmem:[#allocation9 + $0xf80] ss:$48 sps:$4 sm:$0xff]   ;;  %v16033_v26 = vld [vmem:[#allocation9 + $0x2c] ss:$48 sps:$4 sm:$0xff]  }
 0x3af   : > { %7570 = vmatprep.subr.bf16.mxu1 %v15964_v24  ;;  %v16030_v24 = vld [vmem:[#allocation9 + $0xf24] ss:$48 sps:$4 sm:$0xff]  }
 0x3b1   : > { %7598 = vmatpush1.bf16.msra.mxu0 %v15965_v27  ;;  %v16028_v27 = vld [vmem:[#allocation9 + $0xf20] ss:$48 sps:$4 sm:$0xff]  }
 0x3b2   : > { %7571 = vmatpush2.bf16.msra.mxu1 %v15962_v14  ;;  %7599 = vmatprep.subr.bf16.mxu0 %v15973_v31  ;;  %v17478_v14 = vpop.f32.mrf.mxu0  ;;  %v16036_v31 = vld [vmem:[#allocation9 + $0x5cc] ss:$48 sps:$4 sm:$0xff]  }
 0x3b3   : > { %7572 = vmatprep.subr.bf16.mxu1 %v15970_v30  ;;  %v16031_v30 = vld [vmem:[#allocation9 + $0x28] ss:$48 sps:$4 sm:$0xff]  }
 0x3b5   : > { %7600 = vmatpush1.bf16.msra.mxu0 %v15971_v33  ;;  %v17480_v33 = vpop.f32.mrf.mxu1 }
 0x3b6   : > { %7573 = vmatpush2.bf16.msra.mxu1 %v15968_v32  ;;  %7601 = vmatprep.subr.bf16.mxu0 %v15979_v38  ;;  %v16039_v32 = vld [vmem:[#allocation9 + $0x8cc] ss:$48 sps:$4 sm:$0xff]   ;;  %v16034_v38 = vld [vmem:[#allocation9 + $0x5c8] ss:$48 sps:$4 sm:$0xff]  }
 0x3b7   : > { %7574 = vmatprep.subr.bf16.mxu1 %v15976_v7  ;;  %v17482_v7 = vpop.f32.mrf.mxu0 }
 0x3b9   : > { %7602 = vmatpush1.bf16.msra.mxu0 %v15977_v40  ;;  %v16042_v40 = vld [vmem:[#allocation9 + $0x56c] ss:$48 sps:$4 sm:$0xff]  }
 0x3ba   : > { %7575 = vmatpush2.bf16.msra.mxu1 %v15974_v39  ;;  %7603 = vmatprep.subr.bf16.mxu0 %v15985_v41  ;;  %v16037_v39 = vld [vmem:[#allocation9 + $0x8c8] ss:$48 sps:$4 sm:$0xff]   ;;  %v17484_v41 = vpop.f32.mrf.mxu0 }
 0x3bb   : > { %7576 = vmatprep.subr.bf16.mxu1 %v15982_v53  ;;  %v16045_v53 = vld [vmem:[#allocation9 + $0x86c] ss:$48 sps:$4 sm:$0xff]  }
 0x3bd   : > { %7604 = vmatpush1.bf16.msra.mxu0 %v15983_v4  ;;  %v17490_v4 = vpop.f32.mrf.mxu1 }
 0x3be   : > { %7577 = vmatpush2.bf16.msra.mxu1 %v15980_v42  ;;  %7605 = vmatprep.subr.bf16.mxu0 %v15988_v43  ;;  %v17487_v42 = vld [vmem:[%s17306_s28 + $0x10] ss:$24 sps:$4 sm:$0xff]  }
 0x3bf   : > { %7632 = vmatprep.subr.bf16.mxu1 %v15991_v29  ;;  %v16040_v43 = vld [vmem:[#allocation9 + $0x568] ss:$48 sps:$4 sm:$0xff]  }
 0x3c0   : > { %v16043_v29 = vld [vmem:[#allocation9 + $0x868] ss:$48 sps:$4 sm:$0xff]  }
 0x3c1   : > { %7579 = vmatmul.mubr.bf16.vlgmr.msra.gmra.mxu1 %v17470_v54  ;;  %7606 = vmatpush2.bf16.msra.mxu0 %v15986_v44  ;;  %v16048_v44 = vld [vmem:[#allocation9 + $0x50c] ss:$48 sps:$4 sm:$0xff]  }
 0x3c2   : > { %7633 = vmatpush1.bf16.msra.mxu1 %v15989_v45  ;;  %7607 = vmatprep.subr.bf16.mxu0 %v15994_v48  ;;  %v16051_v45 = vld [vmem:[#allocation9 + $0x80c] ss:$48 sps:$4 sm:$0xff]   ;;  %v17492_v48 = vpop.f32.mrf.mxu0 }
 0x3c3   : > { %7634 = vmatprep.subr.bf16.mxu1 %v15997_v51  ;;  %7664 = vmatprep.mubr.bf16.mxu1 %v17453_v61  ;;  %v16013_v61 = vld [vmem:[#allocation9 + $0x148] ss:$48 sps:$4 sm:$0xff]   ;;  %v17495_v51 = vpop.f32.mrf.mxu1 }
 0x3c5   : > { %7608 = vmatpush2.bf16.msra.mxu0 %v15992_v58  ;;  %v16046_v58 = vld [vmem:[#allocation9 + $0x508] ss:$48 sps:$4 sm:$0xff]  }
 0x3c6   : > { %7635 = vmatpush1.bf16.msra.mxu1 %v15995_v60  ;;  %7609 = vmatprep.subr.bf16.mxu0 %v16000_v34  ;;  %v16049_v60 = vld [vmem:[#allocation9 + $0x808] ss:$48 sps:$4 sm:$0xff]   ;;  %v16054_v34 = vld [vmem:[#allocation9 + $0x4ac] ss:$48 sps:$4 sm:$0xff]  }
 0x3c7   : > { %7636 = vmatprep.subr.bf16.mxu1 %v16003_v62  ;;  %v16057_v62 = vld [vmem:[#allocation9 + $0x7ac] ss:$48 sps:$4 sm:$0xff]  }
 0x3c9   : > { %7610 = vmatpush2.bf16.msra.mxu0 %v15998_v35  ;;  %v17497_v35 = vpop.f32.mrf.mxu0 }
 0x3ca   : > { %7637 = vmatpush1.bf16.msra.mxu1 %v16001_v47  ;;  %7611 = vmatprep.subr.bf16.mxu0 %v16006_v63  ;;  %v17499_v47 = vpop.f32.mrf.mxu1  ;;  %v16052_v63 = vld [vmem:[#allocation9 + $0x4a8] ss:$48 sps:$4 sm:$0xff]  }
 0x3cb   : > { %7638 = vmatprep.subr.bf16.mxu1 %v16009_v2  ;;  %v16055_v2 = vld [vmem:[#allocation9 + $0x7a8] ss:$48 sps:$4 sm:$0xff]  }
 0x3cd   : > { %7612 = vmatpush2.bf16.msra.mxu0 %v16004_v28  ;;  %v16063_v28 = vld [vmem:[#allocation9 + $0x74c] ss:$48 sps:$4 sm:$0xff]  }
 0x3ce   : > { %7639 = vmatpush1.bf16.msra.mxu1 %v16007_v5  ;;  %7613 = vmatprep.subr.bf16.mxu0 %v16012_v3  ;;  %v17501_v5 = vpop.f32.mrf.mxu0  ;;  %v17503_v3 = vpop.f32.mrf.mxu1 }
 0x3cf   : > { %7640 = vmatprep.subr.bf16.mxu1 %v16015_v8 }
 0x3d0   : > { %v17505_v8 = vpop.f32.mrf.mxu0 }
 0x3d1   : > { %7614 = vmatpush2.bf16.msra.mxu0 %v16010_v9  ;;  %v16058_v9 = vld [vmem:[#allocation9 + $0x448] ss:$48 sps:$4 sm:$0xff]  }
 0x3d2   : > { %7641 = vmatpush1.bf16.msra.mxu1 %v16013_v61  ;;  %7615 = vmatprep.subr.bf16.mxu0 %v16018_v13  ;;  %v16061_v61 = vld [vmem:[#allocation9 + $0x748] ss:$48 sps:$4 sm:$0xff]   ;;  %v16066_v13 = vld [vmem:[#allocation9 + $0x3ec] ss:$48 sps:$4 sm:$0xff]  }
 0x3d3   : > { %7642 = vmatprep.subr.bf16.mxu1 %v16021_v15  ;;  %v16069_v15 = vld [vmem:[#allocation9 + $0x6ec] ss:$48 sps:$4 sm:$0xff]  }
 0x3d5   : > { %7616 = vmatpush2.bf16.msra.mxu0 %v16016_v17  ;;  %v17507_v17 = vpop.f32.mrf.mxu1 }
 0x3d6   : > { %7643 = vmatpush1.bf16.msra.mxu1 %v16019_v55  ;;  %7617 = vmatprep.subr.bf16.mxu0 %v16024_v49  ;;  %v17509_v55 = vpop.f32.mrf.mxu0  ;;  %v16064_v49 = vld [vmem:[#allocation9 + $0x3e8] ss:$48 sps:$4 sm:$0xff]  }
 0x3d7   : > { %7644 = vmatprep.subr.bf16.mxu1 %v16027_v20  ;;  %v16067_v20 = vld [vmem:[#allocation9 + $0x6e8] ss:$48 sps:$4 sm:$0xff]  }
 0x3d9   : > { %7618 = vmatpush2.bf16.msra.mxu0 %v16022_v22  ;;  %v16072_v22 = vld [vmem:[#allocation9 + $0x38c] ss:$48 sps:$4 sm:$0xff]  }
 0x3da   : > { %7645 = vmatpush1.bf16.msra.mxu1 %v16025_v23  ;;  %7619 = vmatprep.subr.bf16.mxu0 %v16030_v24  ;;  %v16075_v23 = vld [vmem:[#allocation9 + $0x68c] ss:$48 sps:$4 sm:$0xff]   ;;  %v17511_v24 = vpop.f32.mrf.mxu1 }
 0x3db   : > { %7646 = vmatprep.subr.bf16.mxu1 %v16033_v26  ;;  %v17513_v26 = vpop.f32.mrf.mxu0 }
 0x3dd   : > { %7620 = vmatpush2.bf16.msra.mxu0 %v16028_v27  ;;  %v16070_v27 = vld [vmem:[#allocation9 + $0x388] ss:$48 sps:$4 sm:$0xff]  }
 0x3de   : > { %7647 = vmatpush1.bf16.msra.mxu1 %v16031_v30  ;;  %7675 = vmatprep.subr.bf16.mxu0 %v16039_v32  ;;  %v16073_v30 = vld [vmem:[#allocation9 + $0x688] ss:$48 sps:$4 sm:$0xff]   ;;  %v16081_v32 = vld [vmem:[#allocation9 + $0x62c] ss:$48 sps:$4 sm:$0xff]  }
 0x3df   : > { %7648 = vmatprep.subr.bf16.mxu1 %v16036_v31  ;;  %v16078_v31 = vld [vmem:[#allocation9 + $0x32c] ss:$48 sps:$4 sm:$0xff]  }
 0x3e0   : > { %7622 = vmatmul.mubr.bf16.vlgmr.msra.gmra.mxu0 %v17487_v42 }
 0x3e1   : > { %7676 = vmatpush1.bf16.msra.mxu0 %v16037_v39  ;;  %7707 = vmatprep.mubr.bf16.mxu0 %v17458_v36  ;;  %v16060_v36 = vld [vmem:[#allocation9 + $0x44c] ss:$48 sps:$4 sm:$0xff]   ;;  %v17517_v39 = vpop.f32.mrf.mxu0 }
 0x3e2   : > { %7649 = vmatpush2.bf16.msra.mxu1 %v16034_v38  ;;  %7677 = vmatprep.subr.bf16.mxu0 %v16045_v53  ;;  %v17515_v38 = vpop.f32.mrf.mxu1  ;;  %v16076_v53 = vld [vmem:[#allocation9 + $0x328] ss:$48 sps:$4 sm:$0xff]  }
 0x3e3   : > { %7650 = vmatprep.subr.bf16.mxu1 %v16042_v40 }
 0x3e4   : > { %v17519_v40 = vpop.f32.mrf.mxu1 }
 0x3e5   : > { %7678 = vmatpush1.bf16.msra.mxu0 %v16043_v29  ;;  %v16084_v29 = vld [vmem:[#allocation9 + $0xbcc] ss:$48 sps:$4 sm:$0xff]  }
 0x3e6   : > { %7651 = vmatpush2.bf16.msra.mxu1 %v16040_v43  ;;  %7679 = vmatprep.subr.bf16.mxu0 %v16051_v45  ;;  %v16079_v43 = vld [vmem:[#allocation9 + $0x628] ss:$48 sps:$4 sm:$0xff]   ;;  %v17521_v45 = vpop.f32.mrf.mxu0 }
 0x3e7   : > { %7652 = vmatprep.subr.bf16.mxu1 %v16048_v44  ;;  %v16087_v44 = vld [vmem:[#allocation9 + $0xecc] ss:$48 sps:$4 sm:$0xff]  }
 0x3e9   : > { %7680 = vmatpush1.bf16.msra.mxu0 %v16049_v60  ;;  %v16082_v60 = vld [vmem:[#allocation9 + $0xbc8] ss:$48 sps:$4 sm:$0xff]  }
 0x3ea   : > { %7653 = vmatpush2.bf16.msra.mxu1 %v16046_v58  ;;  %7681 = vmatprep.subr.bf16.mxu0 %v16057_v62  ;;  %v17523_v58 = vpop.f32.mrf.mxu1  ;;  %v16090_v62 = vld [vmem:[#allocation9 + $0xb6c] ss:$48 sps:$4 sm:$0xff]  }
 0x3eb   : > { %7654 = vmatprep.subr.bf16.mxu1 %v16054_v34  ;;  %v16085_v34 = vld [vmem:[#allocation9 + $0xec8] ss:$48 sps:$4 sm:$0xff]  }
 0x3ed   : > { %7682 = vmatpush1.bf16.msra.mxu0 %v16055_v2  ;;  %v7281_v2 = vpop.f32.mrf.mxu0 }
 0x3ee   : > { %7655 = vmatpush2.bf16.msra.mxu1 %v16052_v63  ;;  %7683 = vmatprep.subr.bf16.mxu0 %v16063_v28  ;;  %v16093_v63 = vld [vmem:[#allocation9 + $0xe6c] ss:$48 sps:$4 sm:$0xff]   ;;  %v16088_v28 = vld [vmem:[#allocation9 + $0xb68] ss:$48 sps:$4 sm:$0xff]  }
 0x3ef   : > { %7656 = vmatprep.subr.bf16.mxu1 %v16060_v36  ;;  %v17526_v36 = vpop.f32.mrf.mxu1 }
 0x3f1   : > { %7684 = vmatpush1.bf16.msra.mxu0 %v16061_v61  ;;  %v16096_v61 = vld [vmem:[#allocation9 + $0xb0c] ss:$48 sps:$4 sm:$0xff]  }
 0x3f2   : > { %7657 = vmatpush2.bf16.msra.mxu1 %v16058_v9  ;;  %7685 = vmatprep.subr.bf16.mxu0 %v16069_v15  ;;  %v16091_v9 = vld [vmem:[#allocation9 + $0xe68] ss:$48 sps:$4 sm:$0xff]   ;;  %v7283_v15 = vpop.f32.mrf.mxu0 }
 0x3f3   : > { %7658 = vmatprep.subr.bf16.mxu1 %v16066_v13  ;;  %v16099_v13 = vld [vmem:[#allocation9 + $0xe0c] ss:$48 sps:$4 sm:$0xff]  }
 0x3f5   : > { %7686 = vmatpush1.bf16.msra.mxu0 %v16067_v20  ;;  %v16094_v20 = vld [vmem:[#allocation9 + $0xb08] ss:$48 sps:$4 sm:$0xff]  }
 0x3f6   : > { %7659 = vmatpush2.bf16.msra.mxu1 %v16064_v49  ;;  %7687 = vmatprep.subr.bf16.mxu0 %v16075_v23  ;;  %v17529_v49 = vpop.f32.mrf.mxu1  ;;  %v16105_v23 = vld [vmem:[#allocation9 + $0xdac] ss:$48 sps:$4 sm:$0xff]  }
 0x3f7   : > { %7660 = vmatprep.subr.bf16.mxu1 %v16072_v22  ;;  %v16097_v22 = vld [vmem:[#allocation9 + $0xe08] ss:$48 sps:$4 sm:$0xff]  }
 0x3f9   : > { %7688 = vmatpush1.bf16.msra.mxu0 %v16073_v30  ;;  %v7285_v30 = vpop.f32.mrf.mxu0 }
 0x3fa   : > { %7661 = vmatpush2.bf16.msra.mxu1 %v16070_v27  ;;  %7689 = vmatprep.subr.bf16.mxu0 %v16081_v32  ;;  %v17531_v27 = vpop.f32.mrf.mxu1  ;;  %v16100_v32 = vld [vmem:[#allocation9 + $0xaa8] ss:$48 sps:$4 sm:$0xff]  }
 0x3fb   : > { %7662 = vmatprep.subr.bf16.mxu1 %v16078_v31  ;;  %v17533_v31 = vpop.f32.mrf.mxu0 }
 0x3fd   : > { %7690 = vmatpush1.bf16.msra.mxu0 %v16079_v43  ;;  %v16111_v43 = vld [vmem:[#allocation9 + $0xd4c] ss:$48 sps:$4 sm:$0xff]  }
 0x3fe   : > { %7663 = vmatpush2.bf16.msra.mxu1 %v16076_v53  ;;  %7691 = vmatprep.subr.bf16.mxu0 %v16084_v29  ;;  %v16103_v53 = vld [vmem:[#allocation9 + $0xda8] ss:$48 sps:$4 sm:$0xff]   ;;  %v7324_v29 = vpop.f32.mrf.mxu1 }
 0x3ff   : > { %7718 = vmatprep.subr.bf16.mxu1 %v16087_v44  ;;  %v7367_v44 = vpop.f32.mrf.mxu0 }
 0x401   : > { %7665 = vmatmul.mubr.bf16.vlgmr.msra.gmra.mxu1 %v17462_v12  ;;  %7692 = vmatpush2.bf16.msra.mxu0 %v16082_v60  ;;  %v16102_v12 = vld [vmem:[#allocation9 + $0xaac] ss:$48 sps:$4 sm:$0xff]   ;;  %v16106_v60 = vld [vmem:[#allocation9 + $0xa48] ss:$48 sps:$4 sm:$0xff]  }
 0x402   : > { %7719 = vmatpush1.bf16.msra.mxu1 %v16085_v34  ;;  %7693 = vmatprep.subr.bf16.mxu0 %v16090_v62  ;;  %v16109_v34 = vld [vmem:[#allocation9 + $0xd48] ss:$48 sps:$4 sm:$0xff]   ;;  %v16114_v62 = vld [vmem:[#allocation9 + $0x9ec] ss:$48 sps:$4 sm:$0xff]  }
 0x403   : > { %7720 = vmatprep.subr.bf16.mxu1 %v16093_v63  ;;  %7750 = vmatprep.mubr.bf16.mxu1 %v17466_v19  ;;  %v16108_v19 = vld [vmem:[#allocation9 + $0xa4c] ss:$48 sps:$4 sm:$0xff]  }
 0x404   : > { %v16117_v63 = vld [vmem:[#allocation9 + $0xcec] ss:$48 sps:$4 sm:$0xff]  }
 0x405   : > { %7694 = vmatpush2.bf16.msra.mxu0 %v16088_v28  ;;  %v17535_v28 = vld [vmem:[#allocation10] sm:$0xff] }
 0x406   : > { %7721 = vmatpush1.bf16.msra.mxu1 %v16091_v9  ;;  %7695 = vmatprep.subr.bf16.mxu0 %v16096_v61  ;;  %v7326_v9 = vpop.f32.mrf.mxu1  ;;  %v4040_v61 = vrot.slane %v17535_v28, %v17405_v18 }
 0x407   : > { %7722 = vmatprep.subr.bf16.mxu1 %v16099_v13  ;;  %v7369_v13 = vpop.f32.mrf.mxu0 }
 0x408   : > { %v7286_v46 = vadd.f32 %v7285_v30, %v4040_v61 }
 0x409   : > { %7696 = vmatpush2.bf16.msra.mxu0 %v16094_v20  ;;  %v16112_v20 = vld [vmem:[#allocation9 + $0x9e8] ss:$48 sps:$4 sm:$0xff]   ;;  %v7371_v18 = vpop.f32.mrf.mxu0 }
 0x40a   : > { %7723 = vmatpush1.bf16.msra.mxu1 %v16097_v22  ;;  %7697 = vmatprep.subr.bf16.mxu0 %v16102_v12  ;;  %v16115_v22 = vld [vmem:[#allocation9 + $0xce8] ss:$48 sps:$4 sm:$0xff]   ;;  %v16120_v12 = vld [vmem:[#allocation9 + $0x98c] ss:$48 sps:$4 sm:$0xff]  }
 0x40b   : > { %7724 = vmatprep.subr.bf16.mxu1 %v16105_v23  ;;  %v16123_v23 = vld [vmem:[#allocation9 + $0xc8c] ss:$48 sps:$4 sm:$0xff]  }
 0x40d   : > { %7698 = vmatpush2.bf16.msra.mxu0 %v16100_v32  ;;  %v4036_v32 = vrot.slane %v17535_v28, %v17402_v37 }
 0x40e   : > { %7725 = vmatpush1.bf16.msra.mxu1 %v16103_v53  ;;  %7699 = vmatprep.subr.bf16.mxu0 %v16108_v19  ;;  %v7328_v53 = vpop.f32.mrf.mxu1  ;;  %v4024_v19 = vrot.slane %v17535_v28, %v17323_v57 }
 0x40f   : > { %7726 = vmatprep.subr.bf16.mxu1 %v16111_v43  ;;  %v7282_v43 = vadd.f32 %v7281_v2, %v4040_v61  ;;  %v7284_v21 = vadd.f32 %v7283_v15, %v4036_v32  ;;  %v7329_v25 = vadd.f32 %v7328_v53, %v7286_v46  ;;  %v7280_v50 = vadd.f32 %v17521_v45, %v4036_v32  ;;  %v16124_v15 = vld [vmem:[#allocation9 + $0x928] ss:$48 sps:$4 sm:$0xff]  }
 0x410   : > { %v7024_v37 = vadd.f32 %v17476_v6, %v4024_v19  ;;  %v7028_v11 = vadd.f32 %v17482_v7, %v4024_v19  ;;  %v16127_v61 = vld [vmem:[#allocation9 + $0xc28] ss:$48 sps:$4 sm:$0xff]   ;;  %v4020_v45 = vrot.slane %v17535_v28, %v17320_v56  ;;  %v16992_v32 = vmov 0.0|0.0  }
 0x411   : > { %7700 = vmatpush2.bf16.msra.mxu0 %v16106_v60  ;;  %v16118_v60 = vld [vmem:[#allocation9 + $0x988] ss:$48 sps:$4 sm:$0xff]   ;;  %v7325_v57 = vadd.f32 %v7324_v29, %v7282_v43  ;;  %v7372_v2 = vadd.f32 %v7371_v18, %v7329_v25  ;;  %v7327_v30 = vadd.f32 %v7326_v9, %v7284_v21  ;;  %v7323_v6 = vadd.f32 %v17531_v27, %v7280_v50  ;;  %v16135_v50 = vld [vmem:[#allocation9 + $0x116c] ss:$48 sps:$4 sm:$0xff]  }
 0x412   : > { %7727 = vmatpush1.bf16.msra.mxu1 %v16109_v34  ;;  %7701 = vmatprep.subr.bf16.mxu0 %v16114_v62  ;;  %v16121_v34 = vld [vmem:[#allocation9 + $0xc88] ss:$48 sps:$4 sm:$0xff]   ;;  %v16126_v62 = vld [vmem:[#allocation9 + $0x92c] ss:$48 sps:$4 sm:$0xff]   ;;  %v7067_v7 = vadd.f32 %v17490_v4, %v7024_v37  ;;  %v7026_v25 = vadd.f32 %v17478_v14, %v4020_v45  ;;  %v4032_v29 = vrot.slane %v17535_v28, %v17367_v0  ;;  %v18113_v37 = vlaneseq }
 0x413   : > { %7728 = vmatprep.subr.bf16.mxu1 %v16117_v63  ;;  %v16129_v63 = vld [vmem:[#allocation9 + $0xc2c] ss:$48 sps:$4 sm:$0xff]   ;;  %v7368_v46 = vadd.f32 %v7367_v44, %v7325_v57  ;;  %v16130_v57 = vld [vmem:[#allocation9 + $0x11c8] ss:$48 sps:$4 sm:$0xff]  }
 0x414   : > { %v17561_v4 = vand.u32 127, %v18113_v37  ;;  %v7069_v44 = vadd.f32 %v17495_v51, %v7026_v25  ;;  %v16133_v9 = vld [vmem:[#allocation9 + $0x1168] ss:$48 sps:$4 sm:$0xff]  }
 0x415   : > { %7702 = vmatpush2.bf16.msra.mxu0 %v16112_v20  ;;  %v7071_v20 = vadd.f32 %v17499_v47, %v7028_v11  ;;  %v17552_v21 = vpack.c.bf16 %v7372_v2, %v7368_v46  ;;  %v7366_v11 = vadd.f32 %v17533_v31, %v7323_v6  ;;  %v7110_v47 = vadd.f32 %v17492_v48, %v7067_v7  ;;  %v16136_v19 = vld [vmem:[#allocation9 + $0x1108] ss:$48 sps:$4 sm:$0xff]   ;;  %v16147_v2 = vld [vmem:[#allocation9 + $0xfec] ss:$48 sps:$4 sm:$0xff]  }
 0x416   : > { %7729 = vmatpush1.bf16.msra.mxu1 %v16115_v22  ;;  %7703 = vmatprep.subr.bf16.mxu0 %v16120_v12  ;;  %v16132_v22 = vld [vmem:[#allocation9 + $0x11cc] ss:$48 sps:$4 sm:$0xff]   ;;  %v7370_v12 = vadd.f32 %v7369_v13, %v7327_v30  ;;  %v7157_v31 = vadd.f32 %v17515_v38, %v4032_v29  ;;  %v17571_v48 = vadd.s32 128, %v17561_v4  ;;  %v7153_v13 = vadd.f32 %v17507_v17, %v4032_v29 }
 0x417   : > { %7730 = vmatprep.subr.bf16.mxu1 %v16123_v23  ;;  %v7114_v18 = vadd.f32 %v17501_v5, %v7071_v20  ;;  %v7022_v5 = vadd.f32 %v17474_v16, %v4020_v45  ;;  %v16138_v23 = vld [vmem:[#allocation9 + $0x110c] ss:$48 sps:$4 sm:$0xff]   ;;  %vm7772_vm2 = vcmp.ge.s32.totalorder %v17561_v4, 96  ;;  %vm7814_vm6 = vcmp.lt.s32.totalorder %v17561_v4, 96  ;;  %v17660_v20 = vpop.f32.mrf.mxu1 }
 0x418   : > { %v17564_v14 = vpack.c.bf16 %v7370_v12, %v7366_v11  ;;  %v7200_v16 = vadd.f32 %v17517_v39, %v7157_v31  ;;  %v7196_v51 = vadd.f32 %v17509_v55, %v7153_v13  ;;  %vm7821_vm0 = vcmp.lt.s32.totalorder %v17571_v48, 192  ;;  %v16141_v55 = vld [vmem:[#allocation9 + $0x10ac] ss:$48 sps:$4 sm:$0xff]   ;;  %vm14148_vm3 = vmpackc.low %vm7772_vm2, %vm7772_vm2 }
 0x419   : > { %7704 = vmatpush2.bf16.msra.mxu0 %v16118_v60  ;;  %v17566_v27 = vpack.c.bf16 %v7114_v18, %v7110_v47  ;;  %v7065_v38 = vadd.f32 %v17480_v33, %v7022_v5  ;;  %v4028_v39 = vrot.slane %v17535_v28, %v17364_v10  ;;  %vm14145_vm1 = vmpackc.low %vm7821_vm0, %vm7821_vm0  ;;  %vm7779_vm4 = vcmp.ge.s32.totalorder %v17571_v48, 192  ;;  %v7410_v46 = vpop.f32.mrf.mxu1  ;;  %v18115_v47 = vld [vmem:[#allocation24_spill] sm:$0xff] }
 0x41a   : > { %7731 = vmatpush1.bf16.msra.mxu1 %v16121_v34  ;;  %7705 = vmatprep.subr.bf16.mxu0 %v16126_v62  ;;  %v7243_v53 = vadd.f32 %v17529_v49, %v7200_v16  ;;  %v7239_v33 = vadd.f32 %v17523_v58, %v7196_v51  ;;  %v16144_v34 = vld [vmem:[#allocation9 + $0x104c] ss:$48 sps:$4 sm:$0xff]   ;;  %vm14151_vm5 = vmpackc.low %vm7779_vm4, %vm7779_vm4  ;;  %v17692_v11 = vadd.s32 640, %v17561_v4  ;;  %v4047_v29 = vsub.s32 7, %v18115_v47 }
 0x41b   : > { %7732 = vmatprep.subr.bf16.mxu1 %v16129_v63  ;;  %v7108_v17 = vadd.f32 %v17484_v41, %v7065_v38  ;;  %v7155_v43 = vadd.f32 %v17511_v24, %v4028_v39  ;;  %v14146_v41 = vpack.c.bf16 %v17348_v59, %v17348_v59  ;;  %v7151_v60 = vadd.f32 %v17503_v3, %v4028_v39  ;;  %v16139_v24 = vld [vmem:[#allocation9 + $0x10a8] ss:$48 sps:$4 sm:$0xff]   ;;  %vm14142_vm7 = vmpackc.low %vm7814_vm6, %vm7814_vm6  ;;  %v7412_v6 = vpop.f32.mrf.mxu1 }
 0x41c   : > { %v17596_v49 = vpack.c.bf16 %v7243_v53, %v7239_v33  ;;  %v16142_v3 = vld [vmem:[#allocation9 + $0x1048] ss:$48 sps:$4 sm:$0xff]   ;;  %vm7855_vm15 = vcmp.lt.s32.totalorder %v17692_v11, 672  ;;  %v4048_v5 = vrot.slane %v17535_v28, %v4047_v29  ;;  %v17711_v31 = vadd.s32 512, %v17561_v4 }
 0x41d   : > { %7706 = vmatpush2.bf16.msra.mxu0 %v16124_v15  ;;  %v7198_v58 = vadd.f32 %v17513_v26, %v7155_v43  ;;  %v7194_v59 = vadd.f32 %v17505_v8, %v7151_v60  ;;  %v14143_v26 = vpack.c.bf16 %v17345_v52, %v17345_v52  ;;  %v16145_v8 = vld [vmem:[#allocation9 + $0xfe8] ss:$48 sps:$4 sm:$0xff]   ;;  %v16153_v52 = vld [vmem:[#allocation9 + $0xf2c] ss:$48 sps:$4 sm:$0xff]   ;;  %v7414_v12 = vpop.f32.mrf.mxu1 }
 0x41e   : > { %7733 = vmatpush1.bf16.msra.mxu1 %v16127_v61  ;;  %8208 = vmatprep.subr.bf16.mxu0 %v17552_v21  ;;  %v16151_v15 = vld [vmem:[#allocation9 + $0xf28] ss:$48 sps:$4 sm:$0xff]   ;;  %v14155_v61 = vpack.c.bf16 %v17389_v1, %v17389_v1  ;;  %v17665_v1 = vadd.s32 384, %v17561_v4  ;;  %v7415_v16 = vadd.f32 %v7414_v12, %v4048_v5 }
 0x41f   : > { %7734 = vmatprep.subr.bf16.mxu1 %v16132_v22  ;;  %v7241_v62 = vadd.f32 %v17526_v36, %v7198_v58  ;;  %v7237_v63 = vadd.f32 %v17519_v40, %v7194_v59  ;;  %v16150_v40 = vld [vmem:[#allocation9 + $0xf8c] ss:$48 sps:$4 sm:$0xff]   ;;  %v16148_v36 = vld [vmem:[#allocation9 + $0xf88] ss:$48 sps:$4 sm:$0xff]  }
 0x420   : > { %7708 = vmatmul.mubr.bf16.vlgmr.msra.gmra.mxu0 %v17470_v54  ;;  %v7112_v54 = vadd.f32 %v17497_v35, %v7069_v44  ;;  %vm7799_vm11 = vcmp.ge.s32.totalorder %v17665_v1, 480  ;;  %v18114_v22 = vld [vmem:[#allocation26_spill] sm:$0xff]  ;;  %v7451_v7 = vpop.f32.mrf.mxu0  ;;  %vm7841_vm14 = vcmp.lt.s32.totalorder %v17665_v1, 480  ;;  %v16291_v1 = vld [vmem:[#allocation12 + $0x12c] ss:$24 sps:$4 sm:$0xff]  }
 0x421   : > { %8209 = vmatpush1.bf16.xpose.msra.mxu0 %v17564_v14  ;;  %8226 = vmatprep.mubr.bf16.mxu0 %v16992_v32  ;;  %v17612_v30 = vpack.c.bf16 %v7241_v62, %v7237_v63  ;;  %vm14163_vm13 = vmpackc.low %vm7799_vm11, %vm7799_vm11  ;;  %v14161_v45 = vpack.c.bf16 %v18114_v22, %v18114_v22  ;;  %v18116_v44 = vld [vmem:[#allocation30_spill] sm:$0xff] }
 0x422   : > { %7735 = vmatpush2.bf16.msra.mxu1 %v16130_v57  ;;  %8248 = vmatprep.subr.bf16.mxu0 %v17566_v27  ;;  %v17588_v35 = vpack.c.bf16 %v7112_v54, %v7108_v17  ;;  %v7453_v25 = vpop.f32.mrf.mxu0  ;;  %v7411_v54 = vadd.f32 %v7410_v46, %v4048_v5 }
 0x423   : > { %7736 = vmatprep.subr.bf16.mxu1 %v16135_v50 }
 0x424   : > { %v7455_v50 = vpop.f32.mrf.mxu0  ;;  %v7454_v53 = vadd.f32 %v7453_v25, %v7411_v54 }
 0x426   : > { %7737 = vmatpush2.bf16.msra.mxu1 %v16133_v9  ;;  %v14170_v9 = vpack.c.bf16 %v18116_v44, %v18116_v44  ;;  %v7457_v13 = vpop.f32.mrf.mxu0 }
 0x427   : > { %7738 = vmatprep.subr.bf16.mxu1 %v16138_v23  ;;  %v4043_v23 = vsub.s32 6, %v18115_v47  ;;  %v7458_v51 = vadd.f32 %v7457_v13, %v7415_v16 }
 0x428   : > { %8227 = vmatmul.mubr.bf16.vlgmr.msra.gmra.mxu0 %v16992_v32 }
 0x429   : > { %8249 = vmatpush1.bf16.xpose.msra.mxu0 %v17588_v35  ;;  %14147 = vmatprep.mubr.msk.bf16.mxu0 %vm14145_vm1, %v14146_v41  ;;  %vm14160_vm1 = vmpackc.low %vm7841_vm14, %vm7841_vm14  ;;  %v4044_v39 = vrot.slane %v17535_v28, %v4043_v23 }
 0x42a   : > { %7739 = vmatpush2.bf16.msra.mxu1 %v16136_v19  ;;  %8288 = vmatprep.subr.bf16.mxu0 %v17596_v49  ;;  %v18117_v19 = vld [vmem:[#allocation29_spill] sm:$0xff] }
 0x42b   : > { %7740 = vmatprep.subr.bf16.mxu1 %v16141_v55  ;;  %v14167_v33 = vpack.c.bf16 %v18117_v19, %v18117_v19  ;;  %v7413_v55 = vadd.f32 %v7412_v6, %v4044_v39  ;;  %v7409_v60 = vadd.f32 %v17660_v20, %v4044_v39 }
 0x42d   : > { %v7456_v58 = vadd.f32 %v7455_v50, %v7413_v55  ;;  %v7452_v28 = vadd.f32 %v7451_v7, %v7409_v60 }
 0x42e   : > { %7741 = vmatpush2.bf16.msra.mxu1 %v16139_v24 }
 0x42f   : > { %7742 = vmatprep.subr.bf16.mxu1 %v16144_v34 }
 0x430   : > { %14150 = vmatmul.mubr.msk.bf16.vlgmr.msra.gmra.mxu0 %vm14148_vm3, %v14143_v26  ;;  %vm14169_vm3 = vmpackc.low %vm7855_vm15, %vm7855_vm15 }
 0x431   : > { %8289 = vmatpush1.bf16.xpose.msra.mxu0 %v17612_v30  ;;  %8306 = vmatprep.mubr.bf16.mxu0 %v16992_v32 }
 0x432   : > { %7743 = vmatpush2.bf16.msra.mxu1 %v16142_v3  ;;  %8368 = vmatprep.subr.bf16.mxu0 %v17566_v27 }
 0x433   : > { %7744 = vmatprep.subr.bf16.mxu1 %v16147_v2 }
 0x436   : > { %7745 = vmatpush2.bf16.msra.mxu1 %v16145_v8 }
 0x437   : > { %7746 = vmatprep.subr.bf16.mxu1 %v16150_v40 }
 0x438   : > { %8307 = vmatmul.mubr.bf16.vlgmr.msra.gmra.mxu0 %v16992_v32 }
 0x439   : > { %8369 = vmatpush1.bf16.xpose.msra.mxu0 %v17588_v35  ;;  %14153 = vmatprep.mubr.msk.bf16.mxu0 %vm14151_vm5, %v14146_v41  ;;  %vm7806_vm5 = vcmp.ge.s32.totalorder %v17711_v31, 576 }
 0x43a   : > { %7747 = vmatpush2.bf16.msra.mxu1 %v16148_v36  ;;  %8448 = vmatprep.subr.bf16.mxu0 %v17552_v21 }
 0x43b   : > { %7748 = vmatprep.subr.bf16.mxu1 %v16153_v52 }
 0x43e   : > { %7749 = vmatpush2.bf16.msra.mxu1 %v16151_v15 }
 0x43f   : > { %8128 = vmatprep.subr.bf16.mxu1 %v17566_v27 }
 0x440   : > { %8387 = vmatmul.mubr.bf16.vlgmr.msra.gmra.mxu0 %v16992_v32 }
 0x441   : > { %7751 = vmatmul.mubr.bf16.vlgmr.msra.gmra.mxu1 %v17487_v42  ;;  %8449 = vmatpush1.bf16.xpose.msra.mxu0 %v17564_v14  ;;  %v17638_v42 = vadd.s32 256, %v17561_v4  ;;  %v7494_v18 = vpop.f32.mrf.mxu1 }
 0x442   : > { %8129 = vmatpush1.bf16.xpose.msra.mxu1 %v17588_v35  ;;  %8528 = vmatprep.subr.bf16.mxu0 %v17596_v49  ;;  %v7495_v34 = vadd.f32 %v7494_v18, %v7452_v28 }
 0x443   : > { %8168 = vmatprep.subr.bf16.mxu1 %v17596_v49  ;;  %8146 = vmatprep.mubr.bf16.mxu1 %v16992_v32  ;;  %vm7786_vm8 = vcmp.ge.s32.totalorder %v17638_v42, 288  ;;  %vm7828_vm10 = vcmp.lt.s32.totalorder %v17638_v42, 288  ;;  %v7496_v57 = vpop.f32.mrf.mxu1 }
 0x444   : > { %8466 = vmatprep.mubr.bf16.mxu0 %v16992_v32  ;;  %vm14157_vm9 = vmpackc.low %vm7786_vm8, %vm7786_vm8  ;;  %v7497_v43 = vadd.f32 %v7496_v57, %v7454_v53 }
 0x445   : > { %vm14154_vm12 = vmpackc.low %vm7828_vm10, %vm7828_vm10  ;;  %v7498_v37 = vpop.f32.mrf.mxu1 }
 0x446   : > { %v7499_v24 = vadd.f32 %v7498_v37, %v7456_v58 }
 0x447   : > { %v7500_v38 = vpop.f32.mrf.mxu1 }
 0x448   : > { %8467 = vmatmul.mubr.bf16.vlgmr.msra.gmra.mxu0 %v16992_v32  ;;  %v7501_v17 = vadd.f32 %v7500_v38, %v7458_v51  ;;  %v17739_v59 = vpack.c.bf16 %v7499_v24, %v7495_v34 }
 0x449   : > { %14144 = vmatmul.mubr.msk.bf16.vlgmr.msra.gmra.mxu1 %vm14142_vm7, %v14143_v26  ;;  %8529 = vmatpush1.bf16.xpose.msra.mxu0 %v17612_v30  ;;  %vm14172_vm7 = vmpackc.low %vm7806_vm5, %vm7806_vm5  ;;  %v18118_v26 = vld [vmem:[#allocation25_spill] sm:$0xff] }
 0x44a   : > { %8169 = vmatpush1.bf16.xpose.msra.mxu1 %v17612_v30  ;;  %8608 = vmatprep.subr.bf16.mxu0 %v17566_v27  ;;  %v17730_v41 = vpack.c.bf16 %v7501_v17, %v7497_v43 }
 0x44b   : > { %8328 = vmatprep.subr.bf16.mxu1 %v17552_v21  ;;  %8186 = vmatprep.mubr.bf16.mxu1 %v16992_v32 }
 0x44c   : > { %8546 = vmatprep.mubr.bf16.mxu0 %v16992_v32 }
 0x450   : > { %14159 = vmatmul.mubr.msk.bf16.vlgmr.msra.gmra.mxu0 %vm14157_vm9, %v14155_v61  ;;  %vm7848_vm9 = vcmp.lt.s32.totalorder %v17711_v31, 576 }
 0x451   : > { %8187 = vmatmul.mubr.bf16.vlgmr.msra.gmra.mxu1 %v16992_v32  ;;  %8609 = vmatpush1.bf16.xpose.msra.mxu0 %v17588_v35 }
 0x452   : > { %8329 = vmatpush1.bf16.xpose.msra.mxu1 %v17564_v14  ;;  %8688 = vmatprep.subr.bf16.mxu0 %v17552_v21 }
 0x453   : > { %8408 = vmatprep.subr.bf16.mxu1 %v17596_v49  ;;  %8346 = vmatprep.mubr.bf16.mxu1 %v16992_v32 }
 0x454   : > { %8626 = vmatprep.mubr.bf16.mxu0 %v16992_v32 }
 0x458   : > { %8627 = vmatmul.mubr.bf16.vlgmr.msra.gmra.mxu0 %v16992_v32 }
 0x459   : > { %8347 = vmatmul.mubr.bf16.vlgmr.msra.gmra.mxu1 %v16992_v32  ;;  %8689 = vmatpush1.bf16.xpose.msra.mxu0 %v17564_v14 }
 0x45a   : > { %8409 = vmatpush1.bf16.xpose.msra.mxu1 %v17612_v30  ;;  %8768 = vmatprep.subr.bf16.mxu0 %v17596_v49 }
 0x45b   : > { %8488 = vmatprep.subr.bf16.mxu1 %v17566_v27  ;;  %8426 = vmatprep.mubr.bf16.mxu1 %v16992_v32 }
 0x45c   : > { %8706 = vmatprep.mubr.bf16.mxu0 %v16992_v32 }
 0x460   : > { %8707 = vmatmul.mubr.bf16.vlgmr.msra.gmra.mxu0 %v16992_v32 }
 0x461   : > { %14156 = vmatmul.mubr.msk.bf16.vlgmr.msra.gmra.mxu1 %vm14154_vm12, %v14155_v61  ;;  %8769 = vmatpush1.bf16.xpose.msra.mxu0 %v17612_v30  ;;  %vm14166_vm12 = vmpackc.low %vm7848_vm9, %vm7848_vm9 }
 0x462   : > { %8489 = vmatpush1.bf16.xpose.msra.mxu1 %v17588_v35  ;;  %14165 = vmatprep.mubr.msk.bf16.mxu0 %vm14163_vm13, %v14161_v45  ;;  %vm7813_vm13 = vcmp.ge.s32.totalorder %v17692_v11, 672  ;;  %v16324_v11 = vld [vmem:[#allocation12 + $0xc] ss:$24 sps:$4 sm:$0xff]  }
 0x463   : > { %8568 = vmatprep.subr.bf16.mxu1 %v17552_v21  ;;  %8848 = vmatprep.subr.bf16.mxu0 %v17566_v27 }
 0x464   : > { %8506 = vmatprep.mubr.bf16.mxu1 %v16992_v32 }
 0x468   : > { %8787 = vmatmul.mubr.bf16.vlgmr.msra.gmra.mxu0 %v16992_v32 }
 0x469   : > { %8507 = vmatmul.mubr.bf16.vlgmr.msra.gmra.mxu1 %v16992_v32  ;;  %8849 = vmatpush1.bf16.xpose.msra.mxu0 %v17588_v35 }
 0x46a   : > { %8569 = vmatpush1.bf16.xpose.msra.mxu1 %v17564_v14  ;;  %8928 = vmatprep.subr.bf16.mxu0 %v17552_v21 }
 0x46b   : > { %8648 = vmatprep.subr.bf16.mxu1 %v17596_v49  ;;  %8586 = vmatprep.mubr.bf16.mxu1 %v16992_v32 }
 0x46c   : > { %8866 = vmatprep.mubr.bf16.mxu0 %v16992_v32 }
 0x470   : > { %8867 = vmatmul.mubr.bf16.vlgmr.msra.gmra.mxu0 %v16992_v32 }
 0x471   : > { %8587 = vmatmul.mubr.bf16.vlgmr.msra.gmra.mxu1 %v16992_v32  ;;  %8929 = vmatpush1.bf16.xpose.msra.mxu0 %v17564_v14 }
 0x472   : > { %8649 = vmatpush1.bf16.xpose.msra.mxu1 %v17612_v30  ;;  %14162 = vmatprep.mubr.msk.bf16.mxu1 %vm14160_vm1, %v14161_v45  ;;  %vm14175_vm1 = vmpackc.low %vm7813_vm13, %vm7813_vm13 }
 0x473   : > { %14171 = vmatprep.mubr.msk.bf16.mxu0 %vm14169_vm3, %v14170_v9  ;;  %8728 = vmatprep.subr.bf16.mxu1 %v17566_v27  ;;  %vm9082_vm3 = vcmask 130048  }
 0x474   : > { %9008 = vmatprep.subr.bf16.mxu0 %v17596_v49 }
 0x478   : > { %14174 = vmatmul.mubr.msk.bf16.vlgmr.msra.gmra.mxu0 %vm14172_vm7, %v14167_v33  ;;  %vm1266_vm7 = vcmp.lt.s32.totalorder %v17561_v4, 5 }
 0x479   : > { %8667 = vmatmul.mubr.bf16.vlgmr.msra.gmra.mxu1 %v16992_v32  ;;  %9009 = vmatpush1.bf16.xpose.msra.mxu0 %v17612_v30 }
 0x47a   : > { %8729 = vmatpush1.bf16.xpose.msra.mxu1 %v17588_v35  ;;  %9196 = vmatprep.subr.bf16.mxu0 %v17730_v41 }
 0x47b   : > { %8808 = vmatprep.subr.bf16.mxu1 %v17552_v21  ;;  %8746 = vmatprep.mubr.bf16.mxu1 %v16992_v32 }
 0x47c   : > { %9026 = vmatprep.mubr.bf16.mxu0 %v16992_v32 }
 0x480   : > { %9027 = vmatmul.mubr.bf16.vlgmr.msra.gmra.mxu0 %v16992_v32 }
 0x481   : > { %8747 = vmatmul.mubr.bf16.vlgmr.msra.gmra.mxu1 %v16992_v32  ;;  %9197 = vmatpush1.bf16.msra.mxu0 %v17739_v59  ;;  %v7580_v63 = vpop.f32.mrf.mxu1 }
 0x482   : > { %8809 = vmatpush1.bf16.xpose.msra.mxu1 %v17564_v14  ;;  %8826 = vmatprep.mubr.bf16.mxu1 %v16992_v32 }
 0x483   : > { %8888 = vmatprep.subr.bf16.mxu1 %v17596_v49  ;;  %v7537_v49 = vpop.f32.mrf.mxu0  ;;  %v7582_v3 = vpop.f32.mrf.mxu1 }
 0x485   : > { %v7539_v62 = vpop.f32.mrf.mxu0  ;;  %v7584_v8 = vpop.f32.mrf.mxu1 }
 0x487   : > { %v7586_v61 = vpop.f32.mrf.mxu1 }
 0x489   : > { %14168 = vmatmul.mubr.msk.bf16.vlgmr.msra.gmra.mxu1 %vm14166_vm12, %v14167_v33 }
 0x48a   : > { %8889 = vmatpush1.bf16.xpose.msra.mxu1 %v17612_v30  ;;  %8906 = vmatprep.mubr.bf16.mxu1 %v16992_v32 }
 0x48b   : > { %8968 = vmatprep.subr.bf16.mxu1 %v17566_v27  ;;  %v4014_v27 = vld [vmem:[#allocation10 + $0x8] sm:$0xf] }
 0x48c   : > { %v4056_v2 = vrot.slane %v4014_v27, %v18118_v26  ;;  %v4060_v37 = vrot.slane %v4014_v27, %v17364_v10 }
 0x48e   : > { %v7540_v52 = vadd.f32 %v7539_v62, %v4056_v2 }
 0x490   : > { %v7583_v45 = vadd.f32 %v7582_v3, %v7540_v52 }
 0x491   : > { %8907 = vmatmul.mubr.bf16.vlgmr.msra.gmra.mxu1 %v16992_v32 }
 0x492   : > { %8969 = vmatpush1.bf16.xpose.msra.mxu1 %v17588_v35  ;;  %8986 = vmatprep.mubr.bf16.mxu1 %v16992_v32  ;;  %v7541_v35 = vpop.f32.mrf.mxu0 }
 0x493   : > { %9048 = vmatprep.subr.bf16.mxu1 %v17552_v21  ;;  %v4052_v21 = vrot.slane %v4014_v27, %v17320_v56 }
 0x494   : > { %v7543_v30 = vpop.f32.mrf.mxu0 }
 0x495   : > { %v7542_v40 = vadd.f32 %v7541_v35, %v4052_v21  ;;  %v7538_v15 = vadd.f32 %v7537_v49, %v4052_v21  ;;  %v7544_v46 = vadd.f32 %v7543_v30, %v4056_v2 }
 0x497   : > { %v7587_v6 = vadd.f32 %v7586_v61, %v7544_v46  ;;  %v7581_v12 = vadd.f32 %v7580_v63, %v7538_v15  ;;  %v4064_v63 = vrot.slane %v4014_v27, %v17367_v0 }
 0x499   : > { %8987 = vmatmul.mubr.bf16.vlgmr.msra.gmra.mxu1 %v16992_v32 }
 0x49a   : > { %9049 = vmatpush1.bf16.xpose.msra.mxu1 %v17564_v14  ;;  %14177 = vmatprep.mubr.msk.bf16.mxu1 %vm14175_vm1, %v14170_v9  ;;  %v7585_v14 = vadd.f32 %v7584_v8, %v7542_v40 }
 0x4a0   : > { %v7623_v36 = vpop.f32.mrf.mxu0 }
 0x4a1   : > { %9067 = vmatmul.mubr.bf16.vlgmr.msra.gmra.mxu1 %v16992_v32  ;;  %v7624_v47 = vadd.f32 %v7623_v36, %v7581_v12 }
 0x4a2   : > { %v7625_v20 = vpop.f32.mrf.mxu0 }
 0x4a3   : > { %v7626_v25 = vadd.f32 %v7625_v20, %v7583_v45 }
 0x4a4   : > { %v7627_v22 = vpop.f32.mrf.mxu0 }
 0x4a5   : > { %v7628_v7 = vadd.f32 %v7627_v22, %v7585_v14 }
 0x4a6   : > { %v7629_v18 = vpop.f32.mrf.mxu0 }
 0x4a7   : > { %v7630_v57 = vadd.f32 %v7629_v18, %v7587_v6  ;;  %v17769_v50 = vpack.c.bf16 %v7628_v7, %v7624_v47 }
 0x4a9   : > { %v17767_v29 = vpack.c.bf16 %v7630_v57, %v7626_v25 }
 0x4ab   : > { %9237 = vmatprep.subr.bf16.mxu1 %v17767_v29 }
 0x4ac   : > { %9238 = vmatpush1.bf16.msra.mxu1 %v17769_v50 }
 0x4ad   : > { %9322 = vmatprep.subr.bf16.mxu1 %v17730_v41 }
 0x4c1   : > { %v7666_v32 = vpop.f32.mrf.mxu1 }
 0x4c2   : > { %v7667_v44 = vadd.f32 %v7666_v32, %v4060_v37 }
 0x4c3   : > { %v7668_v5 = vpop.f32.mrf.mxu1 }
 0x4c4   : > { %v7669_v8 = vadd.f32 %v7668_v5, %v4064_v63 }
 0x4c5   : > { %v7670_v9 = vpop.f32.mrf.mxu1 }
 0x4c6   : > { %v7671_v38 = vadd.f32 %v7670_v9, %v4060_v37 }
 0x4c7   : > { %v7672_v49 = vpop.f32.mrf.mxu1 }
 0x4c8   : > { %v7673_v40 = vadd.f32 %v7672_v49, %v4064_v63 }
 0x4e0   : > { %v7709_v13 = vpop.f32.mrf.mxu0 }
 0x4e1   : > { %v7710_v16 = vadd.f32 %v7709_v13, %v7667_v44 }
 0x4e2   : > { %v7711_v23 = vpop.f32.mrf.mxu0 }
 0x4e3   : > { %v7712_v15 = vadd.f32 %v7711_v23, %v7669_v8 }
 0x4e4   : > { %v7713_v54 = vpop.f32.mrf.mxu0 }
 0x4e5   : > { %v7714_v51 = vadd.f32 %v7713_v54, %v7671_v38 }
 0x4e6   : > { %v7715_v53 = vpop.f32.mrf.mxu0 }
 0x4e7   : > { %v7716_v61 = vadd.f32 %v7715_v53, %v7673_v40 }
 0x4e8   : > { %v8228_v17 = vpop.f32.mrf.mxu0 }
 0x4ea   : > { %v8230_v39 = vpop.f32.mrf.mxu0 }
 0x4ec   : > { %v8231_v19 = vpop.f32.mrf.mxu0 }
 0x4ee   : > { %v8232_v33 = vpop.f32.mrf.mxu0 }
 0x4f0   : > { %v8268_v43 = vpop.f32.mrf.mxu0 }
 0x4f2   : > { %v8270_v55 = vpop.f32.mrf.mxu0 }
 0x4f4   : > { %v8271_v60 = vpop.f32.mrf.mxu0 }
 0x4f6   : > { %v8272_v58 = vpop.f32.mrf.mxu0 }
 0x4f8   : > { %v8308_v28 = vpop.f32.mrf.mxu0 }
 0x4f9   : > { %v8309_v19 = vadd.f32 %v8308_v28, %v8268_v43 }
 0x4fa   : > { %v8310_v24 = vpop.f32.mrf.mxu0 }
 0x4fc   : > { %v8311_v34 = vpop.f32.mrf.mxu0 }
 0x4fe   : > { %v8312_v62 = vpop.f32.mrf.mxu0 }
 0x500   : > { %v8388_v3 = vpop.f32.mrf.mxu0 }
 0x501   : > { %v7752_v35 = vpop.f32.mrf.mxu1 }
 0x502   : > { %v7753_v2 = vadd.f32 %v7752_v35, %v7710_v16  ;;  %v8390_v30 = vpop.f32.mrf.mxu0 }
 0x503   : > { %v7754_v21 = vpop.f32.mrf.mxu1 }
 0x504   : > { %v8391_v52 = vpop.f32.mrf.mxu0  ;;  %v7755_v22 = vadd.f32 %v7754_v21, %v7712_v15 }
 0x505   : > { %v7756_v36 = vpop.f32.mrf.mxu1 }
 0x506   : > { %v7757_v20 = vadd.f32 %v7756_v36, %v7714_v51  ;;  %v8392_v14 = vpop.f32.mrf.mxu0 }
 0x507   : > { %v7758_v46 = vpop.f32.mrf.mxu1 }
 0x508   : > { %v17776_v45 = vpack.c.bf16 %v7757_v20, %v7753_v2  ;;  %v7759_v6 = vadd.f32 %v7758_v46, %v7716_v61  ;;  %v8468_v27 = vpop.f32.mrf.mxu0 }
 0x509   : > { %v8148_v12 = vpop.f32.mrf.mxu1 }
 0x50a   : > { %v17778_v7 = vpack.c.bf16 %v7759_v6, %v7755_v22  ;;  %v8470_v25 = vpop.f32.mrf.mxu0 }
 0x50b   : > { %v8150_v18 = vpop.f32.mrf.mxu1 }
 0x50c   : > { %9278 = vmatprep.subr.bf16.mxu0 %v17778_v7  ;;  %v8471_v47 = vpop.f32.mrf.mxu0 }
 0x50d   : > { %v8151_v57 = vpop.f32.mrf.mxu1 }
 0x50e   : > { %v8472_v37 = vpop.f32.mrf.mxu0 }
 0x50f   : > { %v8152_v32 = vpop.f32.mrf.mxu1 }
 0x510   : > { %v8548_v44 = vpop.f32.mrf.mxu0 }
 0x511   : > { %v8188_v5 = vpop.f32.mrf.mxu1 }
 0x512   : > { %v8189_v9 = vadd.f32 %v8188_v5, %v8148_v12  ;;  %v8550_v16 = vpop.f32.mrf.mxu0 }
 0x513   : > { %v8190_v13 = vpop.f32.mrf.mxu1 }
 0x514   : > { %v8229_v23 = vadd.f32 %v8228_v17, %v8189_v9  ;;  %v8551_v54 = vpop.f32.mrf.mxu0 }
 0x515   : > { %v8191_v38 = vpop.f32.mrf.mxu1 }
 0x516   : > { %v17781_v51 = vmul.f32 0.10206208, %v8229_v23  ;;  %v8552_v39 = vpop.f32.mrf.mxu0 }
 0x517   : > { %v8192_v53 = vpop.f32.mrf.mxu1 }
 0x518   : > { %v9083_v33 = vsel %vm9082_vm3, %v17781_v51, -inf  ;;  %v8628_v60 = vpop.f32.mrf.mxu0 }
 0x519   : > { %v8348_v55 = vpop.f32.mrf.mxu1  ;;  %9084 = vmax.xlane.f32.xlu0 %v9083_v33 }
 0x51a   : > { %v8349_v58 = vadd.f32 %v8348_v55, %v8309_v19  ;;  %v8630_v34 = vpop.f32.mrf.mxu0 }
 0x51b   : > { %v8350_v24 = vpop.f32.mrf.mxu1 }
 0x51c   : > { %v17785_v49 = vmul.f32 0.10206208, %v8349_v58  ;;  %v8631_v62 = vpop.f32.mrf.mxu0 }
 0x51d   : > { %v8351_v17 = vpop.f32.mrf.mxu1 }
 0x51e   : > { %v9086_v63 = vsel %vm9082_vm3, %v17785_v49, -inf  ;;  %v8632_v2 = vpop.f32.mrf.mxu0 }
 0x51f   : > { %v8352_v35 = vpop.f32.mrf.mxu1  ;;  %9087 = vmax.xlane.f32.xlu0 %v9086_v63 }
 0x520   : > { %v8708_v28 = vpop.f32.mrf.mxu0 }
 0x521   : > { %v8428_v43 = vpop.f32.mrf.mxu1 }
 0x522   : > { %v8429_v21 = vadd.f32 %v8428_v43, %v8388_v3  ;;  %v8710_v8 = vpop.f32.mrf.mxu0 }
 0x523   : > { %v8430_v30 = vpop.f32.mrf.mxu1 }
 0x524   : > { %v8469_v40 = vadd.f32 %v8468_v27, %v8429_v21  ;;  %v8711_v52 = vpop.f32.mrf.mxu0 }
 0x525   : > { %v8431_v36 = vpop.f32.mrf.mxu1 }
 0x526   : > { %v17789_v15 = vmul.f32 0.10206208, %v8469_v40  ;;  %v8712_v20 = vpop.f32.mrf.mxu0 }
 0x527   : > { %v8432_v61 = vpop.f32.mrf.mxu1 }
 0x528   : > { %v9089_v46 = vsel %vm9082_vm3, %v17789_v15, -inf  ;;  %v8788_v22 = vpop.f32.mrf.mxu0 }
 0x529   : > { %v8508_v14 = vpop.f32.mrf.mxu1  ;;  %9090 = vmax.xlane.f32.xlu1 %v9089_v46 }
 0x52a   : > { %v8790_v12 = vpop.f32.mrf.mxu0  ;;  %v8549_v47 = vadd.f32 %v8548_v44, %v8508_v14 }
 0x52b   : > { %v8510_v6 = vpop.f32.mrf.mxu1 }
 0x52c   : > { %v8791_v25 = vpop.f32.mrf.mxu0 }
 0x52d   : > { %v8511_v18 = vpop.f32.mrf.mxu1 }
 0x52e   : > { %v8792_v57 = vpop.f32.mrf.mxu0 }
 0x52f   : > { %v8512_v3 = vpop.f32.mrf.mxu1 }
 0x530   : > { %v8868_v32 = vpop.f32.mrf.mxu0 }
 0x531   : > { %v8588_v27 = vpop.f32.mrf.mxu1 }
 0x532   : > { %v8589_v37 = vadd.f32 %v8588_v27, %v8549_v47  ;;  %v8870_v9 = vpop.f32.mrf.mxu0 }
 0x533   : > { %v8590_v5 = vpop.f32.mrf.mxu1 }
 0x534   : > { %v17793_v13 = vmul.f32 0.10206208, %v8589_v37  ;;  %v8871_v23 = vpop.f32.mrf.mxu0 }
 0x535   : > { %v8591_v16 = vpop.f32.mrf.mxu1 }
 0x536   : > { %v9092_v38 = vsel %vm9082_vm3, %v17793_v13, -inf  ;;  %v8872_v53 = vpop.f32.mrf.mxu0 }
 0x537   : > { %v8592_v54 = vpop.f32.mrf.mxu1  ;;  %9093 = vmax.xlane.f32.xlu1 %v9092_v38 }
 0x538   : > { %v8948_v33 = vpop.f32.mrf.mxu0 }
 0x539   : > { %v8668_v39 = vpop.f32.mrf.mxu1 }
 0x53a   : > { %v8669_v19 = vadd.f32 %v8668_v39, %v8628_v60  ;;  %v8950_v58 = vpop.f32.mrf.mxu0 }
 0x53b   : > { %v8670_v55 = vpop.f32.mrf.mxu1 }
 0x53c   : > { %v8709_v44 = vadd.f32 %v8708_v28, %v8669_v19  ;;  %v8951_v34 = vpop.f32.mrf.mxu0 }
 0x53d   : > { %v8671_v24 = vpop.f32.mrf.mxu1 }
 0x53e   : > { %v17797_v17 = vmul.f32 0.10206208, %v8709_v44  ;;  %v8952_v63 = vpop.f32.mrf.mxu0  ;;  %v16993_v44 = vmov 0  }
 0x53f   : > { %v8672_v62 = vpop.f32.mrf.mxu1  ;;  %14793 = vset.pattern.permute.xlu1 %v16993_v44  ;;  %9214 = vmatprep.mubr.bf16.mxu0 %v16993_v44 }
 0x540   : > { %v9095_v35 = vsel %vm9082_vm3, %v17797_v17, -inf  ;;  %v9028_v43 = vpop.f32.mrf.mxu0  ;;  %9255 = vmatprep.mubr.bf16.mxu1 %v16993_v44  ;;  %14794 = vset.pattern.permute.xlu0 %v16993_v44 }
 0x541   : > { %v8748_v2 = vpop.f32.mrf.mxu1  ;;  %9096 = vmax.xlane.f32.xlu0 %v9095_v35 }
 0x542   : > { %v9030_v30 = vpop.f32.mrf.mxu0  ;;  %v8789_v36 = vadd.f32 %v8788_v22, %v8748_v2 }
 0x543   : > { %v8750_v21 = vpop.f32.mrf.mxu1 }
 0x544   : > { %v9031_v60 = vpop.f32.mrf.mxu0 }
 0x545   : > { %v8751_v8 = vpop.f32.mrf.mxu1 }
 0x546   : > { %v9032_v28 = vpop.f32.mrf.mxu0 }
 0x547   : > { %v8752_v40 = vpop.f32.mrf.mxu1 }
 0x549   : > { %v8828_v52 = vpop.f32.mrf.mxu1 }
 0x54a   : > { %v8829_v61 = vadd.f32 %v8828_v52, %v8789_v36 }
 0x54b   : > { %v8830_v20 = vpop.f32.mrf.mxu1 }
 0x54c   : > { %v17801_v46 = vmul.f32 0.10206208, %v8829_v61 }
 0x54d   : > { %v8831_v14 = vpop.f32.mrf.mxu1 }
 0x54e   : > { %v9098_v6 = vsel %vm9082_vm3, %v17801_v46, -inf }
 0x54f   : > { %v8832_v12 = vpop.f32.mrf.mxu1  ;;  %9099 = vmax.xlane.f32.xlu1 %v9098_v6 }
 0x551   : > { %v8908_v18 = vpop.f32.mrf.mxu1 }
 0x552   : > { %v8909_v25 = vadd.f32 %v8908_v18, %v8868_v32 }
 0x553   : > { %v8910_v3 = vpop.f32.mrf.mxu1 }
 0x554   : > { %v8949_v57 = vadd.f32 %v8948_v33, %v8909_v25 }
 0x555   : > { %v8911_v47 = vpop.f32.mrf.mxu1 }
 0x556   : > { %v17805_v27 = vmul.f32 0.10206208, %v8949_v57 }
 0x557   : > { %v8912_v22 = vpop.f32.mrf.mxu1 }
 0x558   : > { %v9101_v37 = vsel %vm9082_vm3, %v17805_v27, -inf }
 0x559   : > { %v8988_v5 = vpop.f32.mrf.mxu1  ;;  %9102 = vmax.xlane.f32.xlu0 %v9101_v37 }
 0x55a   : > { %v9029_v38 = vadd.f32 %v9028_v43, %v8988_v5 }
 0x55b   : > { %v8990_v9 = vpop.f32.mrf.mxu1 }
 0x55d   : > { %v8991_v16 = vpop.f32.mrf.mxu1 }
 0x55f   : > { %v8992_v23 = vpop.f32.mrf.mxu1 }
 0x561   : > { %v9068_v54 = vpop.f32.mrf.mxu1 }
 0x562   : > { %v9069_v53 = vadd.f32 %v9068_v54, %v9029_v38 }
 0x563   : > { %v9070_v39 = vpop.f32.mrf.mxu1 }
 0x564   : > { %v9081_v19 = vmul.f32 0.10206208, %v9069_v53  ;;  %v17859_v39 = vld [vmem:[%s705_s30] sm:$0xff] }
 0x565   : > { %v9071_v32 = vpop.f32.mrf.mxu1  ;;  %vm1285_vm1 = vcmp.ne.s32.totalorder %v17859_v39, 4294967196 }
 0x566   : > { %v9104_v33 = vsel %vm9082_vm3, %v9081_v19, -inf }
 0x567   : > { %v9072_v55 = vpop.f32.mrf.mxu1  ;;  %9105 = vmax.xlane.f32.xlu1 %v9104_v33 }
 0x5a2   : > { %v9085_v58 = vpop.xlane.xlu0 %9084 }
 0x5a3   : > { %v9107_v24 = vsub.f32 %v17781_v51, %v9085_v58 }
 0x5a5   : > { %v9115_v34 = vmul.f32 1.442695, %v9107_v24 }
 0x5a7   : > { %16634 = vpow2.f32 %v9115_v34 }
 0x5a8   : > { %v9088_v62 = vpop.xlane.xlu0 %9087 }
 0x5a9   : > { %v9108_v63 = vsub.f32 %v17785_v49, %v9088_v62 }
 0x5ab   : > { %v9117_v35 = vmul.f32 1.442695, %v9108_v63 }
 0x5ad   : > { %16636 = vpow2.f32 %v9117_v35 }
 0x5b2   : > { %v9091_v2 = vpop.xlane.xlu1 %9090 }
 0x5b3   : > { %v9109_v43 = vsub.f32 %v17789_v15, %v9091_v2 }
 0x5b4   : > { %v16635_v21 = vpop.eup %16634 }
 0x5b5   : > { %v9119_v30 = vmul.f32 1.442695, %v9109_v43  ;;  %v9131_v8 = vsel %vm9082_vm3, %v16635_v21, 0.0 }
 0x5b6   : > { %9132 = vadd.xlane.f32.xlu0 %v9131_v8 }
 0x5b7   : > { %16638 = vpow2.f32 %v9119_v30 }
 0x5ba   : > { %v16637_v60 = vpop.eup %16636 }
 0x5bb   : > { %v9134_v40 = vsel %vm9082_vm3, %v16637_v60, 0.0 }
 0x5bc   : > { %9135 = vadd.xlane.f32.xlu1 %v9134_v40 }
 0x5c0   : > { %v9094_v51 = vpop.xlane.xlu1 %9093 }
 0x5c1   : > { %v9110_v36 = vsub.f32 %v17793_v13, %v9094_v51 }
 0x5c3   : > { %v9121_v28 = vmul.f32 1.442695, %v9110_v36 }
 0x5c4   : > { %v17820_v49 = vpop.eup %16638 }
 0x5c5   : > { %16640 = vpow2.f32 %v9121_v28  ;;  %v9137_v15 = vsel %vm9082_vm3, %v17820_v49, 0.0 }
 0x5c6   : > { %9138 = vadd.xlane.f32.xlu0 %v9137_v15 }
 0x5ca   : > { %v9097_v52 = vpop.xlane.xlu0 %9096 }
 0x5cb   : > { %v9111_v61 = vsub.f32 %v17797_v17, %v9097_v52 }
 0x5cd   : > { %v9123_v20 = vmul.f32 1.442695, %v9111_v61 }
 0x5cf   : > { %16642 = vpow2.f32 %v9123_v20 }
 0x5d2   : > { %v17825_v14 = vpop.eup %16640 }
 0x5d3   : > { %v9140_v6 = vsel %vm9082_vm3, %v17825_v14, 0.0 }
 0x5d4   : > { %9141 = vadd.xlane.f32.xlu1 %v9140_v6 }
 0x5d8   : > { %v9100_v13 = vpop.xlane.xlu1 %9099 }
 0x5d9   : > { %v9112_v12 = vsub.f32 %v17801_v46, %v9100_v13 }
 0x5db   : > { %v9125_v18 = vmul.f32 1.442695, %v9112_v12 }
 0x5dc   : > { %v17830_v25 = vpop.eup %16642 }
 0x5dd   : > { %16644 = vpow2.f32 %v9125_v18  ;;  %v9143_v3 = vsel %vm9082_vm3, %v17830_v25, 0.0 }
 0x5de   : > { %9144 = vadd.xlane.f32.xlu0 %v9143_v3 }
 0x5e2   : > { %v9103_v17 = vpop.xlane.xlu0 %9102 }
 0x5e3   : > { %v9113_v57 = vsub.f32 %v17805_v27, %v9103_v17  ;;  %v17845_v27 = vld [vmem:[%s17299_s22] sm:$0xff]  ;;  %s716_s22 = scalar_lea.vmem %s18082_s15, %s18122_s24 }
 0x5e4   : > { %v17848_v38 = vsel %vm1266_vm7, %v17845_v27, -1e+30  ;;  %vm1296_vm7 = vcmask 0  }
 0x5e5   : > { %v9127_v47 = vmul.f32 1.442695, %v9113_v57 }
 0x5e7   : > { %16646 = vpow2.f32 %v9127_v47 }
 0x5ea   : > { %v17835_v22 = vpop.eup %16644 }
 0x5eb   : > { %v9146_v37 = vsel %vm9082_vm3, %v17835_v22, 0.0 }
 0x5ec   : > { %9147 = vadd.xlane.f32.xlu1 %v9146_v37 }
 0x5f0   : > { %v9106_v46 = vpop.xlane.xlu1 %9105 }
 0x5f1   : > { %v9114_v5 = vsub.f32 %v9081_v19, %v9106_v46  ;;  %v16156_v46 = vld [vmem:[#allocation12 + $0x154] ss:$24 sps:$4 sm:$0xff]  }
 0x5f3   : > { %v9129_v9 = vmul.f32 1.442695, %v9114_v5  ;;  %v16189_v5 = vld [vmem:[#allocation12 + $0x454] ss:$24 sps:$4 sm:$0xff]  }
 0x5f4   : > { %v17839_v16 = vpop.eup %16646 }
 0x5f5   : > { %16648 = vpow2.f32 %v9129_v9  ;;  %v9149_v23 = vsel %vm9082_vm3, %v17839_v16, 0.0  ;;  %v16195_v9 = vld [vmem:[#allocation12 + $0x424] ss:$24 sps:$4 sm:$0xff]  }
 0x5f6   : > { %9150 = vadd.xlane.f32.xlu0 %v9149_v23  ;;  %v16201_v23 = vld [vmem:[#allocation12 + $0x3f4] ss:$24 sps:$4 sm:$0xff]  }
 0x5fa   : > { %1268 = vmax.xlane.f32.xlu0 %v17848_v38 }
 0x602   : > { %v17851_v54 = vpop.eup %16648 }
 0x603   : > { %v9152_v53 = vsel %vm9082_vm3, %v17851_v54, 0.0 }
 0x604   : > { %9153 = vadd.xlane.f32.xlu1 %v9152_v53  ;;  %v16165_v53 = vld [vmem:[#allocation12 + $0xc4] ss:$24 sps:$4 sm:$0xff]  }
 0x615   : > { %1279 = vperm.xlu1 %14793, %v17859_v39   ;;  %v16243_v39 = vld [vmem:[#allocation12 + $0x6c4] ss:$24 sps:$4 sm:$0xff]  }
 0x63f   : > { %v9133_v19 = vpop.xlane.xlu0 %9132 }
 0x640   : > { %16650 = vrcp.f32 %v9133_v19  ;;  %v16207_v19 = vld [vmem:[#allocation12 + $0x3c4] ss:$24 sps:$4 sm:$0xff]  }
 0x645   : > { %v9136_v32 = vpop.xlane.xlu1 %9135 }
 0x646   : > { %16652 = vrcp.f32 %v9136_v32 }
 0x64d   : > { %v16651_v33 = vpop.eup %16650 }
 0x64e   : > { %v9163_v55 = vmul.f32 %v16651_v33, %v16635_v21 }
 0x64f   : > { %v9139_v24 = vpop.xlane.xlu0 %9138 }
 0x650   : > { %v9171_v58 = vpack.c.bf16 %v9163_v55, %v9163_v55  ;;  %16654 = vrcp.f32 %v9139_v24  ;;  %v16163_v55 = vld [vmem:[#allocation12 + $0xc0] ss:$24 sps:$4 sm:$0xff]   ;;  %v16168_v24 = vld [vmem:[#allocation12 + $0x94] ss:$24 sps:$4 sm:$0xff]  }
 0x652   : > { %14178 = vmatmul.mubr.msk.bf16.vlgmr.msra.gmra.mxu0 %vm9082_vm3, %v9171_v58  ;;  %14179 = vmatmul.mubr.msk.bf16.vlgmr.msra.gmra.mxu1 %vm9082_vm3, %v9171_v58 }
 0x653   : > { %v16653_v34 = vpop.eup %16652  ;;  %9279 = vmatpush1.bf16.msra.mxu0 %v17776_v45  ;;  %9323 = vmatpush1.bf16.msra.mxu1 %v17739_v59 }
 0x654   : > { %v9164_v62 = vmul.f32 %v16653_v34, %v16637_v60  ;;  %9363 = vmatprep.subr.bf16.mxu0 %v17767_v29  ;;  %9404 = vmatprep.subr.bf16.mxu1 %v17778_v7 }
 0x655   : > { %9296 = vmatprep.mubr.bf16.mxu0 %v16993_v44  ;;  %9340 = vmatprep.mubr.bf16.mxu1 %v16993_v44 }
 0x656   : > { %v9172_v63 = vpack.c.bf16 %v9164_v62, %v9164_v62  ;;  %v16213_v62 = vld [vmem:[#allocation12 + $0x394] ss:$24 sps:$4 sm:$0xff]  }
 0x65a   : > { %14180 = vmatmul.mubr.msk.bf16.vlgmr.msra.gmra.mxu0 %vm9082_vm3, %v9171_v58  ;;  %14181 = vmatmul.mubr.msk.bf16.vlgmr.msra.gmra.mxu1 %vm9082_vm3, %v9172_v63  ;;  %v16205_v58 = vld [vmem:[#allocation12 + $0x3c0] ss:$24 sps:$4 sm:$0xff]  }
 0x65b   : > { %9364 = vmatpush1.bf16.msra.mxu0 %v17769_v50  ;;  %9405 = vmatpush1.bf16.msra.mxu1 %v17776_v45 }
 0x65c   : > { %9448 = vmatprep.subr.bf16.mxu0 %v17730_v41  ;;  %9489 = vmatprep.subr.bf16.mxu1 %v17767_v29 }
 0x65d   : > { %v9142_v35 = vpop.xlane.xlu1 %9141  ;;  %9381 = vmatprep.mubr.bf16.mxu0 %v16993_v44  ;;  %9422 = vmatprep.mubr.bf16.mxu1 %v16993_v44  ;;  %v16655_v2 = vpop.eup %16654 }
 0x65e   : > { %16656 = vrcp.f32 %v9142_v35  ;;  %v9165_v43 = vmul.f32 %v16655_v2, %v17820_v49  ;;  %v16166_v35 = vld [vmem:[#allocation12 + $0x90] ss:$24 sps:$4 sm:$0xff]  }
 0x65f   : > { %v16211_v2 = vld [vmem:[#allocation12 + $0x390] ss:$24 sps:$4 sm:$0xff]  }
 0x660   : > { %v9173_v21 = vpack.c.bf16 %v9165_v43, %v9165_v43  ;;  %v16171_v43 = vld [vmem:[#allocation12 + $0x64] ss:$24 sps:$4 sm:$0xff]  }
 0x662   : > { %14182 = vmatmul.mubr.msk.bf16.vlgmr.msra.gmra.mxu0 %vm9082_vm3, %v9172_v63  ;;  %14183 = vmatmul.mubr.msk.bf16.vlgmr.msra.gmra.mxu1 %vm9082_vm3, %v9172_v63 }
 0x663   : > { %9449 = vmatpush1.bf16.msra.mxu0 %v17739_v59  ;;  %9490 = vmatpush1.bf16.msra.mxu1 %v17769_v50 }
 0x664   : > { %9530 = vmatprep.subr.bf16.mxu0 %v17778_v7  ;;  %9574 = vmatprep.subr.bf16.mxu1 %v17730_v41 }
 0x665   : > { %9466 = vmatprep.mubr.bf16.mxu0 %v16993_v44  ;;  %9507 = vmatprep.mubr.bf16.mxu1 %v16993_v44 }
 0x667   : > { %v9145_v30 = vpop.xlane.xlu0 %9144 }
 0x668   : > { %16658 = vrcp.f32 %v9145_v30  ;;  %v16219_v30 = vld [vmem:[#allocation12 + $0x364] ss:$24 sps:$4 sm:$0xff]  }
 0x66a   : > { %14184 = vmatmul.mubr.msk.bf16.vlgmr.msra.gmra.mxu0 %vm9082_vm3, %v9173_v21  ;;  %14185 = vmatmul.mubr.msk.bf16.vlgmr.msra.gmra.mxu1 %vm9082_vm3, %v9173_v21 }
 0x66b   : > { %v16657_v8 = vpop.eup %16656  ;;  %9531 = vmatpush1.bf16.msra.mxu0 %v17776_v45  ;;  %9575 = vmatpush1.bf16.msra.mxu1 %v17739_v59 }
 0x66c   : > { %v9166_v60 = vmul.f32 %v16657_v8, %v17825_v14  ;;  %9615 = vmatprep.subr.bf16.mxu0 %v17767_v29  ;;  %9656 = vmatprep.subr.bf16.mxu1 %v17778_v7 }
 0x66d   : > { %9548 = vmatprep.mubr.bf16.mxu0 %v16993_v44  ;;  %9592 = vmatprep.mubr.bf16.mxu1 %v16993_v44 }
 0x66e   : > { %v9174_v40 = vpack.c.bf16 %v9166_v60, %v9166_v60  ;;  %v16169_v60 = vld [vmem:[#allocation12 + $0x60] ss:$24 sps:$4 sm:$0xff]  }
 0x672   : > { %14186 = vmatmul.mubr.msk.bf16.vlgmr.msra.gmra.mxu0 %vm9082_vm3, %v9173_v21  ;;  %14187 = vmatmul.mubr.msk.bf16.vlgmr.msra.gmra.mxu1 %vm9082_vm3, %v9174_v40 }
 0x673   : > { %9616 = vmatpush1.bf16.msra.mxu0 %v17769_v50  ;;  %9657 = vmatpush1.bf16.msra.mxu1 %v17776_v45 }
 0x674   : > { %9700 = vmatprep.subr.bf16.mxu0 %v17730_v41  ;;  %9741 = vmatprep.subr.bf16.mxu1 %v17767_v29 }
 0x675   : > { %v9148_v51 = vpop.xlane.xlu1 %9147  ;;  %9633 = vmatprep.mubr.bf16.mxu0 %v16993_v44  ;;  %9674 = vmatprep.mubr.bf16.mxu1 %v16993_v44  ;;  %v16659_v36 = vpop.eup %16658 }
 0x676   : > { %16660 = vrcp.f32 %v9148_v51  ;;  %v9167_v28 = vmul.f32 %v16659_v36, %v17830_v25  ;;  %v16174_v51 = vld [vmem:[#allocation12 + $0x34] ss:$24 sps:$4 sm:$0xff]  }
 0x678   : > { %v9175_v15 = vpack.c.bf16 %v9167_v28, %v9167_v28  ;;  %v16222_v28 = vld [vmem:[#allocation12 + $0x334] ss:$24 sps:$4 sm:$0xff]  }
 0x67a   : > { %14188 = vmatmul.mubr.msk.bf16.vlgmr.msra.gmra.mxu0 %vm9082_vm3, %v9174_v40  ;;  %14189 = vmatmul.mubr.msk.bf16.vlgmr.msra.gmra.mxu1 %vm9082_vm3, %v9174_v40  ;;  %v16217_v40 = vld [vmem:[#allocation12 + $0x360] ss:$24 sps:$4 sm:$0xff]  }
 0x67b   : > { %9701 = vmatpush1.bf16.msra.mxu0 %v17739_v59  ;;  %9742 = vmatpush1.bf16.msra.mxu1 %v17769_v50 }
 0x67c   : > { %9782 = vmatprep.subr.bf16.mxu0 %v17778_v7  ;;  %9826 = vmatprep.subr.bf16.mxu1 %v17730_v41 }
 0x67d   : > { %9718 = vmatprep.mubr.bf16.mxu0 %v16993_v44  ;;  %9759 = vmatprep.mubr.bf16.mxu1 %v16993_v44 }
 0x67f   : > { %v9151_v49 = vpop.xlane.xlu0 %9150 }
 0x680   : > { %16662 = vrcp.f32 %v9151_v49  ;;  %v16172_v49 = vld [vmem:[#allocation12 + $0x30] ss:$24 sps:$4 sm:$0xff]  }
 0x682   : > { %14190 = vmatmul.mubr.msk.bf16.vlgmr.msra.gmra.mxu0 %vm9082_vm3, %v9175_v15  ;;  %14191 = vmatmul.mubr.msk.bf16.vlgmr.msra.gmra.mxu1 %vm9082_vm3, %v9175_v15 }
 0x683   : > { %v16661_v52 = vpop.eup %16660  ;;  %9783 = vmatpush1.bf16.msra.mxu0 %v17776_v45  ;;  %9827 = vmatpush1.bf16.msra.mxu1 %v17739_v59  ;;  %v17917_v61 = vpop.xlane.xlu0 %1268 }
 0x684   : > { %v9168_v20 = vmul.f32 %v16661_v52, %v17835_v22  ;;  %9867 = vmatprep.subr.bf16.mxu0 %v17767_v29  ;;  %9908 = vmatprep.subr.bf16.mxu1 %v17778_v7  ;;  %v1270_v14 = vsub.f32 %v17848_v38, %v17917_v61  ;;  %v16160_v38 = vld [vmem:[#allocation12 + $0xf0] ss:$24 sps:$4 sm:$0xff]   ;;  %v16177_v52 = vld [vmem:[#allocation12 + $0x4] ss:$24 sps:$4 sm:$0xff]  }
 0x685   : > { %9800 = vmatprep.mubr.bf16.mxu0 %v16993_v44  ;;  %9844 = vmatprep.mubr.bf16.mxu1 %v16993_v44 }
 0x686   : > { %v1271_v6 = vmul.f32 1.442695, %v1270_v14  ;;  %v9176_v13 = vpack.c.bf16 %v9168_v20, %v9168_v20  ;;  %v16228_v20 = vld [vmem:[#allocation12 + $0x304] ss:$24 sps:$4 sm:$0xff]   ;;  %v16175_v14 = vld [vmem:[#allocation12] ss:$24 sps:$4 sm:$0xff]  }
 0x688   : > { %16664 = vpow2.f32 %v1271_v6  ;;  %v16226_v6 = vld [vmem:[#allocation12 + $0x300] ss:$24 sps:$4 sm:$0xff]  }
 0x68a   : > { %14192 = vmatmul.mubr.msk.bf16.vlgmr.msra.gmra.mxu0 %vm9082_vm3, %v9175_v15  ;;  %14193 = vmatmul.mubr.msk.bf16.vlgmr.msra.gmra.mxu1 %vm9082_vm3, %v9176_v13  ;;  %v16220_v15 = vld [vmem:[#allocation12 + $0x330] ss:$24 sps:$4 sm:$0xff]  }
 0x68b   : > { %9868 = vmatpush1.bf16.msra.mxu0 %v17769_v50  ;;  %9909 = vmatpush1.bf16.msra.mxu1 %v17776_v45 }
 0x68c   : > { %9952 = vmatprep.subr.bf16.mxu0 %v17730_v41  ;;  %9993 = vmatprep.subr.bf16.mxu1 %v17767_v29 }
 0x68d   : > { %v9154_v12 = vpop.xlane.xlu1 %9153  ;;  %9885 = vmatprep.mubr.bf16.mxu0 %v16993_v44  ;;  %9926 = vmatprep.mubr.bf16.mxu1 %v16993_v44  ;;  %v16663_v18 = vpop.eup %16662 }
 0x68e   : > { %16666 = vrcp.f32 %v9154_v12  ;;  %v9169_v25 = vmul.f32 %v16663_v18, %v17839_v16  ;;  %v16157_v16 = vld [vmem:[#allocation12 + $0x120] ss:$24 sps:$4 sm:$0xff]   ;;  %v16234_v12 = vld [vmem:[#allocation12 + $0x5d4] ss:$24 sps:$4 sm:$0xff]   ;;  %v16178_v18 = vld [vmem:[#allocation12 + $0x2d0] ss:$24 sps:$4 sm:$0xff]  }
 0x690   : > { %v9177_v57 = vpack.c.bf16 %v9169_v25, %v9169_v25  ;;  %v16232_v25 = vld [vmem:[#allocation12 + $0x5d0] ss:$24 sps:$4 sm:$0xff]  }
 0x691   : > { %v1280_v17 = vpop.permute.xlu1 %1279 }
 0x692   : > { %14194 = vmatmul.mubr.msk.bf16.vlgmr.msra.gmra.mxu0 %vm9082_vm3, %v9176_v13  ;;  %14195 = vmatmul.mubr.msk.bf16.vlgmr.msra.gmra.mxu1 %vm9082_vm3, %v9176_v13  ;;  %vm1281_vm12 = vcmp.eq.s32.totalorder %v17561_v4, %v1280_v17  ;;  %v16180_v13 = vld [vmem:[#allocation12 + $0x2d4] ss:$24 sps:$4 sm:$0xff]   ;;  %v16240_v17 = vld [vmem:[#allocation12 + $0x5a4] ss:$24 sps:$4 sm:$0xff]  }
 0x693   : > { %9953 = vmatpush1.bf16.msra.mxu0 %v17739_v59  ;;  %9994 = vmatpush1.bf16.msra.mxu1 %v17769_v50 }
 0x694   : > { %10034 = vmatprep.subr.bf16.mxu0 %v17778_v7  ;;  %10078 = vmatprep.subr.bf16.mxu1 %v17730_v41  ;;  %v1282_v41 = vsel %vm1281_vm12, %v17845_v27, 0.0 }
 0x695   : > { %v16665_v3 = vpop.eup %16664  ;;  %9970 = vmatprep.mubr.bf16.mxu0 %v16993_v44  ;;  %10011 = vmatprep.mubr.bf16.mxu1 %v16993_v44 }
 0x696   : > { %1273 = vadd.xlane.f32.xlu0 %v16665_v3  ;;  %v16183_v3 = vld [vmem:[#allocation12 + $0x2a4] ss:$24 sps:$4 sm:$0xff]  }
 0x69a   : > { %14196 = vmatmul.mubr.msk.bf16.vlgmr.msra.gmra.mxu0 %vm9082_vm3, %v9177_v57  ;;  %14197 = vmatmul.mubr.msk.bf16.vlgmr.msra.gmra.mxu1 %vm9082_vm3, %v9177_v57 }
 0x69b   : > { %v16667_v47 = vpop.eup %16666  ;;  %10035 = vmatpush1.bf16.msra.mxu0 %v17776_v45  ;;  %10079 = vmatpush1.bf16.msra.mxu1 %v17739_v59  ;;  %v16154_v59 = vld [vmem:[#allocation12 + $0x150] ss:$24 sps:$4 sm:$0xff]  }
 0x69c   : > { %v9170_v22 = vmul.f32 %v16667_v47, %v17851_v54  ;;  %1283 = vadd.xlane.f32.xlu0 %v1282_v41  ;;  %10119 = vmatprep.subr.bf16.mxu0 %v17767_v29  ;;  %v16187_v29 = vld [vmem:[#allocation12 + $0x450] ss:$24 sps:$4 sm:$0xff]   ;;  %v16238_v47 = vld [vmem:[#allocation12 + $0x5a0] ss:$24 sps:$4 sm:$0xff]   ;;  %v16186_v41 = vld [vmem:[#allocation12 + $0x274] ss:$24 sps:$4 sm:$0xff]  }
 0x69d   : > { %10160 = vmatprep.subr.bf16.mxu1 %v17778_v7  ;;  %10052 = vmatprep.mubr.bf16.mxu0 %v16993_v44  ;;  %v16159_v7 = vld [vmem:[#allocation12 + $0x124] ss:$24 sps:$4 sm:$0xff]   ;;  %v16199_v54 = vld [vmem:[#allocation12 + $0x3f0] ss:$24 sps:$4 sm:$0xff]  }
 0x69e   : > { %10096 = vmatprep.mubr.bf16.mxu1 %v16993_v44  ;;  %v9178_v37 = vpack.c.bf16 %v9170_v22, %v9170_v22  ;;  %v16246_v22 = vld [vmem:[#allocation12 + $0x574] ss:$24 sps:$4 sm:$0xff]  }
 0x6a2   : > { %14198 = vmatmul.mubr.msk.bf16.vlgmr.msra.gmra.mxu0 %vm9082_vm3, %v9177_v57  ;;  %14199 = vmatmul.mubr.msk.bf16.vlgmr.msra.gmra.mxu1 %vm9082_vm3, %v9178_v37  ;;  %v16181_v57 = vld [vmem:[#allocation12 + $0x2a0] ss:$24 sps:$4 sm:$0xff]  }
 0x6a3   : > { %10120 = vmatpush1.bf16.msra.mxu0 %v17769_v50  ;;  %10161 = vmatpush1.bf16.msra.mxu1 %v17776_v45  ;;  %v16193_v50 = vld [vmem:[#allocation12 + $0x420] ss:$24 sps:$4 sm:$0xff]   ;;  %v16162_v45 = vld [vmem:[#allocation12 + $0xf4] ss:$24 sps:$4 sm:$0xff]  }
 0x6a4   : > { %10137 = vmatprep.mubr.bf16.mxu0 %v16993_v44  ;;  %10178 = vmatprep.mubr.bf16.mxu1 %v16993_v44  ;;  %v16994_v44 = vmov 0.0  }
 0x6a5   : > { %12043 = vmatprep.subr.bf16.mxu0 %v16156_v46  ;;  %12084 = vmatprep.subr.bf16.mxu1 %v16189_v5  ;;  %v13271_v27 = vsel %vm1285_vm1, 1.0, %v16994_v44  ;;  %v16244_v46 = vld [vmem:[#allocation12 + $0x570] ss:$24 sps:$4 sm:$0xff]   ;;  %v16192_v5 = vld [vmem:[#allocation12 + $0x244] ss:$24 sps:$4 sm:$0xff]  }
 0x6a6   : > { %v16264_v44 = vld [vmem:[#allocation12 + $0x4e4] ss:$24 sps:$4 sm:$0xff]  }
 0x6aa   : > { %14200 = vmatmul.mubr.msk.bf16.vlgmr.msra.gmra.mxu0 %vm9082_vm3, %v9178_v37  ;;  %14201 = vmatmul.mubr.msk.bf16.vlgmr.msra.gmra.mxu1 %vm9082_vm3, %v9178_v37  ;;  %vm1288_vm3 = vcmask 7168   ;;  %v16184_v37 = vld [vmem:[#allocation12 + $0x270] ss:$24 sps:$4 sm:$0xff]  }
 0x6ab   : > { %12044 = vmatpush1.bf16.msra.mxu0 %v16154_v59  ;;  %12085 = vmatpush1.bf16.msra.mxu1 %v16187_v29  ;;  %v1300_v32 = vsel %vm1288_vm3, %v13271_v27, 0.0  ;;  %v16252_v59 = vld [vmem:[#allocation12 + $0x544] ss:$24 sps:$4 sm:$0xff]   ;;  %v16190_v29 = vld [vmem:[#allocation12 + $0x240] ss:$24 sps:$4 sm:$0xff]  }
 0x6ac   : > { %12045 = vmatprep.subr.bf16.mxu0 %v16159_v7  ;;  %12086 = vmatprep.subr.bf16.mxu1 %v16195_v9  ;;  %v1301_v33 = vrot.slane %v1300_v32, 4  ;;  %v16250_v7 = vld [vmem:[#allocation12 + $0x540] ss:$24 sps:$4 sm:$0xff]   ;;  %v16198_v9 = vld [vmem:[#allocation12 + $0x214] ss:$24 sps:$4 sm:$0xff]  }
 0x6ad   : > { %v16202_v27 = vld [vmem:[#allocation12 + $0x1e0] ss:$24 sps:$4 sm:$0xff]  }
 0x6ae   : > { %v1302_v34 = vadd.f32 %v1301_v33, %v1300_v32  ;;  %v16268_v32 = vld [vmem:[#allocation12 + $0x4b0] ss:$24 sps:$4 sm:$0xff]   ;;  %v16216_v33 = vld [vmem:[#allocation12 + $0x184] ss:$24 sps:$4 sm:$0xff]  }
 0x6af   : > { %12046 = vmatpush1.bf16.msra.mxu0 %v16157_v16  ;;  %12087 = vmatpush1.bf16.msra.mxu1 %v16193_v50  ;;  %v16258_v16 = vld [vmem:[#allocation12 + $0x514] ss:$24 sps:$4 sm:$0xff]   ;;  %v16196_v50 = vld [vmem:[#allocation12 + $0x210] ss:$24 sps:$4 sm:$0xff]  }
 0x6b0   : > { %12047 = vmatprep.subr.bf16.mxu0 %v16162_v45  ;;  %12088 = vmatprep.subr.bf16.mxu1 %v16201_v23  ;;  %v1303_v63 = vrot.slane %v1302_v34, 2  ;;  %v16256_v45 = vld [vmem:[#allocation12 + $0x510] ss:$24 sps:$4 sm:$0xff]   ;;  %v16204_v23 = vld [vmem:[#allocation12 + $0x1e4] ss:$24 sps:$4 sm:$0xff]  }
 0x6b2   : > { %v1304_v21 = vadd.f32 %v1303_v63, %v1302_v34  ;;  %v16225_v34 = vld [vmem:[#allocation12 + $0x754] ss:$24 sps:$4 sm:$0xff]  }
 0x6b3   : > { %12048 = vmatpush1.bf16.msra.mxu0 %v16160_v38  ;;  %12089 = vmatpush1.bf16.msra.mxu1 %v16199_v54  ;;  %v16262_v38 = vld [vmem:[#allocation12 + $0x4e0] ss:$24 sps:$4 sm:$0xff]   ;;  %v16210_v54 = vld [vmem:[#allocation12 + $0x1b4] ss:$24 sps:$4 sm:$0xff]  }
 0x6b4   : > { %12049 = vmatprep.subr.bf16.mxu0 %v16165_v53  ;;  %12090 = vmatprep.subr.bf16.mxu1 %v16207_v19  ;;  %v1305_v8 = vrot.slane %v1304_v21, 1  ;;  %v16270_v53 = vld [vmem:[#allocation12 + $0x4b4] ss:$24 sps:$4 sm:$0xff]   ;;  %v16208_v19 = vld [vmem:[#allocation12 + $0x1b0] ss:$24 sps:$4 sm:$0xff]  }
 0x6b6   : > { %v1306_v36 = vadd.f32 %v1305_v8, %v1304_v21 }
 0x6b7   : > { %12050 = vmatpush1.bf16.msra.mxu0 %v16163_v55  ;;  %12091 = vmatpush1.bf16.msra.mxu1 %v16205_v58  ;;  %v16276_v55 = vld [vmem:[#allocation12 + $0x484] ss:$24 sps:$4 sm:$0xff]   ;;  %v16214_v58 = vld [vmem:[#allocation12 + $0x180] ss:$24 sps:$4 sm:$0xff]  }
 0x6b8   : > { %12051 = vmatprep.subr.bf16.mxu0 %v16168_v24  ;;  %12092 = vmatprep.subr.bf16.mxu1 %v16213_v62  ;;  %1307 = vst.msk [vmem:[%s719_s3] sm:$0x1] %vm1296_vm7, %v1306_v36  ;;  %v16274_v24 = vld [vmem:[#allocation12 + $0x480] ss:$24 sps:$4 sm:$0xff]   ;;  %v16285_v62 = vld [vmem:[#allocation12 + $0x15c] ss:$24 sps:$4 sm:$0xff]  }
 0x6bb   : > { %12052 = vmatpush1.bf16.msra.mxu0 %v16166_v35  ;;  %12093 = vmatpush1.bf16.msra.mxu1 %v16211_v2 }
 0x6bc   : > { %12053 = vmatprep.subr.bf16.mxu0 %v16171_v43  ;;  %12094 = vmatprep.subr.bf16.mxu1 %v16219_v30 }
 0x6bf   : > { %12054 = vmatpush1.bf16.msra.mxu0 %v16169_v60  ;;  %12095 = vmatpush1.bf16.msra.mxu1 %v16217_v40 }
 0x6c0   : > { %12055 = vmatprep.subr.bf16.mxu0 %v16174_v51  ;;  %12096 = vmatprep.subr.bf16.mxu1 %v16222_v28 }
 0x6c3   : > { %12056 = vmatpush1.bf16.msra.mxu0 %v16172_v49  ;;  %12097 = vmatpush1.bf16.msra.mxu1 %v16220_v15 }
 0x6c4   : > { %12057 = vmatprep.subr.bf16.mxu0 %v16177_v52  ;;  %12098 = vmatprep.subr.bf16.mxu1 %v16228_v20 }
 0x6c7   : > { %12058 = vmatpush1.bf16.msra.mxu0 %v16175_v14  ;;  %12099 = vmatpush1.bf16.msra.mxu1 %v16226_v6 }
 0x6c8   : > { %12059 = vmatprep.subr.bf16.mxu0 %v16180_v13  ;;  %12100 = vmatprep.subr.bf16.mxu1 %v16234_v12 }
 0x6cb   : > { %12060 = vmatpush2.bf16.msra.mxu0 %v16178_v18  ;;  %12101 = vmatpush2.bf16.msra.mxu1 %v16232_v25 }
 0x6cc   : > { %12061 = vmatprep.subr.bf16.mxu0 %v16183_v3  ;;  %12102 = vmatprep.subr.bf16.mxu1 %v16240_v17 }
 0x6cf   : > { %12062 = vmatpush2.bf16.msra.mxu0 %v16181_v57  ;;  %12103 = vmatpush2.bf16.msra.mxu1 %v16238_v47 }
 0x6d0   : > { %12063 = vmatprep.subr.bf16.mxu0 %v16186_v41  ;;  %12104 = vmatprep.subr.bf16.mxu1 %v16246_v22 }
 0x6d3   : > { %12064 = vmatpush2.bf16.msra.mxu0 %v16184_v37  ;;  %12105 = vmatpush2.bf16.msra.mxu1 %v16244_v46 }
 0x6d4   : > { %12065 = vmatprep.subr.bf16.mxu0 %v16192_v5  ;;  %12106 = vmatprep.subr.bf16.mxu1 %v16252_v59 }
 0x6d7   : > { %12066 = vmatpush2.bf16.msra.mxu0 %v16190_v29  ;;  %12107 = vmatpush2.bf16.msra.mxu1 %v16250_v7 }
 0x6d8   : > { %12067 = vmatprep.subr.bf16.mxu0 %v16198_v9  ;;  %12108 = vmatprep.subr.bf16.mxu1 %v16258_v16 }
 0x6db   : > { %12068 = vmatpush2.bf16.msra.mxu0 %v16196_v50  ;;  %12109 = vmatpush2.bf16.msra.mxu1 %v16256_v45 }
 0x6dc   : > { %12069 = vmatprep.subr.bf16.mxu0 %v16204_v23  ;;  %12110 = vmatprep.subr.bf16.mxu1 %v16264_v44 }
 0x6df   : > { %12070 = vmatpush2.bf16.msra.mxu0 %v16202_v27  ;;  %12111 = vmatpush2.bf16.msra.mxu1 %v16262_v38 }
 0x6e0   : > { %12071 = vmatprep.subr.bf16.mxu0 %v16210_v54  ;;  %12112 = vmatprep.subr.bf16.mxu1 %v16270_v53  ;;  %v16223_v54 = vld [vmem:[#allocation12 + $0x750] ss:$24 sps:$4 sm:$0xff]  }
 0x6e3   : > { %12072 = vmatpush2.bf16.msra.mxu0 %v16208_v19  ;;  %12113 = vmatpush2.bf16.msra.mxu1 %v16268_v32  ;;  %v16231_v32 = vld [vmem:[#allocation12 + $0x724] ss:$24 sps:$4 sm:$0xff]  }
 0x6e4   : > { %12073 = vmatprep.subr.bf16.mxu0 %v16216_v33  ;;  %12114 = vmatprep.subr.bf16.mxu1 %v16276_v55 }
 0x6e7   : > { %12074 = vmatpush2.bf16.msra.mxu0 %v16214_v58  ;;  %12115 = vmatpush2.bf16.msra.mxu1 %v16274_v24 }
 0x6e8   : > { %12125 = vmatprep.subr.bf16.mxu0 %v16225_v34  ;;  %12166 = vmatprep.subr.bf16.mxu1 %v16285_v62  ;;  %v16229_v34 = vld [vmem:[#allocation12 + $0x720] ss:$24 sps:$4 sm:$0xff]  }
 0x712   : > { %v9216_v63 = vpop.f32.mrf.mxu0  ;;  %v9257_v35 = vpop.f32.mrf.mxu1 }
 0x713   : > { %v10187_v37 = vsel %vm7814_vm6, %v9216_v63, 0.0  ;;  %v16237_v63 = vld [vmem:[#allocation12 + $0x6f4] ss:$24 sps:$4 sm:$0xff]  }
 0x714   : > { %v9218_v2 = vpop.f32.mrf.mxu0  ;;  %v9259_v43 = vpop.f32.mrf.mxu1 }
 0x716   : > { %v9220_v21 = vpop.f32.mrf.mxu0  ;;  %v9261_v30 = vpop.f32.mrf.mxu1 }
 0x718   : > { %v9221_v8 = vpop.f32.mrf.mxu0  ;;  %v9262_v60 = vpop.f32.mrf.mxu1 }
 0x719   : > { %v16235_v60 = vld [vmem:[#allocation12 + $0x6f0] ss:$24 sps:$4 sm:$0xff]  }
 0x71a   : > { %v9298_v40 = vpop.f32.mrf.mxu0  ;;  %v9342_v51 = vpop.f32.mrf.mxu1 }
 0x71b   : > { %v10193_v47 = vsel %vm7772_vm2, %v9342_v51, 0.0 }
 0x71c   : > { %v9300_v36 = vpop.f32.mrf.mxu0  ;;  %v9344_v28 = vpop.f32.mrf.mxu1  ;;  %v10235_v29 = vadd.f32 %v10193_v47, %v10187_v37 }
 0x71d   : > { %v10194_v7 = vsel %vm7821_vm0, %v9344_v28, 0.0 }
 0x71e   : > { %v9302_v49 = vpop.f32.mrf.mxu0  ;;  %v9346_v15 = vpop.f32.mrf.mxu1  ;;  %v17984_v53 = vpack.c.bf16 %v10235_v29, %v10235_v29 }
 0x71f   : > { %v1274_v52 = vpop.xlane.xlu0 %1273 }
 0x720   : > { %16668 = vlog2.f32 %v1274_v52  ;;  %v9303_v20 = vpop.f32.mrf.mxu0  ;;  %v9347_v14 = vpop.f32.mrf.mxu1  ;;  %v16241_v52 = vld [vmem:[#allocation12 + $0x6c0] ss:$24 sps:$4 sm:$0xff]  }
 0x721   : > { %v16249_v20 = vld [vmem:[#allocation12 + $0x694] ss:$24 sps:$4 sm:$0xff]  }
 0x722   : > { %v9383_v6 = vpop.f32.mrf.mxu0  ;;  %v9424_v13 = vpop.f32.mrf.mxu1 }
 0x724   : > { %v9385_v12 = vpop.f32.mrf.mxu0  ;;  %v9426_v18 = vpop.f32.mrf.mxu1 }
 0x725   : > { %v1284_v19 = vpop.xlane.xlu0 %1283 }
 0x726   : > { %v9387_v25 = vpop.f32.mrf.mxu0  ;;  %v9428_v3 = vpop.f32.mrf.mxu1 }
 0x727   : > { %v16247_v3 = vld [vmem:[#allocation12 + $0x690] ss:$24 sps:$4 sm:$0xff]  }
 0x728   : > { %v9388_v17 = vpop.f32.mrf.mxu0  ;;  %v9429_v57 = vpop.f32.mrf.mxu1 }
 0x729   : > { %v16255_v17 = vld [vmem:[#allocation12 + $0x664] ss:$24 sps:$4 sm:$0xff]  }
 0x72a   : > { %v9468_v41 = vpop.f32.mrf.mxu0  ;;  %v17973_v22 = vpop.f32.mrf.mxu1 }
 0x72c   : > { %v9470_v46 = vpop.f32.mrf.mxu0  ;;  %v9511_v5 = vpop.f32.mrf.mxu1 }
 0x72d   : > { %v16669_v59 = vpop.eup %16668  ;;  %v10200_v9 = vsel %vm7779_vm4, %v9470_v46, 0.0  ;;  %v16253_v46 = vld [vmem:[#allocation12 + $0x660] ss:$24 sps:$4 sm:$0xff]   ;;  %v16261_v5 = vld [vmem:[#allocation12 + $0x634] ss:$24 sps:$4 sm:$0xff]  }
 0x72e   : > { %v1276_v16 = vmul.f32 0.6931472, %v16669_v59  ;;  %v10243_v50 = vadd.f32 %v10200_v9, %v10194_v7  ;;  %v9472_v45 = vpop.f32.mrf.mxu0  ;;  %v9513_v23 = vpop.f32.mrf.mxu1 }
 0x730   : > { %v1277_v44 = vadd.f32 %v1276_v16, %v17917_v61  ;;  %v17982_v27 = vpack.c.bf16 %v10243_v50, %v10243_v50  ;;  %v9473_v4 = vpop.f32.mrf.mxu0  ;;  %v9514_v38 = vpop.f32.mrf.mxu1  ;;  %v16259_v16 = vld [vmem:[#allocation12 + $0x630] ss:$24 sps:$4 sm:$0xff]   ;;  %v16267_v50 = vld [vmem:[#allocation12 + $0x604] ss:$24 sps:$4 sm:$0xff]  }
 0x731   : > { %v16265_v38 = vld [vmem:[#allocation12 + $0x600] ss:$24 sps:$4 sm:$0xff]  }
 0x732   : > { %v1286_v33 = vsub.f32 %v1277_v44, %v1284_v19  ;;  %v9550_v55 = vpop.f32.mrf.mxu0  ;;  %v9594_v58 = vpop.f32.mrf.mxu1  ;;  %12075 = vmatprep.mubr.bf16.mxu0 %v17982_v27 }
 0x733   : > { %12076 = vmatmul.mubr.bf16.vlgmr.msra.gmra.mxu0 %v17984_v53  ;;  %v16271_v58 = vld [vmem:[#allocation12 + $0x8d0] ss:$24 sps:$4 sm:$0xff]  }
 0x734   : > { %v1287_v48 = vsel %vm1285_vm1, %v1286_v33, 0.0  ;;  %12126 = vmatpush1.bf16.msra.mxu0 %v16223_v54  ;;  %v9552_v61 = vpop.f32.mrf.mxu0  ;;  %v9596_v24 = vpop.f32.mrf.mxu1  ;;  %v16273_v54 = vld [vmem:[#allocation12 + $0x8d4] ss:$24 sps:$4 sm:$0xff]  }
 0x735   : > { %v1289_v62 = vsel %vm1288_vm3, %v1287_v48, 0.0  ;;  %12127 = vmatprep.subr.bf16.mxu0 %v16231_v32  ;;  %v16279_v48 = vld [vmem:[#allocation12 + $0x8a4] ss:$24 sps:$4 sm:$0xff]  }
 0x736   : > { %v1290_v35 = vrot.slane %v1289_v62, 4  ;;  %v9554_v2 = vpop.f32.mrf.mxu0  ;;  %v9598_v43 = vpop.f32.mrf.mxu1 }
 0x737   : > { %v16277_v2 = vld [vmem:[#allocation12 + $0x8a0] ss:$24 sps:$4 sm:$0xff]  }
 0x738   : > { %v1291_v21 = vadd.f32 %v1290_v35, %v1289_v62  ;;  %12128 = vmatpush1.bf16.msra.mxu0 %v16229_v34  ;;  %v9555_v30 = vpop.f32.mrf.mxu0  ;;  %v9599_v8 = vpop.f32.mrf.mxu1  ;;  %v10201_v62 = vsel %vm7828_vm10, %v17973_v22, 0.0 }
 0x739   : > { %12129 = vmatprep.subr.bf16.mxu0 %v16237_v63  ;;  %v16282_v8 = vld [vmem:[#allocation12 + $0x874] ss:$24 sps:$4 sm:$0xff]  }
 0x73a   : > { %v1292_v40 = vrot.slane %v1291_v21, 2  ;;  %v9635_v51 = vpop.f32.mrf.mxu0  ;;  %v9676_v36 = vpop.f32.mrf.mxu1 }
 0x73b   : > { %v10207_v61 = vsel %vm7786_vm8, %v9635_v51, 0.0  ;;  %v16280_v36 = vld [vmem:[#allocation12 + $0x870] ss:$24 sps:$4 sm:$0xff]  }
 0x73c   : > { %v1293_v28 = vadd.f32 %v1292_v40, %v1291_v21  ;;  %12130 = vmatpush1.bf16.msra.mxu0 %v16235_v60  ;;  %v9637_v49 = vpop.f32.mrf.mxu0  ;;  %v9678_v15 = vpop.f32.mrf.mxu1  ;;  %v10251_v43 = vadd.f32 %v10207_v61, %v10201_v62 }
 0x73d   : > { %12131 = vmatprep.subr.bf16.mxu0 %v16243_v39  ;;  %v16288_v15 = vld [vmem:[#allocation12 + $0x844] ss:$24 sps:$4 sm:$0xff]  }
 0x73e   : > { %v1294_v14 = vrot.slane %v1293_v28, 1  ;;  %v9639_v6 = vpop.f32.mrf.mxu0  ;;  %v9680_v13 = vpop.f32.mrf.mxu1  ;;  %v18009_v49 = vpack.c.bf16 %v10251_v43, %v10251_v43 }
 0x73f   : > { %v16286_v13 = vld [vmem:[#allocation12 + $0x840] ss:$24 sps:$4 sm:$0xff]  }
 0x740   : > { %v1295_v12 = vadd.f32 %v1294_v14, %v1293_v28  ;;  %12132 = vmatpush1.bf16.msra.mxu0 %v16241_v52  ;;  %v9640_v18 = vpop.f32.mrf.mxu0  ;;  %v9681_v25 = vpop.f32.mrf.mxu1  ;;  %v16283_v28 = vld [vmem:[#allocation12 + $0x158] ss:$24 sps:$4 sm:$0xff]  }
 0x741   : > { %12133 = vmatprep.subr.bf16.mxu0 %v16249_v20  ;;  %v16294_v18 = vld [vmem:[#allocation12 + $0x814] ss:$24 sps:$4 sm:$0xff]  }
 0x742   : > { %1297 = vst.msk [vmem:[%s716_s22] sm:$0x1] %vm1296_vm7, %v1295_v12  ;;  %v9720_v57 = vpop.f32.mrf.mxu0  ;;  %v9761_v47 = vpop.f32.mrf.mxu1  ;;  %v16289_v12 = vld [vmem:[#allocation12 + $0x128] ss:$24 sps:$4 sm:$0xff]   ;;  %v16297_v25 = vld [vmem:[#allocation12 + $0xfc] ss:$24 sps:$4 sm:$0xff]  }
 0x744   : > { %12134 = vmatpush1.bf16.msra.mxu0 %v16247_v3  ;;  %v9722_v41 = vpop.f32.mrf.mxu0  ;;  %v9763_v37 = vpop.f32.mrf.mxu1 }
 0x745   : > { %12135 = vmatprep.subr.bf16.mxu0 %v16255_v17  ;;  %v10214_v21 = vsel %vm7841_vm14, %v9763_v37, 0.0  ;;  %v16292_v41 = vld [vmem:[#allocation12 + $0x810] ss:$24 sps:$4 sm:$0xff]  }
 0x746   : > { %v9724_v59 = vpop.f32.mrf.mxu0  ;;  %v9765_v29 = vpop.f32.mrf.mxu1  ;;  %v16295_v37 = vld [vmem:[#allocation12 + $0xf8] ss:$24 sps:$4 sm:$0xff]  }
 0x748   : > { %12136 = vmatpush1.bf16.msra.mxu0 %v16253_v46  ;;  %v9725_v7 = vpop.f32.mrf.mxu0  ;;  %v9766_v9 = vpop.f32.mrf.mxu1  ;;  %v16300_v46 = vld [vmem:[#allocation12 + $0x7e4] ss:$24 sps:$4 sm:$0xff]  }
 0x749   : > { %12137 = vmatprep.subr.bf16.mxu0 %v16261_v5  ;;  %v16303_v5 = vld [vmem:[#allocation12 + $0xcc] ss:$24 sps:$4 sm:$0xff]  }
 0x74a   : > { %v9802_v45 = vpop.f32.mrf.mxu0  ;;  %v9846_v23 = vpop.f32.mrf.mxu1 }
 0x74b   : > { %v16306_v45 = vld [vmem:[#allocation12 + $0x7b4] ss:$24 sps:$4 sm:$0xff]  }
 0x74c   : > { %12138 = vmatpush1.bf16.msra.mxu0 %v16259_v16  ;;  %v9804_v44 = vpop.f32.mrf.mxu0  ;;  %v9848_v4 = vpop.f32.mrf.mxu1  ;;  %v16298_v16 = vld [vmem:[#allocation12 + $0x7e0] ss:$24 sps:$4 sm:$0xff]   ;;  %v16309_v23 = vld [vmem:[#allocation12 + $0x9c] ss:$24 sps:$4 sm:$0xff]  }
 0x74d   : > { %12139 = vmatprep.subr.bf16.mxu0 %v16267_v50  ;;  %v16301_v50 = vld [vmem:[#allocation12 + $0xc8] ss:$24 sps:$4 sm:$0xff]  }
 0x74e   : > { %v9806_v19 = vpop.f32.mrf.mxu0  ;;  %v9850_v32 = vpop.f32.mrf.mxu1 }
 0x74f   : > { %v16304_v19 = vld [vmem:[#allocation12 + $0x7b0] ss:$24 sps:$4 sm:$0xff]  }
 0x750   : > { %12140 = vmatpush1.bf16.msra.mxu0 %v16265_v38  ;;  %v9807_v33 = vpop.f32.mrf.mxu0  ;;  %v9851_v55 = vpop.f32.mrf.mxu1  ;;  %v16307_v32 = vld [vmem:[#allocation12 + $0x98] ss:$24 sps:$4 sm:$0xff]  }
 0x751   : > { %12141 = vmatprep.subr.bf16.mxu0 %v16273_v54  ;;  %v16312_v33 = vld [vmem:[#allocation12 + $0x784] ss:$24 sps:$4 sm:$0xff]  }
 0x752   : > { %v9887_v24 = vpop.f32.mrf.mxu0  ;;  %v17998_v34 = vpop.f32.mrf.mxu1  ;;  %v16315_v55 = vld [vmem:[#allocation12 + $0x6c] ss:$24 sps:$4 sm:$0xff]  }
 0x753   : > { %v10221_v24 = vsel %vm7848_vm9, %v17998_v34, 0.0 }
 0x754   : > { %12142 = vmatpush2.bf16.msra.mxu0 %v16271_v58  ;;  %v9889_v63 = vpop.f32.mrf.mxu0  ;;  %v9930_v35 = vpop.f32.mrf.mxu1 }
 0x755   : > { %v10220_v30 = vsel %vm7799_vm11, %v9889_v63, 0.0  ;;  %12143 = vmatprep.subr.bf16.mxu0 %v16279_v48  ;;  %v16310_v35 = vld [vmem:[#allocation12 + $0x780] ss:$24 sps:$4 sm:$0xff]  }
 0x756   : > { %v10260_v60 = vadd.f32 %v10220_v30, %v10214_v21  ;;  %v9891_v39 = vpop.f32.mrf.mxu0  ;;  %v9932_v40 = vpop.f32.mrf.mxu1 }
 0x758   : > { %v18007_v51 = vpack.c.bf16 %v10260_v60, %v10260_v60  ;;  %12144 = vmatpush2.bf16.msra.mxu0 %v16277_v2  ;;  %v9892_v42 = vpop.f32.mrf.mxu0  ;;  %v9933_v22 = vpop.f32.mrf.mxu1  ;;  %v16313_v2 = vld [vmem:[#allocation12 + $0x68] ss:$24 sps:$4 sm:$0xff]   ;;  %v16321_v60 = vld [vmem:[#allocation12 + $0x45c] ss:$24 sps:$4 sm:$0xff]  }
 0x759   : > { %12145 = vmatprep.subr.bf16.mxu0 %v16282_v8  ;;  %v16318_v8 = vld [vmem:[#allocation12 + $0x3c] ss:$24 sps:$4 sm:$0xff]  }
 0x75a   : > { %v9972_v52 = vpop.f32.mrf.mxu0  ;;  %v10013_v20 = vpop.f32.mrf.mxu1  ;;  %12116 = vmatprep.mubr.bf16.mxu1 %v18007_v51 }
 0x75b   : > { %12117 = vmatmul.mubr.bf16.vlgmr.msra.gmra.mxu1 %v18009_v49  ;;  %v16327_v52 = vld [vmem:[#allocation12 + $0x42c] ss:$24 sps:$4 sm:$0xff]   ;;  %v16322_v20 = vld [vmem:[#allocation12 + $0x8] ss:$24 sps:$4 sm:$0xff]  }
 0x75c   : > { %12146 = vmatpush2.bf16.msra.mxu0 %v16280_v36  ;;  %12167 = vmatpush1.bf16.msra.mxu1 %v16283_v28  ;;  %v9974_v14 = vpop.f32.mrf.mxu0  ;;  %v10015_v6 = vpop.f32.mrf.mxu1  ;;  %v16316_v36 = vld [vmem:[#allocation12 + $0x38] ss:$24 sps:$4 sm:$0xff]  }
 0x75d   : > { %12198 = vmatprep.mubr.bf16.mxu1 %v17982_v27  ;;  %12147 = vmatprep.subr.bf16.mxu0 %v16288_v15  ;;  %v16319_v28 = vld [vmem:[#allocation12 + $0x458] ss:$24 sps:$4 sm:$0xff]   ;;  %v16330_v14 = vld [vmem:[#allocation12 + $0x2dc] ss:$24 sps:$4 sm:$0xff]  }
 0x75e   : > { %v9976_v3 = vpop.f32.mrf.mxu0  ;;  %v10017_v17 = vpop.f32.mrf.mxu1  ;;  %12168 = vmatprep.subr.bf16.mxu1 %v16291_v1  ;;  %v16325_v1 = vld [vmem:[#allocation12 + $0x428] ss:$24 sps:$4 sm:$0xff]   ;;  %v16333_v6 = vld [vmem:[#allocation12 + $0x3fc] ss:$24 sps:$4 sm:$0xff]  }
 0x75f   : > { %v16334_v3 = vld [vmem:[#allocation12 + $0x2a8] ss:$24 sps:$4 sm:$0xff]  }
 0x760   : > { %12148 = vmatpush2.bf16.msra.mxu0 %v16286_v13  ;;  %12169 = vmatpush1.bf16.msra.mxu1 %v16289_v12  ;;  %v9977_v57 = vpop.f32.mrf.mxu0  ;;  %v10018_v47 = vpop.f32.mrf.mxu1  ;;  %v16328_v13 = vld [vmem:[#allocation12 + $0x2d8] ss:$24 sps:$4 sm:$0xff]   ;;  %v16337_v17 = vld [vmem:[#allocation12 + $0x3c8] ss:$24 sps:$4 sm:$0xff]  }
 0x761   : > { %12149 = vmatprep.subr.bf16.mxu0 %v16294_v18  ;;  %12170 = vmatprep.subr.bf16.mxu1 %v16297_v25  ;;  %v16331_v12 = vld [vmem:[#allocation12 + $0x3f8] ss:$24 sps:$4 sm:$0xff]   ;;  %v16336_v18 = vld [vmem:[#allocation12 + $0x2ac] ss:$24 sps:$4 sm:$0xff]   ;;  %v16342_v57 = vld [vmem:[#allocation12 + $0x27c] ss:$24 sps:$4 sm:$0xff]  }
 0x762   : > { %v10054_v59 = vpop.f32.mrf.mxu0  ;;  %v10098_v29 = vpop.f32.mrf.mxu1  ;;  %v16339_v25 = vld [vmem:[#allocation12 + $0x3cc] ss:$24 sps:$4 sm:$0xff]   ;;  %v16345_v47 = vld [vmem:[#allocation12 + $0x39c] ss:$24 sps:$4 sm:$0xff]  }
 0x763   : > { %v10227_v58 = vsel %vm7806_vm5, %v10054_v59, 0.0  ;;  %v16346_v59 = vld [vmem:[#allocation12 + $0x248] ss:$24 sps:$4 sm:$0xff]  }
 0x764   : > { %12150 = vmatpush2.bf16.msra.mxu0 %v16292_v41  ;;  %12171 = vmatpush1.bf16.msra.mxu1 %v16295_v37  ;;  %v10056_v7 = vpop.f32.mrf.mxu0  ;;  %v10100_v9 = vpop.f32.mrf.mxu1  ;;  %v10268_v43 = vadd.f32 %v10227_v58, %v10221_v24  ;;  %v16340_v41 = vld [vmem:[#allocation12 + $0x278] ss:$24 sps:$4 sm:$0xff]   ;;  %v16349_v29 = vld [vmem:[#allocation12 + $0x368] ss:$24 sps:$4 sm:$0xff]   ;;  %v16381_v24 = vld [vmem:[#allocation12 + $0x75c] ss:$24 sps:$4 sm:$0xff]  }
 0x765   : > { %12151 = vmatprep.subr.bf16.mxu0 %v16300_v46  ;;  %12172 = vmatprep.subr.bf16.mxu1 %v16303_v5  ;;  %v10228_v21 = vsel %vm7855_vm15, %v10056_v7, 0.0  ;;  %v16343_v37 = vld [vmem:[#allocation12 + $0x398] ss:$24 sps:$4 sm:$0xff]   ;;  %v16348_v46 = vld [vmem:[#allocation12 + $0x24c] ss:$24 sps:$4 sm:$0xff]  }
 0x766   : > { %v10058_v44 = vpop.f32.mrf.mxu0  ;;  %v10102_v4 = vpop.f32.mrf.mxu1  ;;  %v18025_v15 = vpack.c.bf16 %v10268_v43, %v10268_v43  ;;  %v16351_v5 = vld [vmem:[#allocation12 + $0x36c] ss:$24 sps:$4 sm:$0xff]   ;;  %v16354_v7 = vld [vmem:[#allocation12 + $0x21c] ss:$24 sps:$4 sm:$0xff]   ;;  %v16370_v58 = vld [vmem:[#allocation12 + $0x188] ss:$24 sps:$4 sm:$0xff]  }
 0x767   : > { %v16357_v9 = vld [vmem:[#allocation12 + $0x33c] ss:$24 sps:$4 sm:$0xff]   ;;  %v16358_v44 = vld [vmem:[#allocation12 + $0x1e8] ss:$24 sps:$4 sm:$0xff]  }
 0x768   : > { %12152 = vmatpush2.bf16.msra.mxu0 %v16298_v16  ;;  %12173 = vmatpush1.bf16.msra.mxu1 %v16301_v50  ;;  %v10059_v38 = vpop.f32.mrf.mxu0  ;;  %v10103_v54 = vpop.f32.mrf.mxu1  ;;  %v16352_v16 = vld [vmem:[#allocation12 + $0x218] ss:$24 sps:$4 sm:$0xff]   ;;  %v16361_v4 = vld [vmem:[#allocation12 + $0x308] ss:$24 sps:$4 sm:$0xff]  }
 0x769   : > { %12153 = vmatprep.subr.bf16.mxu0 %v16306_v45  ;;  %12174 = vmatprep.subr.bf16.mxu1 %v16309_v23  ;;  %v16355_v50 = vld [vmem:[#allocation12 + $0x338] ss:$24 sps:$4 sm:$0xff]   ;;  %v16360_v45 = vld [vmem:[#allocation12 + $0x1ec] ss:$24 sps:$4 sm:$0xff]   ;;  %v16366_v38 = vld [vmem:[#allocation12 + $0x1bc] ss:$24 sps:$4 sm:$0xff]  }
 0x76a   : > { %v10139_v48 = vpop.f32.mrf.mxu0  ;;  %v10180_v61 = vpop.f32.mrf.mxu1  ;;  %v16363_v23 = vld [vmem:[#allocation12 + $0x30c] ss:$24 sps:$4 sm:$0xff]   ;;  %v16369_v54 = vld [vmem:[#allocation12 + $0x5dc] ss:$24 sps:$4 sm:$0xff]   ;;  %v16382_v43 = vld [vmem:[#allocation12 + $0x548] ss:$24 sps:$4 sm:$0xff]  }
 0x76b   : > { %v16373_v48 = vld [vmem:[#allocation12 + $0x5a8] ss:$24 sps:$4 sm:$0xff]   ;;  %v16378_v61 = vld [vmem:[#allocation12 + $0x57c] ss:$24 sps:$4 sm:$0xff]  }
 0x76c   : > { %12154 = vmatpush2.bf16.msra.mxu0 %v16304_v19  ;;  %12175 = vmatpush1.bf16.msra.mxu1 %v16307_v32  ;;  %v10141_v62 = vpop.f32.mrf.mxu0  ;;  %v10182_v63 = vpop.f32.mrf.mxu1  ;;  %v16364_v19 = vld [vmem:[#allocation12 + $0x1b8] ss:$24 sps:$4 sm:$0xff]  }
 0x76d   : > { %v10234_v30 = vsel %vm7813_vm13, %v10182_v63, 0.0  ;;  %12155 = vmatprep.subr.bf16.mxu0 %v16312_v33  ;;  %12176 = vmatprep.subr.bf16.mxu1 %v16315_v55  ;;  %v16367_v32 = vld [vmem:[#allocation12 + $0x5d8] ss:$24 sps:$4 sm:$0xff]   ;;  %v16372_v33 = vld [vmem:[#allocation12 + $0x18c] ss:$24 sps:$4 sm:$0xff]  }
 0x76e   : > { %v10276_v39 = vadd.f32 %v10234_v30, %v10228_v21  ;;  %v10143_v31 = vpop.f32.mrf.mxu0  ;;  %v10184_v34 = vpop.f32.mrf.mxu1  ;;  %v16375_v55 = vld [vmem:[#allocation12 + $0x5ac] ss:$24 sps:$4 sm:$0xff]   ;;  %v16376_v62 = vld [vmem:[#allocation12 + $0x578] ss:$24 sps:$4 sm:$0xff]   ;;  %v16385_v21 = vld [vmem:[#allocation12 + $0x728] ss:$24 sps:$4 sm:$0xff]  }
 0x76f   : > { %v16379_v63 = vld [vmem:[#allocation12 + $0x758] ss:$24 sps:$4 sm:$0xff]   ;;  %v16390_v30 = vld [vmem:[#allocation12 + $0x51c] ss:$24 sps:$4 sm:$0xff]   ;;  %v16396_v31 = vld [vmem:[#allocation12 + $0x4ec] ss:$24 sps:$4 sm:$0xff]  }
 0x770   : > { %v18023_v40 = vpack.c.bf16 %v10276_v39, %v10276_v39  ;;  %12156 = vmatpush2.bf16.msra.mxu0 %v16310_v35  ;;  %12177 = vmatpush1.bf16.msra.mxu1 %v16313_v2  ;;  %v10144_v42 = vpop.f32.mrf.mxu0  ;;  %v10185_v22 = vpop.f32.mrf.mxu1  ;;  %v16384_v35 = vld [vmem:[#allocation12 + $0x54c] ss:$24 sps:$4 sm:$0xff]   ;;  %v16391_v39 = vld [vmem:[#allocation12 + $0x6f8] ss:$24 sps:$4 sm:$0xff]  }
 0x771   : > { %12178 = vmatprep.subr.bf16.mxu1 %v16318_v8  ;;  %12207 = vmatprep.subr.bf16.mxu0 %v16321_v60  ;;  %v16387_v2 = vld [vmem:[#allocation12 + $0x72c] ss:$24 sps:$4 sm:$0xff]   ;;  %v16393_v8 = vld [vmem:[#allocation12 + $0x6fc] ss:$24 sps:$4 sm:$0xff]   ;;  %v16388_v60 = vld [vmem:[#allocation12 + $0x518] ss:$24 sps:$4 sm:$0xff]  }
 0x772   : > { %12157 = vmatprep.mubr.bf16.mxu0 %v18023_v40  ;;  %v16399_v34 = vld [vmem:[#allocation12 + $0x6cc] ss:$24 sps:$4 sm:$0xff]   ;;  %v16394_v42 = vld [vmem:[#allocation12 + $0x4e8] ss:$24 sps:$4 sm:$0xff]  }
 0x773   : > { %12158 = vmatmul.mubr.bf16.vlgmr.msra.gmra.mxu0 %v18025_v15  ;;  %v16397_v22 = vld [vmem:[#allocation12 + $0x6c8] ss:$24 sps:$4 sm:$0xff]  }
 0x774   : > { %12179 = vmatpush1.bf16.msra.mxu1 %v16316_v36  ;;  %12208 = vmatpush1.bf16.msra.mxu0 %v16319_v28  ;;  %v16402_v36 = vld [vmem:[#allocation12 + $0x4bc] ss:$24 sps:$4 sm:$0xff]  }
 0x775   : > { %12239 = vmatprep.mubr.bf16.mxu0 %v18007_v51  ;;  %12180 = vmatprep.subr.bf16.mxu1 %v16324_v11  ;;  %v16405_v28 = vld [vmem:[#allocation12 + $0x69c] ss:$24 sps:$4 sm:$0xff]   ;;  %v16400_v11 = vld [vmem:[#allocation12 + $0x4b8] ss:$24 sps:$4 sm:$0xff]  }
 0x776   : > { %12209 = vmatprep.subr.bf16.mxu0 %v16327_v52  ;;  %v16403_v52 = vld [vmem:[#allocation12 + $0x698] ss:$24 sps:$4 sm:$0xff]  }
 0x778   : > { %12181 = vmatpush1.bf16.msra.mxu1 %v16322_v20  ;;  %12210 = vmatpush1.bf16.msra.mxu0 %v16325_v1  ;;  %v16408_v20 = vld [vmem:[#allocation12 + $0x48c] ss:$24 sps:$4 sm:$0xff]  }
 0x779   : > { %12182 = vmatprep.subr.bf16.mxu1 %v16330_v14  ;;  %12211 = vmatprep.subr.bf16.mxu0 %v16333_v6  ;;  %v16411_v1 = vld [vmem:[#allocation12 + $0x66c] ss:$24 sps:$4 sm:$0xff]   ;;  %v16406_v14 = vld [vmem:[#allocation12 + $0x488] ss:$24 sps:$4 sm:$0xff]  }
 0x77a   : > { %v16409_v6 = vld [vmem:[#allocation12 + $0x668] ss:$24 sps:$4 sm:$0xff]  }
 0x77c   : > { %12183 = vmatpush2.bf16.msra.mxu1 %v16328_v13  ;;  %12212 = vmatpush1.bf16.msra.mxu0 %v16331_v12  ;;  %v16414_v13 = vld [vmem:[#allocation12 + $0x63c] ss:$24 sps:$4 sm:$0xff]  }
 0x77d   : > { %12184 = vmatprep.subr.bf16.mxu1 %v16336_v18  ;;  %12213 = vmatprep.subr.bf16.mxu0 %v16339_v25  ;;  %v16417_v12 = vld [vmem:[#allocation12 + $0x164] ss:$24 sps:$4 sm:$0xff]   ;;  %v16412_v18 = vld [vmem:[#allocation12 + $0x638] ss:$24 sps:$4 sm:$0xff]  }
 0x77e   : > { %v16415_v25 = vld [vmem:[#allocation12 + $0x160] ss:$24 sps:$4 sm:$0xff]  }
 0x780   : > { %12185 = vmatpush2.bf16.msra.mxu1 %v16334_v3  ;;  %12214 = vmatpush1.bf16.msra.mxu0 %v16337_v17  ;;  %v16420_v3 = vld [vmem:[#allocation12 + $0x60c] ss:$24 sps:$4 sm:$0xff]  }
 0x781   : > { %12186 = vmatprep.subr.bf16.mxu1 %v16342_v57  ;;  %12215 = vmatprep.subr.bf16.mxu0 %v16345_v47  ;;  %v16423_v17 = vld [vmem:[#allocation12 + $0x134] ss:$24 sps:$4 sm:$0xff]   ;;  %v16418_v57 = vld [vmem:[#allocation12 + $0x608] ss:$24 sps:$4 sm:$0xff]  }
 0x782   : > { %v16421_v47 = vld [vmem:[#allocation12 + $0x130] ss:$24 sps:$4 sm:$0xff]  }
 0x784   : > { %12187 = vmatpush2.bf16.msra.mxu1 %v16340_v41  ;;  %12216 = vmatpush1.bf16.msra.mxu0 %v16343_v37  ;;  %v16426_v41 = vld [vmem:[#allocation12 + $0x8dc] ss:$24 sps:$4 sm:$0xff]  }
 0x785   : > { %12188 = vmatprep.subr.bf16.mxu1 %v16348_v46  ;;  %12217 = vmatprep.subr.bf16.mxu0 %v16351_v5  ;;  %v16429_v37 = vld [vmem:[#allocation12 + $0x104] ss:$24 sps:$4 sm:$0xff]   ;;  %v16424_v46 = vld [vmem:[#allocation12 + $0x8d8] ss:$24 sps:$4 sm:$0xff]  }
 0x786   : > { %v16427_v5 = vld [vmem:[#allocation12 + $0x100] ss:$24 sps:$4 sm:$0xff]  }
 0x788   : > { %12189 = vmatpush2.bf16.msra.mxu1 %v16346_v59  ;;  %12218 = vmatpush1.bf16.msra.mxu0 %v16349_v29  ;;  %v16432_v59 = vld [vmem:[#allocation12 + $0x8ac] ss:$24 sps:$4 sm:$0xff]  }
 0x789   : > { %12190 = vmatprep.subr.bf16.mxu1 %v16354_v7  ;;  %12219 = vmatprep.subr.bf16.mxu0 %v16357_v9  ;;  %v16435_v29 = vld [vmem:[#allocation12 + $0xd4] ss:$24 sps:$4 sm:$0xff]   ;;  %v16430_v7 = vld [vmem:[#allocation12 + $0x8a8] ss:$24 sps:$4 sm:$0xff]  }
 0x78a   : > { %v16433_v9 = vld [vmem:[#allocation12 + $0xd0] ss:$24 sps:$4 sm:$0xff]  }
 0x78c   : > { %12191 = vmatpush2.bf16.msra.mxu1 %v16352_v16  ;;  %12220 = vmatpush1.bf16.msra.mxu0 %v16355_v50  ;;  %v16438_v16 = vld [vmem:[#allocation12 + $0x87c] ss:$24 sps:$4 sm:$0xff]   ;;  %v16436_v50 = vld [vmem:[#allocation12 + $0x878] ss:$24 sps:$4 sm:$0xff]  }
 0x78d   : > { %12192 = vmatprep.subr.bf16.mxu1 %v16360_v45  ;;  %12221 = vmatprep.subr.bf16.mxu0 %v16363_v23  ;;  %v16439_v45 = vld [vmem:[#allocation12 + $0xa0] ss:$24 sps:$4 sm:$0xff]   ;;  %v16444_v23 = vld [vmem:[#allocation12 + $0x84c] ss:$24 sps:$4 sm:$0xff]  }
 0x790   : > { %12193 = vmatpush2.bf16.msra.mxu1 %v16358_v44  ;;  %12222 = vmatpush1.bf16.msra.mxu0 %v16361_v4  ;;  %v16447_v44 = vld [vmem:[#allocation12 + $0x74] ss:$24 sps:$4 sm:$0xff]   ;;  %v16442_v4 = vld [vmem:[#allocation12 + $0x848] ss:$24 sps:$4 sm:$0xff]  }
 0x791   : > { %12194 = vmatprep.subr.bf16.mxu1 %v16366_v38  ;;  %12223 = vmatprep.subr.bf16.mxu0 %v16369_v54  ;;  %v16445_v38 = vld [vmem:[#allocation12 + $0x70] ss:$24 sps:$4 sm:$0xff]   ;;  %v16450_v54 = vld [vmem:[#allocation12 + $0x81c] ss:$24 sps:$4 sm:$0xff]  }
 0x794   : > { %12195 = vmatpush2.bf16.msra.mxu1 %v16364_v19  ;;  %12224 = vmatpush2.bf16.msra.mxu0 %v16367_v32  ;;  %v16453_v19 = vld [vmem:[#allocation12 + $0x44] ss:$24 sps:$4 sm:$0xff]   ;;  %v16448_v32 = vld [vmem:[#allocation12 + $0x818] ss:$24 sps:$4 sm:$0xff]  }
 0x795   : > { %12196 = vmatprep.subr.bf16.mxu1 %v16372_v33  ;;  %12225 = vmatprep.subr.bf16.mxu0 %v16375_v55  ;;  %v16451_v33 = vld [vmem:[#allocation12 + $0x40] ss:$24 sps:$4 sm:$0xff]   ;;  %v16456_v55 = vld [vmem:[#allocation12 + $0x7ec] ss:$24 sps:$4 sm:$0xff]  }
 0x798   : > { %12197 = vmatpush2.bf16.msra.mxu1 %v16370_v58  ;;  %12226 = vmatpush2.bf16.msra.mxu0 %v16373_v48  ;;  %v16459_v58 = vld [vmem:[#allocation12 + $0x14] ss:$24 sps:$4 sm:$0xff]   ;;  %v16454_v48 = vld [vmem:[#allocation12 + $0x7e8] ss:$24 sps:$4 sm:$0xff]  }
 0x799   : > { %12227 = vmatprep.subr.bf16.mxu0 %v16378_v61  ;;  %12248 = vmatprep.subr.bf16.mxu1 %v16381_v24  ;;  %v16457_v61 = vld [vmem:[#allocation12 + $0x10] ss:$24 sps:$4 sm:$0xff]   ;;  %v16462_v24 = vld [vmem:[#allocation12 + $0x7bc] ss:$24 sps:$4 sm:$0xff]  }
 0x79b   : > { %12199 = vmatmul.mubr.bf16.vlgmr.msra.gmra.mxu1 %v17984_v53 }
 0x79c   : > { %12228 = vmatpush2.bf16.msra.mxu0 %v16376_v62  ;;  %12249 = vmatpush1.bf16.msra.mxu1 %v16379_v63  ;;  %v16465_v62 = vld [vmem:[#allocation12 + $0x2e4] ss:$24 sps:$4 sm:$0xff]   ;;  %v16460_v63 = vld [vmem:[#allocation12 + $0x7b8] ss:$24 sps:$4 sm:$0xff]  }
 0x79d   : > { %12280 = vmatprep.mubr.bf16.mxu1 %v18023_v40  ;;  %12229 = vmatprep.subr.bf16.mxu0 %v16384_v35  ;;  %v16463_v35 = vld [vmem:[#allocation12 + $0x2e0] ss:$24 sps:$4 sm:$0xff]  }
 0x79e   : > { %12250 = vmatprep.subr.bf16.mxu1 %v16387_v2  ;;  %v16468_v2 = vld [vmem:[#allocation12 + $0x78c] ss:$24 sps:$4 sm:$0xff]  }
 0x7a0   : > { %12230 = vmatpush2.bf16.msra.mxu0 %v16382_v43  ;;  %12251 = vmatpush1.bf16.msra.mxu1 %v16385_v21  ;;  %v16471_v43 = vld [vmem:[#allocation12 + $0x2b4] ss:$24 sps:$4 sm:$0xff]   ;;  %v16466_v21 = vld [vmem:[#allocation12 + $0x788] ss:$24 sps:$4 sm:$0xff]  }
 0x7a1   : > { %12231 = vmatprep.subr.bf16.mxu0 %v16390_v30  ;;  %12252 = vmatprep.subr.bf16.mxu1 %v16393_v8  ;;  %v16469_v30 = vld [vmem:[#allocation12 + $0x2b0] ss:$24 sps:$4 sm:$0xff]   ;;  %v16474_v8 = vld [vmem:[#allocation12 + $0x284] ss:$24 sps:$4 sm:$0xff]  }
 0x7a4   : > { %12232 = vmatpush2.bf16.msra.mxu0 %v16388_v60  ;;  %12253 = vmatpush1.bf16.msra.mxu1 %v16391_v39  ;;  %v16477_v60 = vld [vmem:[#allocation12 + $0x464] ss:$24 sps:$4 sm:$0xff]   ;;  %v16472_v39 = vld [vmem:[#allocation12 + $0x280] ss:$24 sps:$4 sm:$0xff]  }
 0x7a5   : > { %12233 = vmatprep.subr.bf16.mxu0 %v16396_v31  ;;  %12254 = vmatprep.subr.bf16.mxu1 %v16399_v34  ;;  %v16475_v31 = vld [vmem:[#allocation12 + $0x460] ss:$24 sps:$4 sm:$0xff]   ;;  %v16480_v34 = vld [vmem:[#allocation12 + $0x254] ss:$24 sps:$4 sm:$0xff]  }
 0x7a8   : > { %12234 = vmatpush2.bf16.msra.mxu0 %v16394_v42  ;;  %12255 = vmatpush1.bf16.msra.mxu1 %v16397_v22  ;;  %v16483_v42 = vld [vmem:[#allocation12 + $0x434] ss:$24 sps:$4 sm:$0xff]   ;;  %v16478_v22 = vld [vmem:[#allocation12 + $0x250] ss:$24 sps:$4 sm:$0xff]  }
 0x7a9   : > { %12235 = vmatprep.subr.bf16.mxu0 %v16402_v36  ;;  %12256 = vmatprep.subr.bf16.mxu1 %v16405_v28  ;;  %v16481_v36 = vld [vmem:[#allocation12 + $0x430] ss:$24 sps:$4 sm:$0xff]   ;;  %v16486_v28 = vld [vmem:[#allocation12 + $0x224] ss:$24 sps:$4 sm:$0xff]  }
 0x7ac   : > { %12236 = vmatpush2.bf16.msra.mxu0 %v16400_v11  ;;  %12257 = vmatpush1.bf16.msra.mxu1 %v16403_v52  ;;  %v16489_v11 = vld [vmem:[#allocation12 + $0x404] ss:$24 sps:$4 sm:$0xff]   ;;  %v16484_v52 = vld [vmem:[#allocation12 + $0x220] ss:$24 sps:$4 sm:$0xff]  }
 0x7ad   : > { %12237 = vmatprep.subr.bf16.mxu0 %v16408_v20  ;;  %12258 = vmatprep.subr.bf16.mxu1 %v16411_v1  ;;  %v16487_v20 = vld [vmem:[#allocation12 + $0x400] ss:$24 sps:$4 sm:$0xff]   ;;  %v16492_v1 = vld [vmem:[#allocation12 + $0x1f4] ss:$24 sps:$4 sm:$0xff]  }
 0x7b0   : > { %12238 = vmatpush2.bf16.msra.mxu0 %v16406_v14  ;;  %12259 = vmatpush1.bf16.msra.mxu1 %v16409_v6  ;;  %v16495_v14 = vld [vmem:[#allocation12 + $0x3d4] ss:$24 sps:$4 sm:$0xff]   ;;  %v16490_v6 = vld [vmem:[#allocation12 + $0x1f0] ss:$24 sps:$4 sm:$0xff]  }
 0x7b1   : > { %12260 = vmatprep.subr.bf16.mxu1 %v16414_v13  ;;  %12289 = vmatprep.subr.bf16.mxu0 %v16417_v12  ;;  %v16493_v13 = vld [vmem:[#allocation12 + $0x3d0] ss:$24 sps:$4 sm:$0xff]   ;;  %v16498_v12 = vld [vmem:[#allocation12 + $0x1c4] ss:$24 sps:$4 sm:$0xff]  }
 0x7b3   : > { %12240 = vmatmul.mubr.bf16.vlgmr.msra.gmra.mxu0 %v18009_v49 }
 0x7b4   : > { %12261 = vmatpush1.bf16.msra.mxu1 %v16412_v18  ;;  %12290 = vmatpush1.bf16.msra.mxu0 %v16415_v25  ;;  %v16496_v18 = vld [vmem:[#allocation12 + $0x1c0] ss:$24 sps:$4 sm:$0xff]  }
 0x7b5   : > { %12321 = vmatprep.mubr.bf16.mxu0 %v17982_v27  ;;  %12262 = vmatprep.subr.bf16.mxu1 %v16420_v3  ;;  %v16441_v27 = vld [vmem:[#allocation12 + $0xa4] ss:$24 sps:$4 sm:$0xff]   ;;  %v16499_v25 = vld [vmem:[#allocation12 + $0x3a0] ss:$24 sps:$4 sm:$0xff]   ;;  %v16504_v3 = vld [vmem:[#allocation12 + $0x194] ss:$24 sps:$4 sm:$0xff]  }
 0x7b6   : > { %12291 = vmatprep.subr.bf16.mxu0 %v16423_v17  ;;  %v16507_v17 = vld [vmem:[#allocation12 + $0x374] ss:$24 sps:$4 sm:$0xff]  }
 0x7b8   : > { %12263 = vmatpush1.bf16.msra.mxu1 %v16418_v57  ;;  %12292 = vmatpush1.bf16.msra.mxu0 %v16421_v47  ;;  %v16502_v57 = vld [vmem:[#allocation12 + $0x190] ss:$24 sps:$4 sm:$0xff]  }
 0x7b9   : > { %12264 = vmatprep.subr.bf16.mxu1 %v16426_v41  ;;  %12293 = vmatprep.subr.bf16.mxu0 %v16429_v37  ;;  %v16505_v47 = vld [vmem:[#allocation12 + $0x370] ss:$24 sps:$4 sm:$0xff]   ;;  %v16510_v41 = vld [vmem:[#allocation12 + $0x344] ss:$24 sps:$4 sm:$0xff]  }
 0x7ba   : > { %v16513_v37 = vld [vmem:[#allocation12 + $0x764] ss:$24 sps:$4 sm:$0xff]  }
 0x7bc   : > { %12265 = vmatpush2.bf16.msra.mxu1 %v16424_v46  ;;  %12294 = vmatpush1.bf16.msra.mxu0 %v16427_v5  ;;  %v16508_v46 = vld [vmem:[#allocation12 + $0x340] ss:$24 sps:$4 sm:$0xff]  }
 0x7bd   : > { %12266 = vmatprep.subr.bf16.mxu1 %v16432_v59  ;;  %12295 = vmatprep.subr.bf16.mxu0 %v16435_v29  ;;  %v16511_v5 = vld [vmem:[#allocation12 + $0x760] ss:$24 sps:$4 sm:$0xff]   ;;  %v16516_v59 = vld [vmem:[#allocation12 + $0x314] ss:$24 sps:$4 sm:$0xff]  }
 0x7be   : > { %v16519_v29 = vld [vmem:[#allocation12 + $0x734] ss:$24 sps:$4 sm:$0xff]  }
 0x7c0   : > { %12267 = vmatpush2.bf16.msra.mxu1 %v16430_v7  ;;  %12296 = vmatpush1.bf16.msra.mxu0 %v16433_v9  ;;  %v16514_v9 = vld [vmem:[#allocation12 + $0x310] ss:$24 sps:$4 sm:$0xff]  }
 0x7c1   : > { %12268 = vmatprep.subr.bf16.mxu1 %v16438_v16  ;;  %12297 = vmatprep.subr.bf16.mxu0 %v16441_v27  ;;  %v16517_v16 = vld [vmem:[#allocation12 + $0x730] ss:$24 sps:$4 sm:$0xff]  }
 0x7c4   : > { %12269 = vmatpush2.bf16.msra.mxu1 %v16436_v50  ;;  %12298 = vmatpush1.bf16.msra.mxu0 %v16439_v45  ;;  %v16522_v50 = vld [vmem:[#allocation12 + $0x5e4] ss:$24 sps:$4 sm:$0xff]  }
 0x7c5   : > { %12270 = vmatprep.subr.bf16.mxu1 %v16444_v23  ;;  %12299 = vmatprep.subr.bf16.mxu0 %v16447_v44  ;;  %v16525_v45 = vld [vmem:[#allocation12 + $0x704] ss:$24 sps:$4 sm:$0xff]   ;;  %v16520_v44 = vld [vmem:[#allocation12 + $0x5e0] ss:$24 sps:$4 sm:$0xff]  }
 0x7c8   : > { %12271 = vmatpush2.bf16.msra.mxu1 %v16442_v4  ;;  %12300 = vmatpush1.bf16.msra.mxu0 %v16445_v38  ;;  %v16523_v4 = vld [vmem:[#allocation12 + $0x700] ss:$24 sps:$4 sm:$0xff]   ;;  %v16528_v38 = vld [vmem:[#allocation12 + $0x5b4] ss:$24 sps:$4 sm:$0xff]  }
 0x7c9   : > { %12272 = vmatprep.subr.bf16.mxu1 %v16450_v54  ;;  %12301 = vmatprep.subr.bf16.mxu0 %v16453_v19  ;;  %v16531_v54 = vld [vmem:[#allocation12 + $0x6d4] ss:$24 sps:$4 sm:$0xff]   ;;  %v16526_v19 = vld [vmem:[#allocation12 + $0x5b0] ss:$24 sps:$4 sm:$0xff]  }
 0x7cc   : > { %12273 = vmatpush2.bf16.msra.mxu1 %v16448_v32  ;;  %12302 = vmatpush1.bf16.msra.mxu0 %v16451_v33  ;;  %v16534_v32 = vld [vmem:[#allocation12 + $0x584] ss:$24 sps:$4 sm:$0xff]  }
 0x7cd   : > { %12274 = vmatprep.subr.bf16.mxu1 %v16456_v55  ;;  %12303 = vmatprep.subr.bf16.mxu0 %v16459_v58  ;;  %v16537_v33 = vld [vmem:[#allocation12 + $0x6a4] ss:$24 sps:$4 sm:$0xff]   ;;  %v16532_v55 = vld [vmem:[#allocation12 + $0x580] ss:$24 sps:$4 sm:$0xff]  }
 0x7ce   : > { %v16535_v58 = vld [vmem:[#allocation12 + $0x6a0] ss:$24 sps:$4 sm:$0xff]  }
 0x7d0   : > { %12275 = vmatpush2.bf16.msra.mxu1 %v16454_v48  ;;  %12304 = vmatpush1.bf16.msra.mxu0 %v16457_v61  ;;  %v16540_v48 = vld [vmem:[#allocation12 + $0x554] ss:$24 sps:$4 sm:$0xff]  }
 0x7d1   : > { %12276 = vmatprep.subr.bf16.mxu1 %v16462_v24  ;;  %12305 = vmatprep.subr.bf16.mxu0 %v16465_v62  ;;  %v16543_v61 = vld [vmem:[#allocation12 + $0x674] ss:$24 sps:$4 sm:$0xff]   ;;  %v16538_v24 = vld [vmem:[#allocation12 + $0x550] ss:$24 sps:$4 sm:$0xff]  }
 0x7d2   : > { %v16541_v62 = vld [vmem:[#allocation12 + $0x670] ss:$24 sps:$4 sm:$0xff]  }
 0x7d4   : > { %12277 = vmatpush2.bf16.msra.mxu1 %v16460_v63  ;;  %12306 = vmatpush2.bf16.msra.mxu0 %v16463_v35  ;;  %v16546_v63 = vld [vmem:[#allocation12 + $0x524] ss:$24 sps:$4 sm:$0xff]  }
 0x7d5   : > { %12278 = vmatprep.subr.bf16.mxu1 %v16468_v2  ;;  %12307 = vmatprep.subr.bf16.mxu0 %v16471_v43  ;;  %v16549_v35 = vld [vmem:[#allocation12 + $0x644] ss:$24 sps:$4 sm:$0xff]   ;;  %v16544_v2 = vld [vmem:[#allocation12 + $0x520] ss:$24 sps:$4 sm:$0xff]  }
 0x7d6   : > { %v16547_v43 = vld [vmem:[#allocation12 + $0x640] ss:$24 sps:$4 sm:$0xff]  }
 0x7d8   : > { %12279 = vmatpush2.bf16.msra.mxu1 %v16466_v21  ;;  %12308 = vmatpush2.bf16.msra.mxu0 %v16469_v30  ;;  %v16552_v21 = vld [vmem:[#allocation12 + $0x4f4] ss:$24 sps:$4 sm:$0xff]  }
 0x7d9   : > { %12309 = vmatprep.subr.bf16.mxu0 %v16474_v8  ;;  %12330 = vmatprep.subr.bf16.mxu1 %v16477_v60  ;;  %v16555_v30 = vld [vmem:[#allocation12 + $0x614] ss:$24 sps:$4 sm:$0xff]   ;;  %v16550_v8 = vld [vmem:[#allocation12 + $0x4f0] ss:$24 sps:$4 sm:$0xff]  }
 0x7da   : > { %v16553_v60 = vld [vmem:[#allocation12 + $0x610] ss:$24 sps:$4 sm:$0xff]  }
 0x7db   : > { %12281 = vmatmul.mubr.bf16.vlgmr.msra.gmra.mxu1 %v18025_v15 }
 0x7dc   : > { %12310 = vmatpush2.bf16.msra.mxu0 %v16472_v39  ;;  %12331 = vmatpush1.bf16.msra.mxu1 %v16475_v31  ;;  %v16558_v39 = vld [vmem:[#allocation12 + $0x4c4] ss:$24 sps:$4 sm:$0xff]  }
 0x7dd   : > { %12362 = vmatprep.mubr.bf16.mxu1 %v18007_v51  ;;  %12311 = vmatprep.subr.bf16.mxu0 %v16480_v34  ;;  %v16501_v51 = vld [vmem:[#allocation12 + $0x3a4] ss:$24 sps:$4 sm:$0xff]   ;;  %v16556_v34 = vld [vmem:[#allocation12 + $0x4c0] ss:$24 sps:$4 sm:$0xff]  }
 0x7de   : > { %12332 = vmatprep.subr.bf16.mxu1 %v16483_v42  ;;  %v16561_v31 = vld [vmem:[#allocation12 + $0x8e4] ss:$24 sps:$4 sm:$0xff]   ;;  %v16559_v42 = vld [vmem:[#allocation12 + $0x8e0] ss:$24 sps:$4 sm:$0xff]  }
 0x7e0   : > { %12312 = vmatpush2.bf16.msra.mxu0 %v16478_v22  ;;  %12333 = vmatpush1.bf16.msra.mxu1 %v16481_v36  ;;  %v16564_v22 = vld [vmem:[#allocation12 + $0x494] ss:$24 sps:$4 sm:$0xff]  }
 0x7e1   : > { %12313 = vmatprep.subr.bf16.mxu0 %v16486_v28  ;;  %12334 = vmatprep.subr.bf16.mxu1 %v16489_v11  ;;  %v16567_v36 = vld [vmem:[#allocation12 + $0x8b4] ss:$24 sps:$4 sm:$0xff]   ;;  %v16562_v28 = vld [vmem:[#allocation12 + $0x490] ss:$24 sps:$4 sm:$0xff]  }
 0x7e2   : > { %v16565_v11 = vld [vmem:[#allocation12 + $0x8b0] ss:$24 sps:$4 sm:$0xff]  }
 0x7e4   : > { %12314 = vmatpush2.bf16.msra.mxu0 %v16484_v52  ;;  %12335 = vmatpush1.bf16.msra.mxu1 %v16487_v20  ;;  %v16570_v52 = vld [vmem:[#allocation12 + $0x884] ss:$24 sps:$4 sm:$0xff]  }
 0x7e5   : > { %12315 = vmatprep.subr.bf16.mxu0 %v16492_v1  ;;  %12336 = vmatprep.subr.bf16.mxu1 %v16495_v14  ;;  %v16571_v20 = vld [vmem:[#allocation15 + $0x78] sm:$0xff]  }
 0x7e6   : > { %v16568_v1 = vld [vmem:[#allocation12 + $0x880] ss:$24 sps:$4 sm:$0xff]  }
 0x7e7   : > { %v16572_v14 = vld [vmem:[#allocation15 + $0x38] sm:$0xff]  }
 0x7e8   : > { %12316 = vmatpush2.bf16.msra.mxu0 %v16490_v6  ;;  %12337 = vmatpush1.bf16.msra.mxu1 %v16493_v13  ;;  %v16575_v6 = vld [vmem:[#allocation12 + $0x854] ss:$24 sps:$4 sm:$0xff]  }
 0x7e9   : > { %12317 = vmatprep.subr.bf16.mxu0 %v16498_v12  ;;  %12338 = vmatprep.subr.bf16.mxu1 %v16501_v51  ;;  %v16576_v13 = vld [vmem:[#allocation15 + $0x70] sm:$0xff]   ;;  %v16573_v51 = vld [vmem:[#allocation12 + $0x850] ss:$24 sps:$4 sm:$0xff]  }
 0x7ec   : > { %12318 = vmatpush2.bf16.msra.mxu0 %v16496_v18  ;;  %12339 = vmatpush1.bf16.msra.mxu1 %v16499_v25  ;;  %v16577_v18 = vld [vmem:[#allocation15 + $0x30] sm:$0xff]  }
 0x7ed   : > { %12319 = vmatprep.subr.bf16.mxu0 %v16504_v3  ;;  %12340 = vmatprep.subr.bf16.mxu1 %v16507_v17  ;;  %v16580_v3 = vld [vmem:[#allocation12 + $0x824] ss:$24 sps:$4 sm:$0xff]   ;;  %v16581_v17 = vld [vmem:[#allocation15 + $0x68] sm:$0xff]  }
 0x7f0   : > { %12320 = vmatpush2.bf16.msra.mxu0 %v16502_v57  ;;  %12341 = vmatpush1.bf16.msra.mxu1 %v16505_v47  ;;  %v16578_v47 = vld [vmem:[#allocation12 + $0x820] ss:$24 sps:$4 sm:$0xff]  }
 0x7f1   : > { %12342 = vmatprep.subr.bf16.mxu1 %v16510_v41  ;;  %12371 = vmatprep.subr.bf16.mxu0 %v16513_v37  ;;  %v16582_v41 = vld [vmem:[#allocation15 + $0x28] sm:$0xff]  }
 0x7f3   : > { %12322 = vmatmul.mubr.bf16.vlgmr.msra.gmra.mxu0 %v17984_v53  ;;  %v18037_v7 = vpop.f32.mrf.mxu0 }
 0x7f4   : > { %12343 = vmatpush1.bf16.msra.mxu1 %v16508_v46  ;;  %12372 = vmatpush1.bf16.msra.mxu0 %v16511_v5  ;;  %v16585_v46 = vld [vmem:[#allocation12 + $0x7f4] ss:$24 sps:$4 sm:$0xff]   ;;  %v16583_v5 = vld [vmem:[#allocation12 + $0x7f0] ss:$24 sps:$4 sm:$0xff]  }
 0x7f5   : > { %12403 = vmatprep.mubr.bf16.mxu0 %v18023_v40  ;;  %v18040_v27 = vpop.f32.mrf.mxu0  ;;  %12344 = vmatprep.subr.bf16.mxu1 %v16516_v59  ;;  %v16529_v40 = vld [vmem:[#allocation12 + $0x6d0] ss:$24 sps:$4 sm:$0xff]  }
 0x7f6   : > { %12373 = vmatprep.subr.bf16.mxu0 %v16519_v29  ;;  %v16587_v59 = vld [vmem:[#allocation15 + $0x20] sm:$0xff]  }
 0x7f7   : > { %v12081_v23 = vpop.f32.mrf.mxu0  ;;  %v16590_v29 = vld [vmem:[#allocation12 + $0x7c4] ss:$24 sps:$4 sm:$0xff]  }
 0x7f8   : > { %12345 = vmatpush1.bf16.msra.mxu1 %v16514_v9  ;;  %12374 = vmatpush1.bf16.msra.mxu0 %v16517_v16  ;;  %v16591_v9 = vld [vmem:[#allocation15 + $0x58] sm:$0xff]   ;;  %v16596_v23 = vld [vmem:[#allocation15 + $0x50] sm:$0xff]  }
 0x7f9   : > { %v12082_v53 = vpop.f32.mrf.mxu0  ;;  %12346 = vmatprep.subr.bf16.mxu1 %v16522_v50  ;;  %12375 = vmatprep.subr.bf16.mxu0 %v16525_v45  ;;  %v16588_v16 = vld [vmem:[#allocation12 + $0x7c0] ss:$24 sps:$4 sm:$0xff]   ;;  %v16595_v45 = vld [vmem:[#allocation12 + $0x794] ss:$24 sps:$4 sm:$0xff]  }
 0x7fa   : > { %v16592_v50 = vld [vmem:[#allocation15 + $0x18] sm:$0xff]   ;;  %v16597_v53 = vld [vmem:[#allocation15 + $0x10] sm:$0xff]  }
 0x7fc   : > { %12347 = vmatpush2.bf16.msra.mxu1 %v16520_v44  ;;  %12376 = vmatpush1.bf16.msra.mxu0 %v16523_v4  ;;  %v18043_v44 = vld [vmem:[#allocation13] sm:$0x3f]  ;;  %v16593_v4 = vld [vmem:[#allocation12 + $0x790] ss:$24 sps:$4 sm:$0xff]  }
 0x7fd   : > { %12348 = vmatprep.subr.bf16.mxu1 %v16528_v38  ;;  %12377 = vmatprep.subr.bf16.mxu0 %v16531_v54  ;;  %v10576_v38 = vrot.slane %v18043_v44, %v17320_v56  ;;  %v16598_v54 = vld [vmem:[#allocation15 + $0x48] sm:$0xff]  }
 0x800   : > { %12349 = vmatpush2.bf16.msra.mxu1 %v16526_v19  ;;  %12378 = vmatpush1.bf16.msra.mxu0 %v16529_v40  ;;  %v10580_v19 = vrot.slane %v18043_v44, %v18118_v26  ;;  %v16599_v40 = vld [vmem:[#allocation15 + $0x8] sm:$0xff]   ;;  %v16602_v26 = vld [vmem:[#allocation15 + $0xf8] sm:$0xff]  }
 0x801   : > { %12350 = vmatprep.subr.bf16.mxu1 %v16534_v32  ;;  %12379 = vmatprep.subr.bf16.mxu0 %v16537_v33  ;;  %v12078_v32 = vadd.f32 %v18037_v7, %v10576_v38  ;;  %v16600_v33 = vld [vmem:[#allocation15 + $0x40] sm:$0xff]   ;;  %v16603_v7 = vld [vmem:[#allocation15 + $0xb8] sm:$0xff]  }
 0x804   : > { %12351 = vmatpush2.bf16.msra.mxu1 %v16532_v55  ;;  %12380 = vmatpush1.bf16.msra.mxu0 %v16535_v58  ;;  %v12080_v55 = vadd.f32 %v18040_v27, %v10580_v19  ;;  %v16604_v27 = vld [vmem:[#allocation15 + $0xf0] sm:$0xff]  }
 0x805   : > { %12352 = vmatprep.subr.bf16.mxu1 %v16540_v48  ;;  %12381 = vmatprep.subr.bf16.mxu0 %v16543_v61  ;;  %v16601_v61 = vld [vmem:[#allocation15] sm:$0xff]  }
 0x808   : > { %12353 = vmatpush2.bf16.msra.mxu1 %v16538_v24  ;;  %12382 = vmatpush1.bf16.msra.mxu0 %v16541_v62 }
 0x809   : > { %12354 = vmatprep.subr.bf16.mxu1 %v16546_v63  ;;  %12383 = vmatprep.subr.bf16.mxu0 %v16549_v35 }
 0x80c   : > { %12355 = vmatpush2.bf16.msra.mxu1 %v16544_v2  ;;  %12384 = vmatpush1.bf16.msra.mxu0 %v16547_v43 }
 0x80d   : > { %12356 = vmatprep.subr.bf16.mxu1 %v16552_v21  ;;  %12385 = vmatprep.subr.bf16.mxu0 %v16555_v30  ;;  %v16606_v30 = vld [vmem:[#allocation15 + $0xe8] sm:$0xff]  }
 0x810   : > { %12357 = vmatpush2.bf16.msra.mxu1 %v16550_v8  ;;  %12386 = vmatpush1.bf16.msra.mxu0 %v16553_v60  ;;  %v16607_v8 = vld [vmem:[#allocation15 + $0xa8] sm:$0xff]   ;;  %v16608_v60 = vld [vmem:[#allocation15 + $0xe0] sm:$0xff]  }
 0x811   : > { %12358 = vmatprep.subr.bf16.mxu1 %v16558_v39  ;;  %12387 = vmatprep.subr.bf16.mxu0 %v16561_v31  ;;  %v16609_v39 = vld [vmem:[#allocation15 + $0xa0] sm:$0xff]   ;;  %v16610_v31 = vld [vmem:[#allocation15 + $0xd8] sm:$0xff]  }
 0x814   : > { %12359 = vmatpush2.bf16.msra.mxu1 %v16556_v34  ;;  %12388 = vmatpush2.bf16.msra.mxu0 %v16559_v42  ;;  %v16611_v34 = vld [vmem:[#allocation15 + $0x98] sm:$0xff]   ;;  %v16612_v42 = vld [vmem:[#allocation15 + $0xd0] sm:$0xff]  }
 0x815   : > { %12360 = vmatprep.subr.bf16.mxu1 %v16564_v22  ;;  %12389 = vmatprep.subr.bf16.mxu0 %v16567_v36  ;;  %v16613_v22 = vld [vmem:[#allocation15 + $0x90] sm:$0xff]   ;;  %v16614_v36 = vld [vmem:[#allocation15 + $0xc8] sm:$0xff]  }
 0x818   : > { %12361 = vmatpush2.bf16.msra.mxu1 %v16562_v28  ;;  %12390 = vmatpush2.bf16.msra.mxu0 %v16565_v11  ;;  %v16615_v28 = vld [vmem:[#allocation15 + $0x88] sm:$0xff]   ;;  %v16616_v11 = vld [vmem:[#allocation15 + $0xc0] sm:$0xff]  }
 0x819   : > { %12391 = vmatprep.subr.bf16.mxu0 %v16570_v52  ;;  %14607 = vmatprep.subr.bf16.mxu1 %v16571_v20  ;;  %v16617_v52 = vld [vmem:[#allocation15 + $0x80] sm:$0xff]   ;;  %v16618_v20 = vld [vmem:[#allocation15 + $0x178] sm:$0xff]  }
 0x81b   : > { %12363 = vmatmul.mubr.bf16.vlgmr.msra.gmra.mxu1 %v18009_v49  ;;  %v12118_v12 = vpop.f32.mrf.mxu1  ;;  %v16586_v49 = vld [vmem:[#allocation15 + $0x60] sm:$0xff]  }
 0x81c   : > { %12392 = vmatpush2.bf16.msra.mxu0 %v16568_v1  ;;  %14608 = vmatpush3.bf16.msra.mxu1 %v16572_v14  ;;  %v12119_v58 = vadd.f32 %v12118_v12, %v12078_v32  ;;  %v16619_v14 = vld [vmem:[#allocation15 + $0x138] sm:$0xff]  }
 0x81d   : > { %v12120_v25 = vpop.f32.mrf.mxu1  ;;  %12393 = vmatprep.subr.bf16.mxu0 %v16575_v6  ;;  %14609 = vmatprep.subr.bf16.mxu1 %v16576_v13  ;;  %v16620_v13 = vld [vmem:[#allocation15 + $0x170] sm:$0xff]  }
 0x81e   : > { %v12121_v56 = vadd.f32 %v12120_v25, %v12080_v55  ;;  %v16622_v25 = vld [vmem:[#allocation15 + $0x168] sm:$0xff]  }
 0x81f   : > { %v12122_v57 = vpop.f32.mrf.mxu1 }
 0x820   : > { %12394 = vmatpush2.bf16.msra.mxu0 %v16573_v51  ;;  %14610 = vmatpush3.bf16.msra.mxu1 %v16577_v18  ;;  %v16621_v51 = vld [vmem:[#allocation15 + $0x130] sm:$0xff]   ;;  %v16625_v57 = vld [vmem:[#allocation15 + $0x120] sm:$0xff]  }
 0x821   : > { %v12123_v37 = vpop.f32.mrf.mxu1  ;;  %12395 = vmatprep.subr.bf16.mxu0 %v16580_v3  ;;  %14611 = vmatprep.subr.bf16.mxu1 %v16581_v17  ;;  %v16623_v3 = vld [vmem:[#allocation15 + $0x128] sm:$0xff]   ;;  %v16624_v17 = vld [vmem:[#allocation15 + $0x160] sm:$0xff]  }
 0x822   : > { %v16628_v37 = vld [vmem:[#allocation15 + $0x150] sm:$0xff]  }
 0x824   : > { %12396 = vmatpush2.bf16.msra.mxu0 %v16578_v47  ;;  %14612 = vmatpush3.bf16.msra.mxu1 %v16582_v41  ;;  %v16626_v47 = vld [vmem:[#allocation15 + $0x158] sm:$0xff]  }
 0x825   : > { %12397 = vmatprep.subr.bf16.mxu0 %v16585_v46  ;;  %14613 = vmatprep.subr.bf16.mxu1 %v16586_v49  ;;  %v16627_v41 = vld [vmem:[#allocation15 + $0x118] sm:$0xff]   ;;  %v16629_v46 = vld [vmem:[#allocation15 + $0x110] sm:$0xff]   ;;  %v16630_v49 = vld [vmem:[#allocation15 + $0x148] sm:$0xff]  }
 0x828   : > { %12398 = vmatpush2.bf16.msra.mxu0 %v16583_v5  ;;  %14614 = vmatpush3.bf16.msra.mxu1 %v16587_v59  ;;  %v16631_v59 = vld [vmem:[#allocation15 + $0x108] sm:$0xff]  }
 0x829   : > { %12399 = vmatprep.subr.bf16.mxu0 %v16590_v29  ;;  %14615 = vmatprep.subr.bf16.mxu1 %v16591_v9  ;;  %v16632_v9 = vld [vmem:[#allocation15 + $0x140] sm:$0xff]  }
 0x82c   : > { %12400 = vmatpush2.bf16.msra.mxu0 %v16588_v16  ;;  %14616 = vmatpush3.bf16.msra.mxu1 %v16592_v50  ;;  %v16633_v50 = vld [vmem:[#allocation15 + $0x100] sm:$0xff]  }
 0x82d   : > { %12401 = vmatprep.subr.bf16.mxu0 %v16595_v45  ;;  %14617 = vmatprep.subr.bf16.mxu1 %v16596_v23  ;;  %v10584_v23 = vrot.slane %v18043_v44, %v17364_v10 }
 0x830   : > { %12402 = vmatpush2.bf16.msra.mxu0 %v16593_v4  ;;  %14618 = vmatpush3.bf16.msra.mxu1 %v16597_v53  ;;  %v10588_v4 = vrot.slane %v18043_v44, %v17367_v0 }
 0x831   : > { %14619 = vmatprep.subr.bf16.mxu1 %v16598_v54  ;;  %14651 = vmatprep.subr.bf16.mxu0 %v16618_v20 }
 0x833   : > { %12404 = vmatmul.mubr.bf16.vlgmr.msra.gmra.mxu0 %v18025_v15  ;;  %v12159_v48 = vpop.f32.mrf.mxu0  ;;  %v16605_v15 = vld [vmem:[#allocation15 + $0xb0] sm:$0xff]  }
 0x834   : > { %14620 = vmatpush3.bf16.msra.mxu1 %v16599_v40  ;;  %v12160_v24 = vadd.f32 %v12159_v48, %v12119_v58  ;;  %14652 = vmatpush3.bf16.msra.mxu0 %v16619_v14 }
 0x835   : > { %v12161_v62 = vpop.f32.mrf.mxu0  ;;  %14621 = vmatprep.subr.bf16.mxu1 %v16600_v33  ;;  %14653 = vmatprep.subr.bf16.mxu0 %v16620_v13 }
 0x836   : > { %v12162_v63 = vadd.f32 %v12161_v62, %v12121_v56  ;;  %v12412_v43 = vpack.c.bf16 %v12160_v24, %v12160_v24 }
 0x837   : > { %v12163_v35 = vpop.f32.mrf.mxu0 }
 0x838   : > { %v12413_v2 = vpack.c.bf16 %v12162_v63, %v12162_v63  ;;  %14622 = vmatpush3.bf16.msra.mxu1 %v16601_v61  ;;  %14654 = vmatpush3.bf16.msra.mxu0 %v16621_v51 }
 0x839   : > { %v12164_v21 = vpop.f32.mrf.mxu0  ;;  %14629 = vmatprep.subr.bf16.mxu1 %v16602_v26  ;;  %14655 = vmatprep.subr.bf16.mxu0 %v16622_v25 }
 0x83a   : > { %12841 = vmatprep.mubr.bf16.mxu1 %v12413_v2  ;;  %v18120_v21 = vld [vmem:[#allocation28_spill] sm:$0xff] }
 0x83b   : > { %12842 = vmatmul.mubr.bf16.vlgmr.msra.gmra.mxu1 %v12412_v43 }
 0x83c   : > { %14630 = vmatpush3.bf16.msra.mxu1 %v16603_v7  ;;  %14656 = vmatpush3.bf16.msra.mxu0 %v16623_v3  ;;  %v18119_v7 = vld [vmem:[#allocation27_spill] sm:$0xff] }
 0x83d   : > { %14631 = vmatprep.subr.bf16.mxu1 %v16604_v27  ;;  %14657 = vmatprep.subr.bf16.mxu0 %v16624_v17  ;;  %v10592_v43 = vrot.slane %v18043_v44, %v18119_v7  ;;  %v10596_v27 = vrot.slane %v18043_v44, %v18120_v21 }
 0x840   : > { %14632 = vmatpush3.bf16.msra.mxu1 %v16605_v15  ;;  %14658 = vmatpush3.bf16.msra.mxu0 %v16625_v57 }
 0x841   : > { %14633 = vmatprep.subr.bf16.mxu1 %v16606_v30  ;;  %14659 = vmatprep.subr.bf16.mxu0 %v16626_v47 }
 0x844   : > { %14634 = vmatpush3.bf16.msra.mxu1 %v16607_v8  ;;  %14660 = vmatpush3.bf16.msra.mxu0 %v16627_v41 }
 0x845   : > { %14635 = vmatprep.subr.bf16.mxu1 %v16608_v60  ;;  %14661 = vmatprep.subr.bf16.mxu0 %v16628_v37 }
 0x848   : > { %14636 = vmatpush3.bf16.msra.mxu1 %v16609_v39  ;;  %14662 = vmatpush3.bf16.msra.mxu0 %v16629_v46 }
 0x849   : > { %14637 = vmatprep.subr.bf16.mxu1 %v16610_v31  ;;  %14663 = vmatprep.subr.bf16.mxu0 %v16630_v49 }
 0x84c   : > { %14638 = vmatpush3.bf16.msra.mxu1 %v16611_v34  ;;  %14664 = vmatpush3.bf16.msra.mxu0 %v16631_v59 }
 0x84d   : > { %14639 = vmatprep.subr.bf16.mxu1 %v16612_v42  ;;  %14665 = vmatprep.subr.bf16.mxu0 %v16632_v9 }
 0x850   : > { %14640 = vmatpush3.bf16.msra.mxu1 %v16613_v22  ;;  %14666 = vmatpush3.bf16.msra.mxu0 %v16633_v50 }
 0x851   : > { %14641 = vmatprep.subr.bf16.mxu1 %v16614_v36 }
 0x854   : > { %14642 = vmatpush3.bf16.msra.mxu1 %v16615_v28 }
 0x855   : > { %14643 = vmatprep.subr.bf16.mxu1 %v16616_v11 }
 0x858   : > { %14644 = vmatpush3.bf16.msra.mxu1 %v16617_v52 }
 0x85b   : > { %v12200_v1 = vpop.f32.mrf.mxu1 }
 0x85c   : > { %v12201_v53 = vadd.f32 %v12200_v1, %v10584_v23 }
 0x85d   : > { %v12202_v6 = vpop.f32.mrf.mxu1 }
 0x85e   : > { %v12203_v38 = vadd.f32 %v12202_v6, %v10588_v4  ;;  %v14490_v6 = vld [vmem:[#allocation16] ss:$0 sm:$0xff] }
 0x85f   : > { %v12204_v12 = vpop.f32.mrf.mxu1 }
 0x861   : > { %v12205_v18 = vpop.f32.mrf.mxu1 }
 0x873   : > { %v12241_v5 = vpop.f32.mrf.mxu0 }
 0x874   : > { %v12242_v54 = vadd.f32 %v12241_v5, %v12201_v53 }
 0x875   : > { %v12243_v29 = vpop.f32.mrf.mxu0 }
 0x876   : > { %v12244_v40 = vadd.f32 %v12243_v29, %v12203_v38 }
 0x877   : > { %v12245_v16 = vpop.f32.mrf.mxu0 }
 0x879   : > { %v12246_v45 = vpop.f32.mrf.mxu0 }
 0x89b   : > { %v12282_v19 = vpop.f32.mrf.mxu1 }
 0x89c   : > { %v12283_v32 = vadd.f32 %v12282_v19, %v12242_v54 }
 0x89d   : > { %v12284_v33 = vpop.f32.mrf.mxu1 }
 0x89e   : > { %v12285_v55 = vadd.f32 %v12284_v33, %v12244_v40  ;;  %v12414_v56 = vpack.c.bf16 %v12283_v32, %v12283_v32 }
 0x89f   : > { %v12286_v58 = vpop.f32.mrf.mxu1 }
 0x8a0   : > { %v12415_v48 = vpack.c.bf16 %v12285_v55, %v12285_v55 }
 0x8a1   : > { %v12287_v61 = vpop.f32.mrf.mxu1 }
 0x8a2   : > { %12881 = vmatprep.mubr.bf16.mxu1 %v12415_v48 }
 0x8a3   : > { %12882 = vmatmul.mubr.bf16.vlgmr.msra.gmra.mxu1 %v12414_v56 }
 0x8b3   : > { %v12323_v24 = vpop.f32.mrf.mxu0 }
 0x8b4   : > { %v12324_v15 = vadd.f32 %v12323_v24, %v10592_v43 }
 0x8b5   : > { %v12325_v62 = vpop.f32.mrf.mxu0 }
 0x8b6   : > { %v12326_v30 = vadd.f32 %v12325_v62, %v10596_v27 }
 0x8b7   : > { %v12327_v10 = vpop.f32.mrf.mxu0 }
 0x8b9   : > { %v12328_v26 = vpop.f32.mrf.mxu0 }
 0x8db   : > { %v12364_v63 = vpop.f32.mrf.mxu1 }
 0x8dc   : > { %v12365_v8 = vadd.f32 %v12364_v63, %v12324_v15 }
 0x8dd   : > { %v12366_v0 = vpop.f32.mrf.mxu1 }
 0x8de   : > { %v12367_v39 = vadd.f32 %v12366_v0, %v12326_v30 }
 0x8df   : > { %v12368_v35 = vpop.f32.mrf.mxu1 }
 0x8e1   : > { %v12369_v2 = vpop.f32.mrf.mxu1 }
 0x8f3   : > { %v12405_v60 = vpop.f32.mrf.mxu0 }
 0x8f4   : > { %v12406_v31 = vadd.f32 %v12405_v60, %v12365_v8 }
 0x8f5   : > { %v12407_v34 = vpop.f32.mrf.mxu0 }
 0x8f6   : > { %v12408_v42 = vadd.f32 %v12407_v34, %v12367_v39  ;;  %v12416_v28 = vpack.c.bf16 %v12406_v31, %v12406_v31 }
 0x8f7   : > { %v12409_v22 = vpop.f32.mrf.mxu0 }
 0x8f8   : > { %v12417_v36 = vpack.c.bf16 %v12408_v42, %v12408_v42 }
 0x8f9   : > { %v12410_v11 = vpop.f32.mrf.mxu0 }
 0x8fa   : > { %12921 = vmatprep.mubr.bf16.mxu0 %v12417_v36 }
 0x8fb   : > { %12922 = vmatmul.mubr.bf16.vlgmr.msra.gmra.mxu0 %v12416_v28  ;;  %v14623_v52 = vpop.f32.mrf.mxu1 }
 0x8fd   : > { %v14624_v20 = vpop.f32.mrf.mxu1 }
 0x8fe   : > { %v14625_v1 = vadd.f32 %v14624_v20, %v14623_v52 }
 0x8ff   : > { %v14626_v14 = vpop.f32.mrf.mxu1 }
 0x900   : > { %v12844_v51 = vadd.f32 %v14625_v1, %v14490_v6 }
 0x901   : > { %v14627_v44 = vpop.f32.mrf.mxu1 }
 0x963   : > { %v14645_v13 = vpop.f32.mrf.mxu1 }
 0x965   : > { %v14646_v12 = vpop.f32.mrf.mxu1 }
 0x966   : > { %v14647_v18 = vadd.f32 %v14646_v12, %v14645_v13 }
 0x967   : > { %v14648_v25 = vpop.f32.mrf.mxu1 }
 0x968   : > { %v12884_v3 = vadd.f32 %v14647_v18, %v12844_v51 }
 0x969   : > { %v14649_v17 = vpop.f32.mrf.mxu1 }
 0x9bb   : > { %v14667_v57 = vpop.f32.mrf.mxu0 }
 0x9bd   : > { %v14668_v47 = vpop.f32.mrf.mxu0 }
 0x9be   : > { %v14669_v41 = vadd.f32 %v14668_v47, %v14667_v57 }
 0x9bf   : > { %v14670_v37 = vpop.f32.mrf.mxu0 }
 0x9c0   : > { %v12924_v46 = vadd.f32 %v14669_v41, %v12884_v3 }
 0x9c1   : > { %v14671_v49 = vpop.f32.mrf.mxu0 }
 0x9c2   : > { %12929 = vst [vmem:[%s713_s20] sm:$0xff] %v12924_v46 }
 0x9c3 PF: > { %s33_s21 = sadd.s32 1, %s16974_s21  }
 0x9c4   : > { %p30_p3 = scmp.ge.s32.totalorder %s33_s21, 4  }
 0x9c6   :  { %32 = sbr.rel (!%p30_p3) target bundleno = 9 (0x9), region = 185 }
 0x9cb   :  { %12987 = vsyncpa [#allocation3], 1 }
 0x9cc   :  { %12989 = vsyncpa [#allocation3 + $0x1], 1 }
 0x9cd   :  { %12990 = vsyncpa [#allocation5], 1 }
 0x9ce   :  { %12991 = vsyncpa [#allocation8], 1 }
 0x9cf   :  { %12992 = vsyncpa [#allocation11], 1 }
 0x9d0   :  { %12993 = vsyncpa [#allocation14], 1 }
 0x9d1   :  { %12994 = vsyncpa [#allocation17], 1 }

</bundles_post_ra>
